<compile_context>
chip_gen: v6e
topology: v6e:2x2x1
jax: 0.10.0
libtpu: 0.0.40
codegen_flags: <defaults>
</compile_context>

<pallas_src>
import functools

import jax
import jax.numpy as jnp
from jax.experimental import pallas as pl
from jax.experimental.pallas import tpu as pltpu


_NUM_BRANCHES = 8
_KS_TAIL = (13, 5, 5, 5, 5, 5, 16)          # kernel sizes of layers 1..7
_HALO = sum(k - 1 for k in _KS_TAIL)        # 47 rows consumed by layers 1..7
_HALO_PAD = 48                              # halo rounded up to a sublane multiple
_TAPS_TAIL = sum(_KS_TAIL)                  # 54 stacked (256,256) tap matrices
_LAYER_CFG = [(3, 256, 13), (256, 256, 13)] + [(256, 256, 5)] * 5 + [(256, 200, 16)]


def _round_up(x, m):
    return ((x + m - 1) // m) * m


def _elu(x):
    # ELU(alpha=1) in f32; clamp arg of exp so the unused branch never overflows.
    return jnp.where(x > 0, x, jnp.exp(jnp.minimum(x, 0.0)) - 1.0)


# ----------------------------------------------------------------------------
# Fused per-branch kernel: 8 conv layers + ELUs + branch sum + Softsign
# ----------------------------------------------------------------------------
def _fused_branch_kernel(x2_ref, w0_ref, wt_ref, b_ref, o_ref, *, t_tile):
    # x2_ref : (T_in_padded, 128)   bf16  im2col'ed layer-0 input (lane padded)
    # w0_ref : (128, 256)           bf16  layer-0 weight (39 real rows, rest 0)
    # wt_ref : (54, 256, 256)       bf16  stacked taps of layers 1..7 (C_out padded)
    # b_ref  : (8, 256)             f32   per-layer biases (layer 7 padded to 256)
    # o_ref  : (t_tile, 256)        f32   branch-accumulated output block
    t_in0 = t_tile + _HALO_PAD
    t0 = pl.multiple_of(pl.program_id(1) * t_tile, 8)

    x2 = x2_ref[pl.ds(t0, t_in0), :]                      # aligned halo'd window
    bias = b_ref[...]                                     # (8, 256) f32

    # ---- layer 0: im2col conv (3 -> 256, K=13) as one MXU matmul
    acc = jnp.dot(x2, w0_ref[...], preferred_element_type=jnp.float32)
    acc = acc + bias[0:1, :]
    h = _elu(acc).astype(jnp.bfloat16)

    # ---- layers 1..7: unrolled tap loops, f32 accumulation, bf16 operands
    off = 0
    t_cur = t_in0
    n_tail = len(_KS_TAIL)
    for li, K in enumerate(_KS_TAIL):
        t_next = t_cur - (K - 1)
        acc = jnp.dot(h[0:t_next, :], wt_ref[off],
                      preferred_element_type=jnp.float32)
        for k in range(1, K):
            acc = acc + jnp.dot(h[k:k + t_next, :], wt_ref[off + k],
                                preferred_element_type=jnp.float32)
        acc = acc + bias[li + 1:li + 2, :]
        off += K
        t_cur = t_next
        if li + 1 < n_tail:                               # last layer: no ELU
            h = _elu(acc).astype(jnp.bfloat16)

    y = acc[0:t_tile, :]                                  # drop halo-rounding row

    # ---- fold 8-branch sum + Softsign into the resident output block
    nb = pl.program_id(2)

    @pl.when(nb == 0)
    def _():
        o_ref[...] = y

    @pl.when(nb > 0)
    def _():
        o_ref[...] = o_ref[...] + y

    @pl.when(nb == pl.num_programs(2) - 1)
    def _():
        s = o_ref[...]
        o_ref[...] = s / (1.0 + jnp.abs(s))               # Softsign


# ----------------------------------------------------------------------------
# Parameters (deterministic synthetic init, same shapes as the PyTorch module)
# ----------------------------------------------------------------------------
def init_params(key):
    params = []
    for _ in range(_NUM_BRANCHES):
        branch = []
        for (cin, cout, k) in _LAYER_CFG:
            key, kw, kb = jax.random.split(key, 3)
            fan_in, fan_out = cin * k, cout * k
            bound = (6.0 / (fan_in + fan_out)) ** 0.5      # xavier_uniform
            w = jax.random.uniform(kw, (k, cin, cout), jnp.float32, -bound, bound)
            bb = 1.0 / (fan_in ** 0.5)                     # torch default bias init
            b = jax.random.uniform(kb, (1, cout), jnp.float32, -bb, bb)
            branch.append((w, b))
        params.append(branch)
    return params


def pack_params(params):
    """Pack per-branch (w, b) lists into stacked, TPU-friendly bf16/f32 arrays."""
    w0_s, wt_s, b_s = [], [], []
    for branch in params:
        w0, b0 = branch[0]                                 # (13, 3, 256), (1, 256)
        w0 = jnp.pad(w0.reshape(13 * 3, 256), ((0, 128 - 39), (0, 0)))
        w0_s.append(w0)                                    # (128, 256)
        taps, biases = [], [b0.reshape(256)]
        for (w, b) in branch[1:]:
            cout = w.shape[-1]
            if cout < 256:                                 # final 200-ch layer
                w = jnp.pad(w, ((0, 0), (0, 0), (0, 256 - cout)))
                b = jnp.pad(b, ((0, 0), (0, 256 - cout)))
            taps.append(w)                                 # (K, 256, 256)
            biases.append(b.reshape(256))
        wt_s.append(jnp.concatenate(taps, axis=0))         # (54, 256, 256)
        b_s.append(jnp.stack(biases, axis=0))              # (8, 256)
    return (jnp.stack(w0_s).astype(jnp.bfloat16),          # (8, 128, 256)
            jnp.stack(wt_s).astype(jnp.bfloat16),          # (8, 54, 256, 256)
            jnp.stack(b_s).astype(jnp.float32))            # (8, 8, 256)


# ----------------------------------------------------------------------------
# Full forward
# ----------------------------------------------------------------------------
def vocoder_forward(x_ncw, packed):
    """x_ncw: (B, 3, L) float32 (PyTorch NCW).  Returns (B, 200 * (L - 59))."""
    w0_s, wt_s, b_s = packed
    B, _, L = x_ncw.shape
    t_out = L - 59
    assert t_out > 0, "sequence too short for this network"

    t_tile = 256 if t_out >= 256 else _round_up(t_out, 8)
    n_t = pl.cdiv(t_out, t_tile)
    t_out_pad = n_t * t_tile
    t_in_needed = t_out_pad + _HALO_PAD

    # channels-last + im2col for the first (3 -> 256, K=13) conv, lane-pad to 128
    x = jnp.transpose(x_ncw, (0, 2, 1))                    # (B, L, 3)
    t0_full = L - 12
    x2 = jnp.concatenate([x[:, k:k + t0_full, :] for k in range(13)], axis=-1)
    x2 = jnp.pad(x2, ((0, 0), (0, t_in_needed - t0_full), (0, 128 - 39)))
    x2 = x2.astype(jnp.bfloat16)                           # (B, t_in_needed, 128)

    kern = functools.partial(_fused_branch_kernel, t_tile=t_tile)
    out = pl.pallas_call(
        kern,
        out_shape=jax.ShapeDtypeStruct((B, t_out_pad, 256), jnp.float32),
        grid=(B, n_t, _NUM_BRANCHES),
        in_specs=[
            pl.BlockSpec((None, t_in_needed, 128), lambda b, t, n: (b, 0, 0)),
            pl.BlockSpec((None, 128, 256), lambda b, t, n: (n, 0, 0)),
            pl.BlockSpec((None, _TAPS_TAIL, 256, 256),
                         lambda b, t, n: (n, 0, 0, 0)),
            pl.BlockSpec((None, 8, 256), lambda b, t, n: (n, 0, 0)),
        ],
        out_specs=pl.BlockSpec((None, t_tile, 256), lambda b, t, n: (b, t, 0)),
        compiler_params=pltpu.CompilerParams(
            dimension_semantics=("parallel", "parallel", "arbitrary"),
            vmem_limit_bytes=48 * 1024 * 1024),
    )(x2, w0_s, wt_s, b_s)

    out = out[:, :t_out, :200]                             # strip time/lane padding
    # PyTorch flattens (B, 200, T_out) channel-major.
    return jnp.transpose(out, (0, 2, 1)).reshape(B, 200 * t_out)


if __name__ == "__main__":
    key = jax.random.PRNGKey(0)
    kx, kp = jax.random.split(key)

    B, L = 2, 64                       # total valid-conv shrinkage = 59 -> T_out = 5
    x = jax.random.normal(kx, (B, 3, L), jnp.float32)
    params = init_params(kp)
    packed = pack_params(params)

    out = jax.jit(vocoder_forward)(x, packed)
    out = jax.block_until_ready(out)

    assert out.shape == (B, 200 * (L - 59)), out.shape
    assert bool(jnp.all(jnp.isfinite(out))), "non-finite output"
    assert bool(jnp.all(jnp.abs(out) < 1.0)), "softsign range violated"
    print("KERNEL_OK")
</pallas_src>

<mosaic_0001>
module attributes {stable_mosaic.version = 11 : i64} {
  func.func @_fused_branch_kernel(%arg0: i32, %arg1: i32, %arg2: i32, %arg3: memref<1x56x128xbf16, #tpu.memory_space<vmem>>, %arg4: memref<1x128x256xbf16, #tpu.memory_space<vmem>>, %arg5: memref<1x54x256x256xbf16, #tpu.memory_space<vmem>>, %arg6: memref<1x8x256xf32, #tpu.memory_space<vmem>>, %arg7: memref<1x8x256xf32, #tpu.memory_space<vmem>>) attributes {dimension_semantics = [#tpu.dimension_semantics<parallel>, #tpu.dimension_semantics<parallel>, #tpu.dimension_semantics<arbitrary>], iteration_bounds = array<i64: 2, 1, 8>, scalar_prefetch = 0 : i64, scratch_operands = 0 : i64, tpu.core_type = #tpu.core_type<tc>, window_params = [{transform_indices = @transform_0, window_bounds = array<i64: 1, 56, 128>}, {transform_indices = @transform_1, window_bounds = array<i64: 1, 128, 256>}, {transform_indices = @transform_2, window_bounds = array<i64: 1, 54, 256, 256>}, {transform_indices = @transform_3, window_bounds = array<i64: 1, 8, 256>}, {transform_indices = @transform_4, window_bounds = array<i64: 1, 8, 256>}]} {
    %c8_i32 = arith.constant 8 : i32
    %0 = arith.muli %arg1, %c8_i32 : i32
    %1 = tpu.assume_multiple %0, 8 : i32
    %c0 = arith.constant 0 : index
    %2 = arith.index_cast %1 : i32 to index
    %c0_0 = arith.constant 0 : index
    %3 = vector.load %arg3[%c0, %2, %c0_0] : memref<1x56x128xbf16, #tpu.memory_space<vmem>>, vector<1x56x128xbf16>
    %4 = vector.shape_cast %3 : vector<1x56x128xbf16> to vector<56x128xbf16>
    %c0_1 = arith.constant 0 : index
    %c0_2 = arith.constant 0 : index
    %c0_3 = arith.constant 0 : index
    %5 = vector.load %arg6[%c0_1, %c0_2, %c0_3] : memref<1x8x256xf32, #tpu.memory_space<vmem>>, vector<1x8x256xf32>
    %6 = vector.shape_cast %5 : vector<1x8x256xf32> to vector<8x256xf32>
    %c0_4 = arith.constant 0 : index
    %c0_5 = arith.constant 0 : index
    %c0_6 = arith.constant 0 : index
    %7 = vector.load %arg4[%c0_4, %c0_5, %c0_6] : memref<1x128x256xbf16, #tpu.memory_space<vmem>>, vector<1x128x256xbf16>
    %8 = vector.shape_cast %7 : vector<1x128x256xbf16> to vector<128x256xbf16>
    %cst = arith.constant dense<0.000000e+00> : vector<56x256xf32>
    %9 = tpu.matmul %4, %8, %cst {dimension_numbers = #tpu.dot_dimension_numbers<[1], [0], [0], [1], [0, 0, 1, 1], [], []>} : vector<56x128xbf16>, vector<128x256xbf16>, vector<56x256xf32> -> vector<56x256xf32>
    %10 = vector.extract_strided_slice %6 {offsets = [0, 0], sizes = [1, 256], strides = [1, 1]} : vector<8x256xf32> to vector<1x256xf32>
    %11 = vector.broadcast %10 : vector<1x256xf32> to vector<56x256xf32>
    %12 = arith.addf %9, %11 : vector<56x256xf32>
    %cst_7 = arith.constant 0.000000e+00 : f32
    %13 = vector.broadcast %cst_7 : f32 to vector<56x256xf32>
    %14 = arith.cmpf ogt, %12, %13 : vector<56x256xf32>
    %cst_8 = arith.constant 0.000000e+00 : f32
    %15 = vector.broadcast %cst_8 : f32 to vector<56x256xf32>
    %16 = arith.minimumf %12, %15 : vector<56x256xf32>
    %17 = math.exp %16 : vector<56x256xf32>
    %cst_9 = arith.constant 1.000000e+00 : f32
    %18 = vector.broadcast %cst_9 : f32 to vector<56x256xf32>
    %19 = arith.subf %17, %18 : vector<56x256xf32>
    %20 = arith.select %14, %12, %19 : vector<56x256xi1>, vector<56x256xf32>
    %21 = arith.truncf %20 : vector<56x256xf32> to vector<56x256xbf16>
    %22 = vector.extract_strided_slice %21 {offsets = [0, 0], sizes = [44, 256], strides = [1, 1]} : vector<56x256xbf16> to vector<44x256xbf16>
    %c0_10 = arith.constant 0 : index
    %c0_11 = arith.constant 0 : index
    %c0_12 = arith.constant 0 : index
    %c0_13 = arith.constant 0 : index
    %23 = vector.load %arg5[%c0_10, %c0_11, %c0_12, %c0_13] : memref<1x54x256x256xbf16, #tpu.memory_space<vmem>>, vector<1x1x256x256xbf16>
    %24 = vector.shape_cast %23 : vector<1x1x256x256xbf16> to vector<256x256xbf16>
    %cst_14 = arith.constant dense<0.000000e+00> : vector<44x256xf32>
    %25 = tpu.matmul %22, %24, %cst_14 {dimension_numbers = #tpu.dot_dimension_numbers<[1], [0], [0], [1], [0, 0, 1, 1], [], []>} : vector<44x256xbf16>, vector<256x256xbf16>, vector<44x256xf32> -> vector<44x256xf32>
    %26 = vector.extract_strided_slice %21 {offsets = [1, 0], sizes = [44, 256], strides = [1, 1]} : vector<56x256xbf16> to vector<44x256xbf16>
    %c0_15 = arith.constant 0 : index
    %c1 = arith.constant 1 : index
    %c0_16 = arith.constant 0 : index
    %c0_17 = arith.constant 0 : index
    %27 = vector.load %arg5[%c0_15, %c1, %c0_16, %c0_17] : memref<1x54x256x256xbf16, #tpu.memory_space<vmem>>, vector<1x1x256x256xbf16>
    %28 = vector.shape_cast %27 : vector<1x1x256x256xbf16> to vector<256x256xbf16>
    %cst_18 = arith.constant dense<0.000000e+00> : vector<44x256xf32>
    %29 = tpu.matmul %26, %28, %cst_18 {dimension_numbers = #tpu.dot_dimension_numbers<[1], [0], [0], [1], [0, 0, 1, 1], [], []>} : vector<44x256xbf16>, vector<256x256xbf16>, vector<44x256xf32> -> vector<44x256xf32>
    %30 = arith.addf %25, %29 : vector<44x256xf32>
    %31 = vector.extract_strided_slice %21 {offsets = [2, 0], sizes = [44, 256], strides = [1, 1]} : vector<56x256xbf16> to vector<44x256xbf16>
    %c0_19 = arith.constant 0 : index
    %c2 = arith.constant 2 : index
    %c0_20 = arith.constant 0 : index
    %c0_21 = arith.constant 0 : index
    %32 = vector.load %arg5[%c0_19, %c2, %c0_20, %c0_21] : memref<1x54x256x256xbf16, #tpu.memory_space<vmem>>, vector<1x1x256x256xbf16>
    %33 = vector.shape_cast %32 : vector<1x1x256x256xbf16> to vector<256x256xbf16>
    %cst_22 = arith.constant dense<0.000000e+00> : vector<44x256xf32>
    %34 = tpu.matmul %31, %33, %cst_22 {dimension_numbers = #tpu.dot_dimension_numbers<[1], [0], [0], [1], [0, 0, 1, 1], [], []>} : vector<44x256xbf16>, vector<256x256xbf16>, vector<44x256xf32> -> vector<44x256xf32>
    %35 = arith.addf %30, %34 : vector<44x256xf32>
    %36 = vector.extract_strided_slice %21 {offsets = [3, 0], sizes = [44, 256], strides = [1, 1]} : vector<56x256xbf16> to vector<44x256xbf16>
    %c0_23 = arith.constant 0 : index
    %c3 = arith.constant 3 : index
    %c0_24 = arith.constant 0 : index
    %c0_25 = arith.constant 0 : index
    %37 = vector.load %arg5[%c0_23, %c3, %c0_24, %c0_25] : memref<1x54x256x256xbf16, #tpu.memory_space<vmem>>, vector<1x1x256x256xbf16>
    %38 = vector.shape_cast %37 : vector<1x1x256x256xbf16> to vector<256x256xbf16>
    %cst_26 = arith.constant dense<0.000000e+00> : vector<44x256xf32>
    %39 = tpu.matmul %36, %38, %cst_26 {dimension_numbers = #tpu.dot_dimension_numbers<[1], [0], [0], [1], [0, 0, 1, 1], [], []>} : vector<44x256xbf16>, vector<256x256xbf16>, vector<44x256xf32> -> vector<44x256xf32>
    %40 = arith.addf %35, %39 : vector<44x256xf32>
    %41 = vector.extract_strided_slice %21 {offsets = [4, 0], sizes = [44, 256], strides = [1, 1]} : vector<56x256xbf16> to vector<44x256xbf16>
    %c0_27 = arith.constant 0 : index
    %c4 = arith.constant 4 : index
    %c0_28 = arith.constant 0 : index
    %c0_29 = arith.constant 0 : index
    %42 = vector.load %arg5[%c0_27, %c4, %c0_28, %c0_29] : memref<1x54x256x256xbf16, #tpu.memory_space<vmem>>, vector<1x1x256x256xbf16>
    %43 = vector.shape_cast %42 : vector<1x1x256x256xbf16> to vector<256x256xbf16>
    %cst_30 = arith.constant dense<0.000000e+00> : vector<44x256xf32>
    %44 = tpu.matmul %41, %43, %cst_30 {dimension_numbers = #tpu.dot_dimension_numbers<[1], [0], [0], [1], [0, 0, 1, 1], [], []>} : vector<44x256xbf16>, vector<256x256xbf16>, vector<44x256xf32> -> vector<44x256xf32>
    %45 = arith.addf %40, %44 : vector<44x256xf32>
    %46 = vector.extract_strided_slice %21 {offsets = [5, 0], sizes = [44, 256], strides = [1, 1]} : vector<56x256xbf16> to vector<44x256xbf16>
    %c0_31 = arith.constant 0 : index
    %c5 = arith.constant 5 : index
    %c0_32 = arith.constant 0 : index
    %c0_33 = arith.constant 0 : index
    %47 = vector.load %arg5[%c0_31, %c5, %c0_32, %c0_33] : memref<1x54x256x256xbf16, #tpu.memory_space<vmem>>, vector<1x1x256x256xbf16>
    %48 = vector.shape_cast %47 : vector<1x1x256x256xbf16> to vector<256x256xbf16>
    %cst_34 = arith.constant dense<0.000000e+00> : vector<44x256xf32>
    %49 = tpu.matmul %46, %48, %cst_34 {dimension_numbers = #tpu.dot_dimension_numbers<[1], [0], [0], [1], [0, 0, 1, 1], [], []>} : vector<44x256xbf16>, vector<256x256xbf16>, vector<44x256xf32> -> vector<44x256xf32>
    %50 = arith.addf %45, %49 : vector<44x256xf32>
    %51 = vector.extract_strided_slice %21 {offsets = [6, 0], sizes = [44, 256], strides = [1, 1]} : vector<56x256xbf16> to vector<44x256xbf16>
    %c0_35 = arith.constant 0 : index
    %c6 = arith.constant 6 : index
    %c0_36 = arith.constant 0 : index
    %c0_37 = arith.constant 0 : index
    %52 = vector.load %arg5[%c0_35, %c6, %c0_36, %c0_37] : memref<1x54x256x256xbf16, #tpu.memory_space<vmem>>, vector<1x1x256x256xbf16>
    %53 = vector.shape_cast %52 : vector<1x1x256x256xbf16> to vector<256x256xbf16>
    %cst_38 = arith.constant dense<0.000000e+00> : vector<44x256xf32>
    %54 = tpu.matmul %51, %53, %cst_38 {dimension_numbers = #tpu.dot_dimension_numbers<[1], [0], [0], [1], [0, 0, 1, 1], [], []>} : vector<44x256xbf16>, vector<256x256xbf16>, vector<44x256xf32> -> vector<44x256xf32>
    %55 = arith.addf %50, %54 : vector<44x256xf32>
    %56 = vector.extract_strided_slice %21 {offsets = [7, 0], sizes = [44, 256], strides = [1, 1]} : vector<56x256xbf16> to vector<44x256xbf16>
    %c0_39 = arith.constant 0 : index
    %c7 = arith.constant 7 : index
    %c0_40 = arith.constant 0 : index
    %c0_41 = arith.constant 0 : index
    %57 = vector.load %arg5[%c0_39, %c7, %c0_40, %c0_41] : memref<1x54x256x256xbf16, #tpu.memory_space<vmem>>, vector<1x1x256x256xbf16>
    %58 = vector.shape_cast %57 : vector<1x1x256x256xbf16> to vector<256x256xbf16>
    %cst_42 = arith.constant dense<0.000000e+00> : vector<44x256xf32>
    %59 = tpu.matmul %56, %58, %cst_42 {dimension_numbers = #tpu.dot_dimension_numbers<[1], [0], [0], [1], [0, 0, 1, 1], [], []>} : vector<44x256xbf16>, vector<256x256xbf16>, vector<44x256xf32> -> vector<44x256xf32>
    %60 = arith.addf %55, %59 : vector<44x256xf32>
    %61 = vector.extract_strided_slice %21 {offsets = [8, 0], sizes = [44, 256], strides = [1, 1]} : vector<56x256xbf16> to vector<44x256xbf16>
    %c0_43 = arith.constant 0 : index
    %c8 = arith.constant 8 : index
    %c0_44 = arith.constant 0 : index
    %c0_45 = arith.constant 0 : index
    %62 = vector.load %arg5[%c0_43, %c8, %c0_44, %c0_45] : memref<1x54x256x256xbf16, #tpu.memory_space<vmem>>, vector<1x1x256x256xbf16>
    %63 = vector.shape_cast %62 : vector<1x1x256x256xbf16> to vector<256x256xbf16>
    %cst_46 = arith.constant dense<0.000000e+00> : vector<44x256xf32>
    %64 = tpu.matmul %61, %63, %cst_46 {dimension_numbers = #tpu.dot_dimension_numbers<[1], [0], [0], [1], [0, 0, 1, 1], [], []>} : vector<44x256xbf16>, vector<256x256xbf16>, vector<44x256xf32> -> vector<44x256xf32>
    %65 = arith.addf %60, %64 : vector<44x256xf32>
    %66 = vector.extract_strided_slice %21 {offsets = [9, 0], sizes = [44, 256], strides = [1, 1]} : vector<56x256xbf16> to vector<44x256xbf16>
    %c0_47 = arith.constant 0 : index
    %c9 = arith.constant 9 : index
    %c0_48 = arith.constant 0 : index
    %c0_49 = arith.constant 0 : index
    %67 = vector.load %arg5[%c0_47, %c9, %c0_48, %c0_49] : memref<1x54x256x256xbf16, #tpu.memory_space<vmem>>, vector<1x1x256x256xbf16>
    %68 = vector.shape_cast %67 : vector<1x1x256x256xbf16> to vector<256x256xbf16>
    %cst_50 = arith.constant dense<0.000000e+00> : vector<44x256xf32>
    %69 = tpu.matmul %66, %68, %cst_50 {dimension_numbers = #tpu.dot_dimension_numbers<[1], [0], [0], [1], [0, 0, 1, 1], [], []>} : vector<44x256xbf16>, vector<256x256xbf16>, vector<44x256xf32> -> vector<44x256xf32>
    %70 = arith.addf %65, %69 : vector<44x256xf32>
    %71 = vector.extract_strided_slice %21 {offsets = [10, 0], sizes = [44, 256], strides = [1, 1]} : vector<56x256xbf16> to vector<44x256xbf16>
    %c0_51 = arith.constant 0 : index
    %c10 = arith.constant 10 : index
    %c0_52 = arith.constant 0 : index
    %c0_53 = arith.constant 0 : index
    %72 = vector.load %arg5[%c0_51, %c10, %c0_52, %c0_53] : memref<1x54x256x256xbf16, #tpu.memory_space<vmem>>, vector<1x1x256x256xbf16>
    %73 = vector.shape_cast %72 : vector<1x1x256x256xbf16> to vector<256x256xbf16>
    %cst_54 = arith.constant dense<0.000000e+00> : vector<44x256xf32>
    %74 = tpu.matmul %71, %73, %cst_54 {dimension_numbers = #tpu.dot_dimension_numbers<[1], [0], [0], [1], [0, 0, 1, 1], [], []>} : vector<44x256xbf16>, vector<256x256xbf16>, vector<44x256xf32> -> vector<44x256xf32>
    %75 = arith.addf %70, %74 : vector<44x256xf32>
    %76 = vector.extract_strided_slice %21 {offsets = [11, 0], sizes = [44, 256], strides = [1, 1]} : vector<56x256xbf16> to vector<44x256xbf16>
    %c0_55 = arith.constant 0 : index
    %c11 = arith.constant 11 : index
    %c0_56 = arith.constant 0 : index
    %c0_57 = arith.constant 0 : index
    %77 = vector.load %arg5[%c0_55, %c11, %c0_56, %c0_57] : memref<1x54x256x256xbf16, #tpu.memory_space<vmem>>, vector<1x1x256x256xbf16>
    %78 = vector.shape_cast %77 : vector<1x1x256x256xbf16> to vector<256x256xbf16>
    %cst_58 = arith.constant dense<0.000000e+00> : vector<44x256xf32>
    %79 = tpu.matmul %76, %78, %cst_58 {dimension_numbers = #tpu.dot_dimension_numbers<[1], [0], [0], [1], [0, 0, 1, 1], [], []>} : vector<44x256xbf16>, vector<256x256xbf16>, vector<44x256xf32> -> vector<44x256xf32>
    %80 = arith.addf %75, %79 : vector<44x256xf32>
    %81 = vector.extract_strided_slice %21 {offsets = [12, 0], sizes = [44, 256], strides = [1, 1]} : vector<56x256xbf16> to vector<44x256xbf16>
    %c0_59 = arith.constant 0 : index
    %c12 = arith.constant 12 : index
    %c0_60 = arith.constant 0 : index
    %c0_61 = arith.constant 0 : index
    %82 = vector.load %arg5[%c0_59, %c12, %c0_60, %c0_61] : memref<1x54x256x256xbf16, #tpu.memory_space<vmem>>, vector<1x1x256x256xbf16>
    %83 = vector.shape_cast %82 : vector<1x1x256x256xbf16> to vector<256x256xbf16>
    %cst_62 = arith.constant dense<0.000000e+00> : vector<44x256xf32>
    %84 = tpu.matmul %81, %83, %cst_62 {dimension_numbers = #tpu.dot_dimension_numbers<[1], [0], [0], [1], [0, 0, 1, 1], [], []>} : vector<44x256xbf16>, vector<256x256xbf16>, vector<44x256xf32> -> vector<44x256xf32>
    %85 = arith.addf %80, %84 : vector<44x256xf32>
    %86 = vector.extract_strided_slice %6 {offsets = [1, 0], sizes = [1, 256], strides = [1, 1]} : vector<8x256xf32> to vector<1x256xf32>
    %87 = vector.broadcast %86 : vector<1x256xf32> to vector<44x256xf32>
    %88 = arith.addf %85, %87 : vector<44x256xf32>
    %cst_63 = arith.constant 0.000000e+00 : f32
    %89 = vector.broadcast %cst_63 : f32 to vector<44x256xf32>
    %90 = arith.cmpf ogt, %88, %89 : vector<44x256xf32>
    %cst_64 = arith.constant 0.000000e+00 : f32
    %91 = vector.broadcast %cst_64 : f32 to vector<44x256xf32>
    %92 = arith.minimumf %88, %91 : vector<44x256xf32>
    %93 = math.exp %92 : vector<44x256xf32>
    %cst_65 = arith.constant 1.000000e+00 : f32
    %94 = vector.broadcast %cst_65 : f32 to vector<44x256xf32>
    %95 = arith.subf %93, %94 : vector<44x256xf32>
    %96 = arith.select %90, %88, %95 : vector<44x256xi1>, vector<44x256xf32>
    %97 = arith.truncf %96 : vector<44x256xf32> to vector<44x256xbf16>
    %98 = vector.extract_strided_slice %97 {offsets = [0, 0], sizes = [40, 256], strides = [1, 1]} : vector<44x256xbf16> to vector<40x256xbf16>
    %c0_66 = arith.constant 0 : index
    %c13 = arith.constant 13 : index
    %c0_67 = arith.constant 0 : index
    %c0_68 = arith.constant 0 : index
    %99 = vector.load %arg5[%c0_66, %c13, %c0_67, %c0_68] : memref<1x54x256x256xbf16, #tpu.memory_space<vmem>>, vector<1x1x256x256xbf16>
    %100 = vector.shape_cast %99 : vector<1x1x256x256xbf16> to vector<256x256xbf16>
    %cst_69 = arith.constant dense<0.000000e+00> : vector<40x256xf32>
    %101 = tpu.matmul %98, %100, %cst_69 {dimension_numbers = #tpu.dot_dimension_numbers<[1], [0], [0], [1], [0, 0, 1, 1], [], []>} : vector<40x256xbf16>, vector<256x256xbf16>, vector<40x256xf32> -> vector<40x256xf32>
    %102 = vector.extract_strided_slice %97 {offsets = [1, 0], sizes = [40, 256], strides = [1, 1]} : vector<44x256xbf16> to vector<40x256xbf16>
    %c0_70 = arith.constant 0 : index
    %c14 = arith.constant 14 : index
    %c0_71 = arith.constant 0 : index
    %c0_72 = arith.constant 0 : index
    %103 = vector.load %arg5[%c0_70, %c14, %c0_71, %c0_72] : memref<1x54x256x256xbf16, #tpu.memory_space<vmem>>, vector<1x1x256x256xbf16>
    %104 = vector.shape_cast %103 : vector<1x1x256x256xbf16> to vector<256x256xbf16>
    %cst_73 = arith.constant dense<0.000000e+00> : vector<40x256xf32>
    %105 = tpu.matmul %102, %104, %cst_73 {dimension_numbers = #tpu.dot_dimension_numbers<[1], [0], [0], [1], [0, 0, 1, 1], [], []>} : vector<40x256xbf16>, vector<256x256xbf16>, vector<40x256xf32> -> vector<40x256xf32>
    %106 = arith.addf %101, %105 : vector<40x256xf32>
    %107 = vector.extract_strided_slice %97 {offsets = [2, 0], sizes = [40, 256], strides = [1, 1]} : vector<44x256xbf16> to vector<40x256xbf16>
    %c0_74 = arith.constant 0 : index
    %c15 = arith.constant 15 : index
    %c0_75 = arith.constant 0 : index
    %c0_76 = arith.constant 0 : index
    %108 = vector.load %arg5[%c0_74, %c15, %c0_75, %c0_76] : memref<1x54x256x256xbf16, #tpu.memory_space<vmem>>, vector<1x1x256x256xbf16>
    %109 = vector.shape_cast %108 : vector<1x1x256x256xbf16> to vector<256x256xbf16>
    %cst_77 = arith.constant dense<0.000000e+00> : vector<40x256xf32>
    %110 = tpu.matmul %107, %109, %cst_77 {dimension_numbers = #tpu.dot_dimension_numbers<[1], [0], [0], [1], [0, 0, 1, 1], [], []>} : vector<40x256xbf16>, vector<256x256xbf16>, vector<40x256xf32> -> vector<40x256xf32>
    %111 = arith.addf %106, %110 : vector<40x256xf32>
    %112 = vector.extract_strided_slice %97 {offsets = [3, 0], sizes = [40, 256], strides = [1, 1]} : vector<44x256xbf16> to vector<40x256xbf16>
    %c0_78 = arith.constant 0 : index
    %c16 = arith.constant 16 : index
    %c0_79 = arith.constant 0 : index
    %c0_80 = arith.constant 0 : index
    %113 = vector.load %arg5[%c0_78, %c16, %c0_79, %c0_80] : memref<1x54x256x256xbf16, #tpu.memory_space<vmem>>, vector<1x1x256x256xbf16>
    %114 = vector.shape_cast %113 : vector<1x1x256x256xbf16> to vector<256x256xbf16>
    %cst_81 = arith.constant dense<0.000000e+00> : vector<40x256xf32>
    %115 = tpu.matmul %112, %114, %cst_81 {dimension_numbers = #tpu.dot_dimension_numbers<[1], [0], [0], [1], [0, 0, 1, 1], [], []>} : vector<40x256xbf16>, vector<256x256xbf16>, vector<40x256xf32> -> vector<40x256xf32>
    %116 = arith.addf %111, %115 : vector<40x256xf32>
    %117 = vector.extract_strided_slice %97 {offsets = [4, 0], sizes = [40, 256], strides = [1, 1]} : vector<44x256xbf16> to vector<40x256xbf16>
    %c0_82 = arith.constant 0 : index
    %c17 = arith.constant 17 : index
    %c0_83 = arith.constant 0 : index
    %c0_84 = arith.constant 0 : index
    %118 = vector.load %arg5[%c0_82, %c17, %c0_83, %c0_84] : memref<1x54x256x256xbf16, #tpu.memory_space<vmem>>, vector<1x1x256x256xbf16>
    %119 = vector.shape_cast %118 : vector<1x1x256x256xbf16> to vector<256x256xbf16>
    %cst_85 = arith.constant dense<0.000000e+00> : vector<40x256xf32>
    %120 = tpu.matmul %117, %119, %cst_85 {dimension_numbers = #tpu.dot_dimension_numbers<[1], [0], [0], [1], [0, 0, 1, 1], [], []>} : vector<40x256xbf16>, vector<256x256xbf16>, vector<40x256xf32> -> vector<40x256xf32>
    %121 = arith.addf %116, %120 : vector<40x256xf32>
    %122 = vector.extract_strided_slice %6 {offsets = [2, 0], sizes = [1, 256], strides = [1, 1]} : vector<8x256xf32> to vector<1x256xf32>
    %123 = vector.broadcast %122 : vector<1x256xf32> to vector<40x256xf32>
    %124 = arith.addf %121, %123 : vector<40x256xf32>
    %cst_86 = arith.constant 0.000000e+00 : f32
    %125 = vector.broadcast %cst_86 : f32 to vector<40x256xf32>
    %126 = arith.cmpf ogt, %124, %125 : vector<40x256xf32>
    %cst_87 = arith.constant 0.000000e+00 : f32
    %127 = vector.broadcast %cst_87 : f32 to vector<40x256xf32>
    %128 = arith.minimumf %124, %127 : vector<40x256xf32>
    %129 = math.exp %128 : vector<40x256xf32>
    %cst_88 = arith.constant 1.000000e+00 : f32
    %130 = vector.broadcast %cst_88 : f32 to vector<40x256xf32>
    %131 = arith.subf %129, %130 : vector<40x256xf32>
    %132 = arith.select %126, %124, %131 : vector<40x256xi1>, vector<40x256xf32>
    %133 = arith.truncf %132 : vector<40x256xf32> to vector<40x256xbf16>
    %134 = vector.extract_strided_slice %133 {offsets = [0, 0], sizes = [36, 256], strides = [1, 1]} : vector<40x256xbf16> to vector<36x256xbf16>
    %c0_89 = arith.constant 0 : index
    %c18 = arith.constant 18 : index
    %c0_90 = arith.constant 0 : index
    %c0_91 = arith.constant 0 : index
    %135 = vector.load %arg5[%c0_89, %c18, %c0_90, %c0_91] : memref<1x54x256x256xbf16, #tpu.memory_space<vmem>>, vector<1x1x256x256xbf16>
    %136 = vector.shape_cast %135 : vector<1x1x256x256xbf16> to vector<256x256xbf16>
    %cst_92 = arith.constant dense<0.000000e+00> : vector<36x256xf32>
    %137 = tpu.matmul %134, %136, %cst_92 {dimension_numbers = #tpu.dot_dimension_numbers<[1], [0], [0], [1], [0, 0, 1, 1], [], []>} : vector<36x256xbf16>, vector<256x256xbf16>, vector<36x256xf32> -> vector<36x256xf32>
    %138 = vector.extract_strided_slice %133 {offsets = [1, 0], sizes = [36, 256], strides = [1, 1]} : vector<40x256xbf16> to vector<36x256xbf16>
    %c0_93 = arith.constant 0 : index
    %c19 = arith.constant 19 : index
    %c0_94 = arith.constant 0 : index
    %c0_95 = arith.constant 0 : index
    %139 = vector.load %arg5[%c0_93, %c19, %c0_94, %c0_95] : memref<1x54x256x256xbf16, #tpu.memory_space<vmem>>, vector<1x1x256x256xbf16>
    %140 = vector.shape_cast %139 : vector<1x1x256x256xbf16> to vector<256x256xbf16>
    %cst_96 = arith.constant dense<0.000000e+00> : vector<36x256xf32>
    %141 = tpu.matmul %138, %140, %cst_96 {dimension_numbers = #tpu.dot_dimension_numbers<[1], [0], [0], [1], [0, 0, 1, 1], [], []>} : vector<36x256xbf16>, vector<256x256xbf16>, vector<36x256xf32> -> vector<36x256xf32>
    %142 = arith.addf %137, %141 : vector<36x256xf32>
    %143 = vector.extract_strided_slice %133 {offsets = [2, 0], sizes = [36, 256], strides = [1, 1]} : vector<40x256xbf16> to vector<36x256xbf16>
    %c0_97 = arith.constant 0 : index
    %c20 = arith.constant 20 : index
    %c0_98 = arith.constant 0 : index
    %c0_99 = arith.constant 0 : index
    %144 = vector.load %arg5[%c0_97, %c20, %c0_98, %c0_99] : memref<1x54x256x256xbf16, #tpu.memory_space<vmem>>, vector<1x1x256x256xbf16>
    %145 = vector.shape_cast %144 : vector<1x1x256x256xbf16> to vector<256x256xbf16>
    %cst_100 = arith.constant dense<0.000000e+00> : vector<36x256xf32>
    %146 = tpu.matmul %143, %145, %cst_100 {dimension_numbers = #tpu.dot_dimension_numbers<[1], [0], [0], [1], [0, 0, 1, 1], [], []>} : vector<36x256xbf16>, vector<256x256xbf16>, vector<36x256xf32> -> vector<36x256xf32>
    %147 = arith.addf %142, %146 : vector<36x256xf32>
    %148 = vector.extract_strided_slice %133 {offsets = [3, 0], sizes = [36, 256], strides = [1, 1]} : vector<40x256xbf16> to vector<36x256xbf16>
    %c0_101 = arith.constant 0 : index
    %c21 = arith.constant 21 : index
    %c0_102 = arith.constant 0 : index
    %c0_103 = arith.constant 0 : index
    %149 = vector.load %arg5[%c0_101, %c21, %c0_102, %c0_103] : memref<1x54x256x256xbf16, #tpu.memory_space<vmem>>, vector<1x1x256x256xbf16>
    %150 = vector.shape_cast %149 : vector<1x1x256x256xbf16> to vector<256x256xbf16>
    %cst_104 = arith.constant dense<0.000000e+00> : vector<36x256xf32>
    %151 = tpu.matmul %148, %150, %cst_104 {dimension_numbers = #tpu.dot_dimension_numbers<[1], [0], [0], [1], [0, 0, 1, 1], [], []>} : vector<36x256xbf16>, vector<256x256xbf16>, vector<36x256xf32> -> vector<36x256xf32>
    %152 = arith.addf %147, %151 : vector<36x256xf32>
    %153 = vector.extract_strided_slice %133 {offsets = [4, 0], sizes = [36, 256], strides = [1, 1]} : vector<40x256xbf16> to vector<36x256xbf16>
    %c0_105 = arith.constant 0 : index
    %c22 = arith.constant 22 : index
    %c0_106 = arith.constant 0 : index
    %c0_107 = arith.constant 0 : index
    %154 = vector.load %arg5[%c0_105, %c22, %c0_106, %c0_107] : memref<1x54x256x256xbf16, #tpu.memory_space<vmem>>, vector<1x1x256x256xbf16>
    %155 = vector.shape_cast %154 : vector<1x1x256x256xbf16> to vector<256x256xbf16>
    %cst_108 = arith.constant dense<0.000000e+00> : vector<36x256xf32>
    %156 = tpu.matmul %153, %155, %cst_108 {dimension_numbers = #tpu.dot_dimension_numbers<[1], [0], [0], [1], [0, 0, 1, 1], [], []>} : vector<36x256xbf16>, vector<256x256xbf16>, vector<36x256xf32> -> vector<36x256xf32>
    %157 = arith.addf %152, %156 : vector<36x256xf32>
    %158 = vector.extract_strided_slice %6 {offsets = [3, 0], sizes = [1, 256], strides = [1, 1]} : vector<8x256xf32> to vector<1x256xf32>
    %159 = vector.broadcast %158 : vector<1x256xf32> to vector<36x256xf32>
    %160 = arith.addf %157, %159 : vector<36x256xf32>
    %cst_109 = arith.constant 0.000000e+00 : f32
    %161 = vector.broadcast %cst_109 : f32 to vector<36x256xf32>
    %162 = arith.cmpf ogt, %160, %161 : vector<36x256xf32>
    %cst_110 = arith.constant 0.000000e+00 : f32
    %163 = vector.broadcast %cst_110 : f32 to vector<36x256xf32>
    %164 = arith.minimumf %160, %163 : vector<36x256xf32>
    %165 = math.exp %164 : vector<36x256xf32>
    %cst_111 = arith.constant 1.000000e+00 : f32
    %166 = vector.broadcast %cst_111 : f32 to vector<36x256xf32>
    %167 = arith.subf %165, %166 : vector<36x256xf32>
    %168 = arith.select %162, %160, %167 : vector<36x256xi1>, vector<36x256xf32>
    %169 = arith.truncf %168 : vector<36x256xf32> to vector<36x256xbf16>
    %170 = vector.extract_strided_slice %169 {offsets = [0, 0], sizes = [32, 256], strides = [1, 1]} : vector<36x256xbf16> to vector<32x256xbf16>
    %c0_112 = arith.constant 0 : index
    %c23 = arith.constant 23 : index
    %c0_113 = arith.constant 0 : index
    %c0_114 = arith.constant 0 : index
    %171 = vector.load %arg5[%c0_112, %c23, %c0_113, %c0_114] : memref<1x54x256x256xbf16, #tpu.memory_space<vmem>>, vector<1x1x256x256xbf16>
    %172 = vector.shape_cast %171 : vector<1x1x256x256xbf16> to vector<256x256xbf16>
    %cst_115 = arith.constant dense<0.000000e+00> : vector<32x256xf32>
    %173 = tpu.matmul %170, %172, %cst_115 {dimension_numbers = #tpu.dot_dimension_numbers<[1], [0], [0], [1], [0, 0, 1, 1], [], []>} : vector<32x256xbf16>, vector<256x256xbf16>, vector<32x256xf32> -> vector<32x256xf32>
    %174 = vector.extract_strided_slice %169 {offsets = [1, 0], sizes = [32, 256], strides = [1, 1]} : vector<36x256xbf16> to vector<32x256xbf16>
    %c0_116 = arith.constant 0 : index
    %c24 = arith.constant 24 : index
    %c0_117 = arith.constant 0 : index
    %c0_118 = arith.constant 0 : index
    %175 = vector.load %arg5[%c0_116, %c24, %c0_117, %c0_118] : memref<1x54x256x256xbf16, #tpu.memory_space<vmem>>, vector<1x1x256x256xbf16>
    %176 = vector.shape_cast %175 : vector<1x1x256x256xbf16> to vector<256x256xbf16>
    %cst_119 = arith.constant dense<0.000000e+00> : vector<32x256xf32>
    %177 = tpu.matmul %174, %176, %cst_119 {dimension_numbers = #tpu.dot_dimension_numbers<[1], [0], [0], [1], [0, 0, 1, 1], [], []>} : vector<32x256xbf16>, vector<256x256xbf16>, vector<32x256xf32> -> vector<32x256xf32>
    %178 = arith.addf %173, %177 : vector<32x256xf32>
    %179 = vector.extract_strided_slice %169 {offsets = [2, 0], sizes = [32, 256], strides = [1, 1]} : vector<36x256xbf16> to vector<32x256xbf16>
    %c0_120 = arith.constant 0 : index
    %c25 = arith.constant 25 : index
    %c0_121 = arith.constant 0 : index
    %c0_122 = arith.constant 0 : index
    %180 = vector.load %arg5[%c0_120, %c25, %c0_121, %c0_122] : memref<1x54x256x256xbf16, #tpu.memory_space<vmem>>, vector<1x1x256x256xbf16>
    %181 = vector.shape_cast %180 : vector<1x1x256x256xbf16> to vector<256x256xbf16>
    %cst_123 = arith.constant dense<0.000000e+00> : vector<32x256xf32>
    %182 = tpu.matmul %179, %181, %cst_123 {dimension_numbers = #tpu.dot_dimension_numbers<[1], [0], [0], [1], [0, 0, 1, 1], [], []>} : vector<32x256xbf16>, vector<256x256xbf16>, vector<32x256xf32> -> vector<32x256xf32>
    %183 = arith.addf %178, %182 : vector<32x256xf32>
    %184 = vector.extract_strided_slice %169 {offsets = [3, 0], sizes = [32, 256], strides = [1, 1]} : vector<36x256xbf16> to vector<32x256xbf16>
    %c0_124 = arith.constant 0 : index
    %c26 = arith.constant 26 : index
    %c0_125 = arith.constant 0 : index
    %c0_126 = arith.constant 0 : index
    %185 = vector.load %arg5[%c0_124, %c26, %c0_125, %c0_126] : memref<1x54x256x256xbf16, #tpu.memory_space<vmem>>, vector<1x1x256x256xbf16>
    %186 = vector.shape_cast %185 : vector<1x1x256x256xbf16> to vector<256x256xbf16>
    %cst_127 = arith.constant dense<0.000000e+00> : vector<32x256xf32>
    %187 = tpu.matmul %184, %186, %cst_127 {dimension_numbers = #tpu.dot_dimension_numbers<[1], [0], [0], [1], [0, 0, 1, 1], [], []>} : vector<32x256xbf16>, vector<256x256xbf16>, vector<32x256xf32> -> vector<32x256xf32>
    %188 = arith.addf %183, %187 : vector<32x256xf32>
    %189 = vector.extract_strided_slice %169 {offsets = [4, 0], sizes = [32, 256], strides = [1, 1]} : vector<36x256xbf16> to vector<32x256xbf16>
    %c0_128 = arith.constant 0 : index
    %c27 = arith.constant 27 : index
    %c0_129 = arith.constant 0 : index
    %c0_130 = arith.constant 0 : index
    %190 = vector.load %arg5[%c0_128, %c27, %c0_129, %c0_130] : memref<1x54x256x256xbf16, #tpu.memory_space<vmem>>, vector<1x1x256x256xbf16>
    %191 = vector.shape_cast %190 : vector<1x1x256x256xbf16> to vector<256x256xbf16>
    %cst_131 = arith.constant dense<0.000000e+00> : vector<32x256xf32>
    %192 = tpu.matmul %189, %191, %cst_131 {dimension_numbers = #tpu.dot_dimension_numbers<[1], [0], [0], [1], [0, 0, 1, 1], [], []>} : vector<32x256xbf16>, vector<256x256xbf16>, vector<32x256xf32> -> vector<32x256xf32>
    %193 = arith.addf %188, %192 : vector<32x256xf32>
    %194 = vector.extract_strided_slice %6 {offsets = [4, 0], sizes = [1, 256], strides = [1, 1]} : vector<8x256xf32> to vector<1x256xf32>
    %195 = vector.broadcast %194 : vector<1x256xf32> to vector<32x256xf32>
    %196 = arith.addf %193, %195 : vector<32x256xf32>
    %cst_132 = arith.constant 0.000000e+00 : f32
    %197 = vector.broadcast %cst_132 : f32 to vector<32x256xf32>
    %198 = arith.cmpf ogt, %196, %197 : vector<32x256xf32>
    %cst_133 = arith.constant 0.000000e+00 : f32
    %199 = vector.broadcast %cst_133 : f32 to vector<32x256xf32>
    %200 = arith.minimumf %196, %199 : vector<32x256xf32>
    %201 = math.exp %200 : vector<32x256xf32>
    %cst_134 = arith.constant 1.000000e+00 : f32
    %202 = vector.broadcast %cst_134 : f32 to vector<32x256xf32>
    %203 = arith.subf %201, %202 : vector<32x256xf32>
    %204 = arith.select %198, %196, %203 : vector<32x256xi1>, vector<32x256xf32>
    %205 = arith.truncf %204 : vector<32x256xf32> to vector<32x256xbf16>
    %206 = vector.extract_strided_slice %205 {offsets = [0, 0], sizes = [28, 256], strides = [1, 1]} : vector<32x256xbf16> to vector<28x256xbf16>
    %c0_135 = arith.constant 0 : index
    %c28 = arith.constant 28 : index
    %c0_136 = arith.constant 0 : index
    %c0_137 = arith.constant 0 : index
    %207 = vector.load %arg5[%c0_135, %c28, %c0_136, %c0_137] : memref<1x54x256x256xbf16, #tpu.memory_space<vmem>>, vector<1x1x256x256xbf16>
    %208 = vector.shape_cast %207 : vector<1x1x256x256xbf16> to vector<256x256xbf16>
    %cst_138 = arith.constant dense<0.000000e+00> : vector<28x256xf32>
    %209 = tpu.matmul %206, %208, %cst_138 {dimension_numbers = #tpu.dot_dimension_numbers<[1], [0], [0], [1], [0, 0, 1, 1], [], []>} : vector<28x256xbf16>, vector<256x256xbf16>, vector<28x256xf32> -> vector<28x256xf32>
    %210 = vector.extract_strided_slice %205 {offsets = [1, 0], sizes = [28, 256], strides = [1, 1]} : vector<32x256xbf16> to vector<28x256xbf16>
    %c0_139 = arith.constant 0 : index
    %c29 = arith.constant 29 : index
    %c0_140 = arith.constant 0 : index
    %c0_141 = arith.constant 0 : index
    %211 = vector.load %arg5[%c0_139, %c29, %c0_140, %c0_141] : memref<1x54x256x256xbf16, #tpu.memory_space<vmem>>, vector<1x1x256x256xbf16>
    %212 = vector.shape_cast %211 : vector<1x1x256x256xbf16> to vector<256x256xbf16>
    %cst_142 = arith.constant dense<0.000000e+00> : vector<28x256xf32>
    %213 = tpu.matmul %210, %212, %cst_142 {dimension_numbers = #tpu.dot_dimension_numbers<[1], [0], [0], [1], [0, 0, 1, 1], [], []>} : vector<28x256xbf16>, vector<256x256xbf16>, vector<28x256xf32> -> vector<28x256xf32>
    %214 = arith.addf %209, %213 : vector<28x256xf32>
    %215 = vector.extract_strided_slice %205 {offsets = [2, 0], sizes = [28, 256], strides = [1, 1]} : vector<32x256xbf16> to vector<28x256xbf16>
    %c0_143 = arith.constant 0 : index
    %c30 = arith.constant 30 : index
    %c0_144 = arith.constant 0 : index
    %c0_145 = arith.constant 0 : index
    %216 = vector.load %arg5[%c0_143, %c30, %c0_144, %c0_145] : memref<1x54x256x256xbf16, #tpu.memory_space<vmem>>, vector<1x1x256x256xbf16>
    %217 = vector.shape_cast %216 : vector<1x1x256x256xbf16> to vector<256x256xbf16>
    %cst_146 = arith.constant dense<0.000000e+00> : vector<28x256xf32>
    %218 = tpu.matmul %215, %217, %cst_146 {dimension_numbers = #tpu.dot_dimension_numbers<[1], [0], [0], [1], [0, 0, 1, 1], [], []>} : vector<28x256xbf16>, vector<256x256xbf16>, vector<28x256xf32> -> vector<28x256xf32>
    %219 = arith.addf %214, %218 : vector<28x256xf32>
    %220 = vector.extract_strided_slice %205 {offsets = [3, 0], sizes = [28, 256], strides = [1, 1]} : vector<32x256xbf16> to vector<28x256xbf16>
    %c0_147 = arith.constant 0 : index
    %c31 = arith.constant 31 : index
    %c0_148 = arith.constant 0 : index
    %c0_149 = arith.constant 0 : index
    %221 = vector.load %arg5[%c0_147, %c31, %c0_148, %c0_149] : memref<1x54x256x256xbf16, #tpu.memory_space<vmem>>, vector<1x1x256x256xbf16>
    %222 = vector.shape_cast %221 : vector<1x1x256x256xbf16> to vector<256x256xbf16>
    %cst_150 = arith.constant dense<0.000000e+00> : vector<28x256xf32>
    %223 = tpu.matmul %220, %222, %cst_150 {dimension_numbers = #tpu.dot_dimension_numbers<[1], [0], [0], [1], [0, 0, 1, 1], [], []>} : vector<28x256xbf16>, vector<256x256xbf16>, vector<28x256xf32> -> vector<28x256xf32>
    %224 = arith.addf %219, %223 : vector<28x256xf32>
    %225 = vector.extract_strided_slice %205 {offsets = [4, 0], sizes = [28, 256], strides = [1, 1]} : vector<32x256xbf16> to vector<28x256xbf16>
    %c0_151 = arith.constant 0 : index
    %c32 = arith.constant 32 : index
    %c0_152 = arith.constant 0 : index
    %c0_153 = arith.constant 0 : index
    %226 = vector.load %arg5[%c0_151, %c32, %c0_152, %c0_153] : memref<1x54x256x256xbf16, #tpu.memory_space<vmem>>, vector<1x1x256x256xbf16>
    %227 = vector.shape_cast %226 : vector<1x1x256x256xbf16> to vector<256x256xbf16>
    %cst_154 = arith.constant dense<0.000000e+00> : vector<28x256xf32>
    %228 = tpu.matmul %225, %227, %cst_154 {dimension_numbers = #tpu.dot_dimension_numbers<[1], [0], [0], [1], [0, 0, 1, 1], [], []>} : vector<28x256xbf16>, vector<256x256xbf16>, vector<28x256xf32> -> vector<28x256xf32>
    %229 = arith.addf %224, %228 : vector<28x256xf32>
    %230 = vector.extract_strided_slice %6 {offsets = [5, 0], sizes = [1, 256], strides = [1, 1]} : vector<8x256xf32> to vector<1x256xf32>
    %231 = vector.broadcast %230 : vector<1x256xf32> to vector<28x256xf32>
    %232 = arith.addf %229, %231 : vector<28x256xf32>
    %cst_155 = arith.constant 0.000000e+00 : f32
    %233 = vector.broadcast %cst_155 : f32 to vector<28x256xf32>
    %234 = arith.cmpf ogt, %232, %233 : vector<28x256xf32>
    %cst_156 = arith.constant 0.000000e+00 : f32
    %235 = vector.broadcast %cst_156 : f32 to vector<28x256xf32>
    %236 = arith.minimumf %232, %235 : vector<28x256xf32>
    %237 = math.exp %236 : vector<28x256xf32>
    %cst_157 = arith.constant 1.000000e+00 : f32
    %238 = vector.broadcast %cst_157 : f32 to vector<28x256xf32>
    %239 = arith.subf %237, %238 : vector<28x256xf32>
    %240 = arith.select %234, %232, %239 : vector<28x256xi1>, vector<28x256xf32>
    %241 = arith.truncf %240 : vector<28x256xf32> to vector<28x256xbf16>
    %242 = vector.extract_strided_slice %241 {offsets = [0, 0], sizes = [24, 256], strides = [1, 1]} : vector<28x256xbf16> to vector<24x256xbf16>
    %c0_158 = arith.constant 0 : index
    %c33 = arith.constant 33 : index
    %c0_159 = arith.constant 0 : index
    %c0_160 = arith.constant 0 : index
    %243 = vector.load %arg5[%c0_158, %c33, %c0_159, %c0_160] : memref<1x54x256x256xbf16, #tpu.memory_space<vmem>>, vector<1x1x256x256xbf16>
    %244 = vector.shape_cast %243 : vector<1x1x256x256xbf16> to vector<256x256xbf16>
    %cst_161 = arith.constant dense<0.000000e+00> : vector<24x256xf32>
    %245 = tpu.matmul %242, %244, %cst_161 {dimension_numbers = #tpu.dot_dimension_numbers<[1], [0], [0], [1], [0, 0, 1, 1], [], []>} : vector<24x256xbf16>, vector<256x256xbf16>, vector<24x256xf32> -> vector<24x256xf32>
    %246 = vector.extract_strided_slice %241 {offsets = [1, 0], sizes = [24, 256], strides = [1, 1]} : vector<28x256xbf16> to vector<24x256xbf16>
    %c0_162 = arith.constant 0 : index
    %c34 = arith.constant 34 : index
    %c0_163 = arith.constant 0 : index
    %c0_164 = arith.constant 0 : index
    %247 = vector.load %arg5[%c0_162, %c34, %c0_163, %c0_164] : memref<1x54x256x256xbf16, #tpu.memory_space<vmem>>, vector<1x1x256x256xbf16>
    %248 = vector.shape_cast %247 : vector<1x1x256x256xbf16> to vector<256x256xbf16>
    %cst_165 = arith.constant dense<0.000000e+00> : vector<24x256xf32>
    %249 = tpu.matmul %246, %248, %cst_165 {dimension_numbers = #tpu.dot_dimension_numbers<[1], [0], [0], [1], [0, 0, 1, 1], [], []>} : vector<24x256xbf16>, vector<256x256xbf16>, vector<24x256xf32> -> vector<24x256xf32>
    %250 = arith.addf %245, %249 : vector<24x256xf32>
    %251 = vector.extract_strided_slice %241 {offsets = [2, 0], sizes = [24, 256], strides = [1, 1]} : vector<28x256xbf16> to vector<24x256xbf16>
    %c0_166 = arith.constant 0 : index
    %c35 = arith.constant 35 : index
    %c0_167 = arith.constant 0 : index
    %c0_168 = arith.constant 0 : index
    %252 = vector.load %arg5[%c0_166, %c35, %c0_167, %c0_168] : memref<1x54x256x256xbf16, #tpu.memory_space<vmem>>, vector<1x1x256x256xbf16>
    %253 = vector.shape_cast %252 : vector<1x1x256x256xbf16> to vector<256x256xbf16>
    %cst_169 = arith.constant dense<0.000000e+00> : vector<24x256xf32>
    %254 = tpu.matmul %251, %253, %cst_169 {dimension_numbers = #tpu.dot_dimension_numbers<[1], [0], [0], [1], [0, 0, 1, 1], [], []>} : vector<24x256xbf16>, vector<256x256xbf16>, vector<24x256xf32> -> vector<24x256xf32>
    %255 = arith.addf %250, %254 : vector<24x256xf32>
    %256 = vector.extract_strided_slice %241 {offsets = [3, 0], sizes = [24, 256], strides = [1, 1]} : vector<28x256xbf16> to vector<24x256xbf16>
    %c0_170 = arith.constant 0 : index
    %c36 = arith.constant 36 : index
    %c0_171 = arith.constant 0 : index
    %c0_172 = arith.constant 0 : index
    %257 = vector.load %arg5[%c0_170, %c36, %c0_171, %c0_172] : memref<1x54x256x256xbf16, #tpu.memory_space<vmem>>, vector<1x1x256x256xbf16>
    %258 = vector.shape_cast %257 : vector<1x1x256x256xbf16> to vector<256x256xbf16>
    %cst_173 = arith.constant dense<0.000000e+00> : vector<24x256xf32>
    %259 = tpu.matmul %256, %258, %cst_173 {dimension_numbers = #tpu.dot_dimension_numbers<[1], [0], [0], [1], [0, 0, 1, 1], [], []>} : vector<24x256xbf16>, vector<256x256xbf16>, vector<24x256xf32> -> vector<24x256xf32>
    %260 = arith.addf %255, %259 : vector<24x256xf32>
    %261 = vector.extract_strided_slice %241 {offsets = [4, 0], sizes = [24, 256], strides = [1, 1]} : vector<28x256xbf16> to vector<24x256xbf16>
    %c0_174 = arith.constant 0 : index
    %c37 = arith.constant 37 : index
    %c0_175 = arith.constant 0 : index
    %c0_176 = arith.constant 0 : index
    %262 = vector.load %arg5[%c0_174, %c37, %c0_175, %c0_176] : memref<1x54x256x256xbf16, #tpu.memory_space<vmem>>, vector<1x1x256x256xbf16>
    %263 = vector.shape_cast %262 : vector<1x1x256x256xbf16> to vector<256x256xbf16>
    %cst_177 = arith.constant dense<0.000000e+00> : vector<24x256xf32>
    %264 = tpu.matmul %261, %263, %cst_177 {dimension_numbers = #tpu.dot_dimension_numbers<[1], [0], [0], [1], [0, 0, 1, 1], [], []>} : vector<24x256xbf16>, vector<256x256xbf16>, vector<24x256xf32> -> vector<24x256xf32>
    %265 = arith.addf %260, %264 : vector<24x256xf32>
    %266 = vector.extract_strided_slice %6 {offsets = [6, 0], sizes = [1, 256], strides = [1, 1]} : vector<8x256xf32> to vector<1x256xf32>
    %267 = vector.broadcast %266 : vector<1x256xf32> to vector<24x256xf32>
    %268 = arith.addf %265, %267 : vector<24x256xf32>
    %cst_178 = arith.constant 0.000000e+00 : f32
    %269 = vector.broadcast %cst_178 : f32 to vector<24x256xf32>
    %270 = arith.cmpf ogt, %268, %269 : vector<24x256xf32>
    %cst_179 = arith.constant 0.000000e+00 : f32
    %271 = vector.broadcast %cst_179 : f32 to vector<24x256xf32>
    %272 = arith.minimumf %268, %271 : vector<24x256xf32>
    %273 = math.exp %272 : vector<24x256xf32>
    %cst_180 = arith.constant 1.000000e+00 : f32
    %274 = vector.broadcast %cst_180 : f32 to vector<24x256xf32>
    %275 = arith.subf %273, %274 : vector<24x256xf32>
    %276 = arith.select %270, %268, %275 : vector<24x256xi1>, vector<24x256xf32>
    %277 = arith.truncf %276 : vector<24x256xf32> to vector<24x256xbf16>
    %278 = vector.extract_strided_slice %277 {offsets = [0, 0], sizes = [9, 256], strides = [1, 1]} : vector<24x256xbf16> to vector<9x256xbf16>
    %c0_181 = arith.constant 0 : index
    %c38 = arith.constant 38 : index
    %c0_182 = arith.constant 0 : index
    %c0_183 = arith.constant 0 : index
    %279 = vector.load %arg5[%c0_181, %c38, %c0_182, %c0_183] : memref<1x54x256x256xbf16, #tpu.memory_space<vmem>>, vector<1x1x256x256xbf16>
    %280 = vector.shape_cast %279 : vector<1x1x256x256xbf16> to vector<256x256xbf16>
    %cst_184 = arith.constant dense<0.000000e+00> : vector<9x256xf32>
    %281 = tpu.matmul %278, %280, %cst_184 {dimension_numbers = #tpu.dot_dimension_numbers<[1], [0], [0], [1], [0, 0, 1, 1], [], []>} : vector<9x256xbf16>, vector<256x256xbf16>, vector<9x256xf32> -> vector<9x256xf32>
    %282 = vector.extract_strided_slice %277 {offsets = [1, 0], sizes = [9, 256], strides = [1, 1]} : vector<24x256xbf16> to vector<9x256xbf16>
    %c0_185 = arith.constant 0 : index
    %c39 = arith.constant 39 : index
    %c0_186 = arith.constant 0 : index
    %c0_187 = arith.constant 0 : index
    %283 = vector.load %arg5[%c0_185, %c39, %c0_186, %c0_187] : memref<1x54x256x256xbf16, #tpu.memory_space<vmem>>, vector<1x1x256x256xbf16>
    %284 = vector.shape_cast %283 : vector<1x1x256x256xbf16> to vector<256x256xbf16>
    %cst_188 = arith.constant dense<0.000000e+00> : vector<9x256xf32>
    %285 = tpu.matmul %282, %284, %cst_188 {dimension_numbers = #tpu.dot_dimension_numbers<[1], [0], [0], [1], [0, 0, 1, 1], [], []>} : vector<9x256xbf16>, vector<256x256xbf16>, vector<9x256xf32> -> vector<9x256xf32>
    %286 = arith.addf %281, %285 : vector<9x256xf32>
    %287 = vector.extract_strided_slice %277 {offsets = [2, 0], sizes = [9, 256], strides = [1, 1]} : vector<24x256xbf16> to vector<9x256xbf16>
    %c0_189 = arith.constant 0 : index
    %c40 = arith.constant 40 : index
    %c0_190 = arith.constant 0 : index
    %c0_191 = arith.constant 0 : index
    %288 = vector.load %arg5[%c0_189, %c40, %c0_190, %c0_191] : memref<1x54x256x256xbf16, #tpu.memory_space<vmem>>, vector<1x1x256x256xbf16>
    %289 = vector.shape_cast %288 : vector<1x1x256x256xbf16> to vector<256x256xbf16>
    %cst_192 = arith.constant dense<0.000000e+00> : vector<9x256xf32>
    %290 = tpu.matmul %287, %289, %cst_192 {dimension_numbers = #tpu.dot_dimension_numbers<[1], [0], [0], [1], [0, 0, 1, 1], [], []>} : vector<9x256xbf16>, vector<256x256xbf16>, vector<9x256xf32> -> vector<9x256xf32>
    %291 = arith.addf %286, %290 : vector<9x256xf32>
    %292 = vector.extract_strided_slice %277 {offsets = [3, 0], sizes = [9, 256], strides = [1, 1]} : vector<24x256xbf16> to vector<9x256xbf16>
    %c0_193 = arith.constant 0 : index
    %c41 = arith.constant 41 : index
    %c0_194 = arith.constant 0 : index
    %c0_195 = arith.constant 0 : index
    %293 = vector.load %arg5[%c0_193, %c41, %c0_194, %c0_195] : memref<1x54x256x256xbf16, #tpu.memory_space<vmem>>, vector<1x1x256x256xbf16>
    %294 = vector.shape_cast %293 : vector<1x1x256x256xbf16> to vector<256x256xbf16>
    %cst_196 = arith.constant dense<0.000000e+00> : vector<9x256xf32>
    %295 = tpu.matmul %292, %294, %cst_196 {dimension_numbers = #tpu.dot_dimension_numbers<[1], [0], [0], [1], [0, 0, 1, 1], [], []>} : vector<9x256xbf16>, vector<256x256xbf16>, vector<9x256xf32> -> vector<9x256xf32>
    %296 = arith.addf %291, %295 : vector<9x256xf32>
    %297 = vector.extract_strided_slice %277 {offsets = [4, 0], sizes = [9, 256], strides = [1, 1]} : vector<24x256xbf16> to vector<9x256xbf16>
    %c0_197 = arith.constant 0 : index
    %c42 = arith.constant 42 : index
    %c0_198 = arith.constant 0 : index
    %c0_199 = arith.constant 0 : index
    %298 = vector.load %arg5[%c0_197, %c42, %c0_198, %c0_199] : memref<1x54x256x256xbf16, #tpu.memory_space<vmem>>, vector<1x1x256x256xbf16>
    %299 = vector.shape_cast %298 : vector<1x1x256x256xbf16> to vector<256x256xbf16>
    %cst_200 = arith.constant dense<0.000000e+00> : vector<9x256xf32>
    %300 = tpu.matmul %297, %299, %cst_200 {dimension_numbers = #tpu.dot_dimension_numbers<[1], [0], [0], [1], [0, 0, 1, 1], [], []>} : vector<9x256xbf16>, vector<256x256xbf16>, vector<9x256xf32> -> vector<9x256xf32>
    %301 = arith.addf %296, %300 : vector<9x256xf32>
    %302 = vector.extract_strided_slice %277 {offsets = [5, 0], sizes = [9, 256], strides = [1, 1]} : vector<24x256xbf16> to vector<9x256xbf16>
    %c0_201 = arith.constant 0 : index
    %c43 = arith.constant 43 : index
    %c0_202 = arith.constant 0 : index
    %c0_203 = arith.constant 0 : index
    %303 = vector.load %arg5[%c0_201, %c43, %c0_202, %c0_203] : memref<1x54x256x256xbf16, #tpu.memory_space<vmem>>, vector<1x1x256x256xbf16>
    %304 = vector.shape_cast %303 : vector<1x1x256x256xbf16> to vector<256x256xbf16>
    %cst_204 = arith.constant dense<0.000000e+00> : vector<9x256xf32>
    %305 = tpu.matmul %302, %304, %cst_204 {dimension_numbers = #tpu.dot_dimension_numbers<[1], [0], [0], [1], [0, 0, 1, 1], [], []>} : vector<9x256xbf16>, vector<256x256xbf16>, vector<9x256xf32> -> vector<9x256xf32>
    %306 = arith.addf %301, %305 : vector<9x256xf32>
    %307 = vector.extract_strided_slice %277 {offsets = [6, 0], sizes = [9, 256], strides = [1, 1]} : vector<24x256xbf16> to vector<9x256xbf16>
    %c0_205 = arith.constant 0 : index
    %c44 = arith.constant 44 : index
    %c0_206 = arith.constant 0 : index
    %c0_207 = arith.constant 0 : index
    %308 = vector.load %arg5[%c0_205, %c44, %c0_206, %c0_207] : memref<1x54x256x256xbf16, #tpu.memory_space<vmem>>, vector<1x1x256x256xbf16>
    %309 = vector.shape_cast %308 : vector<1x1x256x256xbf16> to vector<256x256xbf16>
    %cst_208 = arith.constant dense<0.000000e+00> : vector<9x256xf32>
    %310 = tpu.matmul %307, %309, %cst_208 {dimension_numbers = #tpu.dot_dimension_numbers<[1], [0], [0], [1], [0, 0, 1, 1], [], []>} : vector<9x256xbf16>, vector<256x256xbf16>, vector<9x256xf32> -> vector<9x256xf32>
    %311 = arith.addf %306, %310 : vector<9x256xf32>
    %312 = vector.extract_strided_slice %277 {offsets = [7, 0], sizes = [9, 256], strides = [1, 1]} : vector<24x256xbf16> to vector<9x256xbf16>
    %c0_209 = arith.constant 0 : index
    %c45 = arith.constant 45 : index
    %c0_210 = arith.constant 0 : index
    %c0_211 = arith.constant 0 : index
    %313 = vector.load %arg5[%c0_209, %c45, %c0_210, %c0_211] : memref<1x54x256x256xbf16, #tpu.memory_space<vmem>>, vector<1x1x256x256xbf16>
    %314 = vector.shape_cast %313 : vector<1x1x256x256xbf16> to vector<256x256xbf16>
    %cst_212 = arith.constant dense<0.000000e+00> : vector<9x256xf32>
    %315 = tpu.matmul %312, %314, %cst_212 {dimension_numbers = #tpu.dot_dimension_numbers<[1], [0], [0], [1], [0, 0, 1, 1], [], []>} : vector<9x256xbf16>, vector<256x256xbf16>, vector<9x256xf32> -> vector<9x256xf32>
    %316 = arith.addf %311, %315 : vector<9x256xf32>
    %317 = vector.extract_strided_slice %277 {offsets = [8, 0], sizes = [9, 256], strides = [1, 1]} : vector<24x256xbf16> to vector<9x256xbf16>
    %c0_213 = arith.constant 0 : index
    %c46 = arith.constant 46 : index
    %c0_214 = arith.constant 0 : index
    %c0_215 = arith.constant 0 : index
    %318 = vector.load %arg5[%c0_213, %c46, %c0_214, %c0_215] : memref<1x54x256x256xbf16, #tpu.memory_space<vmem>>, vector<1x1x256x256xbf16>
    %319 = vector.shape_cast %318 : vector<1x1x256x256xbf16> to vector<256x256xbf16>
    %cst_216 = arith.constant dense<0.000000e+00> : vector<9x256xf32>
    %320 = tpu.matmul %317, %319, %cst_216 {dimension_numbers = #tpu.dot_dimension_numbers<[1], [0], [0], [1], [0, 0, 1, 1], [], []>} : vector<9x256xbf16>, vector<256x256xbf16>, vector<9x256xf32> -> vector<9x256xf32>
    %321 = arith.addf %316, %320 : vector<9x256xf32>
    %322 = vector.extract_strided_slice %277 {offsets = [9, 0], sizes = [9, 256], strides = [1, 1]} : vector<24x256xbf16> to vector<9x256xbf16>
    %c0_217 = arith.constant 0 : index
    %c47 = arith.constant 47 : index
    %c0_218 = arith.constant 0 : index
    %c0_219 = arith.constant 0 : index
    %323 = vector.load %arg5[%c0_217, %c47, %c0_218, %c0_219] : memref<1x54x256x256xbf16, #tpu.memory_space<vmem>>, vector<1x1x256x256xbf16>
    %324 = vector.shape_cast %323 : vector<1x1x256x256xbf16> to vector<256x256xbf16>
    %cst_220 = arith.constant dense<0.000000e+00> : vector<9x256xf32>
    %325 = tpu.matmul %322, %324, %cst_220 {dimension_numbers = #tpu.dot_dimension_numbers<[1], [0], [0], [1], [0, 0, 1, 1], [], []>} : vector<9x256xbf16>, vector<256x256xbf16>, vector<9x256xf32> -> vector<9x256xf32>
    %326 = arith.addf %321, %325 : vector<9x256xf32>
    %327 = vector.extract_strided_slice %277 {offsets = [10, 0], sizes = [9, 256], strides = [1, 1]} : vector<24x256xbf16> to vector<9x256xbf16>
    %c0_221 = arith.constant 0 : index
    %c48 = arith.constant 48 : index
    %c0_222 = arith.constant 0 : index
    %c0_223 = arith.constant 0 : index
    %328 = vector.load %arg5[%c0_221, %c48, %c0_222, %c0_223] : memref<1x54x256x256xbf16, #tpu.memory_space<vmem>>, vector<1x1x256x256xbf16>
    %329 = vector.shape_cast %328 : vector<1x1x256x256xbf16> to vector<256x256xbf16>
    %cst_224 = arith.constant dense<0.000000e+00> : vector<9x256xf32>
    %330 = tpu.matmul %327, %329, %cst_224 {dimension_numbers = #tpu.dot_dimension_numbers<[1], [0], [0], [1], [0, 0, 1, 1], [], []>} : vector<9x256xbf16>, vector<256x256xbf16>, vector<9x256xf32> -> vector<9x256xf32>
    %331 = arith.addf %326, %330 : vector<9x256xf32>
    %332 = vector.extract_strided_slice %277 {offsets = [11, 0], sizes = [9, 256], strides = [1, 1]} : vector<24x256xbf16> to vector<9x256xbf16>
    %c0_225 = arith.constant 0 : index
    %c49 = arith.constant 49 : index
    %c0_226 = arith.constant 0 : index
    %c0_227 = arith.constant 0 : index
    %333 = vector.load %arg5[%c0_225, %c49, %c0_226, %c0_227] : memref<1x54x256x256xbf16, #tpu.memory_space<vmem>>, vector<1x1x256x256xbf16>
    %334 = vector.shape_cast %333 : vector<1x1x256x256xbf16> to vector<256x256xbf16>
    %cst_228 = arith.constant dense<0.000000e+00> : vector<9x256xf32>
    %335 = tpu.matmul %332, %334, %cst_228 {dimension_numbers = #tpu.dot_dimension_numbers<[1], [0], [0], [1], [0, 0, 1, 1], [], []>} : vector<9x256xbf16>, vector<256x256xbf16>, vector<9x256xf32> -> vector<9x256xf32>
    %336 = arith.addf %331, %335 : vector<9x256xf32>
    %337 = vector.extract_strided_slice %277 {offsets = [12, 0], sizes = [9, 256], strides = [1, 1]} : vector<24x256xbf16> to vector<9x256xbf16>
    %c0_229 = arith.constant 0 : index
    %c50 = arith.constant 50 : index
    %c0_230 = arith.constant 0 : index
    %c0_231 = arith.constant 0 : index
    %338 = vector.load %arg5[%c0_229, %c50, %c0_230, %c0_231] : memref<1x54x256x256xbf16, #tpu.memory_space<vmem>>, vector<1x1x256x256xbf16>
    %339 = vector.shape_cast %338 : vector<1x1x256x256xbf16> to vector<256x256xbf16>
    %cst_232 = arith.constant dense<0.000000e+00> : vector<9x256xf32>
    %340 = tpu.matmul %337, %339, %cst_232 {dimension_numbers = #tpu.dot_dimension_numbers<[1], [0], [0], [1], [0, 0, 1, 1], [], []>} : vector<9x256xbf16>, vector<256x256xbf16>, vector<9x256xf32> -> vector<9x256xf32>
    %341 = arith.addf %336, %340 : vector<9x256xf32>
    %342 = vector.extract_strided_slice %277 {offsets = [13, 0], sizes = [9, 256], strides = [1, 1]} : vector<24x256xbf16> to vector<9x256xbf16>
    %c0_233 = arith.constant 0 : index
    %c51 = arith.constant 51 : index
    %c0_234 = arith.constant 0 : index
    %c0_235 = arith.constant 0 : index
    %343 = vector.load %arg5[%c0_233, %c51, %c0_234, %c0_235] : memref<1x54x256x256xbf16, #tpu.memory_space<vmem>>, vector<1x1x256x256xbf16>
    %344 = vector.shape_cast %343 : vector<1x1x256x256xbf16> to vector<256x256xbf16>
    %cst_236 = arith.constant dense<0.000000e+00> : vector<9x256xf32>
    %345 = tpu.matmul %342, %344, %cst_236 {dimension_numbers = #tpu.dot_dimension_numbers<[1], [0], [0], [1], [0, 0, 1, 1], [], []>} : vector<9x256xbf16>, vector<256x256xbf16>, vector<9x256xf32> -> vector<9x256xf32>
    %346 = arith.addf %341, %345 : vector<9x256xf32>
    %347 = vector.extract_strided_slice %277 {offsets = [14, 0], sizes = [9, 256], strides = [1, 1]} : vector<24x256xbf16> to vector<9x256xbf16>
    %c0_237 = arith.constant 0 : index
    %c52 = arith.constant 52 : index
    %c0_238 = arith.constant 0 : index
    %c0_239 = arith.constant 0 : index
    %348 = vector.load %arg5[%c0_237, %c52, %c0_238, %c0_239] : memref<1x54x256x256xbf16, #tpu.memory_space<vmem>>, vector<1x1x256x256xbf16>
    %349 = vector.shape_cast %348 : vector<1x1x256x256xbf16> to vector<256x256xbf16>
    %cst_240 = arith.constant dense<0.000000e+00> : vector<9x256xf32>
    %350 = tpu.matmul %347, %349, %cst_240 {dimension_numbers = #tpu.dot_dimension_numbers<[1], [0], [0], [1], [0, 0, 1, 1], [], []>} : vector<9x256xbf16>, vector<256x256xbf16>, vector<9x256xf32> -> vector<9x256xf32>
    %351 = arith.addf %346, %350 : vector<9x256xf32>
    %352 = vector.extract_strided_slice %277 {offsets = [15, 0], sizes = [9, 256], strides = [1, 1]} : vector<24x256xbf16> to vector<9x256xbf16>
    %c0_241 = arith.constant 0 : index
    %c53 = arith.constant 53 : index
    %c0_242 = arith.constant 0 : index
    %c0_243 = arith.constant 0 : index
    %353 = vector.load %arg5[%c0_241, %c53, %c0_242, %c0_243] : memref<1x54x256x256xbf16, #tpu.memory_space<vmem>>, vector<1x1x256x256xbf16>
    %354 = vector.shape_cast %353 : vector<1x1x256x256xbf16> to vector<256x256xbf16>
    %cst_244 = arith.constant dense<0.000000e+00> : vector<9x256xf32>
    %355 = tpu.matmul %352, %354, %cst_244 {dimension_numbers = #tpu.dot_dimension_numbers<[1], [0], [0], [1], [0, 0, 1, 1], [], []>} : vector<9x256xbf16>, vector<256x256xbf16>, vector<9x256xf32> -> vector<9x256xf32>
    %356 = arith.addf %351, %355 : vector<9x256xf32>
    %357 = vector.extract_strided_slice %6 {offsets = [7, 0], sizes = [1, 256], strides = [1, 1]} : vector<8x256xf32> to vector<1x256xf32>
    %358 = vector.broadcast %357 : vector<1x256xf32> to vector<9x256xf32>
    %359 = arith.addf %356, %358 : vector<9x256xf32>
    %360 = vector.extract_strided_slice %359 {offsets = [0, 0], sizes = [8, 256], strides = [1, 1]} : vector<9x256xf32> to vector<8x256xf32>
    %c0_i32 = arith.constant 0 : i32
    %361 = arith.cmpi eq, %arg2, %c0_i32 : i32
    %362 = arith.extui %361 : i1 to i32
    %c0_i32_245 = arith.constant 0 : i32
    %363 = arith.cmpi ne, %362, %c0_i32_245 : i32
    scf.if %363 {
      %c0_249 = arith.constant 0 : index
      %c0_250 = arith.constant 0 : index
      %c0_251 = arith.constant 0 : index
      %370 = vector.load %arg7[%c0_249, %c0_250, %c0_251] : memref<1x8x256xf32, #tpu.memory_space<vmem>>, vector<1x8x256xf32>
      %371 = vector.shape_cast %370 : vector<1x8x256xf32> to vector<8x256xf32>
      %372 = vector.shape_cast %360 : vector<8x256xf32> to vector<1x8x256xf32>
      tpu.vector_store %arg7[%c0_249, %c0_250, %c0_251], %372 {strides = array<i32>} : memref<1x8x256xf32, #tpu.memory_space<vmem>>, vector<1x8x256xf32>,
    } else {
    }
    %c0_i32_246 = arith.constant 0 : i32
    %364 = arith.cmpi sgt, %arg2, %c0_i32_246 : i32
    %365 = arith.extui %364 : i1 to i32
    %c0_i32_247 = arith.constant 0 : i32
    %366 = arith.cmpi ne, %365, %c0_i32_247 : i32
    scf.if %366 {
      %c0_249 = arith.constant 0 : index
      %c0_250 = arith.constant 0 : index
      %c0_251 = arith.constant 0 : index
      %370 = vector.load %arg7[%c0_249, %c0_250, %c0_251] : memref<1x8x256xf32, #tpu.memory_space<vmem>>, vector<1x8x256xf32>
      %371 = vector.shape_cast %370 : vector<1x8x256xf32> to vector<8x256xf32>
      %372 = arith.addf %371, %360 : vector<8x256xf32>
      %c0_252 = arith.constant 0 : index
      %c0_253 = arith.constant 0 : index
      %c0_254 = arith.constant 0 : index
      %373 = vector.load %arg7[%c0_252, %c0_253, %c0_254] : memref<1x8x256xf32, #tpu.memory_space<vmem>>, vector<1x8x256xf32>
      %374 = vector.shape_cast %373 : vector<1x8x256xf32> to vector<8x256xf32>
      %375 = vector.shape_cast %372 : vector<8x256xf32> to vector<1x8x256xf32>
      tpu.vector_store %arg7[%c0_252, %c0_253, %c0_254], %375 {strides = array<i32>} : memref<1x8x256xf32, #tpu.memory_space<vmem>>, vector<1x8x256xf32>,
    } else {
    }
    %c7_i32 = arith.constant 7 : i32
    %367 = arith.cmpi eq, %arg2, %c7_i32 : i32
    %368 = arith.extui %367 : i1 to i32
    %c0_i32_248 = arith.constant 0 : i32
    %369 = arith.cmpi ne, %368, %c0_i32_248 : i32
    scf.if %369 {
      %c0_249 = arith.constant 0 : index
      %c0_250 = arith.constant 0 : index
      %c0_251 = arith.constant 0 : index
      %370 = vector.load %arg7[%c0_249, %c0_250, %c0_251] : memref<1x8x256xf32, #tpu.memory_space<vmem>>, vector<1x8x256xf32>
      %371 = vector.shape_cast %370 : vector<1x8x256xf32> to vector<8x256xf32>
      %372 = math.absf %371 : vector<8x256xf32>
      %cst_252 = arith.constant 1.000000e+00 : f32
      %373 = vector.broadcast %cst_252 : f32 to vector<8x256xf32>
      %374 = arith.addf %373, %372 : vector<8x256xf32>
      %375 = arith.divf %371, %374 : vector<8x256xf32>
      %c0_253 = arith.constant 0 : index
      %c0_254 = arith.constant 0 : index
      %c0_255 = arith.constant 0 : index
      %376 = vector.load %arg7[%c0_253, %c0_254, %c0_255] : memref<1x8x256xf32, #tpu.memory_space<vmem>>, vector<1x8x256xf32>
      %377 = vector.shape_cast %376 : vector<1x8x256xf32> to vector<8x256xf32>
      %378 = vector.shape_cast %375 : vector<8x256xf32> to vector<1x8x256xf32>
      tpu.vector_store %arg7[%c0_253, %c0_254, %c0_255], %378 {strides = array<i32>} : memref<1x8x256xf32, #tpu.memory_space<vmem>>, vector<1x8x256xf32>,
    } else {
    }
    return
  }
  func.func @transform_0(%arg0: i32, %arg1: i32, %arg2: i32) -> (i32, i32, i32) {
    %c0_i32 = arith.constant 0 : i32
    %c0_i32_0 = arith.constant 0 : i32
    %c0_i32_1 = arith.constant 0 : i32
    return %arg0, %c0_i32, %c0_i32_0 : i32, i32, i32
  }
  func.func @transform_1(%arg0: i32, %arg1: i32, %arg2: i32) -> (i32, i32, i32) {
    %c0_i32 = arith.constant 0 : i32
    %c0_i32_0 = arith.constant 0 : i32
    %c0_i32_1 = arith.constant 0 : i32
    return %arg2, %c0_i32, %c0_i32_0 : i32, i32, i32
  }
  func.func @transform_2(%arg0: i32, %arg1: i32, %arg2: i32) -> (i32, i32, i32, i32) {
    %c0_i32 = arith.constant 0 : i32
    %c0_i32_0 = arith.constant 0 : i32
    %c0_i32_1 = arith.constant 0 : i32
    %c0_i32_2 = arith.constant 0 : i32
    return %arg2, %c0_i32, %c0_i32_0, %c0_i32_1 : i32, i32, i32, i32
  }
  func.func @transform_3(%arg0: i32, %arg1: i32, %arg2: i32) -> (i32, i32, i32) {
    %c0_i32 = arith.constant 0 : i32
    %c0_i32_0 = arith.constant 0 : i32
    %c0_i32_1 = arith.constant 0 : i32
    return %arg2, %c0_i32, %c0_i32_0 : i32, i32, i32
  }
  func.func @transform_4(%arg0: i32, %arg1: i32, %arg2: i32) -> (i32, i32, i32) {
    %c0_i32 = arith.constant 0 : i32
    %c0_i32_0 = arith.constant 0 : i32
    return %arg0, %arg1, %c0_i32 : i32, i32, i32
  }
}

</mosaic_0001>

<bundles_post_ra>
// kernel: vocoder_forward.1
= control target key start
LH: loop header
LB: loop body
LE: loop exit
PB: predicated region body
PF: predicated region fallthrough
CT: control target
= control target key end

     0   :  { %s26447_s0 = inlined_call_operand.vmem [shape: bf16[2,56,128], index: 0, kind: input, shape index: {}]   ;;  %s26448_s1 = inlined_call_operand.hbm [shape: bf16[8,128,256], index: 1, kind: input, shape index: {}]   ;;  %s26449_s2 = inlined_call_operand.hbm [shape: bf16[8,54,256,256], index: 2, kind: input, shape index: {}]   ;;  %s26450_s3 = inlined_call_operand.hbm [shape: f32[8,8,256], index: 3, kind: input, shape index: {}]   ;;  %s26451_s4 = inlined_call_operand.vmem [shape: f32[2,8,256], index: 4, kind: output, shape index: {}]  }
   0x1   :  { %26468 = sst [smem:[#allocation33_spill]] %s26448_s1 }
   0x2   :  { %26469 = sst [smem:[#allocation34_spill]] %s26449_s2 }
   0x3   :  { %9 = vsyncpa [#allocation3], 0 }
   0x4   :  { %11 = vsyncpa [#allocation3 + $0x1], 0 }
   0x5   :  { %12 = vsyncpa [#allocation5], 0 }
   0x6   :  { %14 = vsyncpa [#allocation5 + $0x1], 0  ;;  %s22482_s15 = smov 0   ;;  %s22484_s16 = smov 0  }
   0x7   :  { %s22486_s17 = smov 0   ;;  %s22488_s18 = smov 0  }
   0x8   :  { %s22490_s19 = smov 0   ;;  %s22492_s20 = smov 0  }
   0x9   :  { %s22494_s21 = smov 0   ;;  %s22496_s22 = smov 0  }
   0xa LB: > { %s26452_s23 = sadd.s32 4294967295, %s22449_s22   ;;  %s32_s24 = sadd.s32 1, %s22441_s20  ;;  %s22449_s22 = sphi %s22496_s22, %s20_s22   ;;  %s22445_s21 = sphi %s22494_s21, %s26564_s21   ;;  %s22441_s20 = sphi %s22492_s20, %s26563_s20   ;;  %s22437_s19 = sphi %s22490_s19, %s26562_s19   ;;  %s22433_s18 = sphi %s22488_s18, %s26561_s18   ;;  %s22429_s17 = sphi %s22486_s17, %s26560_s17   ;;  %s22425_s16 = sphi %s22484_s16, %s26559_s16   ;;  %s22421_s15 = sphi %s22482_s15, %s26558_s15  }
   0xb   : > { %p33_p0 = scmp.ge.s32.totalorder %s32_s24, 8  ;;  %s39_s25 = sadd.s32 1, %s22445_s21 }
   0xc   : > { %s72_s26 = sadd.s32 1, %s22429_s17  ;;  %p79_p1 = scmp.ne.s32.totalorder %s22429_s17, %s22425_s16 }
   0xd   : > { %s26566_s24 = smov (%p33_p0, %s32_s24), 0  ;;  %s26568_s25 = smov (!%p33_p0, %s39_s25), %s22445_s21 }
   0xe   : > { %26470 = sst [smem:[#allocation9_spill]] %s26566_s24  ;;  %s69_s27 = ssub.s32 %s22441_s20, %s26566_s24 }
   0xf   : > { %p80_p2 = scmp.eq.s32.totalorder %s22449_s22, 0  ;;  %p41_p3 = scmp.ge.s32.totalorder %s26568_s25, 2 }
  0x10   : > { %p70_p4 = scmp.eq.s32.totalorder %s69_s27, 0  ;;  %p85_p6 = scmp.ne.s32.totalorder %s22425_s16, %s22421_s15 }
  0x11   : > { %p81_p5 = por %p80_p2, %p79_p1  ;;  %s26570_s25 = smov (%p41_p3, %s26568_s25), 0 }
  0x12   : > { %26471 = sst [smem:[#allocation10_spill]] %s26570_s25  ;;  %p86_p7 = scmp.eq.s32.totalorder %s26452_s23, 0 }
  0x13   : > { %s22536_s28 = scalar_select %p70_p4, %s22429_s17, %s72_s26  }
  0x14   : > { %p19453_p8 = scmp.lt.s32.totalorder %s22449_s22, 16  ;;  %s22542_s29 = sand.u32 1, %s22429_s17  }
  0x15   : > { %p22544_p9 = por %p86_p7, %p85_p6  ;;  %s218_s6 = sand.u32 1, %s22449_s22  }
  0x16   : > { %p22548_p10 = pnand %p19453_p8, %p81_p5  ;;  %s19433_s7 = smul.u32 13824, %s22542_s29 }
  0x17   : > { %s19434_s8 = smul.u32 221184, %s22441_s20  ;;  %p15907_p11 = scmp.ge.s32.totalorder %s22449_s22, 1 }
  0x18   : > { %s222_s9 = scalar_lea.vmem [#allocation4], %s19433_s7  ;;  %s26474_s2 = sld [smem:[#allocation34_spill]] }
  0x19   : > { %s229_s10 = sshll.u32 %s222_s9, 4  ;;  %s22559_s14 = scalar_lea.sflag [#allocation5], %s218_s6  ;;  %s230_s10 = int_to_ptr.vmem [resolvable:$true] %s229_s10 }
  0x1a   : > { %p22297_p12 = pneg %p22548_p10  ;;  %s22308_s15 = scalar_lea.vmem %s230_s10, 221184 }
  0x1b   : > { %p22309_p13 = scmp.ne.s32.totalorder %s230_s10, %s22308_s15  ;;  %s22451_s26 = smov [#allocation4]  }
  0x1c   : > { %s22313_s27 = sshll.u32 %s22451_s26, 4  ;;  %s22314_s27 = int_to_ptr.vmem [resolvable:$false] %s22313_s27 }
  0x1d   : > { %p22311_p0 = pnand %p22309_p13, %p22297_p12  ;;  %s22315_s7 = scalar_lea.vmem %s22314_s27, 442368 }
  0x1e   : > { %s228_s13 = scalar_lea.hbm %s26474_s2, %s19434_s8  ;;  %p22316_p2 = scmp.lt.s32.totalorder %s230_s10, %s22314_s27 }
  0x1f   : > { %p22312_p1 = pneg %p22311_p0  ;;  %p22317_p3 = scmp.lt.s32.totalorder %s22315_s7, %s22308_s15 }
  0x21   : > { %p22318_p4 = por %p22317_p3, %p22316_p2 }
  0x23   : > { %p22319_p5 = pnand %p22318_p4, %p22312_p1 }
  0x25   : > { %22322 = shalt.err (!%p22319_p5)
}
  0x26   : > { %s26454_s8 = smov 128   ;;  %s22453_s6 = smov 8  }
  0x27   : > { %19449 = dma.hbm_to_vmem [thread:$0]  (!%p22548_p10), %s228_s13, 221184, %s230_s10, %s22559_s14, %s26454_s8, %s26454_s8, %s22453_s6  }
  0x28   : > { %p256_p6 = scmp.lt.s32.totalorder %s22449_s22, 17  ;;  %s15900_s11 = sshll.u32 %s22542_s29, 7 }
  0x29   : > { %s19430_s12 = sshll.u32 %s22441_s20, 11  ;;  %s26476_s1 = sld [smem:[#allocation33_spill]] }
  0x2a   : > { %p22575_p7 = pnand %p15907_p11, %p256_p6  ;;  %s201_s7 = scalar_lea.vmem [#allocation2], %s15900_s11 }
  0x2b   : > { %s208_s23 = sshll.u32 %s201_s7, 4  ;;  %s15904_s2 = sshll.u32 %s22542_s29, 4  ;;  %s209_s23 = int_to_ptr.vmem [resolvable:$true] %s208_s23 }
  0x2c   : > { %s198_s25 = scalar_lea.sflag [#allocation3], %s22542_s29  ;;  %s22336_s24 = scalar_lea.vmem %s209_s23, 2048 }
  0x2d   : > { %p22337_p8 = scmp.ne.s32.totalorder %s209_s23, %s22336_s24  ;;  %s22454_s10 = smov [#allocation2]  }
  0x2e   : > { %s22341_s13 = sshll.u32 %s22454_s10, 4  ;;  %s22342_s13 = int_to_ptr.vmem [resolvable:$false] %s22341_s13 }
  0x2f   : > { %s207_s27 = scalar_lea.hbm %s26476_s1, %s19430_s12  ;;  %p22339_p13 = pnand %p22337_p8, %p22297_p12 }
  0x30   : > { %s22343_s8 = scalar_lea.vmem %s22342_s13, 4096  ;;  %p22344_p0 = scmp.lt.s32.totalorder %s209_s23, %s22342_s13 }
  0x31   : > { %p22340_p11 = pneg %p22339_p13  ;;  %p22345_p1 = scmp.lt.s32.totalorder %s22343_s8, %s22336_s24 }
  0x33   : > { %p22346_p2 = por %p22345_p1, %p22344_p0 }
  0x35   : > { %p22347_p3 = pnand %p22346_p2, %p22340_p11 }
  0x37   : > { %22350 = shalt.err (!%p22347_p3)
}
  0x38   : > { %s26477_s11 = smov 128   ;;  %s19431_s29 = sshll.u32 %s22441_s20, 8 }
  0x39   : > { %19446 = dma.hbm_to_vmem [thread:$0]  (!%p22548_p10), %s207_s27, 2048, %s209_s23, %s198_s25, %s26477_s11, %s26477_s11, %s22453_s6  }
  0x3a   : > { %s249_s26 = scalar_lea.hbm %s26450_s3, %s19431_s29  ;;  %s243_s7 = scalar_lea.vmem [#allocation6], %s15904_s2 }
  0x3b   : > { %s251_s10 = sshll.u32 %s243_s7, 4  ;;  %s22455_s8 = smov [#allocation6]   ;;  %s252_s10 = int_to_ptr.vmem [resolvable:$true] %s251_s10 }
  0x3c   : > { %s22364_s24 = scalar_lea.vmem %s252_s10, 256  ;;  %s22369_s13 = sshll.u32 %s22455_s8, 4  ;;  %s22370_s13 = int_to_ptr.vmem [resolvable:$false] %s22369_s13 }
  0x3d   : > { %p22365_p4 = scmp.ne.s32.totalorder %s252_s10, %s22364_s24  ;;  %s22371_s1 = scalar_lea.vmem %s22370_s13, 512 }
  0x3e   : > { %p22372_p8 = scmp.lt.s32.totalorder %s252_s10, %s22370_s13  ;;  %p22373_p13 = scmp.lt.s32.totalorder %s22371_s1, %s22364_s24 }
  0x3f   : > { %p22367_p5 = pnand %p22365_p4, %p22297_p12 }
  0x40   : > { %p22374_p11 = por %p22373_p13, %p22372_p8 }
  0x41   : > { %p22368_p6 = pneg %p22367_p5 }
  0x43   : > { %p22375_p0 = pnand %p22374_p11, %p22368_p6 }
  0x45   : > { %22378 = shalt.err (!%p22375_p0)
}
  0x46   : > { %19452 = dma.hbm_to_vmem [thread:$0]  (!%p22548_p10), %s249_s26, 256, %s252_s10, %s22559_s14  }
  0x47   : > { %260 = sbr.rel (%p22575_p7) target bundleno = 3505 (0xdb1), region = 36 }
  0x4c   : > { %s22607_s2 = sand.u32 1, %s22425_s16  }
  0x4d   : > { %s15908_s23 = sshll.u32 %s22607_s2, 7  ;;  %s263_s25 = scalar_lea.sflag [#allocation3], %s22607_s2 }
  0x4e   : > { %s22611_s6 = scalar_lea.vmem [#allocation2], %s15908_s23 }
  0x4f   : > { %22412 = dma.done.wait (%p22544_p9), %s263_s25, 2048  }
  0x50   : > { %22414 = vsyncadd (%p22544_p9), %s263_s25, 4294965248  ;;  %s26478_s1 = sadd.s32 4294967295, %s22449_s22   ;;  %s19435_s14 = smul.u32 13824, %s22607_s2 }
  0x51   : > { %s271_s5 = sand.u32 1, %s26478_s1  }
  0x52   : > { %s272_s9 = scalar_lea.sflag [#allocation5], %s271_s5  ;;  %s22620_s27 = scalar_lea.vmem [#allocation4], %s19435_s14 }
  0x53   : > { %22416 = dma.done.wait (%p22544_p9), %s272_s9, 221440  }
  0x54   : > { %22418 = vsyncadd (%p22544_p9), %s272_s9, 4294745856  ;;  %p328_p10 = scmp.lt.s32.totalorder %s22437_s19, 1  ;;  %v22456_v0 = vmov 0   ;;  %v19521_v1 = vld [vmem:[%s22611_s6 + $0x74] ss:$8 sps:$4 sm:$0xff]   ;;  %p19425_p9 = scmp.ne.s32.totalorder %s22433_s18, 0 }
  0x55   : > { %515 = vmatprep.mubr.bf16.mxu0 %v22456_v0  ;;  %v19523_v2 = vld [vmem:[%s22611_s6 + $0x70] ss:$8 sps:$4 sm:$0xff]   ;;  %483 = vmatprep.subr.bf16.mxu0 %v19521_v1  ;;  %v19524_v3 = vld [vmem:[%s22611_s6 + $0x64] ss:$8 sps:$4 sm:$0xff]   ;;  %v19526_v4 = vld [vmem:[%s22611_s6 + $0x60] ss:$8 sps:$4 sm:$0xff]  }
  0x56   : > { %s26572_s19 = smov (!%p328_p10, %s22437_s19), 1  ;;  %484 = vmatpush1.bf16.msra.mxu0 %v19523_v2  ;;  %v19527_v5 = vld [vmem:[%s22611_s6 + $0x54] ss:$8 sps:$4 sm:$0xff]   ;;  %v19529_v6 = vld [vmem:[%s22611_s6 + $0x50] ss:$8 sps:$4 sm:$0xff]  }
  0x57   : > { %s19432_s11 = sshll.u32 %s26572_s19, 4  ;;  %485 = vmatprep.subr.bf16.mxu0 %v19524_v3  ;;  %s19436_s15 = smul.u32 28, %s26572_s19  ;;  %v19530_v7 = vld [vmem:[%s22611_s6 + $0x44] ss:$8 sps:$4 sm:$0xff]   ;;  %v19532_v8 = vld [vmem:[%s22611_s6 + $0x40] ss:$8 sps:$4 sm:$0xff]  }
  0x58   : > { %s22632_s30 = scalar_lea.vmem %s26451_s4, %s19432_s11  ;;  %v19533_v9 = vld [vmem:[%s22611_s6 + $0x34] ss:$8 sps:$4 sm:$0xff]   ;;  %v19535_v10 = vld [vmem:[%s22611_s6 + $0x30] ss:$8 sps:$4 sm:$0xff]   ;;  %v19536_v11 = vld [vmem:[%s22611_s6 + $0x24] ss:$8 sps:$4 sm:$0xff]  }
  0x59   : > { %s22644_s10 = scalar_lea.vmem %s26447_s0, %s19436_s15  ;;  %v19538_v12 = vld [vmem:[%s22611_s6 + $0x20] ss:$8 sps:$4 sm:$0xff]   ;;  %v19539_v13 = vld [vmem:[%s22611_s6 + $0x14] ss:$8 sps:$4 sm:$0xff]   ;;  %v19563_v15 = vld [vmem:[%s22620_s27 + $0x170] ss:$8 sps:$4 sm:$0xff]  }
  0x5a   : > { %486 = vmatpush1.bf16.msra.mxu0 %v19526_v4  ;;  %v19561_v14 = vld [vmem:[%s22620_s27 + $0x174] ss:$8 sps:$4 sm:$0xff]   ;;  %v19541_v16 = vld [vmem:[%s22611_s6 + $0x10] ss:$8 sps:$4 sm:$0xff]   ;;  %v19567_v17 = vld [vmem:[%s22620_s27 + $0x164] ss:$8 sps:$4 sm:$0xff]  }
  0x5b   : > { %487 = vmatprep.subr.bf16.mxu0 %v19527_v5  ;;  %924 = vmatprep.subr.bf16.mxu1 %v19561_v14  ;;  %v19569_v18 = vld [vmem:[%s22620_s27 + $0x160] ss:$8 sps:$4 sm:$0xff]   ;;  %v19542_v19 = vld [vmem:[%s22611_s6 + $0x4] ss:$8 sps:$4 sm:$0xff]   ;;  %v19573_v20 = vld [vmem:[%s22620_s27 + $0x154] ss:$8 sps:$4 sm:$0xff]  }
  0x5c   : > { %925 = vmatpush1.bf16.msra.mxu1 %v19563_v15  ;;  %v19544_v21 = vld [vmem:[%s22611_s6] ss:$8 sps:$4 sm:$0xff]   ;;  %v19575_v22 = vld [vmem:[%s22620_s27 + $0x150] ss:$8 sps:$4 sm:$0xff]   ;;  %v19551_v23 = vld [vmem:[%s22620_s27 + $0x74] ss:$8 sps:$4 sm:$0xff]  }
  0x5d   : > { %926 = vmatprep.subr.bf16.mxu1 %v19567_v17  ;;  %v19579_v24 = vld [vmem:[%s22620_s27 + $0x144] ss:$8 sps:$4 sm:$0xff]   ;;  %v19549_v26 = vld [vmem:[%s22620_s27 + $0x70] ss:$8 sps:$4 sm:$0xff]   ;;  %v19581_v28 = vld [vmem:[%s22620_s27 + $0x140] ss:$8 sps:$4 sm:$0xff]  }
  0x5e   : > { %488 = vmatpush1.bf16.msra.mxu0 %v19529_v6  ;;  %v19545_v25 = vld [vmem:[%s22644_s10] sm:$0xff]   ;;  %v19585_v29 = vld [vmem:[%s22620_s27 + $0x134] ss:$8 sps:$4 sm:$0xff]   ;;  %v19587_v32 = vld [vmem:[%s22620_s27 + $0x130] ss:$8 sps:$4 sm:$0xff]   ;;  %s15909_s19 = sshll.u32 %s22607_s2, 4 }
  0x5f   : > { %489 = vmatprep.subr.bf16.mxu0 %v19530_v7  ;;  %v19554_v27 = vld [vmem:[%s22620_s27 + $0x64] ss:$8 sps:$4 sm:$0xff]   ;;  %v19552_v30 = vld [vmem:[%s22620_s27 + $0x60] ss:$8 sps:$4 sm:$0xff]   ;;  %v19557_v31 = vld [vmem:[%s22620_s27 + $0x54] ss:$8 sps:$4 sm:$0xff]  }
  0x60   : > { %927 = vmatpush1.bf16.msra.mxu1 %v19569_v18  ;;  %v19546_v33 = vld [vmem:[%s22644_s10 + $0x8] sm:$0xff]   ;;  %v19560_v35 = vld [vmem:[%s22620_s27 + $0x44] ss:$8 sps:$4 sm:$0xff]   ;;  %v19558_v36 = vld [vmem:[%s22620_s27 + $0x40] ss:$8 sps:$4 sm:$0xff]   ;;  %s22731_s24 = scalar_lea.vmem [#allocation6], %s15909_s19 }
  0x61   : > { %928 = vmatprep.subr.bf16.mxu1 %v19573_v20  ;;  %v19555_v34 = vld [vmem:[%s22620_s27 + $0x50] ss:$8 sps:$4 sm:$0xff]   ;;  %v19566_v37 = vld [vmem:[%s22620_s27 + $0x34] ss:$8 sps:$4 sm:$0xff]   ;;  %v19572_v40 = vld [vmem:[%s22620_s27 + $0x24] ss:$8 sps:$4 sm:$0xff]  }
  0x62   : > { %490 = vmatpush1.bf16.msra.mxu0 %v19532_v8  ;;  %v19547_v38 = vld [vmem:[%s22644_s10 + $0x10] sm:$0xff]   ;;  %v19570_v41 = vld [vmem:[%s22620_s27 + $0x20] ss:$8 sps:$4 sm:$0xff]   ;;  %v19584_v45 = vld [vmem:[%s22620_s27 + $0x4] ss:$8 sps:$4 sm:$0xff]  }
  0x63   : > { %491 = vmatprep.subr.bf16.mxu0 %v19533_v9  ;;  %v19564_v39 = vld [vmem:[%s22620_s27 + $0x30] ss:$8 sps:$4 sm:$0xff]   ;;  %v19578_v42 = vld [vmem:[%s22620_s27 + $0x14] ss:$8 sps:$4 sm:$0xff]   ;;  %v19548_v43 = vld [vmem:[%s22644_s10 + $0x18] ss:$0 sps:$4 sm:$0xff]  }
  0x64   : > { %929 = vmatpush1.bf16.msra.mxu1 %v19575_v22  ;;  %v19576_v44 = vld [vmem:[%s22620_s27 + $0x10] ss:$8 sps:$4 sm:$0xff]   ;;  %v19582_v46 = vld [vmem:[%s22620_s27] ss:$8 sps:$4 sm:$0xff]   ;;  %v19590_v47 = vld [vmem:[%s22620_s27 + $0xf4] ss:$8 sps:$4 sm:$0xff]  }
  0x65   : > { %930 = vmatprep.subr.bf16.mxu1 %v19579_v24  ;;  %v19588_v48 = vld [vmem:[%s22620_s27 + $0xf0] ss:$8 sps:$4 sm:$0xff]   ;;  %v19591_v49 = vld [vmem:[%s22620_s27 + $0x124] ss:$8 sps:$4 sm:$0xff]   ;;  %v19593_v50 = vld [vmem:[%s22620_s27 + $0x120] ss:$8 sps:$4 sm:$0xff]  }
  0x66   : > { %492 = vmatpush1.bf16.msra.mxu0 %v19535_v10  ;;  %v19596_v51 = vld [vmem:[%s22620_s27 + $0xe4] ss:$8 sps:$4 sm:$0xff]   ;;  %v19594_v52 = vld [vmem:[%s22620_s27 + $0xe0] ss:$8 sps:$4 sm:$0xff]   ;;  %v19597_v53 = vld [vmem:[%s22620_s27 + $0x114] ss:$8 sps:$4 sm:$0xff]  }
  0x67   : > { %493 = vmatprep.subr.bf16.mxu0 %v19536_v11  ;;  %v19599_v54 = vld [vmem:[%s22620_s27 + $0x110] ss:$8 sps:$4 sm:$0xff]   ;;  %v19602_v55 = vld [vmem:[%s22620_s27 + $0xd4] ss:$8 sps:$4 sm:$0xff]   ;;  %v19603_v57 = vld [vmem:[%s22620_s27 + $0x104] ss:$8 sps:$4 sm:$0xff]  }
  0x68   : > { %931 = vmatpush1.bf16.msra.mxu1 %v19581_v28  ;;  %v19600_v56 = vld [vmem:[%s22620_s27 + $0xd0] ss:$8 sps:$4 sm:$0xff]   ;;  %v19605_v58 = vld [vmem:[%s22620_s27 + $0x100] ss:$8 sps:$4 sm:$0xff]   ;;  %v19608_v59 = vld [vmem:[%s22620_s27 + $0xc4] ss:$8 sps:$4 sm:$0xff]  }
  0x69   : > { %932 = vmatprep.subr.bf16.mxu1 %v19585_v29  ;;  %v19606_v60 = vld [vmem:[%s22620_s27 + $0xc0] ss:$8 sps:$4 sm:$0xff]   ;;  %v19609_v61 = vld [vmem:[%s22620_s27 + $0x1f4] ss:$8 sps:$4 sm:$0xff]   ;;  %v19611_v62 = vld [vmem:[%s22620_s27 + $0x1f0] ss:$8 sps:$4 sm:$0xff]  }
  0x6a   : > { %494 = vmatpush1.bf16.msra.mxu0 %v19538_v12  ;;  %v19614_v63 = vld [vmem:[%s22620_s27 + $0xb4] ss:$8 sps:$4 sm:$0xff]   ;;  %v19615_v1 = vld [vmem:[%s22620_s27 + $0x1e4] ss:$8 sps:$4 sm:$0xff]   ;;  %v19617_v2 = vld [vmem:[%s22620_s27 + $0x1e0] ss:$8 sps:$4 sm:$0xff]  }
  0x6b   : > { %495 = vmatprep.subr.bf16.mxu0 %v19539_v13  ;;  %v19620_v3 = vld [vmem:[%s22620_s27 + $0xa4] ss:$8 sps:$4 sm:$0xff]   ;;  %v19618_v4 = vld [vmem:[%s22620_s27 + $0xa0] ss:$8 sps:$4 sm:$0xff]   ;;  %v19621_v5 = vld [vmem:[%s22620_s27 + $0x1d4] ss:$8 sps:$4 sm:$0xff]  }
  0x6c   : > { %933 = vmatpush1.bf16.msra.mxu1 %v19587_v32  ;;  %v19623_v6 = vld [vmem:[%s22620_s27 + $0x1d0] ss:$8 sps:$4 sm:$0xff]   ;;  %v19626_v7 = vld [vmem:[%s22620_s27 + $0x94] ss:$8 sps:$4 sm:$0xff]   ;;  %v19627_v9 = vld [vmem:[%s22620_s27 + $0x1c4] ss:$8 sps:$4 sm:$0xff]  }
  0x6d   : > { %934 = vmatprep.subr.bf16.mxu1 %v19591_v49  ;;  %v19624_v8 = vld [vmem:[%s22620_s27 + $0x90] ss:$8 sps:$4 sm:$0xff]   ;;  %v19629_v10 = vld [vmem:[%s22620_s27 + $0x1c0] ss:$8 sps:$4 sm:$0xff]   ;;  %v19632_v11 = vld [vmem:[%s22620_s27 + $0x84] ss:$8 sps:$4 sm:$0xff]  }
  0x6e   : > { %496 = vmatpush1.bf16.msra.mxu0 %v19541_v16  ;;  %v19630_v12 = vld [vmem:[%s22620_s27 + $0x80] ss:$8 sps:$4 sm:$0xff]   ;;  %v19633_v13 = vld [vmem:[%s22620_s27 + $0x1b4] ss:$8 sps:$4 sm:$0xff]   ;;  %v19635_v14 = vld [vmem:[%s22620_s27 + $0x1b0] ss:$8 sps:$4 sm:$0xff]  }
  0x6f   : > { %497 = vmatprep.subr.bf16.mxu0 %v19542_v19  ;;  %v19638_v15 = vld [vmem:[%s22620_s27 + $0x374] ss:$8 sps:$4 sm:$0xff]   ;;  %v19639_v16 = vld [vmem:[%s22620_s27 + $0x1a4] ss:$8 sps:$4 sm:$0xff]   ;;  %v19641_v17 = vld [vmem:[%s22620_s27 + $0x1a0] ss:$8 sps:$4 sm:$0xff]  }
  0x70   : > { %935 = vmatpush1.bf16.msra.mxu1 %v19593_v50  ;;  %v19645_v18 = vld [vmem:[%s22620_s27 + $0x194] ss:$8 sps:$4 sm:$0xff]   ;;  %v19647_v19 = vld [vmem:[%s22620_s27 + $0x190] ss:$8 sps:$4 sm:$0xff]   ;;  %v19651_v20 = vld [vmem:[%s22620_s27 + $0x184] ss:$8 sps:$4 sm:$0xff]  }
  0x71   : > { %936 = vmatprep.subr.bf16.mxu1 %v19597_v53  ;;  %v19659_v22 = vld [vmem:[%s22620_s27 + $0x274] ss:$8 sps:$4 sm:$0xff]   ;;  %vm711_vm7 = vsmask.f32 7424  ;;  %vm1534_vm13 = vsmask.f32 6400 }
  0x72   : > { %498 = vmatpush1.bf16.msra.mxu0 %v19544_v21  ;;  %v19653_v21 = vld [vmem:[%s22620_s27 + $0x180] ss:$8 sps:$4 sm:$0xff]   ;;  %vm2116_vm14 = vsmask.f32 5376 }
  0x73   : > { %1147 = vmatprep.subr.bf16.mxu0 %v19551_v23  ;;  %v373_v23 = vlaneseq }
  0x74   : > { %937 = vmatpush1.bf16.msra.mxu1 %v19599_v54 }
  0x75   : > { %516 = vmatmul.mubr.bf16.vlgmr.msra.gmra.mxu0 %v19545_v25  ;;  %938 = vmatprep.subr.bf16.mxu1 %v19603_v57  ;;  %v22729_v24 = vshrl.u32 %v373_v23, 7  ;;  %v355_v25 = vld [vmem:[%s22731_s24] sm:$0xff] }
  0x76   : > { %525 = vmatprep.mubr.bf16.mxu0 %v22456_v0  ;;  %1148 = vmatpush1.bf16.msra.mxu0 %v19549_v26 }
  0x77   : > { %1149 = vmatprep.subr.bf16.mxu0 %v19554_v27  ;;  %26479 = vst [vmem:[#allocation11_spill] sm:$0xff] %v22729_v24  ;;  %v375_v26 = vsub.s32 0, %v22729_v24  ;;  %v356_v27 = vld [vmem:[%s22731_s24 + $0x8] sm:$0xff] }
  0x78   : > { %939 = vmatpush1.bf16.msra.mxu1 %v19605_v58 }
  0x79   : > { %940 = vmatprep.subr.bf16.mxu1 %v19609_v61  ;;  %v22736_v28 = vrot.slane %v355_v25, %v375_v26  ;;  %v22738_v29 = vrot.slane %v356_v27, %v375_v26 }
  0x7a   : > { %1150 = vmatpush1.bf16.msra.mxu0 %v19552_v30 }
  0x7b   : > { %1151 = vmatprep.subr.bf16.mxu0 %v19557_v31 }
  0x7c   : > { %941 = vmatpush2.bf16.msra.mxu1 %v19611_v62 }
  0x7d   : > { %526 = vmatmul.mubr.bf16.gmra.mxu0 %v19546_v33  ;;  %942 = vmatprep.subr.bf16.mxu1 %v19615_v1 }
  0x7e   : > { %535 = vmatprep.mubr.bf16.mxu0 %v22456_v0  ;;  %1152 = vmatpush1.bf16.msra.mxu0 %v19555_v34 }
  0x7f   : > { %1153 = vmatprep.subr.bf16.mxu0 %v19560_v35 }
  0x80   : > { %943 = vmatpush2.bf16.msra.mxu1 %v19617_v2 }
  0x81   : > { %944 = vmatprep.subr.bf16.mxu1 %v19621_v5 }
  0x82   : > { %1154 = vmatpush1.bf16.msra.mxu0 %v19558_v36 }
  0x83   : > { %1155 = vmatprep.subr.bf16.mxu0 %v19566_v37 }
  0x84   : > { %945 = vmatpush2.bf16.msra.mxu1 %v19623_v6 }
  0x85   : > { %536 = vmatmul.mubr.bf16.gmra.mxu0 %v19547_v38  ;;  %946 = vmatprep.subr.bf16.mxu1 %v19627_v9 }
  0x86   : > { %545 = vmatprep.mubr.bf16.mxu0 %v22456_v0  ;;  %1156 = vmatpush1.bf16.msra.mxu0 %v19564_v39  ;;  %v19612_v0 = vld [vmem:[%s22620_s27 + $0xb0] ss:$8 sps:$4 sm:$0xff]  }
  0x87   : > { %1157 = vmatprep.subr.bf16.mxu0 %v19572_v40 }
  0x88   : > { %947 = vmatpush2.bf16.msra.mxu1 %v19629_v10 }
  0x89   : > { %948 = vmatprep.subr.bf16.mxu1 %v19633_v13 }
  0x8a   : > { %1158 = vmatpush1.bf16.msra.mxu0 %v19570_v41 }
  0x8b   : > { %1159 = vmatprep.subr.bf16.mxu0 %v19578_v42 }
  0x8c   : > { %949 = vmatpush2.bf16.msra.mxu1 %v19635_v14 }
  0x8d   : > { %546 = vmatmul.mubr.bf16.gmra.mxu0 %v19548_v43  ;;  %950 = vmatprep.subr.bf16.mxu1 %v19639_v16 }
  0x8e   : > { %1160 = vmatpush1.bf16.msra.mxu0 %v19576_v44 }
  0x8f   : > { %1161 = vmatprep.subr.bf16.mxu0 %v19584_v45 }
  0x90   : > { %951 = vmatpush2.bf16.msra.mxu1 %v19641_v17 }
  0x91   : > { %952 = vmatprep.subr.bf16.mxu1 %v19645_v18 }
  0x92   : > { %1162 = vmatpush1.bf16.msra.mxu0 %v19582_v46 }
  0x93   : > { %1163 = vmatprep.subr.bf16.mxu0 %v19590_v47 }
  0x94   : > { %953 = vmatpush2.bf16.msra.mxu1 %v19647_v19 }
  0x95   : > { %954 = vmatprep.subr.bf16.mxu1 %v19651_v20 }
  0x96   : > { %1164 = vmatpush2.bf16.msra.mxu0 %v19588_v48 }
  0x97   : > { %1165 = vmatprep.subr.bf16.mxu0 %v19596_v51 }
  0x98   : > { %955 = vmatpush2.bf16.msra.mxu1 %v19653_v21 }
  0x99   : > { %1426 = vmatprep.subr.bf16.mxu1 %v19659_v22 }
  0x9a   : > { %1166 = vmatpush2.bf16.msra.mxu0 %v19594_v52 }
  0x9b   : > { %1167 = vmatprep.subr.bf16.mxu0 %v19602_v55 }
  0x9e   : > { %1168 = vmatpush2.bf16.msra.mxu0 %v19600_v56 }
  0x9f   : > { %1169 = vmatprep.subr.bf16.mxu0 %v19608_v59 }
  0xa2   : > { %1170 = vmatpush2.bf16.msra.mxu0 %v19606_v60 }
  0xa3   : > { %1171 = vmatprep.subr.bf16.mxu0 %v19614_v63 }
  0xa6   : > { %1172 = vmatpush2.bf16.msra.mxu0 %v19612_v0 }
  0xa7   : > { %1173 = vmatprep.subr.bf16.mxu0 %v19620_v3 }
  0xaa   : > { %1174 = vmatpush2.bf16.msra.mxu0 %v19618_v4 }
  0xab   : > { %1175 = vmatprep.subr.bf16.mxu0 %v19626_v7 }
  0xae   : > { %1176 = vmatpush2.bf16.msra.mxu0 %v19624_v8 }
  0xaf   : > { %1177 = vmatprep.subr.bf16.mxu0 %v19632_v11 }
  0xb2   : > { %1178 = vmatpush2.bf16.msra.mxu0 %v19630_v12 }
  0xb3   : > { %1723 = vmatprep.subr.bf16.mxu0 %v19638_v15 }
 0x135   : > { %v517_v30 = vpop.f32.mrf.mxu0 }
 0x136   : > { %v22741_v31 = vadd.f32 %v517_v30, %v22736_v28 }
 0x137   : > { %v519_v32 = vpop.f32.mrf.mxu0 }
 0x138   : > { %v568_v33 = vmin.f32 %v22741_v31, 0.0  ;;  %v22745_v34 = vadd.f32 %v519_v32, %v22738_v29  ;;  %vm554_vm0 = vcmp.gt.f32.partialorder %v22741_v31, 0.0 }
 0x139   : > { %v521_v35 = vpop.f32.mrf.mxu0 }
 0x13a   : > { %v582_v36 = vmul.f32 1.442695, %v568_v33  ;;  %v569_v37 = vmin.f32 %v22745_v34, 0.0  ;;  %v22749_v38 = vadd.f32 %v521_v35, %v22736_v28  ;;  %vm555_vm2 = vcmp.gt.f32.partialorder %v22745_v34, 0.0 }
 0x13b   : > { %v523_v39 = vpop.f32.mrf.mxu0 }
 0x13c   : > { %22141 = vpow2.f32 %v582_v36  ;;  %v584_v40 = vmul.f32 1.442695, %v569_v37  ;;  %v570_v41 = vmin.f32 %v22749_v38, 0.0  ;;  %v22753_v42 = vadd.f32 %v523_v39, %v22738_v29 }
 0x13d   : > { %v527_v43 = vpop.f32.mrf.mxu0  ;;  %vm556_vm1 = vcmp.gt.f32.partialorder %v22749_v38, 0.0 }
 0x13e   : > { %v586_v44 = vmul.f32 1.442695, %v570_v41  ;;  %v22756_v45 = vadd.f32 %v527_v43, %v22736_v28  ;;  %22143 = vpow2.f32 %v584_v40  ;;  %v571_v46 = vmin.f32 %v22753_v42, 0.0  ;;  %v19636_v43 = vld [vmem:[%s22620_s27 + $0x370] ss:$8 sps:$4 sm:$0xff]  }
 0x13f   : > { %v529_v47 = vpop.f32.mrf.mxu0  ;;  %vm557_vm3 = vcmp.gt.f32.partialorder %v22753_v42, 0.0 }
 0x140   : > { %22145 = vpow2.f32 %v586_v44  ;;  %v572_v48 = vmin.f32 %v22756_v45, 0.0  ;;  %v22761_v49 = vadd.f32 %v529_v47, %v22738_v29  ;;  %v588_v50 = vmul.f32 1.442695, %v571_v46  ;;  %v19644_v47 = vld [vmem:[%s22620_s27 + $0x364] ss:$8 sps:$4 sm:$0xff]  }
 0x141   : > { %v531_v51 = vpop.f32.mrf.mxu0  ;;  %vm558_vm4 = vcmp.gt.f32.partialorder %v22756_v45, 0.0 }
 0x142   : > { %v590_v52 = vmul.f32 1.442695, %v572_v48  ;;  %v573_v53 = vmin.f32 %v22761_v49, 0.0  ;;  %v22765_v54 = vadd.f32 %v531_v51, %v22736_v28  ;;  %22147 = vpow2.f32 %v588_v50 }
 0x143   : > { %v533_v55 = vpop.f32.mrf.mxu0  ;;  %vm559_vm6 = vcmp.gt.f32.partialorder %v22761_v49, 0.0 }
 0x144   : > { %22149 = vpow2.f32 %v590_v52  ;;  %v592_v56 = vmul.f32 1.442695, %v573_v53  ;;  %v574_v57 = vmin.f32 %v22765_v54, 0.0  ;;  %v22769_v58 = vadd.f32 %v533_v55, %v22738_v29 }
 0x145   : > { %v537_v59 = vpop.f32.mrf.mxu0  ;;  %vm560_vm5 = vcmp.gt.f32.partialorder %v22765_v54, 0.0 }
 0x146   : > { %v594_v60 = vmul.f32 1.442695, %v574_v57  ;;  %v22772_v61 = vadd.f32 %v537_v59, %v22736_v28  ;;  %22151 = vpow2.f32 %v592_v56  ;;  %v575_v62 = vmin.f32 %v22769_v58, 0.0  ;;  %v19642_v56 = vld [vmem:[%s22620_s27 + $0x360] ss:$8 sps:$4 sm:$0xff]  }
 0x147   : > { %v539_v63 = vpop.f32.mrf.mxu0  ;;  %vm561_vm8 = vcmp.gt.f32.partialorder %v22769_v58, 0.0 }
 0x148   : > { %22153 = vpow2.f32 %v594_v60  ;;  %v576_v0 = vmin.f32 %v22772_v61, 0.0  ;;  %v22777_v1 = vadd.f32 %v539_v63, %v22738_v29  ;;  %v596_v3 = vmul.f32 1.442695, %v575_v62  ;;  %v19650_v62 = vld [vmem:[%s22620_s27 + $0x354] ss:$8 sps:$4 sm:$0xff]  }
 0x149   : > { %v22142_v2 = vpop.eup %22141  ;;  %v541_v4 = vpop.f32.mrf.mxu0  ;;  %vm562_vm9 = vcmp.gt.f32.partialorder %v22772_v61, 0.0 }
 0x14a   : > { %v598_v5 = vmul.f32 1.442695, %v576_v0  ;;  %v577_v6 = vmin.f32 %v22777_v1, 0.0  ;;  %22155 = vpow2.f32 %v596_v3  ;;  %v22781_v7 = vadd.f32 %v541_v4, %v22736_v28 }
 0x14b   : > { %v543_v8 = vpop.f32.mrf.mxu0  ;;  %v22144_v9 = vpop.eup %22143  ;;  %v15933_v10 = vadd.f32 -1.0, %v22142_v2  ;;  %vm563_vm10 = vcmp.gt.f32.partialorder %v22777_v1, 0.0 }
 0x14c   : > { %22157 = vpow2.f32 %v598_v5  ;;  %v600_v11 = vmul.f32 1.442695, %v577_v6  ;;  %v578_v13 = vmin.f32 %v22781_v7, 0.0  ;;  %v22786_v14 = vadd.f32 %v543_v8, %v22738_v29  ;;  %v19648_v5 = vld [vmem:[%s22620_s27 + $0x350] ss:$8 sps:$4 sm:$0xff]  }
 0x14d   : > { %v22146_v12 = vpop.eup %22145  ;;  %v547_v15 = vpop.f32.mrf.mxu0  ;;  %v15934_v18 = vadd.f32 -1.0, %v22144_v9  ;;  %v624_v23 = vsel %vm554_vm0, %v22741_v31, %v15933_v10  ;;  %v19656_v9 = vld [vmem:[%s22620_s27 + $0x344] ss:$8 sps:$4 sm:$0xff]   ;;  %vm564_vm11 = vcmp.gt.f32.partialorder %v22781_v7, 0.0 }
 0x14e   : > { %v15935_v16 = vadd.f32 -1.0, %v22146_v12  ;;  %22159 = vpow2.f32 %v600_v11  ;;  %v22790_v17 = vadd.f32 %v547_v15, %v22736_v28  ;;  %v602_v19 = vmul.f32 1.442695, %v578_v13 }
 0x14f   : > { %v579_v20 = vmin.f32 %v22786_v14, 0.0  ;;  %v549_v21 = vpop.f32.mrf.mxu0  ;;  %v22148_v22 = vpop.eup %22147  ;;  %v625_v37 = vsel %vm555_vm2, %v22745_v34, %v15934_v18  ;;  %vm565_vm12 = vcmp.gt.f32.partialorder %v22786_v14, 0.0  ;;  %vm1831_vm2 = vcmask 1045504  }
 0x150   : > { %v626_v25 = vsel %vm556_vm1, %v22749_v38, %v15935_v16  ;;  %v580_v26 = vmin.f32 %v22790_v17, 0.0  ;;  %v22797_v27 = vadd.f32 %v549_v21, %v22738_v29  ;;  %v15936_v28 = vadd.f32 -1.0, %v22148_v22 }
 0x151   : > { %v22150_v30 = vpop.eup %22149  ;;  %v22799_v32 = vpack.c.bf16 %v626_v25, %v624_v23  ;;  %22161 = vpow2.f32 %v602_v19  ;;  %v604_v33 = vmul.f32 1.442695, %v579_v20  ;;  %v551_v35 = vpop.f32.mrf.mxu0  ;;  %v19654_v25 = vld [vmem:[%s22620_s27 + $0x340] ss:$8 sps:$4 sm:$0xff]   ;;  %vm566_vm0 = vcmp.gt.f32.partialorder %v22790_v17, 0.0 }
 0x152   : > { %v606_v31 = vmul.f32 1.442695, %v580_v26  ;;  %v581_v36 = vmin.f32 %v22797_v27, 0.0  ;;  %v627_v29 = vsel %vm557_vm3, %v22753_v42, %v15936_v28  ;;  %v15937_v41 = vadd.f32 -1.0, %v22150_v30 }
 0x153   : > { %22163 = vpow2.f32 %v604_v33  ;;  %v552_v38 = vpop.f32.mrf.mxu0  ;;  %v22152_v39 = vpop.eup %22151  ;;  %v22806_v40 = vpack.c.bf16 %v627_v29, %v625_v37  ;;  %v22811_v48 = vshll.u32 %v22799_v32, 16  ;;  %v22849_v11 = vshrl.u32 %v22799_v32, 16  ;;  %v19662_v37 = vld [vmem:[%s22620_s27 + $0x334] ss:$8 sps:$4 sm:$0xff]  }
 0x154   : > { %22165 = vpow2.f32 %v606_v31  ;;  %v608_v46 = vmul.f32 1.442695, %v581_v36  ;;  %v15938_v51 = vadd.f32 -1.0, %v22152_v39  ;;  %v628_v53 = vsel %vm558_vm4, %v22756_v45, %v15937_v41  ;;  %v19657_v36 = vld [vmem:[%s22620_s27 + $0x270] ss:$8 sps:$4 sm:$0xff]  }
 0x155   : > { %v22154_v44 = vpop.eup %22153  ;;  %1179 = vmatprep.mubr.bf16.mxu0 %v22806_v40  ;;  %v22815_v34 = vshrl.u32 %v22806_v40, 16  ;;  %v22818_v42 = vshll.u32 %v22806_v40, 16  ;;  %v717_v45 = vrot.slane %v22811_v48, 1  ;;  %vm567_vm15 = vcmp.gt.f32.partialorder %v22797_v27, 0.0 }
 0x156   : > { %v15939_v50 = vadd.f32 -1.0, %v22154_v44  ;;  %1180 = vmatmul.mubr.bf16.vlgmr.msra.gmra.mxu0 %v22799_v32  ;;  %22167 = vpow2.f32 %v608_v46  ;;  %v629_v2 = vsel %vm559_vm6, %v22761_v49, %v15938_v51  ;;  %v19663_v46 = vld [vmem:[%s22620_s27 + $0x260] ss:$8 sps:$4 sm:$0xff]   ;;  %vm1249_vm1 = vcmask 1046528  }
 0x157   : > { %v22156_v52 = vpop.eup %22155  ;;  %1724 = vmatpush1.bf16.msra.mxu0 %v19636_v43  ;;  %v2124_v63 = vrot.slane %v22815_v34, 2  ;;  %v729_v10 = vrot.slane %v22818_v42, 1  ;;  %v718_v15 = vor.u32 %v717_v45, %v22849_v11  ;;  %v1542_v18 = vrot.slane %v22815_v34, 1  ;;  %v19660_v43 = vld [vmem:[%s22620_s27 + $0x330] ss:$8 sps:$4 sm:$0xff]  }
 0x158   : > { %v630_v55 = vsel %vm560_vm5, %v22765_v54, %v15939_v50  ;;  %v15940_v60 = vadd.f32 -1.0, %v22156_v52  ;;  %1725 = vmatprep.subr.bf16.mxu0 %v19644_v47  ;;  %v2125_v54 = vrot.slane %v22818_v42, 3  ;;  %v1543_v22 = vrot.slane %v22818_v42, 2  ;;  %v19668_v50 = vld [vmem:[%s22620_s27 + $0x324] ss:$8 sps:$4 sm:$0xff]  }
 0x159   : > { %v22158_v57 = vpop.eup %22157  ;;  %v22827_v59 = vpack.c.bf16 %v630_v55, %v628_v53  ;;  %v730_v26 = vor.u32 %v729_v10, %v22815_v34  ;;  %v19671_v55 = vld [vmem:[%s22620_s27 + $0x254] ss:$8 sps:$4 sm:$0xff]   ;;  %vm2714_vm3 = vsmask.f32 4352  ;;  %vm2425_vm4 = vcmask 1044480  }
 0x15a   : > { %v631_v3 = vsel %vm561_vm8, %v22769_v58, %v15940_v60  ;;  %v15941_v4 = vadd.f32 -1.0, %v22158_v57  ;;  %v22851_v12 = vor.u32 %v2125_v54, %v2124_v63  ;;  %v1544_v60 = vor.u32 %v1543_v22, %v1542_v18 }
 0x15b   : > { %v22160_v0 = vpop.eup %22159  ;;  %v22842_v6 = vshll.u32 %v22827_v59, 16  ;;  %v22844_v8 = vpack.c.bf16 %v631_v3, %v629_v2  ;;  %1726 = vmatpush1.bf16.msra.mxu0 %v19642_v56  ;;  %v22915_v45 = vshrl.u32 %v22827_v59, 16  ;;  %v19666_v2 = vld [vmem:[%s22620_s27 + $0x320] ss:$8 sps:$4 sm:$0xff]   ;;  %vm3023_vm5 = vcmask 1043456  }
 0x15c   : > { %v15942_v13 = vadd.f32 -1.0, %v22160_v0  ;;  %1727 = vmatprep.subr.bf16.mxu0 %v19650_v62  ;;  %v632_v19 = vsel %vm562_vm9, %v22772_v61, %v15941_v4  ;;  %vm3312_vm6 = vsmask.f32 3328  ;;  %vm3906_vm8 = vsmask.f32 2304 }
 0x15d   : > { %1189 = vmatprep.mubr.bf16.mxu0 %v22844_v8  ;;  %v22857_v58 = vshll.u32 %v22844_v8, 16  ;;  %v22861_v16 = vshrl.u32 %v22844_v8, 16  ;;  %v722_v21 = vrot.slane %v22842_v6, 1  ;;  %vm3617_vm9 = vcmask 1042432  }
 0x15e   : > { %v22162_v49 = vpop.eup %22161  ;;  %1190 = vmatmul.mubr.bf16.gmra.mxu0 %v22827_v59  ;;  %v633_v33 = vsel %vm563_vm10, %v22777_v1, %v15942_v13  ;;  %v19665_v1 = vld [vmem:[%s22620_s27 + $0x264] ss:$8 sps:$4 sm:$0xff]   ;;  %vm4211_vm10 = vcmask 1041408  }
 0x15f   : > { %v15943_v20 = vadd.f32 -1.0, %v22162_v49  ;;  %1728 = vmatpush1.bf16.msra.mxu0 %v19648_v5  ;;  %v734_v30 = vrot.slane %v22857_v58, 1  ;;  %v1545_v61 = vrot.slane %v22861_v16, 1  ;;  %v1546_v28 = vrot.slane %v22857_v58, 2  ;;  %v19674_v49 = vld [vmem:[%s22620_s27 + $0x314] ss:$8 sps:$4 sm:$0xff]  }
 0x160   : > { %v22164_v23 = vpop.eup %22163  ;;  %1729 = vmatprep.subr.bf16.mxu0 %v19656_v9  ;;  %v2127_v29 = vrot.slane %v22861_v16, 2  ;;  %v723_v44 = vsel %vm711_vm7, %v718_v15, %v722_v21  ;;  %v2128_v51 = vrot.slane %v22857_v58, 3  ;;  %v19669_v9 = vld [vmem:[%s22620_s27 + $0x250] ss:$8 sps:$4 sm:$0xff]   ;;  %v19677_v15 = vld [vmem:[%s22620_s27 + $0x244] ss:$8 sps:$4 sm:$0xff]  }
 0x161   : > { %v634_v35 = vsel %vm564_vm11, %v22781_v7, %v15943_v20  ;;  %v15944_v31 = vadd.f32 -1.0, %v22164_v23  ;;  %v22166_v38 = vpop.eup %22165  ;;  %v735_v41 = vsel %vm711_vm7, %v730_v26, %v734_v30  ;;  %v22896_v47 = vor.u32 %v1546_v28, %v1545_v61  ;;  %v19672_v61 = vld [vmem:[%s22620_s27 + $0x310] ss:$8 sps:$4 sm:$0xff]   ;;  %v19675_v28 = vld [vmem:[%s22620_s27 + $0x240] ss:$8 sps:$4 sm:$0xff]  }
 0x162   : > { %v22884_v39 = vpack.c.bf16 %v634_v35, %v632_v19  ;;  %956 = vmatprep.mubr.bf16.mxu1 %v735_v41  ;;  %v15945_v56 = vadd.f32 -1.0, %v22166_v38  ;;  %v22907_v62 = vor.u32 %v2128_v51, %v2127_v29  ;;  %v746_v5 = vor.u32 %v22861_v16, %v734_v30  ;;  %v19681_v51 = vld [vmem:[%s22620_s27 + $0x230] ss:$8 sps:$4 sm:$0xff]  }
 0x163   : > { %v635_v7 = vsel %vm565_vm12, %v22786_v14, %v15944_v31  ;;  %v22168_v52 = vpop.eup %22167  ;;  %1730 = vmatpush1.bf16.msra.mxu0 %v19654_v25  ;;  %957 = vmatmul.mubr.bf16.vlgmr.msra.gmra.mxu1 %v723_v44  ;;  %v1548_v0 = vsel %vm1534_vm13, %v1544_v60, %v22896_v47  ;;  %v26462_v19 = vrot.slane %v22827_v59, 1  ;;  %v2117_v25 = vrot.slane %v22849_v11, 2  ;;  %v19686_v60 = vld [vmem:[%s22620_s27 + $0x3f4] ss:$8 sps:$4 sm:$0xff]  }
 0x164   : > { %v22900_v53 = vpack.c.bf16 %v635_v7, %v633_v33  ;;  %v22905_v14 = vshll.u32 %v22884_v39, 16  ;;  %v15946_v57 = vadd.f32 -1.0, %v22168_v52  ;;  %1427 = vmatpush1.bf16.msra.mxu1 %v19657_v36  ;;  %1731 = vmatprep.subr.bf16.mxu0 %v19662_v37  ;;  %v22928_v4 = vsel %vm2116_vm14, %v22851_v12, %v22907_v62  ;;  %v19680_v36 = vld [vmem:[%s22620_s27 + $0x304] ss:$8 sps:$4 sm:$0xff]  }
 0x165   : > { %1428 = vmatprep.subr.bf16.mxu1 %v19665_v1  ;;  %v636_v13 = vsel %vm566_vm0, %v22790_v17, %v15945_v56  ;;  %v738_v12 = vor.u32 %v22915_v45, %v722_v21  ;;  %v22945_v18 = vshrl.u32 %v22884_v39, 16  ;;  %v26460_v23 = vrot.slane %v22884_v39, 1  ;;  %v19683_v1 = vld [vmem:[%s22620_s27 + $0x234] ss:$8 sps:$4 sm:$0xff]  }
 0x166   : > { %1199 = vmatprep.mubr.bf16.mxu0 %v22900_v53  ;;  %v22912_v63 = vshll.u32 %v22900_v53, 16  ;;  %v637_v54 = vsel %vm567_vm15, %v22797_v27, %v15946_v57  ;;  %v742_v3 = vrot.slane %v22905_v14, 1  ;;  %v22934_v10 = vshrl.u32 %v22900_v53, 16 }
 0x167   : > { %1200 = vmatmul.mubr.bf16.gmra.mxu0 %v22884_v39  ;;  %v22948_v20 = vpack.c.bf16 %v637_v54, %v637_v54  ;;  %v2118_v26 = vrot.slane %v22811_v48, 3  ;;  %v22956_v30 = vpack.c.bf16 %v636_v13, %v636_v13  ;;  %v22965_v33 = vsel %vm1249_vm1, %v26462_v19, %v26460_v23  ;;  %v19710_v23 = vld [vmem:[%s22620_s27 + $0x3b4] ss:$8 sps:$4 sm:$0xff]  }
 0x168   : > { %1732 = vmatpush1.bf16.msra.mxu0 %v19660_v43  ;;  %1755 = vmatprep.mubr.bf16.mxu0 %v1548_v0  ;;  %v750_v27 = vrot.slane %v22912_v63, 1  ;;  %v743_v21 = vsel %vm711_vm7, %v738_v12, %v742_v3  ;;  %v2120_v35 = vrot.slane %v22915_v45, 2  ;;  %v2121_v31 = vrot.slane %v22842_v6, 3  ;;  %v19678_v43 = vld [vmem:[%s22620_s27 + $0x300] ss:$8 sps:$4 sm:$0xff]  }
 0x169   : > { %1429 = vmatpush1.bf16.msra.mxu1 %v19663_v46  ;;  %1733 = vmatprep.subr.bf16.mxu0 %v19668_v50  ;;  %v26461_v37 = vrot.slane %v22844_v8, 1  ;;  %v2119_v29 = vor.u32 %v2118_v26, %v2117_v25  ;;  %v2135_v38 = vrot.slane %v22934_v10, 2  ;;  %v2136_v41 = vrot.slane %v22912_v63, 3 }
 0x16a   : > { %v751_v22 = vsel %vm711_vm7, %v746_v5, %v750_v27  ;;  %1430 = vmatprep.subr.bf16.mxu1 %v19671_v55  ;;  %v757_v17 = vor.u32 %v22934_v10, %v750_v27  ;;  %v2122_v7 = vor.u32 %v2121_v31, %v2120_v35  ;;  %v2131_v44 = vrot.slane %v22945_v18, 2  ;;  %v19689_v27 = vld [vmem:[%s22620_s27 + $0x224] ss:$8 sps:$4 sm:$0xff]  }
 0x16b   : > { %966 = vmatprep.mubr.bf16.mxu1 %v751_v22  ;;  %v2132_v46 = vrot.slane %v22905_v14, 3  ;;  %v22978_v50 = vshll.u32 %v22948_v20, 16  ;;  %v754_v52 = vor.u32 %v22945_v18, %v742_v3  ;;  %v26459_v55 = vrot.slane %v22844_v8, 2 }
 0x16c   : > { %1734 = vmatpush1.bf16.msra.mxu0 %v19666_v2  ;;  %967 = vmatmul.mubr.bf16.gmra.mxu1 %v743_v21  ;;  %v2137_v56 = vor.u32 %v2136_v41, %v2135_v38  ;;  %v26456_v57 = vrot.slane %v22900_v53, 2  ;;  %v22986_v54 = vsel %vm2116_vm14, %v2119_v29, %v2122_v7  ;;  %v22990_v5 = vshll.u32 %v22956_v30, 16  ;;  %v19687_v29 = vld [vmem:[%s22620_s27 + $0x220] ss:$8 sps:$4 sm:$0xff]   ;;  %v19692_v38 = vld [vmem:[%s22620_s27 + $0x3e4] ss:$8 sps:$4 sm:$0xff]  }
 0x16d   : > { %1431 = vmatpush1.bf16.msra.mxu1 %v19669_v9  ;;  %1735 = vmatprep.subr.bf16.mxu0 %v19674_v49  ;;  %v2133_v0 = vor.u32 %v2132_v46, %v2131_v44  ;;  %v2147_v2 = vrot.slane %v22978_v50, 3  ;;  %v1253_v3 = vrot.slane %v22806_v40, 1  ;;  %v2722_v12 = vrot.slane %v22815_v34, 3  ;;  %v19690_v44 = vld [vmem:[%s22620_s27 + $0x3e0] ss:$8 sps:$4 sm:$0xff]  }
 0x16e   : > { %1432 = vmatprep.subr.bf16.mxu1 %v19677_v15  ;;  %976 = vmatprep.mubr.bf16.mxu1 %v757_v17  ;;  %v22996_v9 = vsel %vm2116_vm14, %v22907_v62, %v2137_v56  ;;  %v23003_v13 = vsel %vm1831_vm2, %v26459_v55, %v26456_v57  ;;  %v2142_v62 = vrot.slane %v22990_v5, 3  ;;  %v2723_v22 = vrot.slane %v22818_v42, 4  ;;  %v19695_v46 = vld [vmem:[%s22620_s27 + $0x214] ss:$8 sps:$4 sm:$0xff]  }
 0x16f   : > { %v23007_v49 = vsel %vm2116_vm14, %v2122_v7, %v2133_v0  ;;  %v23010_v15 = vsel %vm2116_vm14, %v2137_v56, %v2147_v2  ;;  %v26457_v17 = vrot.slane %v22827_v59, 2  ;;  %v2725_v21 = vrot.slane %v22861_v16, 3 }
 0x170   : > { %1736 = vmatpush1.bf16.msra.mxu0 %v19672_v61  ;;  %v2726_v25 = vrot.slane %v22857_v58, 4  ;;  %v26455_v26 = vrot.slane %v22884_v39, 2  ;;  %v1255_v61 = vsel %vm1249_vm1, %v1253_v3, %v26461_v37  ;;  %v23023_v35 = vsel %vm2116_vm14, %v2133_v0, %v2142_v62 }
 0x171   : > { %1433 = vmatpush1.bf16.msra.mxu1 %v19675_v28  ;;  %1737 = vmatprep.subr.bf16.mxu0 %v19680_v36  ;;  %v19684_v28 = vld [vmem:[%s22620_s27 + $0x3f0] ss:$8 sps:$4 sm:$0xff]   ;;  %v2724_v31 = vor.u32 %v2723_v22, %v2722_v12  ;;  %v2715_v36 = vrot.slane %v22849_v11, 3  ;;  %v2718_v7 = vrot.slane %v22915_v45, 3  ;;  %v2734_v2 = vrot.slane %v22912_v63, 4 }
 0x172   : > { %1434 = vmatprep.subr.bf16.mxu1 %v19683_v1  ;;  %v2727_v41 = vor.u32 %v2726_v25, %v2725_v21  ;;  %v2716_v1 = vrot.slane %v22811_v48, 4  ;;  %v23048_v12 = vshrl.u32 %v22948_v20, 16  ;;  %v2746_v62 = vrot.slane %v22978_v50, 4  ;;  %v19693_v22 = vld [vmem:[%s22620_s27 + $0x210] ss:$8 sps:$4 sm:$0xff]  }
 0x173   : > { %v19698_v21 = vld [vmem:[%s22620_s27 + $0x3d4] ss:$8 sps:$4 sm:$0xff]   ;;  %v3324_v57 = vrot.slane %v22857_v58, 5 }
 0x174   : > { %1738 = vmatpush1.bf16.msra.mxu0 %v19678_v43  ;;  %977 = vmatmul.mubr.bf16.gmra.mxu1 %v754_v52  ;;  %v23033_v43 = vsel %vm1831_vm2, %v26457_v17, %v26455_v26  ;;  %v2733_v52 = vrot.slane %v22934_v10, 3  ;;  %v23042_v56 = vsel %vm2714_vm3, %v2724_v31, %v2727_v41  ;;  %v2717_v0 = vor.u32 %v2716_v1, %v2715_v36  ;;  %v19701_v31 = vld [vmem:[%s22620_s27 + $0x204] ss:$8 sps:$4 sm:$0xff]  }
 0x175   : > { %1435 = vmatpush1.bf16.msra.mxu1 %v19681_v51  ;;  %1458 = vmatprep.mubr.bf16.mxu1 %v1255_v61  ;;  %v2719_v51 = vrot.slane %v22842_v6, 4  ;;  %v19696_v61 = vld [vmem:[%s22620_s27 + $0x3d0] ss:$8 sps:$4 sm:$0xff]   ;;  %v2745_v1 = vrot.slane %v23048_v12, 3  ;;  %v2432_v17 = vrot.slane %v22884_v39, 3 }
 0x176   : > { %1739 = vmatprep.subr.bf16.mxu0 %v19686_v60  ;;  %1436 = vmatprep.subr.bf16.mxu1 %v19689_v27  ;;  %v2729_v60 = vrot.slane %v22945_v18, 3  ;;  %v2730_v27 = vrot.slane %v22905_v14, 4  ;;  %v2735_v25 = vor.u32 %v2734_v2, %v2733_v52  ;;  %v3320_v2 = vrot.slane %v22815_v34, 4 }
 0x177   : > { %v2720_v3 = vor.u32 %v2719_v51, %v2718_v7  ;;  %v26458_v7 = vrot.slane %v22844_v8, 3  ;;  %v2747_v52 = vor.u32 %v2746_v62, %v2745_v1  ;;  %v3323_v1 = vrot.slane %v22861_v16, 4 }
 0x178   : > { %1740 = vmatpush2.bf16.msra.mxu0 %v19684_v28  ;;  %v2731_v36 = vor.u32 %v2730_v27, %v2729_v60  ;;  %v19699_v60 = vld [vmem:[%s22620_s27 + $0x200] ss:$8 sps:$4 sm:$0xff]   ;;  %v26465_v27 = vrot.slane %v22827_v59, 3 }
 0x179   : > { %1437 = vmatpush1.bf16.msra.mxu1 %v19687_v29  ;;  %1741 = vmatprep.subr.bf16.mxu0 %v19692_v38  ;;  %v23056_v28 = vsel %vm2714_vm3, %v2717_v0, %v2720_v3  ;;  %v23061_v29 = vsel %vm2714_vm3, %v2727_v41, %v2735_v25  ;;  %v2434_v38 = vrot.slane %v22900_v53, 3  ;;  %v2740_v0 = vrot.slane %v22990_v5, 4  ;;  %v19704_v41 = vld [vmem:[%s22620_s27 + $0x3c4] ss:$8 sps:$4 sm:$0xff]  }
 0x17a   : > { %1438 = vmatprep.subr.bf16.mxu1 %v19695_v46  ;;  %26480 = vst [vmem:[#allocation12_spill] sm:$0xff] %v23061_v29  ;;  %v23065_v46 = vshrl.u32 %v22956_v30, 16  ;;  %v23068_v51 = vsel %vm2714_vm3, %v2720_v3, %v2731_v36  ;;  %v19707_v3 = vld [vmem:[%s22620_s27 + $0x2f4] ss:$8 sps:$4 sm:$0xff]   ;;  %v23083_v62 = vsel %vm2714_vm3, %v2735_v25, %v2747_v52  ;;  %v19705_v52 = vld [vmem:[%s22620_s27 + $0x2f0] ss:$8 sps:$4 sm:$0xff]   ;;  %v3325_v37 = vor.u32 %v3324_v57, %v3323_v1 }
 0x17b   : > { %26481 = vst [vmem:[#allocation13_spill] sm:$0xff] %v23068_v51  ;;  %v23078_v26 = vsel %vm2425_vm4, %v26458_v7, %v2434_v38  ;;  %26483 = vst [vmem:[#allocation15_spill] sm:$0xff] %v23083_v62  ;;  %v2436_v7 = vrot.slane %v22956_v30, 3  ;;  %v23097_v19 = vsel %vm2425_vm4, %v26465_v27, %v2432_v17  ;;  %v19716_v1 = vld [vmem:[%s22620_s27 + $0x3a4] ss:$8 sps:$4 sm:$0xff]   ;;  %v3340_v62 = vrot.slane %v22978_v50, 5 }
 0x17c   : > { %1742 = vmatpush2.bf16.msra.mxu0 %v19690_v44  ;;  %26482 = vst [vmem:[#allocation14_spill] sm:$0xff] %v23078_v26  ;;  %v19702_v44 = vld [vmem:[%s22620_s27 + $0x3c0] ss:$8 sps:$4 sm:$0xff]   ;;  %26484 = vst [vmem:[#allocation16_spill] sm:$0xff] %v23097_v19  ;;  %v19708_v26 = vld [vmem:[%s22620_s27 + $0x3b0] ss:$8 sps:$4 sm:$0xff]  }
 0x17d   : > { %1439 = vmatpush1.bf16.msra.mxu1 %v19693_v22  ;;  %1743 = vmatprep.subr.bf16.mxu0 %v19698_v21  ;;  %v2739_v22 = vrot.slane %v23065_v46, 3  ;;  %v3321_v21 = vrot.slane %v22818_v42, 5  ;;  %v23109_v57 = vsel %vm2425_vm4, %v2432_v17, %v2436_v7  ;;  %v3327_v17 = vrot.slane %v22945_v18, 4 }
 0x17e   : > { %1440 = vmatprep.subr.bf16.mxu1 %v19701_v31  ;;  %v2438_v31 = vrot.slane %v22948_v20, 3  ;;  %26487 = vst [vmem:[#allocation19_spill] sm:$0xff] %v23109_v57  ;;  %v3328_v7 = vrot.slane %v22905_v14, 5  ;;  %v26466_v51 = vrot.slane %v22844_v8, 4 }
 0x17f   : > { %v2741_v55 = vor.u32 %v2740_v0, %v2739_v22  ;;  %v3322_v25 = vor.u32 %v3321_v21, %v3320_v2  ;;  %v1535_v0 = vrot.slane %v22849_v11, 1  ;;  %v3317_v22 = vrot.slane %v22842_v6, 5  ;;  %v19711_v21 = vld [vmem:[%s22620_s27 + $0x2e0] ss:$8 sps:$4 sm:$0xff]  }
 0x180   : > { %1744 = vmatpush2.bf16.msra.mxu0 %v19696_v61  ;;  %v23100_v24 = vsel %vm2425_vm4, %v2434_v38, %v2438_v31  ;;  %v19713_v61 = vld [vmem:[%s22620_s27 + $0x2e4] ss:$8 sps:$4 sm:$0xff]   ;;  %v3314_v38 = vrot.slane %v22811_v48, 5  ;;  %v1536_v31 = vrot.slane %v22811_v48, 2 }
 0x181   : > { %1441 = vmatpush1.bf16.msra.mxu1 %v19699_v60  ;;  %1745 = vmatprep.subr.bf16.mxu0 %v19704_v41  ;;  %26485 = vst [vmem:[#allocation17_spill] sm:$0xff] %v23100_v24  ;;  %v23106_v2 = vsel %vm2714_vm3, %v2731_v36, %v2741_v55  ;;  %v3313_v60 = vrot.slane %v22849_v11, 4  ;;  %v23113_v41 = vsel %vm3312_vm6, %v3322_v25, %v3325_v37  ;;  %v3331_v55 = vrot.slane %v22934_v10, 4  ;;  %v19719_v24 = vld [vmem:[%s22620_s27 + $0x2d4] ss:$8 sps:$4 sm:$0xff]  }
 0x182   : > { %1442 = vmatprep.subr.bf16.mxu1 %v19707_v3  ;;  %26486 = vst [vmem:[#allocation18_spill] sm:$0xff] %v23106_v2  ;;  %26488 = vst [vmem:[#allocation20_spill] sm:$0xff] %v23113_v41  ;;  %v3316_v3 = vrot.slane %v22915_v45, 4  ;;  %v3332_v36 = vrot.slane %v22912_v63, 5  ;;  %v1538_v25 = vrot.slane %v22915_v45, 1  ;;  %v3329_v41 = vor.u32 %v3328_v7, %v3327_v17 }
 0x183   : > { %v3315_v27 = vor.u32 %v3314_v38, %v3313_v60  ;;  %v3339_v2 = vrot.slane %v23048_v12, 4  ;;  %v3917_v7 = vrot.slane %v22861_v16, 5 }
 0x184   : > { %1746 = vmatpush2.bf16.msra.mxu0 %v19702_v44  ;;  %v3318_v57 = vor.u32 %v3317_v22, %v3316_v3  ;;  %v19714_v44 = vld [vmem:[%s22620_s27 + $0x3a0] ss:$8 sps:$4 sm:$0xff]   ;;  %v3333_v19 = vor.u32 %v3332_v36, %v3331_v55  ;;  %v3335_v22 = vrot.slane %v23065_v46, 4  ;;  %v19722_v55 = vld [vmem:[%s22620_s27 + $0x394] ss:$8 sps:$4 sm:$0xff]   ;;  %v1537_v36 = vor.u32 %v1536_v31, %v1535_v0 }
 0x185   : > { %1443 = vmatpush2.bf16.msra.mxu1 %v19705_v52  ;;  %1747 = vmatprep.subr.bf16.mxu0 %v19710_v23  ;;  %v19717_v52 = vld [vmem:[%s22620_s27 + $0x2d0] ss:$8 sps:$4 sm:$0xff]   ;;  %v1539_v23 = vrot.slane %v22842_v6, 2  ;;  %v3341_v3 = vor.u32 %v3340_v62, %v3339_v2  ;;  %v3336_v62 = vrot.slane %v22990_v5, 5  ;;  %v3914_v0 = vrot.slane %v22815_v34, 5 }
 0x186   : > { %1444 = vmatprep.subr.bf16.mxu1 %v19713_v61  ;;  %v23134_v29 = vsel %vm3312_vm6, %v3315_v27, %v3318_v57  ;;  %v3032_v61 = vrot.slane %v22900_v53, 4  ;;  %v23138_v60 = vsel %vm3312_vm6, %v3325_v37, %v3333_v19  ;;  %v23141_v38 = vsel %vm3312_vm6, %v3318_v57, %v3329_v41  ;;  %v19720_v37 = vld [vmem:[%s22620_s27 + $0x390] ss:$8 sps:$4 sm:$0xff]   ;;  %v19723_v34 = vld [vmem:[%s22620_s27 + $0x2c0] ss:$8 sps:$4 sm:$0xff]  }
 0x187   : > { %v26467_v27 = vrot.slane %v22827_v59, 4  ;;  %v23154_v57 = vsel %vm3312_vm6, %v3333_v19, %v3341_v3  ;;  %v3915_v2 = vrot.slane %v22818_v42, 6  ;;  %v23163_v19 = vor.u32 %v1539_v23, %v1538_v25  ;;  %v19728_v42 = vld [vmem:[%s22620_s27 + $0x384] ss:$8 sps:$4 sm:$0xff]   ;;  %v19731_v23 = vld [vmem:[%s22620_s27 + $0x2b4] ss:$8 sps:$4 sm:$0xff]  }
 0x188   : > { %1748 = vmatpush2.bf16.msra.mxu0 %v19708_v26  ;;  %v23149_v17 = vsel %vm3023_vm5, %v26466_v51, %v3032_v61  ;;  %v19725_v26 = vld [vmem:[%s22620_s27 + $0x2c4] ss:$8 sps:$4 sm:$0xff]   ;;  %v3337_v31 = vor.u32 %v3336_v62, %v3335_v22  ;;  %v3034_v51 = vrot.slane %v22956_v30, 4  ;;  %v3907_v62 = vrot.slane %v22849_v11, 5 }
 0x189   : > { %1445 = vmatpush2.bf16.msra.mxu1 %v19711_v21  ;;  %1749 = vmatprep.subr.bf16.mxu0 %v19716_v1  ;;  %26489 = vst [vmem:[#allocation21_spill] sm:$0xff] %v23149_v17  ;;  %v3918_v21 = vrot.slane %v22857_v58, 6  ;;  %v3030_v1 = vrot.slane %v22884_v39, 4  ;;  %v3916_v3 = vor.u32 %v3915_v2, %v3914_v0  ;;  %v1553_v58 = vrot.slane %v22934_v10, 1 }
 0x18a   : > { %1446 = vmatprep.subr.bf16.mxu1 %v19719_v24  ;;  %v3036_v24 = vrot.slane %v22948_v20, 4  ;;  %v23181_v22 = vsel %vm3312_vm6, %v3329_v41, %v3337_v31  ;;  %v3911_v2 = vrot.slane %v22842_v6, 6  ;;  %v1541_v41 = vsel %vm1534_vm13, %v1537_v36, %v23163_v19  ;;  %v19732_v36 = vld [vmem:[%s22620_s27 + $0x570] ss:$8 sps:$4 sm:$0xff]  }
 0x18b   : > { %v3919_v16 = vor.u32 %v3918_v21, %v3917_v7  ;;  %v23172_v17 = vsel %vm3023_vm5, %v26467_v27, %v3030_v1  ;;  %v3926_v7 = vrot.slane %v22912_v63, 6  ;;  %v3921_v11 = vrot.slane %v22945_v18, 5  ;;  %v19740_v27 = vld [vmem:[%s22620_s27 + $0x564] ss:$8 sps:$4 sm:$0xff]  }
 0x18c   : > { %1750 = vmatpush2.bf16.msra.mxu0 %v19714_v44  ;;  %v23175_v25 = vsel %vm3023_vm5, %v3032_v61, %v3036_v24  ;;  %v19726_v44 = vld [vmem:[%s22620_s27 + $0x380] ss:$8 sps:$4 sm:$0xff]   ;;  %v3908_v61 = vrot.slane %v22811_v48, 6  ;;  %v19729_v48 = vld [vmem:[%s22620_s27 + $0x2b0] ss:$8 sps:$4 sm:$0xff]   ;;  %v1549_v21 = vrot.slane %v22945_v18, 1 }
 0x18d   : > { %1447 = vmatpush2.bf16.msra.mxu1 %v19717_v52  ;;  %1751 = vmatprep.subr.bf16.mxu0 %v19722_v55  ;;  %v1554_v52 = vrot.slane %v22912_v63, 2  ;;  %v23184_v55 = vsel %vm3023_vm5, %v3030_v1, %v3034_v51  ;;  %v23188_v0 = vsel %vm3906_vm8, %v3916_v3, %v3919_v16  ;;  %v3925_v51 = vrot.slane %v22934_v10, 5  ;;  %v19737_v10 = vld [vmem:[%s22620_s27 + $0x2a4] ss:$8 sps:$4 sm:$0xff]  }
 0x18e   : > { %1448 = vmatprep.subr.bf16.mxu1 %v19725_v26  ;;  %26490 = vst [vmem:[#allocation22_spill] sm:$0xff] %v23184_v55  ;;  %v3910_v26 = vrot.slane %v22915_v45, 5  ;;  %v19734_v45 = vld [vmem:[%s22620_s27 + $0x574] ss:$8 sps:$4 sm:$0xff]   ;;  %v1550_v6 = vrot.slane %v22905_v14, 2  ;;  %v3922_v63 = vrot.slane %v22905_v14, 6 }
 0x18f   : > { %v3927_v24 = vor.u32 %v3926_v7, %v3925_v51  ;;  %v3933_v31 = vrot.slane %v23048_v12, 5  ;;  %v3934_v3 = vrot.slane %v22978_v50, 6  ;;  %v3622_v18 = vrot.slane %v22844_v8, 5 }
 0x190   : > { %1752 = vmatpush2.bf16.msra.mxu0 %v19720_v37  ;;  %v3909_v37 = vor.u32 %v3908_v61, %v3907_v62  ;;  %v3912_v1 = vor.u32 %v3911_v2, %v3910_v26  ;;  %v3626_v62 = vrot.slane %v22900_v53, 5  ;;  %v3923_v14 = vor.u32 %v3922_v63, %v3921_v11 }
 0x191   : > { %1449 = vmatpush2.bf16.msra.mxu1 %v19723_v34  ;;  %1753 = vmatprep.subr.bf16.mxu0 %v19728_v42  ;;  %v19735_v34 = vld [vmem:[%s22620_s27 + $0x2a0] ss:$8 sps:$4 sm:$0xff]   ;;  %v1555_v42 = vor.u32 %v1554_v52, %v1553_v58  ;;  %v23216_v61 = vsel %vm3906_vm8, %v3919_v16, %v3927_v24  ;;  %v3935_v12 = vor.u32 %v3934_v3, %v3933_v31  ;;  %v3929_v50 = vrot.slane %v23065_v46, 5  ;;  %v19744_v31 = vld [vmem:[%s22620_s27 + $0x550] ss:$8 sps:$4 sm:$0xff]  }
 0x192   : > { %1450 = vmatprep.subr.bf16.mxu1 %v19731_v23  ;;  %v23211_v55 = vsel %vm3906_vm8, %v3909_v37, %v3912_v1  ;;  %v19743_v23 = vld [vmem:[%s22620_s27 + $0x294] ss:$8 sps:$4 sm:$0xff]   ;;  %v3619_v58 = vrot.slane %v22827_v59, 5  ;;  %v23223_v52 = vsel %vm3617_vm9, %v3622_v18, %v3626_v62  ;;  %v3624_v16 = vrot.slane %v22884_v39, 5 }
 0x193   : > { %v23228_v26 = vsel %vm3906_vm8, %v3912_v1, %v3923_v14  ;;  %v23231_v46 = vsel %vm3906_vm8, %v3927_v24, %v3935_v12  ;;  %v3630_v2 = vrot.slane %v22948_v20, 5  ;;  %v3628_v51 = vrot.slane %v22956_v30, 5  ;;  %v19749_v1 = vld [vmem:[%s22620_s27 + $0x284] ss:$8 sps:$4 sm:$0xff]  }
 0x194   : > { %1754 = vmatpush2.bf16.msra.mxu0 %v19726_v44  ;;  %v3930_v44 = vrot.slane %v22990_v5, 6  ;;  %v1556_v7 = vsel %vm1534_vm13, %v22896_v47, %v1555_v42  ;;  %v19738_v5 = vld [vmem:[%s22620_s27 + $0x560] ss:$8 sps:$4 sm:$0xff]   ;;  %v19746_v47 = vld [vmem:[%s22620_s27 + $0x554] ss:$8 sps:$4 sm:$0xff]   ;;  %v4213_v24 = vrot.slane %v22827_v59, 6  ;;  %v1551_v63 = vor.u32 %v1550_v6, %v1549_v21 }
 0x195   : > { %1451 = vmatpush2.bf16.msra.mxu1 %v19729_v48  ;;  %2315 = vmatprep.subr.bf16.mxu0 %v19734_v45  ;;  %v23241_v48 = vsel %vm3617_vm9, %v3619_v58, %v3624_v16  ;;  %v19741_v45 = vld [vmem:[%s22620_s27 + $0x290] ss:$8 sps:$4 sm:$0xff]   ;;  %v23245_v37 = vsel %vm3617_vm9, %v3626_v62, %v3630_v2  ;;  %v4220_v3 = vrot.slane %v22900_v53, 6  ;;  %v4218_v62 = vrot.slane %v22884_v39, 6  ;;  %v19752_v12 = vld [vmem:[%s22620_s27 + $0x544] ss:$8 sps:$4 sm:$0xff]  }
 0x196   : > { %1452 = vmatprep.subr.bf16.mxu1 %v19737_v10  ;;  %v3931_v11 = vor.u32 %v3930_v44, %v3929_v50  ;;  %v19755_v50 = vld [vmem:[%s22620_s27 + $0x474] ss:$8 sps:$4 sm:$0xff]   ;;  %v1552_v6 = vsel %vm1534_vm13, %v23163_v19, %v1551_v63  ;;  %v19750_v44 = vld [vmem:[%s22620_s27 + $0x540] ss:$8 sps:$4 sm:$0xff]   ;;  %v1258_v2 = vrot.slane %v22900_v53, 1 }
 0x197   : > { %1756 = vmatmul.mubr.bf16.vlgmr.msra.gmra.mxu0 %v1541_v41  ;;  %v23248_v41 = vsel %vm3617_vm9, %v3624_v16, %v3628_v51  ;;  %v23273_v21 = vsel %vm4211_vm10, %v4213_v24, %v4218_v62  ;;  %v19753_v16 = vld [vmem:[%s22620_s27 + $0x470] ss:$8 sps:$4 sm:$0xff]   ;;  %v1250_v51 = vrot.slane %v22799_v32, 1 }
 0x198   : > { %1765 = vmatprep.mubr.bf16.mxu0 %v1556_v7  ;;  %2316 = vmatpush1.bf16.msra.mxu0 %v19732_v36  ;;  %v23253_v10 = vsel %vm3906_vm8, %v3923_v14, %v3931_v11  ;;  %v4216_v36 = vrot.slane %v22844_v8, 6  ;;  %v4222_v14 = vrot.slane %v22956_v30, 6  ;;  %v19758_v7 = vld [vmem:[%s22620_s27 + $0x534] ss:$8 sps:$4 sm:$0xff]   ;;  %v19756_v19 = vld [vmem:[%s22620_s27 + $0x530] ss:$8 sps:$4 sm:$0xff]  }
 0x199   : > { %1453 = vmatpush2.bf16.msra.mxu1 %v19735_v34  ;;  %2317 = vmatprep.subr.bf16.mxu0 %v19740_v27  ;;  %v4224_v27 = vrot.slane %v22948_v20, 6  ;;  %v19747_v34 = vld [vmem:[%s22620_s27 + $0x280] ss:$8 sps:$4 sm:$0xff]   ;;  %v26491_v11 = vrot.slane %v22827_v59, 1 }
 0x19a   : > { %1454 = vmatprep.subr.bf16.mxu1 %v19743_v23  ;;  %v23268_v23 = vsel %vm4211_vm10, %v4216_v36, %v4220_v3  ;;  %v23279_v30 = vsel %vm4211_vm10, %v4218_v62, %v4222_v14  ;;  %v19762_v62 = vld [vmem:[%s22620_s27 + $0x520] ss:$8 sps:$4 sm:$0xff]   ;;  %v19768_v14 = vld [vmem:[%s22620_s27 + $0x510] ss:$8 sps:$4 sm:$0xff]  }
 0x19b   : > { %v23276_v20 = vsel %vm4211_vm10, %v4220_v3, %v4224_v27  ;;  %v19767_v3 = vld [vmem:[%s22620_s27 + $0x454] ss:$8 sps:$4 sm:$0xff]   ;;  %v19765_v27 = vld [vmem:[%s22620_s27 + $0x450] ss:$8 sps:$4 sm:$0xff]  }
 0x19c   : > { %2318 = vmatpush1.bf16.msra.mxu0 %v19738_v5  ;;  %v19761_v5 = vld [vmem:[%s22620_s27 + $0x464] ss:$8 sps:$4 sm:$0xff]  }
 0x19d   : > { %1455 = vmatpush2.bf16.msra.mxu1 %v19741_v45  ;;  %2319 = vmatprep.subr.bf16.mxu0 %v19746_v47  ;;  %v19759_v45 = vld [vmem:[%s22620_s27 + $0x460] ss:$8 sps:$4 sm:$0xff]   ;;  %v26492_v47 = vrot.slane %v22844_v8, 1 }
 0x19e   : > { %1456 = vmatprep.subr.bf16.mxu1 %v19749_v1 }
 0x19f   : > { %1766 = vmatmul.mubr.bf16.gmra.mxu0 %v1552_v6  ;;  %v1259_v1 = vsel %vm1249_vm1, %v26492_v47, %v1258_v2  ;;  %v19779_v6 = vld [vmem:[%s22620_s27 + $0x434] ss:$8 sps:$4 sm:$0xff]   ;;  %v19786_v47 = vld [vmem:[%s22620_s27 + $0x5e0] ss:$8 sps:$4 sm:$0xff]  }
 0x1a0   : > { %1775 = vmatprep.mubr.bf16.mxu0 %v1555_v42  ;;  %2320 = vmatpush1.bf16.msra.mxu0 %v19744_v31  ;;  %v1252_v42 = vsel %vm1249_vm1, %v1250_v51, %v26491_v11  ;;  %v19764_v31 = vld [vmem:[%s22620_s27 + $0x524] ss:$8 sps:$4 sm:$0xff]  }
 0x1a1   : > { %1457 = vmatpush2.bf16.msra.mxu1 %v19747_v34  ;;  %2321 = vmatprep.subr.bf16.mxu0 %v19752_v12  ;;  %v19770_v34 = vld [vmem:[%s22620_s27 + $0x514] ss:$8 sps:$4 sm:$0xff]   ;;  %v19773_v12 = vld [vmem:[%s22620_s27 + $0x444] ss:$8 sps:$4 sm:$0xff]  }
 0x1a2   : > { %2008 = vmatprep.subr.bf16.mxu1 %v19755_v50  ;;  %v19771_v50 = vld [vmem:[%s22620_s27 + $0x440] ss:$8 sps:$4 sm:$0xff]   ;;  %v19785_v51 = vld [vmem:[%s22620_s27 + $0x424] ss:$8 sps:$4 sm:$0xff]  }
 0x1a4   : > { %1459 = vmatmul.mubr.bf16.vlgmr.msra.gmra.mxu1 %v1252_v42  ;;  %2322 = vmatpush1.bf16.msra.mxu0 %v19750_v44  ;;  %v19777_v44 = vld [vmem:[%s22620_s27 + $0x430] ss:$8 sps:$4 sm:$0xff]   ;;  %v19788_v42 = vld [vmem:[%s22620_s27 + $0x5e4] ss:$8 sps:$4 sm:$0xff]  }
 0x1a5   : > { %1468 = vmatprep.mubr.bf16.mxu1 %v1259_v1  ;;  %2009 = vmatpush1.bf16.msra.mxu1 %v19753_v16  ;;  %v19782_v16 = vld [vmem:[%s22620_s27 + $0x5f4] ss:$8 sps:$4 sm:$0xff]   ;;  %v19789_v1 = vld [vmem:[%s22620_s27 + $0x410] ss:$8 sps:$4 sm:$0xff]  }
 0x1a6   : > { %2323 = vmatprep.subr.bf16.mxu0 %v19758_v7  ;;  %2010 = vmatprep.subr.bf16.mxu1 %v19761_v5  ;;  %v19783_v7 = vld [vmem:[%s22620_s27 + $0x420] ss:$8 sps:$4 sm:$0xff]   ;;  %v26493_v5 = vrot.slane %v22884_v39, 1 }
 0x1a7   : > { %1776 = vmatmul.mubr.bf16.gmra.mxu0 %v1551_v63  ;;  %v19776_v63 = vld [vmem:[%s22620_s27 + $0x504] ss:$8 sps:$4 sm:$0xff]  }
 0x1a8   : > { %2324 = vmatpush1.bf16.msra.mxu0 %v19756_v19  ;;  %2347 = vmatprep.mubr.bf16.mxu0 %v22928_v4  ;;  %v19774_v4 = vld [vmem:[%s22620_s27 + $0x500] ss:$8 sps:$4 sm:$0xff]   ;;  %v26494_v19 = vrot.slane %v22844_v8, 2 }
 0x1a9   : > { %2011 = vmatpush1.bf16.msra.mxu1 %v19759_v45  ;;  %2325 = vmatprep.subr.bf16.mxu0 %v19764_v31  ;;  %v19791_v45 = vld [vmem:[%s22620_s27 + $0x414] ss:$8 sps:$4 sm:$0xff]  }
 0x1aa   : > { %2012 = vmatprep.subr.bf16.mxu1 %v19767_v3  ;;  %v19794_v31 = vld [vmem:[%s22620_s27 + $0x5d4] ss:$8 sps:$4 sm:$0xff]   ;;  %v19797_v3 = vld [vmem:[%s22620_s27 + $0x404] ss:$8 sps:$4 sm:$0xff]  }
 0x1ac   : > { %1469 = vmatmul.mubr.bf16.gmra.mxu1 %v22965_v33  ;;  %2326 = vmatpush1.bf16.msra.mxu0 %v19762_v62  ;;  %v1835_v33 = vrot.slane %v22806_v40, 2  ;;  %v19792_v62 = vld [vmem:[%s22620_s27 + $0x5d0] ss:$8 sps:$4 sm:$0xff]  }
 0x1ad   : > { %1478 = vmatprep.mubr.bf16.mxu1 %v1258_v2  ;;  %2013 = vmatpush1.bf16.msra.mxu1 %v19765_v27  ;;  %v19780_v2 = vld [vmem:[%s22620_s27 + $0x5f0] ss:$8 sps:$4 sm:$0xff]   ;;  %v19795_v27 = vld [vmem:[%s22620_s27 + $0x400] ss:$8 sps:$4 sm:$0xff]  }
 0x1ae   : > { %2327 = vmatprep.subr.bf16.mxu0 %v19770_v34  ;;  %2014 = vmatprep.subr.bf16.mxu1 %v19773_v12  ;;  %v1837_v11 = vsel %vm1831_vm2, %v1835_v33, %v26494_v19  ;;  %v19800_v34 = vld [vmem:[%s22620_s27 + $0x5c4] ss:$8 sps:$4 sm:$0xff]   ;;  %v19798_v12 = vld [vmem:[%s22620_s27 + $0x5c0] ss:$8 sps:$4 sm:$0xff]   ;;  %v19815_v33 = vld [vmem:[%s22620_s27 + $0x4d4] ss:$8 sps:$4 sm:$0xff]  }
 0x1af   : > { %v19821_v19 = vld [vmem:[%s22620_s27 + $0x4c4] ss:$8 sps:$4 sm:$0xff]  }
 0x1b0   : > { %2328 = vmatpush1.bf16.msra.mxu0 %v19768_v14  ;;  %v19803_v14 = vld [vmem:[%s22620_s27 + $0x4f4] ss:$8 sps:$4 sm:$0xff]  }
 0x1b1   : > { %2015 = vmatpush1.bf16.msra.mxu1 %v19771_v50  ;;  %2329 = vmatprep.subr.bf16.mxu0 %v19776_v63  ;;  %v19801_v50 = vld [vmem:[%s22620_s27 + $0x4f0] ss:$8 sps:$4 sm:$0xff]   ;;  %v19806_v63 = vld [vmem:[%s22620_s27 + $0x5b4] ss:$8 sps:$4 sm:$0xff]  }
 0x1b2   : > { %2016 = vmatprep.subr.bf16.mxu1 %v19779_v6  ;;  %v19804_v6 = vld [vmem:[%s22620_s27 + $0x5b0] ss:$8 sps:$4 sm:$0xff]  }
 0x1b4   : > { %1479 = vmatmul.mubr.bf16.gmra.mxu1 %v26493_v5  ;;  %2330 = vmatpush1.bf16.msra.mxu0 %v19774_v4  ;;  %v19809_v4 = vld [vmem:[%s22620_s27 + $0x4e4] ss:$8 sps:$4 sm:$0xff]   ;;  %v19816_v5 = vld [vmem:[%s22620_s27 + $0x590] ss:$8 sps:$4 sm:$0xff]  }
 0x1b5   : > { %2017 = vmatpush1.bf16.msra.mxu1 %v19777_v44  ;;  %2040 = vmatprep.mubr.bf16.mxu1 %v1837_v11  ;;  %v19807_v44 = vld [vmem:[%s22620_s27 + $0x4e0] ss:$8 sps:$4 sm:$0xff]  }
 0x1b6   : > { %2331 = vmatprep.subr.bf16.mxu0 %v19782_v16  ;;  %2018 = vmatprep.subr.bf16.mxu1 %v19785_v51  ;;  %v19812_v16 = vld [vmem:[%s22620_s27 + $0x5a4] ss:$8 sps:$4 sm:$0xff]   ;;  %v19810_v51 = vld [vmem:[%s22620_s27 + $0x5a0] ss:$8 sps:$4 sm:$0xff]  }
 0x1b7   : > { %v19819_v11 = vld [vmem:[%s22620_s27 + $0x4c0] ss:$8 sps:$4 sm:$0xff]  }
 0x1b8   : > { %2332 = vmatpush2.bf16.msra.mxu0 %v19780_v2  ;;  %v19813_v2 = vld [vmem:[%s22620_s27 + $0x4d0] ss:$8 sps:$4 sm:$0xff]  }
 0x1b9   : > { %2019 = vmatpush1.bf16.msra.mxu1 %v19783_v7  ;;  %2333 = vmatprep.subr.bf16.mxu0 %v19788_v42  ;;  %v19818_v7 = vld [vmem:[%s22620_s27 + $0x594] ss:$8 sps:$4 sm:$0xff]   ;;  %v19824_v42 = vld [vmem:[%s22620_s27 + $0x584] ss:$8 sps:$4 sm:$0xff]  }
 0x1ba   : > { %2020 = vmatprep.subr.bf16.mxu1 %v19791_v45  ;;  %v19822_v45 = vld [vmem:[%s22620_s27 + $0x580] ss:$8 sps:$4 sm:$0xff]  }
 0x1bc   : > { %2334 = vmatpush2.bf16.msra.mxu0 %v19786_v47  ;;  %v19827_v47 = vld [vmem:[%s22620_s27 + $0x4b4] ss:$8 sps:$4 sm:$0xff]  }
 0x1bd   : > { %2021 = vmatpush1.bf16.msra.mxu1 %v19789_v1  ;;  %2335 = vmatprep.subr.bf16.mxu0 %v19794_v31  ;;  %v19825_v1 = vld [vmem:[%s22620_s27 + $0x4b0] ss:$8 sps:$4 sm:$0xff]   ;;  %v19830_v31 = vld [vmem:[%s22620_s27 + $0x774] ss:$8 sps:$4 sm:$0xff]  }
 0x1be   : > { %2022 = vmatprep.subr.bf16.mxu1 %v19797_v3  ;;  %v19828_v3 = vld [vmem:[%s22620_s27 + $0x770] ss:$8 sps:$4 sm:$0xff]  }
 0x1c0   : > { %2336 = vmatpush2.bf16.msra.mxu0 %v19792_v62  ;;  %v19833_v62 = vld [vmem:[%s22620_s27 + $0x4a4] ss:$8 sps:$4 sm:$0xff]  }
 0x1c1   : > { %2023 = vmatpush1.bf16.msra.mxu1 %v19795_v27  ;;  %2337 = vmatprep.subr.bf16.mxu0 %v19800_v34  ;;  %v19831_v27 = vld [vmem:[%s22620_s27 + $0x4a0] ss:$8 sps:$4 sm:$0xff]   ;;  %v19836_v34 = vld [vmem:[%s22620_s27 + $0x764] ss:$8 sps:$4 sm:$0xff]  }
 0x1c2   : > { %2024 = vmatprep.subr.bf16.mxu1 %v19803_v14  ;;  %v19834_v14 = vld [vmem:[%s22620_s27 + $0x760] ss:$8 sps:$4 sm:$0xff]  }
 0x1c4   : > { %2338 = vmatpush2.bf16.msra.mxu0 %v19798_v12  ;;  %v19839_v12 = vld [vmem:[%s22620_s27 + $0x494] ss:$8 sps:$4 sm:$0xff]  }
 0x1c5   : > { %2025 = vmatpush2.bf16.msra.mxu1 %v19801_v50  ;;  %2339 = vmatprep.subr.bf16.mxu0 %v19806_v63  ;;  %v19837_v50 = vld [vmem:[%s22620_s27 + $0x490] ss:$8 sps:$4 sm:$0xff]   ;;  %v19842_v63 = vld [vmem:[%s22620_s27 + $0x754] ss:$8 sps:$4 sm:$0xff]  }
 0x1c6   : > { %2026 = vmatprep.subr.bf16.mxu1 %v19809_v4  ;;  %v19840_v4 = vld [vmem:[%s22620_s27 + $0x750] ss:$8 sps:$4 sm:$0xff]  }
 0x1c8   : > { %2340 = vmatpush2.bf16.msra.mxu0 %v19804_v6  ;;  %v19845_v6 = vld [vmem:[%s22620_s27 + $0x484] ss:$8 sps:$4 sm:$0xff]  }
 0x1c9   : > { %2027 = vmatpush2.bf16.msra.mxu1 %v19807_v44  ;;  %2341 = vmatprep.subr.bf16.mxu0 %v19812_v16  ;;  %v19843_v44 = vld [vmem:[%s22620_s27 + $0x480] ss:$8 sps:$4 sm:$0xff]   ;;  %v19848_v16 = vld [vmem:[%s22620_s27 + $0x744] ss:$8 sps:$4 sm:$0xff]  }
 0x1ca   : > { %2028 = vmatprep.subr.bf16.mxu1 %v19815_v33  ;;  %v19854_v33 = vld [vmem:[%s22620_s27 + $0x734] ss:$8 sps:$4 sm:$0xff]  }
 0x1cc   : > { %2342 = vmatpush2.bf16.msra.mxu0 %v19810_v51  ;;  %v19851_v51 = vld [vmem:[%s22620_s27 + $0x674] ss:$8 sps:$4 sm:$0xff]  }
 0x1cd   : > { %2029 = vmatpush2.bf16.msra.mxu1 %v19813_v2  ;;  %2343 = vmatprep.subr.bf16.mxu0 %v19818_v7  ;;  %v19857_v2 = vld [vmem:[%s22620_s27 + $0x664] ss:$8 sps:$4 sm:$0xff]   ;;  %v1832_v7 = vrot.slane %v22799_v32, 2 }
 0x1ce   : > { %2030 = vmatprep.subr.bf16.mxu1 %v19821_v19  ;;  %v19852_v19 = vld [vmem:[%s22620_s27 + $0x730] ss:$8 sps:$4 sm:$0xff]  }
 0x1d0   : > { %2344 = vmatpush2.bf16.msra.mxu0 %v19816_v5  ;;  %v26495_v5 = vrot.slane %v22827_v59, 2 }
 0x1d1   : > { %2031 = vmatpush2.bf16.msra.mxu1 %v19819_v11  ;;  %2345 = vmatprep.subr.bf16.mxu0 %v19824_v42  ;;  %v19855_v11 = vld [vmem:[%s22620_s27 + $0x660] ss:$8 sps:$4 sm:$0xff]   ;;  %v19863_v42 = vld [vmem:[%s22620_s27 + $0x654] ss:$8 sps:$4 sm:$0xff]  }
 0x1d2   : > { %2032 = vmatprep.subr.bf16.mxu1 %v19827_v47  ;;  %v19861_v47 = vld [vmem:[%s22620_s27 + $0x650] ss:$8 sps:$4 sm:$0xff]  }
 0x1d4   : > { %2346 = vmatpush2.bf16.msra.mxu0 %v19822_v45  ;;  %v19858_v45 = vld [vmem:[%s22620_s27 + $0x720] ss:$8 sps:$4 sm:$0xff]  }
 0x1d5   : > { %2033 = vmatpush2.bf16.msra.mxu1 %v19825_v1  ;;  %2915 = vmatprep.subr.bf16.mxu0 %v19830_v31  ;;  %v19869_v1 = vld [vmem:[%s22620_s27 + $0x644] ss:$8 sps:$4 sm:$0xff]   ;;  %v19864_v31 = vld [vmem:[%s22620_s27 + $0x710] ss:$8 sps:$4 sm:$0xff]  }
 0x1d6   : > { %2034 = vmatprep.subr.bf16.mxu1 %v19833_v62  ;;  %v19875_v62 = vld [vmem:[%s22620_s27 + $0x634] ss:$8 sps:$4 sm:$0xff]  }
 0x1d7   : > { %2348 = vmatmul.mubr.bf16.vlgmr.msra.gmra.mxu0 %v22986_v54  ;;  %v19846_v54 = vld [vmem:[%s22620_s27 + $0x740] ss:$8 sps:$4 sm:$0xff]  }
 0x1d8   : > { %2357 = vmatprep.mubr.bf16.mxu0 %v22996_v9  ;;  %2916 = vmatpush1.bf16.msra.mxu0 %v19828_v3  ;;  %v19849_v9 = vld [vmem:[%s22620_s27 + $0x670] ss:$8 sps:$4 sm:$0xff]   ;;  %v19867_v3 = vld [vmem:[%s22620_s27 + $0x640] ss:$8 sps:$4 sm:$0xff]  }
 0x1d9   : > { %2035 = vmatpush2.bf16.msra.mxu1 %v19831_v27  ;;  %2917 = vmatprep.subr.bf16.mxu0 %v19836_v34  ;;  %v19870_v27 = vld [vmem:[%s22620_s27 + $0x700] ss:$8 sps:$4 sm:$0xff]   ;;  %v19873_v34 = vld [vmem:[%s22620_s27 + $0x630] ss:$8 sps:$4 sm:$0xff]  }
 0x1da   : > { %2036 = vmatprep.subr.bf16.mxu1 %v19839_v12  ;;  %v19881_v12 = vld [vmem:[%s22620_s27 + $0x624] ss:$8 sps:$4 sm:$0xff]  }
 0x1dc   : > { %2918 = vmatpush1.bf16.msra.mxu0 %v19834_v14  ;;  %v19876_v14 = vld [vmem:[%s22620_s27 + $0x7f0] ss:$8 sps:$4 sm:$0xff]  }
 0x1dd   : > { %2037 = vmatpush2.bf16.msra.mxu1 %v19837_v50  ;;  %2919 = vmatprep.subr.bf16.mxu0 %v19842_v63  ;;  %v19879_v50 = vld [vmem:[%s22620_s27 + $0x620] ss:$8 sps:$4 sm:$0xff]   ;;  %v26497_v63 = vrot.slane %v22884_v39, 2  ;;  %v19885_v39 = vld [vmem:[%s22620_s27 + $0x610] ss:$8 sps:$4 sm:$0xff]  }
 0x1de   : > { %2038 = vmatprep.subr.bf16.mxu1 %v19845_v6  ;;  %v26498_v6 = vrot.slane %v22844_v8, 3 }
 0x1df   : > { %2358 = vmatmul.mubr.bf16.gmra.mxu0 %v23007_v49  ;;  %v1834_v49 = vsel %vm1831_vm2, %v1832_v7, %v26495_v5  ;;  %v19896_v7 = vld [vmem:[%s22620_s27 + $0x7c4] ss:$8 sps:$4 sm:$0xff]   ;;  %v19894_v5 = vld [vmem:[%s22620_s27 + $0x7c0] ss:$8 sps:$4 sm:$0xff]  }
 0x1e0   : > { %2367 = vmatprep.mubr.bf16.mxu0 %v23010_v15  ;;  %2920 = vmatpush1.bf16.msra.mxu0 %v19840_v4  ;;  %v19860_v15 = vld [vmem:[%s22620_s27 + $0x724] ss:$8 sps:$4 sm:$0xff]  }
 0x1e1   : > { %2039 = vmatpush2.bf16.msra.mxu1 %v19843_v44  ;;  %2921 = vmatprep.subr.bf16.mxu0 %v19848_v16  ;;  %v19884_v44 = vld [vmem:[%s22620_s27 + $0x7e4] ss:$8 sps:$4 sm:$0xff]   ;;  %v19887_v16 = vld [vmem:[%s22620_s27 + $0x614] ss:$8 sps:$4 sm:$0xff]  }
 0x1e2   : > { %2606 = vmatprep.subr.bf16.mxu1 %v19851_v51  ;;  %v19882_v51 = vld [vmem:[%s22620_s27 + $0x7e0] ss:$8 sps:$4 sm:$0xff]  }
 0x1e4   : > { %2041 = vmatmul.mubr.bf16.vlgmr.msra.gmra.mxu1 %v1834_v49  ;;  %2922 = vmatpush1.bf16.msra.mxu0 %v19846_v54  ;;  %v19890_v54 = vld [vmem:[%s22620_s27 + $0x7d4] ss:$8 sps:$4 sm:$0xff]  }
 0x1e5   : > { %2050 = vmatprep.mubr.bf16.mxu1 %v23003_v13  ;;  %2607 = vmatpush1.bf16.msra.mxu1 %v19849_v9  ;;  %v19866_v13 = vld [vmem:[%s22620_s27 + $0x714] ss:$8 sps:$4 sm:$0xff]   ;;  %v19893_v9 = vld [vmem:[%s22620_s27 + $0x604] ss:$8 sps:$4 sm:$0xff]  }
 0x1e6   : > { %2923 = vmatprep.subr.bf16.mxu0 %v19854_v33  ;;  %2608 = vmatprep.subr.bf16.mxu1 %v19857_v2  ;;  %v19888_v33 = vld [vmem:[%s22620_s27 + $0x7d0] ss:$8 sps:$4 sm:$0xff]   ;;  %v19891_v2 = vld [vmem:[%s22620_s27 + $0x600] ss:$8 sps:$4 sm:$0xff]   ;;  %v19899_v49 = vld [vmem:[%s22620_s27 + $0x6f4] ss:$8 sps:$4 sm:$0xff]  }
 0x1e7   : > { %2368 = vmatmul.mubr.bf16.gmra.mxu0 %v23023_v35  ;;  %v26496_v35 = vrot.slane %v22900_v53, 2  ;;  %v2429_v53 = vrot.slane %v22806_v40, 3 }
 0x1e8   : > { %2924 = vmatpush1.bf16.msra.mxu0 %v19852_v19  ;;  %2947 = vmatprep.mubr.bf16.mxu0 %v23042_v56  ;;  %v19872_v56 = vld [vmem:[%s22620_s27 + $0x704] ss:$8 sps:$4 sm:$0xff]   ;;  %v19897_v19 = vld [vmem:[%s22620_s27 + $0x6f0] ss:$8 sps:$4 sm:$0xff]  }
 0x1e9   : > { %2609 = vmatpush1.bf16.msra.mxu1 %v19855_v11  ;;  %2925 = vmatprep.subr.bf16.mxu0 %v19860_v15  ;;  %v2431_v4 = vsel %vm2425_vm4, %v2429_v53, %v26498_v6  ;;  %v19902_v11 = vld [vmem:[%s22620_s27 + $0x7b4] ss:$8 sps:$4 sm:$0xff]   ;;  %v19900_v15 = vld [vmem:[%s22620_s27 + $0x7b0] ss:$8 sps:$4 sm:$0xff]   ;;  %v19932_v6 = vld [vmem:[%s22620_s27 + $0x964] ss:$8 sps:$4 sm:$0xff]  }
 0x1ea   : > { %2610 = vmatprep.subr.bf16.mxu1 %v19863_v42  ;;  %v19905_v42 = vld [vmem:[%s22620_s27 + $0x6e4] ss:$8 sps:$4 sm:$0xff]   ;;  %v19926_v53 = vld [vmem:[%s22620_s27 + $0x974] ss:$8 sps:$4 sm:$0xff]  }
 0x1ec   : > { %2051 = vmatmul.mubr.bf16.gmra.mxu1 %v23033_v43  ;;  %2926 = vmatpush1.bf16.msra.mxu0 %v19858_v45  ;;  %v19878_v43 = vld [vmem:[%s22620_s27 + $0x7f4] ss:$8 sps:$4 sm:$0xff]   ;;  %v19903_v45 = vld [vmem:[%s22620_s27 + $0x6e0] ss:$8 sps:$4 sm:$0xff]  }
 0x1ed   : > { %2060 = vmatprep.mubr.bf16.mxu1 %v26496_v35  ;;  %2611 = vmatpush1.bf16.msra.mxu1 %v19861_v47  ;;  %v19908_v47 = vld [vmem:[%s22620_s27 + $0x7a4] ss:$8 sps:$4 sm:$0xff]   ;;  %v19912_v35 = vld [vmem:[%s22620_s27 + $0x790] ss:$8 sps:$4 sm:$0xff]  }
 0x1ee   : > { %2927 = vmatprep.subr.bf16.mxu0 %v19866_v13  ;;  %2612 = vmatprep.subr.bf16.mxu1 %v19869_v1  ;;  %v19906_v13 = vld [vmem:[%s22620_s27 + $0x7a0] ss:$8 sps:$4 sm:$0xff]   ;;  %v19911_v1 = vld [vmem:[%s22620_s27 + $0x6d4] ss:$8 sps:$4 sm:$0xff]  }
 0x1f0   : > { %2928 = vmatpush1.bf16.msra.mxu0 %v19864_v31  ;;  %v19909_v31 = vld [vmem:[%s22620_s27 + $0x6d0] ss:$8 sps:$4 sm:$0xff]  }
 0x1f1   : > { %2613 = vmatpush1.bf16.msra.mxu1 %v19867_v3  ;;  %2929 = vmatprep.subr.bf16.mxu0 %v19872_v56  ;;  %v19914_v3 = vld [vmem:[%s22620_s27 + $0x794] ss:$8 sps:$4 sm:$0xff]   ;;  %v19917_v56 = vld [vmem:[%s22620_s27 + $0x6c4] ss:$8 sps:$4 sm:$0xff]  }
 0x1f2   : > { %2614 = vmatprep.subr.bf16.mxu1 %v19875_v62  ;;  %v19915_v62 = vld [vmem:[%s22620_s27 + $0x6c0] ss:$8 sps:$4 sm:$0xff]  }
 0x1f4   : > { %2061 = vmatmul.mubr.bf16.gmra.mxu1 %v26497_v63  ;;  %2930 = vmatpush1.bf16.msra.mxu0 %v19870_v27  ;;  %v19920_v27 = vld [vmem:[%s22620_s27 + $0x784] ss:$8 sps:$4 sm:$0xff]   ;;  %v19927_v63 = vld [vmem:[%s22620_s27 + $0x6a0] ss:$8 sps:$4 sm:$0xff]  }
 0x1f5   : > { %2615 = vmatpush1.bf16.msra.mxu1 %v19873_v34  ;;  %2638 = vmatprep.mubr.bf16.mxu1 %v2431_v4  ;;  %v19918_v34 = vld [vmem:[%s22620_s27 + $0x780] ss:$8 sps:$4 sm:$0xff]   ;;  %v19935_v4 = vld [vmem:[%s22620_s27 + $0x694] ss:$8 sps:$4 sm:$0xff]  }
 0x1f6   : > { %2931 = vmatprep.subr.bf16.mxu0 %v19878_v43  ;;  %2616 = vmatprep.subr.bf16.mxu1 %v19881_v12  ;;  %v19923_v43 = vld [vmem:[%s22620_s27 + $0x6b4] ss:$8 sps:$4 sm:$0xff]   ;;  %v19921_v12 = vld [vmem:[%s22620_s27 + $0x6b0] ss:$8 sps:$4 sm:$0xff]  }
 0x1f8   : > { %2932 = vmatpush2.bf16.msra.mxu0 %v19876_v14  ;;  %v19924_v14 = vld [vmem:[%s22620_s27 + $0x970] ss:$8 sps:$4 sm:$0xff]  }
 0x1f9   : > { %2617 = vmatpush1.bf16.msra.mxu1 %v19879_v50  ;;  %2933 = vmatprep.subr.bf16.mxu0 %v19884_v44  ;;  %v19929_v50 = vld [vmem:[%s22620_s27 + $0x6a4] ss:$8 sps:$4 sm:$0xff]   ;;  %v19930_v44 = vld [vmem:[%s22620_s27 + $0x960] ss:$8 sps:$4 sm:$0xff]  }
 0x1fa   : > { %2618 = vmatprep.subr.bf16.mxu1 %v19887_v16 }
 0x1fc   : > { %2934 = vmatpush2.bf16.msra.mxu0 %v19882_v51  ;;  %v19933_v51 = vld [vmem:[%s22620_s27 + $0x690] ss:$8 sps:$4 sm:$0xff]  }
 0x1fd   : > { %2619 = vmatpush1.bf16.msra.mxu1 %v19885_v39  ;;  %2935 = vmatprep.subr.bf16.mxu0 %v19890_v54  ;;  %v19938_v39 = vld [vmem:[%s22620_s27 + $0x954] ss:$8 sps:$4 sm:$0xff]   ;;  %v26499_v54 = vld [vmem:[#allocation12_spill] sm:$0xff] }
 0x1fe   : > { %2620 = vmatprep.subr.bf16.mxu1 %v19893_v9  ;;  %v19941_v9 = vld [vmem:[%s22620_s27 + $0x684] ss:$8 sps:$4 sm:$0xff]  }
 0x200   : > { %2936 = vmatpush2.bf16.msra.mxu0 %v19888_v33 }
 0x201   : > { %2621 = vmatpush1.bf16.msra.mxu1 %v19891_v2  ;;  %2937 = vmatprep.subr.bf16.mxu0 %v19896_v7  ;;  %v19936_v2 = vld [vmem:[%s22620_s27 + $0x950] ss:$8 sps:$4 sm:$0xff]  }
 0x202   : > { %2622 = vmatprep.subr.bf16.mxu1 %v19899_v49  ;;  %v19947_v49 = vld [vmem:[%s22620_s27 + $0x874] ss:$8 sps:$4 sm:$0xff]  }
 0x204   : > { %2938 = vmatpush2.bf16.msra.mxu0 %v19894_v5  ;;  %v19939_v5 = vld [vmem:[%s22620_s27 + $0x680] ss:$8 sps:$4 sm:$0xff]  }
 0x205   : > { %2623 = vmatpush2.bf16.msra.mxu1 %v19897_v19  ;;  %2939 = vmatprep.subr.bf16.mxu0 %v19902_v11  ;;  %v26500_v11 = vld [vmem:[#allocation13_spill] sm:$0xff] }
 0x206   : > { %2624 = vmatprep.subr.bf16.mxu1 %v19905_v42  ;;  %v19945_v42 = vld [vmem:[%s22620_s27 + $0x870] ss:$8 sps:$4 sm:$0xff]  }
 0x208   : > { %2940 = vmatpush2.bf16.msra.mxu0 %v19900_v15  ;;  %v19942_v15 = vld [vmem:[%s22620_s27 + $0x940] ss:$8 sps:$4 sm:$0xff]  }
 0x209   : > { %2625 = vmatpush2.bf16.msra.mxu1 %v19903_v45  ;;  %2941 = vmatprep.subr.bf16.mxu0 %v19908_v47  ;;  %v26501_v45 = vld [vmem:[#allocation15_spill] sm:$0xff]  ;;  %v19950_v47 = vld [vmem:[%s22620_s27 + $0x934] ss:$8 sps:$4 sm:$0xff]  }
 0x20a   : > { %2626 = vmatprep.subr.bf16.mxu1 %v19911_v1  ;;  %v2426_v1 = vrot.slane %v22799_v32, 3 }
 0x20c   : > { %2942 = vmatpush2.bf16.msra.mxu0 %v19906_v13  ;;  %v19953_v13 = vld [vmem:[%s22620_s27 + $0x864] ss:$8 sps:$4 sm:$0xff]  }
 0x20d   : > { %2627 = vmatpush2.bf16.msra.mxu1 %v19909_v31  ;;  %2943 = vmatprep.subr.bf16.mxu0 %v19914_v3  ;;  %v19948_v3 = vld [vmem:[%s22620_s27 + $0x930] ss:$8 sps:$4 sm:$0xff]  }
 0x20e   : > { %2628 = vmatprep.subr.bf16.mxu1 %v19917_v56 }
 0x210   : > { %2944 = vmatpush2.bf16.msra.mxu0 %v19912_v35  ;;  %v26502_v35 = vrot.slane %v22827_v59, 3 }
 0x211   : > { %2629 = vmatpush2.bf16.msra.mxu1 %v19915_v62  ;;  %2945 = vmatprep.subr.bf16.mxu0 %v19920_v27  ;;  %v19951_v62 = vld [vmem:[%s22620_s27 + $0x860] ss:$8 sps:$4 sm:$0xff]  }
 0x212   : > { %2630 = vmatprep.subr.bf16.mxu1 %v19923_v43  ;;  %v2428_v56 = vsel %vm2425_vm4, %v2426_v1, %v26502_v35  ;;  %v26503_v43 = vld [vmem:[#allocation14_spill] sm:$0xff]  ;;  %v19966_v1 = vld [vmem:[%s22620_s27 + $0x900] ss:$8 sps:$4 sm:$0xff]  }
 0x213   : > { %v19969_v35 = vld [vmem:[%s22620_s27 + $0x830] ss:$8 sps:$4 sm:$0xff]  }
 0x214   : > { %2946 = vmatpush2.bf16.msra.mxu0 %v19918_v34 }
 0x215   : > { %2631 = vmatpush2.bf16.msra.mxu1 %v19921_v12  ;;  %3509 = vmatprep.subr.bf16.mxu0 %v19926_v53  ;;  %v19956_v12 = vld [vmem:[%s22620_s27 + $0x924] ss:$8 sps:$4 sm:$0xff]   ;;  %v19959_v53 = vld [vmem:[%s22620_s27 + $0x854] ss:$8 sps:$4 sm:$0xff]  }
 0x216   : > { %2632 = vmatprep.subr.bf16.mxu1 %v19929_v50  ;;  %v1181_v16 = vpop.f32.mrf.mxu0 }
 0x217   : > { %2948 = vmatmul.mubr.bf16.vlgmr.msra.gmra.mxu0 %v23056_v28  ;;  %v19944_v28 = vld [vmem:[%s22620_s27 + $0x944] ss:$8 sps:$4 sm:$0xff]  }
 0x218   : > { %2957 = vmatprep.mubr.bf16.mxu0 %v26499_v54  ;;  %3510 = vmatpush1.bf16.msra.mxu0 %v19924_v14  ;;  %v1183_v33 = vpop.f32.mrf.mxu0  ;;  %v19962_v54 = vld [vmem:[%s22620_s27 + $0x914] ss:$8 sps:$4 sm:$0xff]  }
 0x219   : > { %2633 = vmatpush2.bf16.msra.mxu1 %v19927_v63  ;;  %3511 = vmatprep.subr.bf16.mxu0 %v19932_v6  ;;  %v19954_v63 = vld [vmem:[%s22620_s27 + $0x920] ss:$8 sps:$4 sm:$0xff]  }
 0x21a   : > { %2634 = vmatprep.subr.bf16.mxu1 %v19935_v4  ;;  %v1185_v7 = vpop.f32.mrf.mxu0  ;;  %v26504_v4 = vld [vmem:[#allocation18_spill] sm:$0xff] }
 0x21c   : > { %3512 = vmatpush1.bf16.msra.mxu0 %v19930_v44  ;;  %v23449_v19 = vpop.f32.mrf.mxu0  ;;  %v19957_v44 = vld [vmem:[%s22620_s27 + $0x850] ss:$8 sps:$4 sm:$0xff]  }
 0x21d   : > { %2635 = vmatpush2.bf16.msra.mxu1 %v19933_v51  ;;  %3513 = vmatprep.subr.bf16.mxu0 %v19938_v39 }
 0x21e   : > { %2636 = vmatprep.subr.bf16.mxu1 %v19941_v9  ;;  %v1191_v31 = vpop.f32.mrf.mxu0  ;;  %v19965_v9 = vld [vmem:[%s22620_s27 + $0x844] ss:$8 sps:$4 sm:$0xff]  }
 0x21f   : > { %2958 = vmatmul.mubr.bf16.gmra.mxu0 %v26500_v11 }
 0x220   : > { %2967 = vmatprep.mubr.bf16.mxu0 %v26501_v45  ;;  %3514 = vmatpush1.bf16.msra.mxu0 %v19936_v2  ;;  %v1193_v14 = vpop.f32.mrf.mxu0  ;;  %v19971_v45 = vld [vmem:[%s22620_s27 + $0x834] ss:$8 sps:$4 sm:$0xff]  }
 0x221   : > { %2637 = vmatpush2.bf16.msra.mxu1 %v19939_v5  ;;  %3515 = vmatprep.subr.bf16.mxu0 %v19944_v28  ;;  %v19963_v28 = vld [vmem:[%s22620_s27 + $0x840] ss:$8 sps:$4 sm:$0xff]  }
 0x222   : > { %3204 = vmatprep.subr.bf16.mxu1 %v19947_v49  ;;  %v1195_v2 = vpop.f32.mrf.mxu0  ;;  %v26506_v49 = vld [vmem:[#allocation16_spill] sm:$0xff] }
 0x223   : > { %v958_v27 = vpop.f32.mrf.mxu1 }
 0x224   : > { %2639 = vmatmul.mubr.bf16.vlgmr.msra.gmra.mxu1 %v2428_v56  ;;  %3516 = vmatpush1.bf16.msra.mxu0 %v19942_v15  ;;  %v23463_v34 = vadd.f32 %v1181_v16, %v958_v27  ;;  %v26505_v16 = vld [vmem:[#allocation20_spill] sm:$0xff]  ;;  %v26507_v15 = vld [vmem:[#allocation17_spill] sm:$0xff] }
 0x225   : > { %2648 = vmatprep.mubr.bf16.mxu1 %v26503_v43  ;;  %3205 = vmatpush1.bf16.msra.mxu1 %v19945_v42  ;;  %v960_v50 = vpop.f32.mrf.mxu1  ;;  %v19968_v42 = vld [vmem:[%s22620_s27 + $0x904] ss:$8 sps:$4 sm:$0xff]   ;;  %v19974_v27 = vld [vmem:[%s22620_s27 + $0x9f4] ss:$8 sps:$4 sm:$0xff]  }
 0x226   : > { %3517 = vmatprep.subr.bf16.mxu0 %v19950_v47  ;;  %3206 = vmatprep.subr.bf16.mxu1 %v19953_v13  ;;  %v23469_v6 = vadd.f32 %v1183_v33, %v960_v50  ;;  %v19960_v33 = vld [vmem:[%s22620_s27 + $0x910] ss:$8 sps:$4 sm:$0xff]   ;;  %v23488_v47 = vpop.f32.mrf.mxu0  ;;  %v19977_v43 = vld [vmem:[%s22620_s27 + $0x824] ss:$8 sps:$4 sm:$0xff]   ;;  %v19975_v50 = vld [vmem:[%s22620_s27 + $0x820] ss:$8 sps:$4 sm:$0xff]  }
 0x227   : > { %2968 = vmatmul.mubr.bf16.gmra.mxu0 %v26504_v4  ;;  %v962_v51 = vpop.f32.mrf.mxu1  ;;  %v26508_v4 = vld [vmem:[#allocation19_spill] sm:$0xff] }
 0x228   : > { %3518 = vmatpush1.bf16.msra.mxu0 %v19948_v3  ;;  %3541 = vmatprep.mubr.bf16.mxu0 %v26505_v16  ;;  %v23474_v39 = vadd.f32 %v1185_v7, %v962_v51  ;;  %v26509_v16 = vrot.slane %v22844_v8, 4 }
 0x229   : > { %3207 = vmatpush1.bf16.msra.mxu1 %v19951_v62  ;;  %3519 = vmatprep.subr.bf16.mxu0 %v19956_v12  ;;  %v23478_v5 = vpop.f32.mrf.mxu1 }
 0x22a   : > { %3208 = vmatprep.subr.bf16.mxu1 %v19959_v53  ;;  %v3027_v53 = vrot.slane %v22806_v40, 4 }
 0x22c   : > { %2649 = vmatmul.mubr.bf16.gmra.mxu1 %v26506_v49  ;;  %3520 = vmatpush1.bf16.msra.mxu0 %v19954_v63  ;;  %v968_v11 = vpop.f32.mrf.mxu1  ;;  %v3029_v51 = vsel %vm3023_vm5, %v3027_v53, %v26509_v16  ;;  %v19993_v53 = vld [vmem:[%s22620_s27 + $0x8f0] ss:$8 sps:$4 sm:$0xff]   ;;  %v20007_v16 = vld [vmem:[%s22620_s27 + $0x8d4] ss:$8 sps:$4 sm:$0xff]  }
 0x22d   : > { %v23483_v7 = vadd.f32 %v1191_v31, %v968_v11  ;;  %2658 = vmatprep.mubr.bf16.mxu1 %v26507_v15  ;;  %3209 = vmatpush1.bf16.msra.mxu1 %v19957_v44  ;;  %v1201_v31 = vpop.f32.mrf.mxu0  ;;  %v19981_v11 = vld [vmem:[%s22620_s27 + $0x810] ss:$8 sps:$4 sm:$0xff]  }
 0x22e   : > { %v970_v13 = vpop.f32.mrf.mxu1  ;;  %3521 = vmatprep.subr.bf16.mxu0 %v19962_v54  ;;  %3210 = vmatprep.subr.bf16.mxu1 %v19965_v9  ;;  %v19980_v9 = vld [vmem:[%s22620_s27 + $0x9e4] ss:$8 sps:$4 sm:$0xff]  }
 0x22f   : > { %v23491_v3 = vadd.f32 %v1193_v14, %v970_v13  ;;  %v19972_v14 = vld [vmem:[%s22620_s27 + $0x9f0] ss:$8 sps:$4 sm:$0xff]   ;;  %v1203_v63 = vpop.f32.mrf.mxu0  ;;  %v19986_v13 = vld [vmem:[%s22620_s27 + $0x9d4] ss:$8 sps:$4 sm:$0xff]  }
 0x230   : > { %3522 = vmatpush1.bf16.msra.mxu0 %v19960_v33  ;;  %v972_v56 = vpop.f32.mrf.mxu1 }
 0x231   : > { %v23494_v62 = vadd.f32 %v1195_v2, %v972_v56  ;;  %3211 = vmatpush1.bf16.msra.mxu1 %v19963_v28  ;;  %3523 = vmatprep.subr.bf16.mxu0 %v19968_v42  ;;  %v19983_v2 = vld [vmem:[%s22620_s27 + $0x814] ss:$8 sps:$4 sm:$0xff]   ;;  %v19978_v28 = vld [vmem:[%s22620_s27 + $0x9e0] ss:$8 sps:$4 sm:$0xff]   ;;  %v1205_v15 = vpop.f32.mrf.mxu0  ;;  %v19992_v56 = vld [vmem:[%s22620_s27 + $0x9c4] ss:$8 sps:$4 sm:$0xff]  }
 0x232   : > { %v23498_v12 = vpop.f32.mrf.mxu1  ;;  %3212 = vmatprep.subr.bf16.mxu1 %v19971_v45 }
 0x234   : > { %2659 = vmatmul.mubr.bf16.gmra.mxu1 %v26508_v4  ;;  %3524 = vmatpush1.bf16.msra.mxu0 %v19966_v1  ;;  %v978_v44 = vpop.f32.mrf.mxu1  ;;  %v19989_v1 = vld [vmem:[%s22620_s27 + $0x804] ss:$8 sps:$4 sm:$0xff]   ;;  %v19999_v4 = vld [vmem:[%s22620_s27 + $0x8e0] ss:$8 sps:$4 sm:$0xff]  }
 0x235   : > { %v23507_v54 = vadd.f32 %v1201_v31, %v978_v44  ;;  %3213 = vmatpush1.bf16.msra.mxu1 %v19969_v35  ;;  %3236 = vmatprep.mubr.bf16.mxu1 %v3029_v51  ;;  %v19984_v35 = vld [vmem:[%s22620_s27 + $0x9d0] ss:$8 sps:$4 sm:$0xff]   ;;  %v19987_v31 = vld [vmem:[%s22620_s27 + $0x800] ss:$8 sps:$4 sm:$0xff]   ;;  %v20004_v44 = vld [vmem:[%s22620_s27 + $0x9a4] ss:$8 sps:$4 sm:$0xff]  }
 0x236   : > { %v980_v33 = vpop.f32.mrf.mxu1  ;;  %3525 = vmatprep.subr.bf16.mxu0 %v19974_v27  ;;  %3214 = vmatprep.subr.bf16.mxu1 %v19977_v43  ;;  %v19995_v27 = vld [vmem:[%s22620_s27 + $0x8f4] ss:$8 sps:$4 sm:$0xff]   ;;  %v19990_v43 = vld [vmem:[%s22620_s27 + $0x9c0] ss:$8 sps:$4 sm:$0xff]  }
 0x237   : > { %v23512_v49 = vadd.f32 %v1203_v63, %v980_v33  ;;  %v19996_v63 = vld [vmem:[%s22620_s27 + $0x9b0] ss:$8 sps:$4 sm:$0xff]   ;;  %v20002_v51 = vld [vmem:[%s22620_s27 + $0x9a0] ss:$8 sps:$4 sm:$0xff]   ;;  %v20013_v33 = vld [vmem:[%s22620_s27 + $0x8c4] ss:$8 sps:$4 sm:$0xff]  }
 0x238   : > { %3526 = vmatpush2.bf16.msra.mxu0 %v19972_v14  ;;  %v982_v42 = vpop.f32.mrf.mxu1  ;;  %v19998_v14 = vld [vmem:[%s22620_s27 + $0x9b4] ss:$8 sps:$4 sm:$0xff]  }
 0x239   : > { %v23515_v45 = vadd.f32 %v1205_v15, %v982_v42  ;;  %3215 = vmatpush1.bf16.msra.mxu1 %v19975_v50  ;;  %3527 = vmatprep.subr.bf16.mxu0 %v19980_v9  ;;  %v20001_v50 = vld [vmem:[%s22620_s27 + $0x8e4] ss:$8 sps:$4 sm:$0xff]   ;;  %v20005_v9 = vld [vmem:[%s22620_s27 + $0x8d0] ss:$8 sps:$4 sm:$0xff]   ;;  %v20019_v42 = vld [vmem:[%s22620_s27 + $0x8b4] ss:$8 sps:$4 sm:$0xff]  }
 0x23a   : > { %3216 = vmatprep.subr.bf16.mxu1 %v19983_v2  ;;  %v20010_v2 = vld [vmem:[%s22620_s27 + $0x994] ss:$8 sps:$4 sm:$0xff]   ;;  %v20016_v15 = vld [vmem:[%s22620_s27 + $0x984] ss:$8 sps:$4 sm:$0xff]  }
 0x23c   : > { %3528 = vmatpush2.bf16.msra.mxu0 %v19978_v28  ;;  %v20008_v28 = vld [vmem:[%s22620_s27 + $0x990] ss:$8 sps:$4 sm:$0xff]  }
 0x23d   : > { %3217 = vmatpush1.bf16.msra.mxu1 %v19981_v11  ;;  %3529 = vmatprep.subr.bf16.mxu0 %v19986_v13  ;;  %v20011_v11 = vld [vmem:[%s22620_s27 + $0x8c0] ss:$8 sps:$4 sm:$0xff]  }
 0x23e   : > { %3218 = vmatprep.subr.bf16.mxu1 %v19989_v1  ;;  %v20014_v13 = vld [vmem:[%s22620_s27 + $0x980] ss:$8 sps:$4 sm:$0xff]   ;;  %v20017_v1 = vld [vmem:[%s22620_s27 + $0x8b0] ss:$8 sps:$4 sm:$0xff]  }
 0x240   : > { %3530 = vmatpush2.bf16.msra.mxu0 %v19984_v35  ;;  %v20022_v35 = vld [vmem:[%s22620_s27 + $0xb74] ss:$8 sps:$4 sm:$0xff]  }
 0x241   : > { %3219 = vmatpush1.bf16.msra.mxu1 %v19987_v31  ;;  %3531 = vmatprep.subr.bf16.mxu0 %v19992_v56  ;;  %v20025_v31 = vld [vmem:[%s22620_s27 + $0x8a4] ss:$8 sps:$4 sm:$0xff]   ;;  %v20020_v56 = vld [vmem:[%s22620_s27 + $0xb70] ss:$8 sps:$4 sm:$0xff]  }
 0x242   : > { %3220 = vmatprep.subr.bf16.mxu1 %v19995_v27  ;;  %v20023_v27 = vld [vmem:[%s22620_s27 + $0x8a0] ss:$8 sps:$4 sm:$0xff]  }
 0x244   : > { %3532 = vmatpush2.bf16.msra.mxu0 %v19990_v43  ;;  %v20028_v43 = vld [vmem:[%s22620_s27 + $0xb64] ss:$8 sps:$4 sm:$0xff]  }
 0x245   : > { %3221 = vmatpush2.bf16.msra.mxu1 %v19993_v53  ;;  %3533 = vmatprep.subr.bf16.mxu0 %v19998_v14  ;;  %v20031_v53 = vld [vmem:[%s22620_s27 + $0x894] ss:$8 sps:$4 sm:$0xff]   ;;  %v23547_v14 = vpop.f32.mrf.mxu0 }
 0x246   : > { %3222 = vmatprep.subr.bf16.mxu1 %v20001_v50  ;;  %v20026_v50 = vld [vmem:[%s22620_s27 + $0xb60] ss:$8 sps:$4 sm:$0xff]  }
 0x248   : > { %3534 = vmatpush2.bf16.msra.mxu0 %v19996_v63 }
 0x249   : > { %3223 = vmatpush2.bf16.msra.mxu1 %v19999_v4  ;;  %3535 = vmatprep.subr.bf16.mxu0 %v20004_v44  ;;  %v20029_v4 = vld [vmem:[%s22620_s27 + $0x890] ss:$8 sps:$4 sm:$0xff]   ;;  %v20034_v44 = vld [vmem:[%s22620_s27 + $0xb54] ss:$8 sps:$4 sm:$0xff]  }
 0x24a   : > { %3224 = vmatprep.subr.bf16.mxu1 %v20007_v16  ;;  %v20037_v16 = vld [vmem:[%s22620_s27 + $0x884] ss:$8 sps:$4 sm:$0xff]  }
 0x24c   : > { %3536 = vmatpush2.bf16.msra.mxu0 %v20002_v51 }
 0x24d   : > { %3225 = vmatpush2.bf16.msra.mxu1 %v20005_v9  ;;  %3537 = vmatprep.subr.bf16.mxu0 %v20010_v2  ;;  %v20032_v9 = vld [vmem:[%s22620_s27 + $0xb50] ss:$8 sps:$4 sm:$0xff]  }
 0x24e   : > { %3226 = vmatprep.subr.bf16.mxu1 %v20013_v33  ;;  %v20035_v33 = vld [vmem:[%s22620_s27 + $0x880] ss:$8 sps:$4 sm:$0xff]  }
 0x250   : > { %3538 = vmatpush2.bf16.msra.mxu0 %v20008_v28  ;;  %v20040_v28 = vld [vmem:[%s22620_s27 + $0xb44] ss:$8 sps:$4 sm:$0xff]  }
 0x251   : > { %3227 = vmatpush2.bf16.msra.mxu1 %v20011_v11  ;;  %3539 = vmatprep.subr.bf16.mxu0 %v20016_v15  ;;  %v20038_v11 = vld [vmem:[%s22620_s27 + $0xb40] ss:$8 sps:$4 sm:$0xff]   ;;  %v20041_v15 = vld [vmem:[%s22620_s27 + $0xa70] ss:$8 sps:$4 sm:$0xff]  }
 0x252   : > { %3228 = vmatprep.subr.bf16.mxu1 %v20019_v42  ;;  %v20046_v42 = vld [vmem:[%s22620_s27 + $0xb34] ss:$8 sps:$4 sm:$0xff]  }
 0x254   : > { %3540 = vmatpush2.bf16.msra.mxu0 %v20014_v13  ;;  %v20049_v13 = vld [vmem:[%s22620_s27 + $0xa64] ss:$8 sps:$4 sm:$0xff]  }
 0x255   : > { %3229 = vmatpush2.bf16.msra.mxu1 %v20017_v1  ;;  %4103 = vmatprep.subr.bf16.mxu0 %v20022_v35  ;;  %v3024_v1 = vrot.slane %v22799_v32, 4  ;;  %v23568_v35 = vpop.f32.mrf.mxu1 }
 0x256   : > { %3230 = vmatprep.subr.bf16.mxu1 %v20025_v31 }
 0x257   : > { %v1757_v63 = vpop.f32.mrf.mxu0  ;;  %3542 = vmatmul.mubr.bf16.vlgmr.msra.gmra.mxu0 %v23134_v29  ;;  %v20043_v29 = vld [vmem:[%s22620_s27 + $0xa74] ss:$8 sps:$4 sm:$0xff]  }
 0x258   : > { %3551 = vmatprep.mubr.bf16.mxu0 %v23138_v60  ;;  %4104 = vmatpush1.bf16.msra.mxu0 %v20020_v56  ;;  %v20044_v56 = vld [vmem:[%s22620_s27 + $0xb30] ss:$8 sps:$4 sm:$0xff]  }
 0x259   : > { %v1759_v51 = vpop.f32.mrf.mxu0  ;;  %3231 = vmatpush2.bf16.msra.mxu1 %v20023_v27  ;;  %4105 = vmatprep.subr.bf16.mxu0 %v20028_v43  ;;  %v20047_v43 = vld [vmem:[%s22620_s27 + $0xa60] ss:$8 sps:$4 sm:$0xff]  }
 0x25a   : > { %3232 = vmatprep.subr.bf16.mxu1 %v20031_v53 }
 0x25b   : > { %v1761_v2 = vpop.f32.mrf.mxu0 }
 0x25c   : > { %4106 = vmatpush1.bf16.msra.mxu0 %v20026_v50  ;;  %v20055_v50 = vld [vmem:[%s22620_s27 + $0xa54] ss:$8 sps:$4 sm:$0xff]  }
 0x25d   : > { %3233 = vmatpush2.bf16.msra.mxu1 %v20029_v4  ;;  %4107 = vmatprep.subr.bf16.mxu0 %v20034_v44  ;;  %v23559_v60 = vpop.f32.mrf.mxu0  ;;  %v26511_v44 = vld [vmem:[#allocation21_spill] sm:$0xff] }
 0x25e   : > { %3234 = vmatprep.subr.bf16.mxu1 %v20037_v16 }
 0x25f   : > { %3552 = vmatmul.mubr.bf16.gmra.mxu0 %v23141_v38  ;;  %v1767_v31 = vpop.f32.mrf.mxu0  ;;  %v26510_v38 = vrot.slane %v22827_v59, 4 }
 0x260   : > { %3561 = vmatprep.mubr.bf16.mxu0 %v23154_v57  ;;  %4108 = vmatpush1.bf16.msra.mxu0 %v20032_v9  ;;  %v20052_v57 = vld [vmem:[%s22620_s27 + $0xb24] ss:$8 sps:$4 sm:$0xff]  }
 0x261   : > { %3235 = vmatpush2.bf16.msra.mxu1 %v20035_v33  ;;  %4109 = vmatprep.subr.bf16.mxu0 %v20040_v28  ;;  %v3026_v27 = vsel %vm3023_vm5, %v3024_v1, %v26510_v38  ;;  %v1769_v16 = vpop.f32.mrf.mxu0  ;;  %v20050_v33 = vld [vmem:[%s22620_s27 + $0xb20] ss:$8 sps:$4 sm:$0xff]   ;;  %v20061_v1 = vld [vmem:[%s22620_s27 + $0xa44] ss:$8 sps:$4 sm:$0xff]  }
 0x262   : > { %3798 = vmatprep.subr.bf16.mxu1 %v20043_v29  ;;  %v20053_v29 = vld [vmem:[%s22620_s27 + $0xa50] ss:$8 sps:$4 sm:$0xff]   ;;  %v20059_v38 = vld [vmem:[%s22620_s27 + $0xa40] ss:$8 sps:$4 sm:$0xff]  }
 0x264   : > { %v1460_v53 = vpop.f32.mrf.mxu1  ;;  %3237 = vmatmul.mubr.bf16.vlgmr.msra.gmra.mxu1 %v3026_v27  ;;  %4110 = vmatpush1.bf16.msra.mxu0 %v20038_v11 }
 0x265   : > { %v1489_v4 = vadd.f32 %v1460_v53, %v23463_v34  ;;  %3246 = vmatprep.mubr.bf16.mxu1 %v26511_v44  ;;  %3799 = vmatpush1.bf16.msra.mxu1 %v20041_v15  ;;  %v20058_v15 = vld [vmem:[%s22620_s27 + $0xb14] ss:$8 sps:$4 sm:$0xff]   ;;  %v20062_v53 = vld [vmem:[%s22620_s27 + $0xb00] ss:$8 sps:$4 sm:$0xff]   ;;  %v20073_v44 = vld [vmem:[%s22620_s27 + $0xa24] ss:$8 sps:$4 sm:$0xff]  }
 0x266   : > { %v1462_v9 = vpop.f32.mrf.mxu1  ;;  %4111 = vmatprep.subr.bf16.mxu0 %v20046_v42  ;;  %3800 = vmatprep.subr.bf16.mxu1 %v20049_v13  ;;  %v1771_v13 = vpop.f32.mrf.mxu0 }
 0x267   : > { %v1490_v28 = vadd.f32 %v1462_v9, %v23469_v6  ;;  %3562 = vmatmul.mubr.bf16.gmra.mxu0 %v23181_v22  ;;  %v23583_v11 = vadd.f32 %v1757_v63, %v1489_v4  ;;  %v20056_v63 = vld [vmem:[%s22620_s27 + $0xb10] ss:$8 sps:$4 sm:$0xff]  }
 0x268   : > { %v1464_v34 = vpop.f32.mrf.mxu1  ;;  %4112 = vmatpush1.bf16.msra.mxu0 %v20044_v56  ;;  %4135 = vmatprep.mubr.bf16.mxu0 %v23188_v0  ;;  %v20064_v56 = vld [vmem:[%s22620_s27 + $0xb04] ss:$8 sps:$4 sm:$0xff]  }
 0x269   : > { %v1491_v42 = vadd.f32 %v1464_v34, %v23474_v39  ;;  %3801 = vmatpush1.bf16.msra.mxu1 %v20047_v43  ;;  %4113 = vmatprep.subr.bf16.mxu0 %v20052_v57  ;;  %v23589_v6 = vadd.f32 %v1759_v51, %v1490_v28  ;;  %v20067_v39 = vld [vmem:[%s22620_s27 + $0xa34] ss:$8 sps:$4 sm:$0xff]   ;;  %v23602_v43 = vpop.f32.mrf.mxu0  ;;  %v20076_v34 = vld [vmem:[%s22620_s27 + $0xbe4] ss:$8 sps:$4 sm:$0xff]  }
 0x26a   : > { %v23591_v22 = vpop.f32.mrf.mxu1  ;;  %3802 = vmatprep.subr.bf16.mxu1 %v20055_v50 }
 0x26b   : > { %v23596_v27 = vadd.f32 %v1761_v2, %v1491_v42  ;;  %v20079_v42 = vld [vmem:[%s22620_s27 + $0xa14] ss:$8 sps:$4 sm:$0xff]  }
 0x26c   : > { %v1470_v0 = vpop.f32.mrf.mxu1  ;;  %3247 = vmatmul.mubr.bf16.gmra.mxu1 %v23172_v17  ;;  %4114 = vmatpush1.bf16.msra.mxu0 %v20050_v33  ;;  %v20065_v17 = vld [vmem:[%s22620_s27 + $0xa30] ss:$8 sps:$4 sm:$0xff]   ;;  %v1777_v33 = vpop.f32.mrf.mxu0 }
 0x26d   : > { %v1493_v51 = vadd.f32 %v1470_v0, %v23483_v7  ;;  %3256 = vmatprep.mubr.bf16.mxu1 %v23175_v25  ;;  %3803 = vmatpush1.bf16.msra.mxu1 %v20053_v29  ;;  %v20070_v7 = vld [vmem:[%s22620_s27 + $0xbf4] ss:$8 sps:$4 sm:$0xff]   ;;  %v20068_v29 = vld [vmem:[%s22620_s27 + $0xbf0] ss:$8 sps:$4 sm:$0xff]  }
 0x26e   : > { %v1472_v57 = vpop.f32.mrf.mxu1  ;;  %4115 = vmatprep.subr.bf16.mxu0 %v20058_v15  ;;  %3804 = vmatprep.subr.bf16.mxu1 %v20061_v1  ;;  %v26512_v1 = vld [vmem:[#allocation22_spill] sm:$0xff] }
 0x26f   : > { %v1494_v2 = vadd.f32 %v1472_v57, %v23491_v3  ;;  %v23607_v50 = vadd.f32 %v1767_v31, %v1493_v51  ;;  %v3621_v3 = vrot.slane %v22806_v40, 5  ;;  %v20071_v31 = vld [vmem:[%s22620_s27 + $0xa20] ss:$8 sps:$4 sm:$0xff]   ;;  %v20082_v51 = vld [vmem:[%s22620_s27 + $0xbd4] ss:$8 sps:$4 sm:$0xff]  }
 0x270   : > { %v1474_v4 = vpop.f32.mrf.mxu1  ;;  %4116 = vmatpush1.bf16.msra.mxu0 %v20056_v63 }
 0x271   : > { %v1495_v25 = vadd.f32 %v1474_v4, %v23494_v62  ;;  %3805 = vmatpush1.bf16.msra.mxu1 %v20059_v38  ;;  %4117 = vmatprep.subr.bf16.mxu0 %v20064_v56  ;;  %v23612_v9 = vadd.f32 %v1769_v16, %v1494_v2  ;;  %v3623_v16 = vsel %vm3617_vm9, %v3621_v3, %v3622_v18  ;;  %v1779_v38 = vpop.f32.mrf.mxu0  ;;  %v20083_v4 = vld [vmem:[%s22620_s27 + $0xa00] ss:$8 sps:$4 sm:$0xff]   ;;  %v20094_v3 = vld [vmem:[%s22620_s27 + $0xbb4] ss:$8 sps:$4 sm:$0xff]  }
 0x272   : > { %v23614_v28 = vpop.f32.mrf.mxu1  ;;  %3806 = vmatprep.subr.bf16.mxu1 %v20067_v39  ;;  %v20077_v39 = vld [vmem:[%s22620_s27 + $0xa10] ss:$8 sps:$4 sm:$0xff]  }
 0x273   : > { %v23620_v15 = vadd.f32 %v1771_v13, %v1495_v25  ;;  %v20074_v13 = vld [vmem:[%s22620_s27 + $0xbe0] ss:$8 sps:$4 sm:$0xff]   ;;  %v20091_v25 = vld [vmem:[%s22620_s27 + $0xaf4] ss:$8 sps:$4 sm:$0xff]  }
 0x274   : > { %v1480_v62 = vpop.f32.mrf.mxu1  ;;  %3257 = vmatmul.mubr.bf16.gmra.mxu1 %v26512_v1  ;;  %4118 = vmatpush1.bf16.msra.mxu0 %v20062_v53  ;;  %v20103_v1 = vld [vmem:[%s22620_s27 + $0xad4] ss:$8 sps:$4 sm:$0xff]  }
 0x275   : > { %v1497_v63 = vadd.f32 %v1480_v62, %v23507_v54  ;;  %3807 = vmatpush1.bf16.msra.mxu1 %v20065_v17  ;;  %3830 = vmatprep.mubr.bf16.mxu1 %v3623_v16  ;;  %v20085_v54 = vld [vmem:[%s22620_s27 + $0xa04] ss:$8 sps:$4 sm:$0xff]   ;;  %v1781_v17 = vpop.f32.mrf.mxu0  ;;  %v20098_v16 = vld [vmem:[%s22620_s27 + $0xba0] ss:$8 sps:$4 sm:$0xff]  }
 0x276   : > { %v1482_v56 = vpop.f32.mrf.mxu1  ;;  %4119 = vmatprep.subr.bf16.mxu0 %v20070_v7  ;;  %3808 = vmatprep.subr.bf16.mxu1 %v20073_v44  ;;  %v20088_v7 = vld [vmem:[%s22620_s27 + $0xbc4] ss:$8 sps:$4 sm:$0xff]  }
 0x277   : > { %v1498_v0 = vadd.f32 %v1482_v56, %v23512_v49  ;;  %v23632_v18 = vadd.f32 %v1777_v33, %v1497_v63  ;;  %v20080_v49 = vld [vmem:[%s22620_s27 + $0xbd0] ss:$8 sps:$4 sm:$0xff]   ;;  %v20100_v62 = vld [vmem:[%s22620_s27 + $0xba4] ss:$8 sps:$4 sm:$0xff]   ;;  %v20106_v63 = vld [vmem:[%s22620_s27 + $0xb94] ss:$8 sps:$4 sm:$0xff]  }
 0x278   : > { %v1484_v57 = vpop.f32.mrf.mxu1  ;;  %4120 = vmatpush2.bf16.msra.mxu0 %v20068_v29  ;;  %v20089_v33 = vld [vmem:[%s22620_s27 + $0xaf0] ss:$8 sps:$4 sm:$0xff]   ;;  %v20097_v29 = vld [vmem:[%s22620_s27 + $0xae4] ss:$8 sps:$4 sm:$0xff]  }
 0x279   : > { %v1499_v53 = vadd.f32 %v1484_v57, %v23515_v45  ;;  %3809 = vmatpush1.bf16.msra.mxu1 %v20071_v31  ;;  %4121 = vmatprep.subr.bf16.mxu0 %v20076_v34  ;;  %v23636_v2 = vadd.f32 %v1779_v38, %v1498_v0  ;;  %v20086_v45 = vld [vmem:[%s22620_s27 + $0xbc0] ss:$8 sps:$4 sm:$0xff]   ;;  %v20092_v31 = vld [vmem:[%s22620_s27 + $0xbb0] ss:$8 sps:$4 sm:$0xff]   ;;  %v20109_v38 = vld [vmem:[%s22620_s27 + $0xac4] ss:$8 sps:$4 sm:$0xff]  }
 0x27a   : > { %3810 = vmatprep.subr.bf16.mxu1 %v20079_v42  ;;  %v20095_v34 = vld [vmem:[%s22620_s27 + $0xae0] ss:$8 sps:$4 sm:$0xff]   ;;  %v20101_v42 = vld [vmem:[%s22620_s27 + $0xad0] ss:$8 sps:$4 sm:$0xff]   ;;  %v20112_v0 = vld [vmem:[%s22620_s27 + $0xb84] ss:$8 sps:$4 sm:$0xff]  }
 0x27b   : > { %v23641_v44 = vadd.f32 %v1781_v17, %v1499_v53  ;;  %v20104_v56 = vld [vmem:[%s22620_s27 + $0xb90] ss:$8 sps:$4 sm:$0xff]   ;;  %v20116_v53 = vld [vmem:[%s22620_s27 + $0xaa0] ss:$8 sps:$4 sm:$0xff]   ;;  %v20121_v17 = vld [vmem:[%s22620_s27 + $0xa94] ss:$8 sps:$4 sm:$0xff]  }
 0x27c   : > { %4122 = vmatpush2.bf16.msra.mxu0 %v20074_v13  ;;  %v20107_v13 = vld [vmem:[%s22620_s27 + $0xac0] ss:$8 sps:$4 sm:$0xff]   ;;  %v20113_v57 = vld [vmem:[%s22620_s27 + $0xab0] ss:$8 sps:$4 sm:$0xff]  }
 0x27d   : > { %3811 = vmatpush1.bf16.msra.mxu1 %v20077_v39  ;;  %4123 = vmatprep.subr.bf16.mxu0 %v20082_v51  ;;  %v20115_v39 = vld [vmem:[%s22620_s27 + $0xab4] ss:$8 sps:$4 sm:$0xff]   ;;  %v20110_v51 = vld [vmem:[%s22620_s27 + $0xb80] ss:$8 sps:$4 sm:$0xff]  }
 0x27e   : > { %3812 = vmatprep.subr.bf16.mxu1 %v20085_v54  ;;  %v20118_v54 = vld [vmem:[%s22620_s27 + $0xaa4] ss:$8 sps:$4 sm:$0xff]  }
 0x280   : > { %4124 = vmatpush2.bf16.msra.mxu0 %v20080_v49  ;;  %v23665_v49 = vpop.f32.mrf.mxu0 }
 0x281   : > { %3813 = vmatpush1.bf16.msra.mxu1 %v20083_v4  ;;  %4125 = vmatprep.subr.bf16.mxu0 %v20088_v7  ;;  %v20119_v7 = vld [vmem:[%s22620_s27 + $0xa90] ss:$8 sps:$4 sm:$0xff]  }
 0x282   : > { %3814 = vmatprep.subr.bf16.mxu1 %v20091_v25  ;;  %v20124_v25 = vld [vmem:[%s22620_s27 + $0xa84] ss:$8 sps:$4 sm:$0xff]  }
 0x284   : > { %4126 = vmatpush2.bf16.msra.mxu0 %v20086_v45 }
 0x285   : > { %3815 = vmatpush2.bf16.msra.mxu1 %v20089_v33  ;;  %4127 = vmatprep.subr.bf16.mxu0 %v20094_v3  ;;  %v20122_v3 = vld [vmem:[%s22620_s27 + $0xa80] ss:$8 sps:$4 sm:$0xff]  }
 0x286   : > { %3816 = vmatprep.subr.bf16.mxu1 %v20097_v29  ;;  %v20127_v29 = vld [vmem:[%s22620_s27 + $0xc74] ss:$8 sps:$4 sm:$0xff]  }
 0x288   : > { %4128 = vmatpush2.bf16.msra.mxu0 %v20092_v31 }
 0x289   : > { %3817 = vmatpush2.bf16.msra.mxu1 %v20095_v34  ;;  %4129 = vmatprep.subr.bf16.mxu0 %v20100_v62  ;;  %v20130_v34 = vld [vmem:[%s22620_s27 + $0xc64] ss:$8 sps:$4 sm:$0xff]   ;;  %v23680_v62 = vpop.f32.mrf.mxu1 }
 0x28a   : > { %3818 = vmatprep.subr.bf16.mxu1 %v20103_v1 }
 0x28c   : > { %4130 = vmatpush2.bf16.msra.mxu0 %v20098_v16 }
 0x28d   : > { %3819 = vmatpush2.bf16.msra.mxu1 %v20101_v42  ;;  %4131 = vmatprep.subr.bf16.mxu0 %v20106_v63  ;;  %v20128_v42 = vld [vmem:[%s22620_s27 + $0xc60] ss:$8 sps:$4 sm:$0xff]  }
 0x28e   : > { %3820 = vmatprep.subr.bf16.mxu1 %v20109_v38 }
 0x290   : > { %4132 = vmatpush2.bf16.msra.mxu0 %v20104_v56 }
 0x291   : > { %3821 = vmatpush2.bf16.msra.mxu1 %v20107_v13  ;;  %4133 = vmatprep.subr.bf16.mxu0 %v20112_v0 }
 0x292   : > { %3822 = vmatprep.subr.bf16.mxu1 %v20115_v39 }
 0x294   : > { %4134 = vmatpush2.bf16.msra.mxu0 %v20110_v51  ;;  %v20136_v51 = vld [vmem:[%s22620_s27 + $0xc44] ss:$8 sps:$4 sm:$0xff]  }
 0x295   : > { %3823 = vmatpush2.bf16.msra.mxu1 %v20113_v57 }
 0x296   : > { %3824 = vmatprep.subr.bf16.mxu1 %v20118_v54 }
 0x297   : > { %v2349_v4 = vpop.f32.mrf.mxu0  ;;  %4136 = vmatmul.mubr.bf16.vlgmr.msra.gmra.mxu0 %v23211_v55  ;;  %v20125_v55 = vld [vmem:[%s22620_s27 + $0xc70] ss:$8 sps:$4 sm:$0xff]  }
 0x298   : > { %4145 = vmatprep.mubr.bf16.mxu0 %v23216_v61  ;;  %v3618_v61 = vrot.slane %v22799_v32, 5 }
 0x299   : > { %v2351_v45 = vpop.f32.mrf.mxu0  ;;  %3825 = vmatpush2.bf16.msra.mxu1 %v20116_v53 }
 0x29a   : > { %3826 = vmatprep.subr.bf16.mxu1 %v20121_v17  ;;  %v3620_v16 = vsel %vm3617_vm9, %v3618_v61, %v3619_v58  ;;  %v20131_v58 = vld [vmem:[%s22620_s27 + $0xc50] ss:$8 sps:$4 sm:$0xff]   ;;  %v20139_v17 = vld [vmem:[%s22620_s27 + $0xc34] ss:$8 sps:$4 sm:$0xff]  }
 0x29b   : > { %v2353_v33 = vpop.f32.mrf.mxu0 }
 0x29d   : > { %3827 = vmatpush2.bf16.msra.mxu1 %v20119_v7  ;;  %v23673_v31 = vpop.f32.mrf.mxu0 }
 0x29e   : > { %3828 = vmatprep.subr.bf16.mxu1 %v20124_v25 }
 0x29f   : > { %4146 = vmatmul.mubr.bf16.gmra.mxu0 %v23228_v26  ;;  %v2359_v1 = vpop.f32.mrf.mxu0  ;;  %v20133_v26 = vld [vmem:[%s22620_s27 + $0xc54] ss:$8 sps:$4 sm:$0xff]  }
 0x2a0   : > { %4155 = vmatprep.mubr.bf16.mxu0 %v23231_v46 }
 0x2a1   : > { %3829 = vmatpush2.bf16.msra.mxu1 %v20122_v3  ;;  %v2361_v38 = vpop.f32.mrf.mxu0 }
 0x2a2   : > { %4392 = vmatprep.subr.bf16.mxu1 %v20127_v29  ;;  %v20142_v29 = vld [vmem:[%s22620_s27 + $0xc24] ss:$8 sps:$4 sm:$0xff]  }
 0x2a4   : > { %v2042_v63 = vpop.f32.mrf.mxu1  ;;  %3831 = vmatmul.mubr.bf16.vlgmr.msra.gmra.mxu1 %v3620_v16 }
 0x2a5   : > { %v2071_v46 = vadd.f32 %v2042_v63, %v23583_v11  ;;  %3840 = vmatprep.mubr.bf16.mxu1 %v23223_v52  ;;  %4393 = vmatpush1.bf16.msra.mxu1 %v20125_v55  ;;  %v23698_v52 = vpop.f32.mrf.mxu0 }
 0x2a6   : > { %v2044_v56 = vpop.f32.mrf.mxu1  ;;  %4394 = vmatprep.subr.bf16.mxu1 %v20130_v34  ;;  %v4215_v34 = vrot.slane %v22806_v40, 6 }
 0x2a7   : > { %v2072_v13 = vadd.f32 %v2044_v56, %v23589_v6  ;;  %4156 = vmatmul.mubr.bf16.gmra.mxu0 %v23253_v10  ;;  %v23692_v0 = vadd.f32 %v2349_v4, %v2071_v46  ;;  %v20134_v6 = vld [vmem:[%s22620_s27 + $0xc40] ss:$8 sps:$4 sm:$0xff]  }
 0x2a8   : > { %v2046_v39 = vpop.f32.mrf.mxu1  ;;  %v20146_v56 = vld [vmem:[%s22620_s27 + $0xc00] ss:$8 sps:$4 sm:$0xff]  }
 0x2a9   : > { %v2073_v57 = vadd.f32 %v2046_v39, %v23596_v27  ;;  %4395 = vmatpush1.bf16.msra.mxu1 %v20128_v42  ;;  %v23696_v11 = vadd.f32 %v2351_v45, %v2072_v13  ;;  %v23709_v27 = vpop.f32.mrf.mxu0  ;;  %v20137_v45 = vld [vmem:[%s22620_s27 + $0xc30] ss:$8 sps:$4 sm:$0xff]   ;;  %v20154_v39 = vld [vmem:[%s22620_s27 + $0xce4] ss:$8 sps:$4 sm:$0xff]  }
 0x2aa   : > { %v23700_v54 = vpop.f32.mrf.mxu1  ;;  %4396 = vmatprep.subr.bf16.mxu1 %v20133_v26  ;;  %v20143_v26 = vld [vmem:[%s22620_s27 + $0xc10] ss:$8 sps:$4 sm:$0xff]  }
 0x2ab   : > { %v23703_v53 = vadd.f32 %v2353_v33, %v2073_v57  ;;  %v20155_v57 = vld [vmem:[%s22620_s27 + $0xcd0] ss:$8 sps:$4 sm:$0xff]  }
 0x2ac   : > { %v2052_v10 = vpop.f32.mrf.mxu1  ;;  %3841 = vmatmul.mubr.bf16.gmra.mxu1 %v23241_v48 }
 0x2ad   : > { %v2075_v4 = vadd.f32 %v2052_v10, %v23607_v50  ;;  %3850 = vmatprep.mubr.bf16.mxu1 %v23245_v37  ;;  %4397 = vmatpush1.bf16.msra.mxu1 %v20131_v58  ;;  %v2369_v37 = vpop.f32.mrf.mxu0  ;;  %v20149_v58 = vld [vmem:[%s22620_s27 + $0xcf0] ss:$8 sps:$4 sm:$0xff]   ;;  %v20158_v10 = vld [vmem:[%s22620_s27 + $0xcc0] ss:$8 sps:$4 sm:$0xff]  }
 0x2ae   : > { %v2054_v7 = vpop.f32.mrf.mxu1  ;;  %4398 = vmatprep.subr.bf16.mxu1 %v20136_v51  ;;  %v20157_v51 = vld [vmem:[%s22620_s27 + $0xcd4] ss:$8 sps:$4 sm:$0xff]  }
 0x2af   : > { %v2076_v25 = vadd.f32 %v2054_v7, %v23612_v9  ;;  %v23713_v33 = vadd.f32 %v2359_v1, %v2075_v4  ;;  %v20140_v9 = vld [vmem:[%s22620_s27 + $0xc20] ss:$8 sps:$4 sm:$0xff]   ;;  %v20145_v1 = vld [vmem:[%s22620_s27 + $0xc14] ss:$8 sps:$4 sm:$0xff]   ;;  %v2371_v42 = vpop.f32.mrf.mxu0  ;;  %v20161_v4 = vld [vmem:[%s22620_s27 + $0xcb0] ss:$8 sps:$4 sm:$0xff]  }
 0x2b0   : > { %v2056_v3 = vpop.f32.mrf.mxu1  ;;  %v20166_v7 = vld [vmem:[%s22620_s27 + $0xca4] ss:$8 sps:$4 sm:$0xff]  }
 0x2b1   : > { %v23717_v48 = vadd.f32 %v2056_v3, %v23620_v15  ;;  %4399 = vmatpush1.bf16.msra.mxu1 %v20134_v6  ;;  %v23719_v50 = vadd.f32 %v2361_v38, %v2076_v25  ;;  %v4217_v15 = vsel %vm4211_vm10, %v4215_v34, %v4216_v36  ;;  %v20148_v36 = vld [vmem:[%s22620_s27 + $0xc04] ss:$8 sps:$4 sm:$0xff]   ;;  %v2373_v38 = vpop.f32.mrf.mxu0  ;;  %v20164_v25 = vld [vmem:[%s22620_s27 + $0xca0] ss:$8 sps:$4 sm:$0xff]   ;;  %v20167_v3 = vld [vmem:[%s22620_s27 + $0xc90] ss:$8 sps:$4 sm:$0xff]  }
 0x2b2   : > { %v23721_v55 = vpop.f32.mrf.mxu1  ;;  %4400 = vmatprep.subr.bf16.mxu1 %v20139_v17  ;;  %v20160_v6 = vld [vmem:[%s22620_s27 + $0xcc4] ss:$8 sps:$4 sm:$0xff]   ;;  %v20163_v17 = vld [vmem:[%s22620_s27 + $0xcb4] ss:$8 sps:$4 sm:$0xff]   ;;  %v4212_v34 = vrot.slane %v22799_v32, 6 }
 0x2b4   : > { %v2062_v61 = vpop.f32.mrf.mxu1  ;;  %3851 = vmatmul.mubr.bf16.gmra.mxu1 %v23248_v41 }
 0x2b5   : > { %v2079_v16 = vadd.f32 %v2062_v61, %v23632_v18  ;;  %4401 = vmatpush1.bf16.msra.mxu1 %v20137_v45  ;;  %4424 = vmatprep.mubr.bf16.mxu1 %v4217_v15  ;;  %v20169_v45 = vld [vmem:[%s22620_s27 + $0xc94] ss:$8 sps:$4 sm:$0xff]   ;;  %v4214_v61 = vsel %vm4211_vm10, %v4212_v34, %v4213_v24  ;;  %v20208_v34 = vld [vmem:[%s22620_s27 + $0xd04] ss:$8 sps:$4 sm:$0xff]  }
 0x2b6   : > { %v2064_v63 = vpop.f32.mrf.mxu1  ;;  %4402 = vmatprep.subr.bf16.mxu1 %v20142_v29  ;;  %v20172_v29 = vld [vmem:[%s22620_s27 + $0xc84] ss:$8 sps:$4 sm:$0xff]  }
 0x2b7   : > { %v2080_v40 = vadd.f32 %v2064_v63, %v23636_v2  ;;  %v23733_v41 = vadd.f32 %v2369_v37, %v2079_v16  ;;  %v20151_v2 = vld [vmem:[%s22620_s27 + $0xcf4] ss:$8 sps:$4 sm:$0xff]   ;;  %v20170_v37 = vld [vmem:[%s22620_s27 + $0xc80] ss:$8 sps:$4 sm:$0xff]  }
 0x2b8   : > { %v2066_v8 = vpop.f32.mrf.mxu1 }
 0x2b9   : > { %v2081_v18 = vadd.f32 %v2066_v8, %v23641_v44  ;;  %4403 = vmatpush1.bf16.msra.mxu1 %v20140_v9  ;;  %v23737_v46 = vadd.f32 %v2371_v42, %v2080_v40  ;;  %v20152_v44 = vld [vmem:[%s22620_s27 + $0xce0] ss:$8 sps:$4 sm:$0xff]  }
 0x2ba   : > { %4404 = vmatprep.subr.bf16.mxu1 %v20145_v1  ;;  %v23757_v9 = vpop.f32.mrf.mxu1 }
 0x2bb   : > { %v2388_v13 = vadd.f32 %v2373_v38, %v2081_v18  ;;  %v20175_v18 = vld [vmem:[%s22620_s27 + $0xd74] ss:$8 sps:$4 sm:$0xff]   ;;  %v20178_v38 = vld [vmem:[%s22620_s27 + $0xd64] ss:$8 sps:$4 sm:$0xff]  }
 0x2bd   : > { %4405 = vmatpush1.bf16.msra.mxu1 %v20143_v26 }
 0x2be   : > { %4406 = vmatprep.subr.bf16.mxu1 %v20148_v36  ;;  %v20173_v36 = vld [vmem:[%s22620_s27 + $0xd70] ss:$8 sps:$4 sm:$0xff]  }
 0x2c1   : > { %4407 = vmatpush1.bf16.msra.mxu1 %v20146_v56  ;;  %v20187_v56 = vld [vmem:[%s22620_s27 + $0xe74] ss:$8 sps:$4 sm:$0xff]  }
 0x2c2   : > { %4408 = vmatprep.subr.bf16.mxu1 %v20151_v2  ;;  %v20193_v2 = vld [vmem:[%s22620_s27 + $0xe64] ss:$8 sps:$4 sm:$0xff]   ;;  %4843 = vmatprep.subr.bf16.mxu0 %v20187_v56  ;;  %v20221_v56 = vld [vmem:[%s22620_s27 + $0xe10] ss:$8 sps:$4 sm:$0xff]  }
 0x2c5   : > { %4409 = vmatpush2.bf16.msra.mxu1 %v20149_v58  ;;  %v20179_v58 = vld [vmem:[%s22620_s27 + $0xd50] ss:$8 sps:$4 sm:$0xff]  }
 0x2c6   : > { %4410 = vmatprep.subr.bf16.mxu1 %v20154_v39  ;;  %v20199_v39 = vld [vmem:[%s22620_s27 + $0xe54] ss:$8 sps:$4 sm:$0xff]  }
 0x2c9   : > { %4411 = vmatpush2.bf16.msra.mxu1 %v20152_v44  ;;  %v20184_v44 = vld [vmem:[%s22620_s27 + $0xd44] ss:$8 sps:$4 sm:$0xff]  }
 0x2ca   : > { %4412 = vmatprep.subr.bf16.mxu1 %v20157_v51  ;;  %v20197_v51 = vld [vmem:[%s22620_s27 + $0xe50] ss:$8 sps:$4 sm:$0xff]  }
 0x2cd   : > { %4413 = vmatpush2.bf16.msra.mxu1 %v20155_v57  ;;  %v20182_v57 = vld [vmem:[%s22620_s27 + $0xd40] ss:$8 sps:$4 sm:$0xff]  }
 0x2ce   : > { %4414 = vmatprep.subr.bf16.mxu1 %v20160_v6  ;;  %v20205_v6 = vld [vmem:[%s22620_s27 + $0xe44] ss:$8 sps:$4 sm:$0xff]  }
 0x2d1   : > { %4415 = vmatpush2.bf16.msra.mxu1 %v20158_v10  ;;  %v20190_v10 = vld [vmem:[%s22620_s27 + $0xd34] ss:$8 sps:$4 sm:$0xff]  }
 0x2d2   : > { %4416 = vmatprep.subr.bf16.mxu1 %v20163_v17  ;;  %v20203_v17 = vld [vmem:[%s22620_s27 + $0xe40] ss:$8 sps:$4 sm:$0xff]  }
 0x2d5   : > { %4417 = vmatpush2.bf16.msra.mxu1 %v20161_v4  ;;  %v20188_v4 = vld [vmem:[%s22620_s27 + $0xd30] ss:$8 sps:$4 sm:$0xff]  }
 0x2d6   : > { %4418 = vmatprep.subr.bf16.mxu1 %v20166_v7  ;;  %v20211_v7 = vld [vmem:[%s22620_s27 + $0xe34] ss:$8 sps:$4 sm:$0xff]  }
 0x2d9   : > { %4419 = vmatpush2.bf16.msra.mxu1 %v20164_v25  ;;  %v20196_v25 = vld [vmem:[%s22620_s27 + $0xd24] ss:$8 sps:$4 sm:$0xff]  }
 0x2da   : > { %4420 = vmatprep.subr.bf16.mxu1 %v20169_v45  ;;  %v20209_v45 = vld [vmem:[%s22620_s27 + $0xe30] ss:$8 sps:$4 sm:$0xff]  }
 0x2dd   : > { %4421 = vmatpush2.bf16.msra.mxu1 %v20167_v3  ;;  %v20194_v3 = vld [vmem:[%s22620_s27 + $0xd20] ss:$8 sps:$4 sm:$0xff]  }
 0x2de   : > { %4422 = vmatprep.subr.bf16.mxu1 %v20172_v29  ;;  %v20202_v29 = vld [vmem:[%s22620_s27 + $0xd14] ss:$8 sps:$4 sm:$0xff]  }
 0x2e1   : > { %4423 = vmatpush2.bf16.msra.mxu1 %v20170_v37  ;;  %v20200_v37 = vld [vmem:[%s22620_s27 + $0xd10] ss:$8 sps:$4 sm:$0xff]  }
 0x2e2   : > { %5064 = vmatprep.subr.bf16.mxu1 %v20175_v18  ;;  %v20217_v18 = vld [vmem:[%s22620_s27 + $0xe24] ss:$8 sps:$4 sm:$0xff]  }
 0x2e4   : > { %v2640_v15 = vpop.f32.mrf.mxu1  ;;  %4425 = vmatmul.mubr.bf16.vlgmr.msra.gmra.mxu1 %v4214_v61  ;;  %v20206_v61 = vld [vmem:[%s22620_s27 + $0xd00] ss:$8 sps:$4 sm:$0xff]  }
 0x2e5   : > { %v23763_v1 = vadd.f32 %v2640_v15, %v23692_v0  ;;  %4434 = vmatprep.mubr.bf16.mxu1 %v23268_v23  ;;  %5065 = vmatpush1.bf16.msra.mxu1 %v20173_v36  ;;  %v23821_v15 = vpop.f32.mrf.mxu0 }
 0x2e6   : > { %v2642_v16 = vpop.f32.mrf.mxu1  ;;  %5066 = vmatprep.subr.bf16.mxu1 %v20178_v38 }
 0x2e7   : > { %v23767_v42 = vadd.f32 %v2642_v16, %v23696_v11  ;;  %v23823_v16 = vpop.f32.mrf.mxu0 }
 0x2e8   : > { %v2644_v63 = vpop.f32.mrf.mxu1 }
 0x2e9   : > { %v23770_v32 = vadd.f32 %v2644_v63, %v23703_v53  ;;  %v23825_v63 = vpop.f32.mrf.mxu0 }
 0x2ea   : > { %v23772_v40 = vpop.f32.mrf.mxu1 }
 0x2ec   : > { %v2650_v59 = vpop.f32.mrf.mxu1  ;;  %4435 = vmatmul.mubr.bf16.gmra.mxu1 %v23273_v21 }
 0x2ed   : > { %v23776_v24 = vadd.f32 %v2650_v59, %v23713_v33  ;;  %4444 = vmatprep.mubr.bf16.mxu1 %v23276_v20  ;;  %v23827_v59 = vpop.f32.mrf.mxu0 }
 0x2ee   : > { %v2652_v23 = vpop.f32.mrf.mxu1 }
 0x2ef   : > { %v23780_v0 = vadd.f32 %v2652_v23, %v23719_v50  ;;  %v23829_v23 = vpop.f32.mrf.mxu0 }
 0x2f0   : > { %v23782_v11 = vpop.f32.mrf.mxu1 }
 0x2f1   : > { %v23834_v36 = vpop.f32.mrf.mxu0 }
 0x2f2   : > { %v23784_v53 = vpop.f32.mrf.mxu1 }
 0x2f3   : > { %v23837_v38 = vpop.f32.mrf.mxu0 }
 0x2f4   : > { %v2660_v26 = vpop.f32.mrf.mxu1  ;;  %4445 = vmatmul.mubr.bf16.gmra.mxu1 %v23279_v30  ;;  %v20185_v30 = vld [vmem:[%s22620_s27 + $0xe70] ss:$8 sps:$4 sm:$0xff]  }
 0x2f5   : > { %v23788_v21 = vadd.f32 %v2660_v26, %v23733_v41  ;;  %v20176_v41 = vld [vmem:[%s22620_s27 + $0xd60] ss:$8 sps:$4 sm:$0xff]   ;;  %4844 = vmatpush1.bf16.msra.mxu0 %v20185_v30  ;;  %v20212_v26 = vld [vmem:[%s22620_s27 + $0xdf0] ss:$8 sps:$4 sm:$0xff]  }
 0x2f6   : > { %v2662_v20 = vpop.f32.mrf.mxu1  ;;  %5067 = vmatpush1.bf16.msra.mxu1 %v20176_v41  ;;  %4845 = vmatprep.subr.bf16.mxu0 %v20193_v2  ;;  %v20218_v30 = vld [vmem:[%s22620_s27 + $0xde0] ss:$8 sps:$4 sm:$0xff]   ;;  %v20220_v41 = vld [vmem:[%s22620_s27 + $0xde4] ss:$8 sps:$4 sm:$0xff]   ;;  %v20223_v2 = vld [vmem:[%s22620_s27 + $0xe14] ss:$8 sps:$4 sm:$0xff]  }
 0x2f7   : > { %v23791_v33 = vadd.f32 %v2662_v20, %v23737_v46  ;;  %v20181_v46 = vld [vmem:[%s22620_s27 + $0xd54] ss:$8 sps:$4 sm:$0xff]  }
 0x2f8   : > { %v2664_v50 = vpop.f32.mrf.mxu1  ;;  %5068 = vmatprep.subr.bf16.mxu1 %v20181_v46  ;;  %v20214_v20 = vld [vmem:[%s22620_s27 + $0xdf4] ss:$8 sps:$4 sm:$0xff]  }
 0x2f9   : > { %26513 = vst [vmem:[#allocation12_spill] sm:$0xff] %v23791_v33  ;;  %v23793_v8 = vadd.f32 %v2664_v50, %v2388_v13  ;;  %v20191_v13 = vld [vmem:[%s22620_s27 + $0xe60] ss:$8 sps:$4 sm:$0xff]  }
 0x2fa   : > { %4846 = vmatpush1.bf16.msra.mxu0 %v20191_v13  ;;  %5069 = vmatpush1.bf16.msra.mxu1 %v20179_v58  ;;  %v20215_v50 = vld [vmem:[%s22620_s27 + $0xe20] ss:$8 sps:$4 sm:$0xff]   ;;  %v23842_v46 = vpop.f32.mrf.mxu1  ;;  %v20226_v13 = vld [vmem:[%s22620_s27 + $0xdd4] ss:$8 sps:$4 sm:$0xff]   ;;  %v23846_v58 = vpop.f32.mrf.mxu0 }
 0x2fb   : > { %26514 = vst [vmem:[#allocation13_spill] sm:$0xff] %v23793_v8  ;;  %4847 = vmatprep.subr.bf16.mxu0 %v20199_v39  ;;  %5070 = vmatprep.subr.bf16.mxu1 %v20184_v44  ;;  %v20224_v44 = vld [vmem:[%s22620_s27 + $0xdd0] ss:$8 sps:$4 sm:$0xff]  }
 0x2fe   : > { %4848 = vmatpush1.bf16.msra.mxu0 %v20197_v51  ;;  %5071 = vmatpush1.bf16.msra.mxu1 %v20182_v57  ;;  %v20229_v51 = vld [vmem:[%s22620_s27 + $0xe04] ss:$8 sps:$4 sm:$0xff]   ;;  %v20227_v57 = vld [vmem:[%s22620_s27 + $0xe00] ss:$8 sps:$4 sm:$0xff]  }
 0x2ff   : > { %4849 = vmatprep.subr.bf16.mxu0 %v20205_v6  ;;  %5072 = vmatprep.subr.bf16.mxu1 %v20190_v10  ;;  %v23853_v6 = vpop.f32.mrf.mxu0 }
 0x302   : > { %4850 = vmatpush1.bf16.msra.mxu0 %v20203_v17  ;;  %5073 = vmatpush1.bf16.msra.mxu1 %v20188_v4  ;;  %v20230_v17 = vld [vmem:[%s22620_s27 + $0xdc0] ss:$8 sps:$4 sm:$0xff]   ;;  %v20232_v4 = vld [vmem:[%s22620_s27 + $0xdc4] ss:$8 sps:$4 sm:$0xff]  }
 0x303   : > { %4851 = vmatprep.subr.bf16.mxu0 %v20211_v7  ;;  %5074 = vmatprep.subr.bf16.mxu1 %v20196_v25  ;;  %v20233_v7 = vld [vmem:[%s22620_s27 + $0xef0] ss:$8 sps:$4 sm:$0xff]   ;;  %v20235_v25 = vld [vmem:[%s22620_s27 + $0xef4] ss:$8 sps:$4 sm:$0xff]  }
 0x306   : > { %4852 = vmatpush1.bf16.msra.mxu0 %v20209_v45  ;;  %5075 = vmatpush1.bf16.msra.mxu1 %v20194_v3  ;;  %v23861_v45 = vpop.f32.mrf.mxu0 }
 0x307   : > { %5076 = vmatprep.subr.bf16.mxu1 %v20202_v29  ;;  %4853 = vmatprep.subr.bf16.mxu0 %v20217_v18  ;;  %v20236_v29 = vld [vmem:[%s22620_s27 + $0xdb0] ss:$8 sps:$4 sm:$0xff]   ;;  %v20244_v18 = vld [vmem:[%s22620_s27 + $0xda4] ss:$8 sps:$4 sm:$0xff]  }
 0x30a   : > { %5077 = vmatpush1.bf16.msra.mxu1 %v20200_v37  ;;  %4854 = vmatpush1.bf16.msra.mxu0 %v20215_v50  ;;  %v20238_v37 = vld [vmem:[%s22620_s27 + $0xdb4] ss:$8 sps:$4 sm:$0xff]   ;;  %v20242_v50 = vld [vmem:[%s22620_s27 + $0xda0] ss:$8 sps:$4 sm:$0xff]  }
 0x30b   : > { %5078 = vmatprep.subr.bf16.mxu1 %v20208_v34  ;;  %4855 = vmatprep.subr.bf16.mxu0 %v20223_v2  ;;  %v20239_v34 = vld [vmem:[%s22620_s27 + $0xee0] ss:$8 sps:$4 sm:$0xff]   ;;  %v20253_v2 = vld [vmem:[%s22620_s27 + $0xec4] ss:$8 sps:$4 sm:$0xff]  }
 0x30e   : > { %5079 = vmatpush1.bf16.msra.mxu1 %v20206_v61  ;;  %4856 = vmatpush1.bf16.msra.mxu0 %v20221_v56  ;;  %v20241_v61 = vld [vmem:[%s22620_s27 + $0xee4] ss:$8 sps:$4 sm:$0xff]   ;;  %v20250_v56 = vld [vmem:[%s22620_s27 + $0xd94] ss:$8 sps:$4 sm:$0xff]  }
 0x30f   : > { %5080 = vmatprep.subr.bf16.mxu1 %v20214_v20  ;;  %4857 = vmatprep.subr.bf16.mxu0 %v20229_v51  ;;  %v20248_v51 = vld [vmem:[%s22620_s27 + $0xd90] ss:$8 sps:$4 sm:$0xff]  }
 0x312   : > { %5081 = vmatpush2.bf16.msra.mxu1 %v20212_v26  ;;  %4858 = vmatpush1.bf16.msra.mxu0 %v20227_v57  ;;  %v23869_v26 = vpop.f32.mrf.mxu0  ;;  %v20251_v57 = vld [vmem:[%s22620_s27 + $0xec0] ss:$8 sps:$4 sm:$0xff]  }
 0x313   : > { %5082 = vmatprep.subr.bf16.mxu1 %v20220_v41  ;;  %4859 = vmatprep.subr.bf16.mxu0 %v20235_v25  ;;  %26515 = vst [vmem:[#allocation15_spill] sm:$0xff] %v23869_v26  ;;  %v20247_v41 = vld [vmem:[%s22620_s27 + $0xed4] ss:$8 sps:$4 sm:$0xff]  }
 0x316   : > { %5083 = vmatpush2.bf16.msra.mxu1 %v20218_v30  ;;  %4860 = vmatpush2.bf16.msra.mxu0 %v20233_v7  ;;  %v20245_v30 = vld [vmem:[%s22620_s27 + $0xed0] ss:$8 sps:$4 sm:$0xff]  }
 0x317   : > { %5084 = vmatprep.subr.bf16.mxu1 %v20226_v13  ;;  %4861 = vmatprep.subr.bf16.mxu0 %v20241_v61  ;;  %v23879_v13 = vpop.f32.mrf.mxu0 }
 0x318   : > { %26516 = vst [vmem:[#allocation14_spill] sm:$0xff] %v23879_v13 }
 0x319   : > { %v23887_v7 = vpop.f32.mrf.mxu0 }
 0x31a   : > { %5085 = vmatpush2.bf16.msra.mxu1 %v20224_v44  ;;  %4862 = vmatpush2.bf16.msra.mxu0 %v20239_v34  ;;  %26517 = vst [vmem:[#allocation18_spill] sm:$0xff] %v23887_v7  ;;  %v20262_v34 = vld [vmem:[%s22620_s27 + $0x1074] ss:$8 sps:$4 sm:$0xff]  }
 0x31b   : > { %5086 = vmatprep.subr.bf16.mxu1 %v20232_v4  ;;  %4863 = vmatprep.subr.bf16.mxu0 %v20247_v41  ;;  %v20259_v4 = vld [vmem:[%s22620_s27 + $0xeb4] ss:$8 sps:$4 sm:$0xff]   ;;  %v23894_v61 = vpop.f32.mrf.mxu0 }
 0x31d   : > { %v23900_v41 = vpop.f32.mrf.mxu0 }
 0x31e   : > { %5087 = vmatpush2.bf16.msra.mxu1 %v20230_v17  ;;  %4864 = vmatpush2.bf16.msra.mxu0 %v20245_v30  ;;  %v20256_v17 = vld [vmem:[%s22620_s27 + $0xd84] ss:$8 sps:$4 sm:$0xff]   ;;  %v20263_v30 = vld [vmem:[%s22620_s27 + $0xea0] ss:$8 sps:$4 sm:$0xff]  }
 0x31f   : > { %5088 = vmatprep.subr.bf16.mxu1 %v20238_v37  ;;  %4865 = vmatprep.subr.bf16.mxu0 %v20253_v2  ;;  %v20257_v37 = vld [vmem:[%s22620_s27 + $0xeb0] ss:$8 sps:$4 sm:$0xff]  }
 0x322   : > { %5089 = vmatpush2.bf16.msra.mxu1 %v20236_v29  ;;  %v20254_v29 = vld [vmem:[%s22620_s27 + $0xd80] ss:$8 sps:$4 sm:$0xff]   ;;  %4866 = vmatpush2.bf16.msra.mxu0 %v20251_v57  ;;  %v23906_v57 = vpop.f32.mrf.mxu0 }
 0x323   : > { %5090 = vmatprep.subr.bf16.mxu1 %v20244_v18  ;;  %4867 = vmatprep.subr.bf16.mxu0 %v20259_v4 }
 0x324   : > { %v23848_v39 = vpop.f32.mrf.mxu1 }
 0x326   : > { %v23855_v10 = vpop.f32.mrf.mxu1  ;;  %5091 = vmatpush2.bf16.msra.mxu1 %v20242_v50  ;;  %v20265_v50 = vld [vmem:[%s22620_s27 + $0xea4] ss:$8 sps:$4 sm:$0xff]   ;;  %4868 = vmatpush2.bf16.msra.mxu0 %v20257_v37  ;;  %v23912_v37 = vpop.f32.mrf.mxu0 }
 0x327   : > { %5092 = vmatprep.subr.bf16.mxu1 %v20250_v56  ;;  %4869 = vmatprep.subr.bf16.mxu0 %v20265_v50  ;;  %v20271_v56 = vld [vmem:[%s22620_s27 + $0xe94] ss:$8 sps:$4 sm:$0xff]  }
 0x328   : > { %v23863_v3 = vpop.f32.mrf.mxu1  ;;  %v23917_v50 = vpop.f32.mrf.mxu0 }
 0x32a   : > { %v23871_v20 = vpop.f32.mrf.mxu1  ;;  %5093 = vmatpush2.bf16.msra.mxu1 %v20248_v51  ;;  %4870 = vmatpush2.bf16.msra.mxu0 %v20263_v30  ;;  %v20269_v51 = vld [vmem:[%s22620_s27 + $0xe90] ss:$8 sps:$4 sm:$0xff]   ;;  %v23921_v13 = vpop.f32.mrf.mxu0 }
 0x32b   : > { %5094 = vmatprep.subr.bf16.mxu1 %v20256_v17  ;;  %4871 = vmatprep.subr.bf16.mxu0 %v20271_v56  ;;  %v20277_v17 = vld [vmem:[%s22620_s27 + $0xe84] ss:$8 sps:$4 sm:$0xff]   ;;  %26523 = vst [vmem:[#allocation22_spill] sm:$0xff] %v23921_v13 }
 0x32c   : > { %v23881_v44 = vpop.f32.mrf.mxu1  ;;  %v23925_v8 = vpop.f32.mrf.mxu0 }
 0x32d   : > { %26525 = vst [vmem:[#allocation24_spill] sm:$0xff] %v23925_v8  ;;  %v1188_v8 = vadd.f32 %v23449_v19, %v23478_v5  ;;  %v1208_v19 = vadd.f32 %v23547_v14, %v23568_v35  ;;  %v2979_v14 = vadd.f32 %v23825_v63, %v23767_v42 }
 0x32e   : > { %v23889_v25 = vpop.f32.mrf.mxu1  ;;  %5095 = vmatpush2.bf16.msra.mxu1 %v20254_v29  ;;  %4872 = vmatpush2.bf16.msra.mxu0 %v20269_v51  ;;  %v20275_v29 = vld [vmem:[%s22620_s27 + $0xe80] ss:$8 sps:$4 sm:$0xff]   ;;  %v23927_v26 = vpop.f32.mrf.mxu0 }
 0x32f   : > { %5632 = vmatprep.subr.bf16.mxu1 %v20262_v34  ;;  %4873 = vmatprep.subr.bf16.mxu0 %v20277_v17  ;;  %v20283_v34 = vld [vmem:[%s22620_s27 + $0xf74] ss:$8 sps:$4 sm:$0xff]   ;;  %26526 = vst [vmem:[#allocation25_spill] sm:$0xff] %v23927_v26 }
 0x330   : > { %v23897_v18 = vpop.f32.mrf.mxu1  ;;  %v23929_v17 = vpop.f32.mrf.mxu0 }
 0x331   : > { %26518 = vst [vmem:[#allocation20_spill] sm:$0xff] %v23897_v18  ;;  %26527 = vst [vmem:[#allocation26_spill] sm:$0xff] %v23929_v17 }
 0x332   : > { %v23903_v2 = vpop.f32.mrf.mxu1  ;;  %4874 = vmatpush2.bf16.msra.mxu0 %v20275_v29 }
 0x333   : > { %26519 = vst [vmem:[#allocation16_spill] sm:$0xff] %v23903_v2  ;;  %5340 = vmatprep.subr.bf16.mxu0 %v20283_v34  ;;  %v1492_v2 = vadd.f32 %v23591_v22, %v1188_v8 }
 0x334   : > { %v23909_v4 = vpop.f32.mrf.mxu1 }
 0x335   : > { %26520 = vst [vmem:[#allocation17_spill] sm:$0xff] %v23909_v4 }
 0x336   : > { %v23915_v7 = vpop.f32.mrf.mxu1 }
 0x337   : > { %26521 = vst [vmem:[#allocation19_spill] sm:$0xff] %v23915_v7  ;;  %v23931_v7 = vpop.f32.mrf.mxu0 }
 0x338   : > { %v23919_v30 = vpop.f32.mrf.mxu1  ;;  %26528 = vst [vmem:[#allocation27_spill] sm:$0xff] %v23931_v7  ;;  %v1198_v7 = vadd.f32 %v23488_v47, %v23498_v12  ;;  %v2978_v47 = vadd.f32 %v23823_v16, %v23763_v1  ;;  %v1500_v12 = vadd.f32 %v23680_v62, %v1208_v19  ;;  %v2980_v62 = vadd.f32 %v23827_v59, %v23770_v32  ;;  %v26534_v59 = vld [vmem:[#allocation11_spill] sm:$0xff] }
 0x339   : > { %26522 = vst [vmem:[#allocation21_spill] sm:$0xff] %v23919_v30  ;;  %v23935_v34 = vpop.f32.mrf.mxu0  ;;  %v2384_v1 = vadd.f32 %v23698_v52, %v23717_v48 }
 0x33a   : > { %v23923_v56 = vpop.f32.mrf.mxu1  ;;  %26530 = vst [vmem:[#allocation29_spill] sm:$0xff] %v23935_v34  ;;  %v1789_v34 = vadd.f32 %v23559_v60, %v1492_v2  ;;  %v3269_v42 = vadd.f32 %v23863_v3, %v2980_v62  ;;  %v4469_v3 = vsub.s32 1, %v26534_v59 }
 0x33b   : > { %26524 = vst [vmem:[#allocation23_spill] sm:$0xff] %v23923_v56  ;;  %v23939_v13 = vpop.f32.mrf.mxu0 }
 0x33c   : > { %26532 = vst [vmem:[#allocation31_spill] sm:$0xff] %v23939_v13  ;;  %v1496_v13 = vadd.f32 %v23614_v28, %v1198_v7 }
 0x33e   : > { %v1793_v22 = vadd.f32 %v23602_v43, %v1496_v13  ;;  %v3268_v43 = vadd.f32 %v23855_v10, %v2979_v14 }
 0x340   : > { %v2078_v28 = vadd.f32 %v23721_v55, %v1793_v22 }
 0x342   : > { %v2385_v16 = vadd.f32 %v23709_v27, %v2078_v28  ;;  %v3573_v27 = vadd.f32 %v23900_v41, %v3268_v43 }
 0x344   : > { %v2676_v52 = vadd.f32 %v23784_v53, %v2385_v16 }
 0x357   : > { %v4137_v26 = vpop.f32.mrf.mxu0 }
 0x359   : > { %v4139_v18 = vpop.f32.mrf.mxu0 }
 0x364   : > { %v3832_v51 = vpop.f32.mrf.mxu1 }
 0x366   : > { %v3834_v33 = vpop.f32.mrf.mxu1 }
 0x368   : > { %v3836_v4 = vpop.f32.mrf.mxu1 }
 0x36a   : > { %v23933_v29 = vpop.f32.mrf.mxu1 }
 0x36b   : > { %26529 = vst [vmem:[#allocation28_spill] sm:$0xff] %v23933_v29 }
 0x36c   : > { %v23937_v30 = vpop.f32.mrf.mxu1 }
 0x36d   : > { %26531 = vst [vmem:[#allocation30_spill] sm:$0xff] %v23937_v30  ;;  %v23955_v30 = vpop.f32.mrf.mxu0 }
 0x36e   : > { %v23941_v56 = vpop.f32.mrf.mxu1 }
 0x36f   : > { %26533 = vst [vmem:[#allocation32_spill] sm:$0xff] %v23941_v56  ;;  %v2074_v56 = vadd.f32 %v23700_v54, %v1789_v34  ;;  %v23966_v8 = vpop.f32.mrf.mxu0  ;;  %v3267_v54 = vadd.f32 %v23848_v39, %v2978_v47  ;;  %v2675_v39 = vadd.f32 %v23782_v11, %v2384_v1  ;;  %v2983_v11 = vadd.f32 %v23837_v38, %v23780_v0  ;;  %v26536_v47 = vld [vmem:[#allocation16_spill] sm:$0xff]  ;;  %v26543_v1 = vld [vmem:[#allocation14_spill] sm:$0xff] }
 0x370   : > { %v23946_v17 = vpop.f32.mrf.mxu1 }
 0x371   : > { %v2381_v60 = vadd.f32 %v23673_v31, %v2074_v56  ;;  %v1797_v31 = vadd.f32 %v23665_v49, %v1500_v12  ;;  %v23981_v55 = vpop.f32.mrf.mxu0  ;;  %v2982_v49 = vadd.f32 %v23834_v36, %v23776_v24  ;;  %v3574_v24 = vadd.f32 %v23906_v57, %v3269_v42  ;;  %v26535_v57 = vld [vmem:[#allocation20_spill] sm:$0xff]  ;;  %v26544_v42 = vld [vmem:[#allocation18_spill] sm:$0xff] }
 0x372   : > { %v23951_v29 = vpop.f32.mrf.mxu1  ;;  %v3272_v53 = vadd.f32 %v23889_v25, %v2983_v11  ;;  %v2984_v2 = vadd.f32 %v23846_v58, %v2675_v39  ;;  %v26538_v28 = vld [vmem:[#allocation28_spill] sm:$0xff] }
 0x373   : > { %v2672_v35 = vadd.f32 %v23772_v40, %v2381_v60  ;;  %v3572_v40 = vadd.f32 %v23894_v61, %v3267_v54  ;;  %v2082_v63 = vadd.f32 %v23757_v9, %v1797_v31  ;;  %v3271_v9 = vadd.f32 %v23881_v44, %v2982_v49  ;;  %v26537_v60 = vld [vmem:[#allocation17_spill] sm:$0xff] }
 0x374   : > { %v23959_v5 = vpop.f32.mrf.mxu1  ;;  %v3862_v61 = vadd.f32 %v3834_v33, %v3573_v27  ;;  %v3863_v56 = vadd.f32 %v3836_v4, %v3574_v24  ;;  %v2986_v33 = vadd.f32 %v23861_v45, %v23788_v21  ;;  %v3273_v19 = vadd.f32 %v26535_v57, %v2984_v2  ;;  %v22278_v4 = vld [vmem:[%s22731_s24 + $0x8] sm:$0xff]  ;;  %v26542_v31 = vld [vmem:[#allocation13_spill] sm:$0xff] }
 0x375   : > { %v2981_v10 = vadd.f32 %v23829_v23, %v2672_v35  ;;  %v3861_v48 = vadd.f32 %v3832_v51, %v3572_v40  ;;  %v4149_v23 = vpop.f32.mrf.mxu0  ;;  %v2389_v36 = vadd.f32 %v23821_v15, %v2082_v63  ;;  %v22277_v51 = vld [vmem:[%s22731_s24] sm:$0xff]  ;;  %v3576_v58 = vadd.f32 %v23917_v50, %v3271_v9  ;;  %v26539_v21 = vld [vmem:[#allocation22_spill] sm:$0xff]  ;;  %v26547_v27 = vld [vmem:[#allocation24_spill] sm:$0xff] }
 0x376   : > { %v23973_v7 = vpop.f32.mrf.mxu1  ;;  %v24008_v34 = vrot.slane %v22277_v51, %v4469_v3  ;;  %v3577_v45 = vadd.f32 %v26539_v21, %v3272_v53  ;;  %v26541_v35 = vld [vmem:[#allocation15_spill] sm:$0xff]  ;;  %v2988_v16 = vadd.f32 %v26543_v1, %v26542_v31  ;;  %v26545_v39 = vld [vmem:[#allocation30_spill] sm:$0xff]  ;;  %v26546_v49 = vld [vmem:[#allocation32_spill] sm:$0xff] }
 0x377   : > { %v3270_v13 = vadd.f32 %v23871_v20, %v2981_v10  ;;  %v2985_v20 = vadd.f32 %v23853_v6, %v2676_v52  ;;  %v4166_v44 = vadd.f32 %v4137_v26, %v3861_v48  ;;  %v2680_v0 = vadd.f32 %v23842_v46, %v2389_v36  ;;  %v4151_v15 = vpop.f32.mrf.mxu0  ;;  %v26549_v24 = vld [vmem:[#allocation25_spill] sm:$0xff]  ;;  %v26550_v53 = vld [vmem:[#allocation26_spill] sm:$0xff] }
 0x378   : > { %v23991_v32 = vpop.f32.mrf.mxu1  ;;  %v4167_v6 = vadd.f32 %v4139_v18, %v3862_v61  ;;  %v24017_v26 = vrot.slane %v22278_v4, %v4469_v3  ;;  %v3275_v46 = vadd.f32 %v26537_v60, %v2986_v33  ;;  %v4168_v18 = vadd.f32 %v23955_v30, %v3863_v56  ;;  %v26548_v30 = vld [vmem:[#allocation19_spill] sm:$0xff] }
 0x379   : > { %v3575_v38 = vadd.f32 %v23912_v37, %v3270_v13  ;;  %v3274_v12 = vadd.f32 %v26536_v47, %v2985_v20  ;;  %v26540_v37 = vld [vmem:[#allocation12_spill] sm:$0xff]  ;;  %v2989_v40 = vadd.f32 %v26544_v42, %v2680_v0  ;;  %v4153_v63 = vpop.f32.mrf.mxu0  ;;  %v3865_v10 = vadd.f32 %v26545_v39, %v3576_v58  ;;  %v26552_v47 = vld [vmem:[#allocation23_spill] sm:$0xff] }
 0x37a   : > { %v24004_v41 = vpop.f32.mrf.mxu1  ;;  %v2987_v50 = vadd.f32 %v26541_v35, %v26540_v37  ;;  %v3866_v52 = vadd.f32 %v26546_v49, %v3577_v45  ;;  %v3578_v3 = vadd.f32 %v26547_v27, %v3273_v19  ;;  %v3580_v2 = vadd.f32 %v26550_v53, %v3275_v46  ;;  %v26553_v60 = vld [vmem:[#allocation27_spill] sm:$0xff]  ;;  %v26554_v37 = vld [vmem:[#allocation29_spill] sm:$0xff] }
 0x37b   : > { %v3864_v54 = vadd.f32 %v26538_v28, %v3575_v38  ;;  %v3579_v36 = vadd.f32 %v26549_v24, %v3274_v12  ;;  %v26551_v38 = vld [vmem:[#allocation21_spill] sm:$0xff]  ;;  %v4170_v19 = vadd.f32 %v23981_v55, %v3865_v10  ;;  %v3278_v12 = vadd.f32 %v26552_v47, %v2989_v40 }
 0x37c   : > { %v3276_v61 = vadd.f32 %v26548_v30, %v2987_v50  ;;  %v3277_v58 = vadd.f32 %v26551_v38, %v2988_v16 }
 0x37d   : > { %v4169_v20 = vadd.f32 %v23966_v8, %v3864_v54  ;;  %v3868_v4 = vadd.f32 %v23951_v29, %v3579_v36  ;;  %v3869_v29 = vadd.f32 %v23959_v5, %v3580_v2 }
 0x37e   : > { %v3581_v46 = vadd.f32 %v26553_v60, %v3276_v61  ;;  %v3582_v35 = vadd.f32 %v26554_v37, %v3277_v58 }
 0x37f   : > { %v4173_v16 = vadd.f32 %v4153_v63, %v3868_v4 }
 0x380   : > { %v3870_v42 = vadd.f32 %v23973_v7, %v3581_v46  ;;  %v3871_v49 = vadd.f32 %v23991_v32, %v3582_v35 }
 0x3a4   : > { %v4426_v25 = vpop.f32.mrf.mxu1 }
 0x3a5   : > { %v4455_v22 = vadd.f32 %v4426_v25, %v4166_v44  ;;  %v3867_v44 = vadd.f32 %v23946_v17, %v3578_v3  ;;  %v4157_v25 = vpop.f32.mrf.mxu0 }
 0x3a6   : > { %v4428_v14 = vpop.f32.mrf.mxu1  ;;  %v4174_v63 = vadd.f32 %v4157_v25, %v3869_v29 }
 0x3a7   : > { %v24026_v43 = vadd.f32 %v24008_v34, %v4455_v22  ;;  %v4456_v62 = vadd.f32 %v4428_v14, %v4167_v6  ;;  %v4171_v6 = vadd.f32 %v4149_v23, %v3866_v52  ;;  %v4172_v14 = vadd.f32 %v4151_v15, %v3867_v44  ;;  %v4159_v23 = vpop.f32.mrf.mxu0  ;;  %v26555_v15 = vld [vmem:[#allocation31_spill] sm:$0xff] }
 0x3a8   : > { %v4430_v48 = vpop.f32.mrf.mxu1  ;;  %v3583_v40 = vadd.f32 %v26555_v15, %v3278_v12  ;;  %v4175_v36 = vadd.f32 %v4159_v23, %v3870_v42 }
 0x3a9   : > { %v4499_v13 = vmin.f32 %v24026_v43, 0.0  ;;  %v24037_v9 = vadd.f32 %v24017_v26, %v4456_v62  ;;  %v4457_v11 = vadd.f32 %v4430_v48, %v4168_v18  ;;  %v4161_v3 = vpop.f32.mrf.mxu0  ;;  %vm4487_vm11 = vcmp.gt.f32.partialorder %v24026_v43, 0.0 }
 0x3aa   : > { %v4432_v56 = vpop.f32.mrf.mxu1  ;;  %v3872_v7 = vadd.f32 %v24004_v41, %v3583_v40 }
 0x3ab   : > { %v4511_v51 = vmul.f32 1.442695, %v4499_v13  ;;  %v4500_v0 = vmin.f32 %v24037_v9, 0.0  ;;  %v24046_v33 = vadd.f32 %v24008_v34, %v4457_v11  ;;  %v4458_v57 = vadd.f32 %v4432_v56, %v4169_v20  ;;  %v4163_v44 = vpop.f32.mrf.mxu0 }
 0x3ac   : > { %v4436_v22 = vpop.f32.mrf.mxu1  ;;  %v4176_v56 = vadd.f32 %v4161_v3, %v3871_v49  ;;  %v4177_v25 = vadd.f32 %v4163_v44, %v3872_v7  ;;  %vm4488_vm14 = vcmp.gt.f32.partialorder %v24037_v9, 0.0 }
 0x3ad   : > { %22169 = vpow2.f32 %v4511_v51  ;;  %v4513_v8 = vmul.f32 1.442695, %v4500_v0  ;;  %v4501_v17 = vmin.f32 %v24046_v33, 0.0  ;;  %v24055_v28 = vadd.f32 %v24017_v26, %v4458_v57 }
 0x3ae   : > { %v4459_v54 = vadd.f32 %v4436_v22, %v4170_v19  ;;  %v4438_v21 = vpop.f32.mrf.mxu1  ;;  %vm4489_vm12 = vcmp.gt.f32.partialorder %v24046_v33, 0.0 }
 0x3af   : > { %22171 = vpow2.f32 %v4513_v8  ;;  %v4515_v45 = vmul.f32 1.442695, %v4501_v17  ;;  %v4460_v55 = vadd.f32 %v4438_v21, %v4171_v6  ;;  %v4502_v50 = vmin.f32 %v24055_v28, 0.0 }
 0x3b0   : > { %v24061_v62 = vadd.f32 %v24008_v34, %v4459_v54  ;;  %v4440_v18 = vpop.f32.mrf.mxu1  ;;  %vm4490_vm15 = vcmp.gt.f32.partialorder %v24055_v28, 0.0 }
 0x3b1   : > { %22173 = vpow2.f32 %v4515_v45  ;;  %v24064_v31 = vadd.f32 %v24017_v26, %v4460_v55  ;;  %v4461_v1 = vadd.f32 %v4440_v18, %v4172_v14  ;;  %v4517_v39 = vmul.f32 1.442695, %v4502_v50 }
 0x3b2   : > { %v4503_v5 = vmin.f32 %v24061_v62, 0.0  ;;  %v4442_v10 = vpop.f32.mrf.mxu1  ;;  %vm4491_vm0 = vcmp.gt.f32.partialorder %v24061_v62, 0.0 }
 0x3b3   : > { %v4504_v52 = vmin.f32 %v24064_v31, 0.0  ;;  %v24072_v48 = vadd.f32 %v24008_v34, %v4461_v1  ;;  %v4462_v27 = vadd.f32 %v4442_v10, %v4173_v16  ;;  %22175 = vpow2.f32 %v4517_v39  ;;  %v20260_v39 = vld [vmem:[%s22620_s27 + $0x1070] ss:$8 sps:$4 sm:$0xff]  }
 0x3b4   : > { %v4519_v13 = vmul.f32 1.442695, %v4503_v5  ;;  %v4446_v11 = vpop.f32.mrf.mxu1  ;;  %vm4492_vm3 = vcmp.gt.f32.partialorder %v24064_v31, 0.0 }
 0x3b5   : > { %v4521_v30 = vmul.f32 1.442695, %v4504_v52  ;;  %v4505_v61 = vmin.f32 %v24072_v48, 0.0  ;;  %v24077_v24 = vadd.f32 %v24017_v26, %v4462_v27  ;;  %v4463_v32 = vadd.f32 %v4446_v11, %v4174_v63 }
 0x3b6   : > { %22177 = vpow2.f32 %v4519_v13  ;;  %v4448_v53 = vpop.f32.mrf.mxu1  ;;  %vm4493_vm4 = vcmp.gt.f32.partialorder %v24072_v48, 0.0 }
 0x3b7   : > { %22179 = vpow2.f32 %v4521_v30  ;;  %v4523_v2 = vmul.f32 1.442695, %v4505_v61  ;;  %v4506_v20 = vmin.f32 %v24077_v24, 0.0  ;;  %v24081_v51 = vadd.f32 %v24008_v34, %v4463_v32 }
 0x3b8   : > { %v4464_v41 = vadd.f32 %v4448_v53, %v4175_v36  ;;  %v4450_v0 = vpop.f32.mrf.mxu1  ;;  %v20266_v36 = vld [vmem:[%s22620_s27 + $0x1060] ss:$8 sps:$4 sm:$0xff]  }
 0x3b9   : > { %22181 = vpow2.f32 %v4523_v2  ;;  %v4525_v38 = vmul.f32 1.442695, %v4506_v20  ;;  %v4465_v58 = vadd.f32 %v4450_v0, %v4176_v56  ;;  %v4507_v19 = vmin.f32 %v24081_v51, 0.0  ;;  %v20274_v56 = vld [vmem:[%s22620_s27 + $0x1054] ss:$8 sps:$4 sm:$0xff]  }
 0x3ba   : > { %v22170_v57 = vpop.eup %22169  ;;  %v24085_v22 = vadd.f32 %v24017_v26, %v4464_v41  ;;  %v4452_v6 = vpop.f32.mrf.mxu1 }
 0x3bb   : > { %22183 = vpow2.f32 %v4525_v38  ;;  %v24088_v4 = vadd.f32 %v24008_v34, %v4465_v58  ;;  %v4466_v8 = vadd.f32 %v4452_v6, %v4177_v25  ;;  %v4527_v47 = vmul.f32 1.442695, %v4507_v19 }
 0x3bc   : > { %v22172_v17 = vpop.eup %22171  ;;  %v4508_v12 = vmin.f32 %v24085_v22, 0.0  ;;  %v16747_v60 = vadd.f32 -1.0, %v22170_v57 }
 0x3bd   : > { %v4509_v46 = vmin.f32 %v24088_v4, 0.0  ;;  %22185 = vpow2.f32 %v4527_v47  ;;  %v24093_v45 = vadd.f32 %v24017_v26, %v4466_v8  ;;  %v16748_v55 = vadd.f32 -1.0, %v22172_v17  ;;  %v20272_v17 = vld [vmem:[%s22620_s27 + $0x1050] ss:$8 sps:$4 sm:$0xff]  }
 0x3be   : > { %v22174_v54 = vpop.eup %22173  ;;  %v4529_v21 = vmul.f32 1.442695, %v4508_v12  ;;  %v4547_v37 = vsel %vm4487_vm11, %v24026_v43, %v16747_v60  ;;  %vm4494_vm11 = vcmp.gt.f32.partialorder %v24077_v24, 0.0 }
 0x3bf   : > { %v16749_v14 = vadd.f32 -1.0, %v22174_v54  ;;  %v4531_v23 = vmul.f32 1.442695, %v4509_v46  ;;  %v4510_v34 = vmin.f32 %v24093_v45, 0.0  ;;  %v4548_v16 = vsel %vm4488_vm14, %v24037_v9, %v16748_v55 }
 0x3c0   : > { %22187 = vpow2.f32 %v4529_v21  ;;  %v22176_v29 = vpop.eup %22175  ;;  %vm4496_vm14 = vcmp.gt.f32.partialorder %v24085_v22, 0.0  ;;  %v20280_v21 = vld [vmem:[%s22620_s27 + $0x1044] ss:$8 sps:$4 sm:$0xff]  }
 0x3c1   : > { %v4549_v35 = vsel %vm4489_vm12, %v24046_v33, %v16749_v14  ;;  %22189 = vpow2.f32 %v4531_v23  ;;  %v16750_v50 = vadd.f32 -1.0, %v22176_v29  ;;  %v4533_v18 = vmul.f32 1.442695, %v4510_v34 }
 0x3c2   : > { %v24101_v26 = vpack.c.bf16 %v4549_v35, %v4547_v37  ;;  %vm4495_vm12 = vcmp.gt.f32.partialorder %v24081_v51, 0.0 }
 0x3c3   : > { %v22178_v1 = vpop.eup %22177  ;;  %v4550_v15 = vsel %vm4490_vm15, %v24055_v28, %v16750_v50  ;;  %22191 = vpow2.f32 %v4533_v18  ;;  %v20268_v28 = vld [vmem:[%s22620_s27 + $0x1064] ss:$8 sps:$4 sm:$0xff]   ;;  %vm4497_vm15 = vcmp.gt.f32.partialorder %v24088_v4, 0.0 }
 0x3c4   : > { %v22180_v42 = vpop.eup %22179  ;;  %v16751_v43 = vadd.f32 -1.0, %v22178_v1  ;;  %v4632_v33 = vshrl.u32 %v24101_v26, 16  ;;  %v24107_v40 = vpack.c.bf16 %v4550_v15, %v4548_v16  ;;  %v4634_v5 = vshll.u32 %v24101_v26, 16 }
 0x3c5   : > { %v16752_v10 = vadd.f32 -1.0, %v22180_v42  ;;  %v5164_v3 = vrot.slane %v24101_v26, 1  ;;  %v5736_v41 = vrot.slane %v24101_v26, 2 }
 0x3c6   : > { %v22182_v9 = vpop.eup %22181  ;;  %5096 = vmatprep.mubr.bf16.mxu1 %v24107_v40  ;;  %v4644_v52 = vshrl.u32 %v24107_v40, 16  ;;  %v4646_v27 = vshll.u32 %v24107_v40, 16  ;;  %v4551_v63 = vsel %vm4491_vm0, %v24061_v62, %v16751_v43  ;;  %v4636_v11 = vrot.slane %v4634_v5, 1  ;;  %v20278_v43 = vld [vmem:[%s22620_s27 + $0x1040] ss:$8 sps:$4 sm:$0xff]  }
 0x3c7   : > { %v16753_v49 = vadd.f32 -1.0, %v22182_v9  ;;  %5097 = vmatmul.mubr.bf16.vlgmr.msra.gmra.mxu1 %v24101_v26  ;;  %v24127_v7 = vrot.slane %v4632_v33, 1  ;;  %v24129_v30 = vrot.slane %v4634_v5, 2  ;;  %v4552_v2 = vsel %vm4492_vm3, %v24064_v31, %v16752_v10  ;;  %v20298_v26 = vld [vmem:[%s22620_s27 + $0x1014] ss:$8 sps:$4 sm:$0xff]  }
 0x3c8   : > { %v22184_v13 = vpop.eup %22183  ;;  %5633 = vmatpush1.bf16.msra.mxu1 %v20260_v39  ;;  %v4648_v62 = vrot.slane %v4646_v27, 1  ;;  %v24135_v53 = vrot.slane %v4644_v52, 1  ;;  %v24143_v44 = vrot.slane %v4646_v27, 2  ;;  %vm4498_vm0 = vcmp.gt.f32.partialorder %v24093_v45, 0.0 }
 0x3c9   : > { %v4553_v61 = vsel %vm4493_vm4, %v24072_v48, %v16753_v49  ;;  %v16754_v32 = vadd.f32 -1.0, %v22184_v13  ;;  %5634 = vmatprep.subr.bf16.mxu1 %v20268_v28  ;;  %v4637_v38 = vor.u32 %v4636_v11, %v4632_v33  ;;  %v5167_v58 = vrot.slane %v24107_v40, 1  ;;  %v20281_v33 = vld [vmem:[%s22620_s27 + $0xf70] ss:$8 sps:$4 sm:$0xff]   ;;  %v20289_v49 = vld [vmem:[%s22620_s27 + $0xf64] ss:$8 sps:$4 sm:$0xff]  }
 0x3ca   : > { %v24140_v20 = vpack.c.bf16 %v4553_v61, %v4551_v63  ;;  %v22186_v48 = vpop.eup %22185  ;;  %v5739_v31 = vrot.slane %v24107_v40, 2  ;;  %v5446_v6 = vor.u32 %v24129_v30, %v24127_v7  ;;  %v5453_v47 = vor.u32 %v24143_v44, %v24135_v53  ;;  %v20287_v53 = vld [vmem:[%s22620_s27 + $0xf60] ss:$8 sps:$4 sm:$0xff]   ;;  %v20293_v40 = vld [vmem:[%s22620_s27 + $0xf50] ss:$8 sps:$4 sm:$0xff]  }
 0x3cb   : > { %v4554_v0 = vsel %vm4494_vm11, %v24077_v24, %v16754_v32  ;;  %v16755_v57 = vadd.f32 -1.0, %v22186_v48  ;;  %v4649_v24 = vor.u32 %v4648_v62, %v4644_v52  ;;  %v20290_v7 = vld [vmem:[%s22620_s27 + $0x1020] ss:$8 sps:$4 sm:$0xff]  }
 0x3cc   : > { %v24152_v25 = vpack.c.bf16 %v4554_v0, %v4552_v2  ;;  %v4639_v19 = vshll.u32 %v24140_v20, 16  ;;  %5635 = vmatpush1.bf16.msra.mxu1 %v20266_v36  ;;  %v4655_v12 = vshrl.u32 %v24140_v20, 16  ;;  %v5165_v60 = vrot.slane %v24140_v20, 1 }
 0x3cd   : > { %v22188_v8 = vpop.eup %22187  ;;  %5636 = vmatprep.subr.bf16.mxu1 %v20274_v56  ;;  %v5737_v23 = vrot.slane %v24140_v20, 2  ;;  %v4555_v34 = vsel %vm4495_vm12, %v24081_v51, %v16755_v57 }
 0x3ce   : > { %v22190_v46 = vpop.eup %22189  ;;  %v16756_v54 = vadd.f32 -1.0, %v22188_v8  ;;  %5106 = vmatprep.mubr.bf16.mxu1 %v24152_v25  ;;  %v4651_v55 = vshll.u32 %v24152_v25, 16  ;;  %v4641_v14 = vrot.slane %v4639_v19, 1  ;;  %v4663_v37 = vshrl.u32 %v24152_v25, 16 }
 0x3cf   : > { %v16757_v29 = vadd.f32 -1.0, %v22190_v46  ;;  %v5168_v35 = vrot.slane %v24152_v25, 1  ;;  %5107 = vmatmul.mubr.bf16.gmra.mxu1 %v24140_v20  ;;  %v5447_v16 = vrot.slane %v4655_v12, 1  ;;  %v5448_v27 = vrot.slane %v4639_v19, 2  ;;  %v20295_v19 = vld [vmem:[%s22620_s27 + $0xf54] ss:$8 sps:$4 sm:$0xff]  }
 0x3d0   : > { %v4653_v50 = vrot.slane %v4651_v55, 1  ;;  %v4642_v18 = vsel %vm711_vm7, %v4637_v38, %v4641_v14  ;;  %v5455_v1 = vrot.slane %v4651_v55, 2  ;;  %v22192_v42 = vpop.eup %22191  ;;  %v4556_v15 = vsel %vm4496_vm14, %v24085_v22, %v16756_v54  ;;  %5637 = vmatpush1.bf16.msra.mxu1 %v20272_v17  ;;  %v20286_v22 = vld [vmem:[%s22620_s27 + $0x1034] ss:$8 sps:$4 sm:$0xff]  }
 0x3d1   : > { %v4557_v51 = vsel %vm4497_vm15, %v24088_v4, %v16757_v29  ;;  %v5454_v39 = vrot.slane %v4663_v37, 1  ;;  %v24184_v5 = vsel %vm1249_vm1, %v5167_v58, %v5168_v35  ;;  %v16758_v10 = vadd.f32 -1.0, %v22192_v42  ;;  %5638 = vmatprep.subr.bf16.mxu1 %v20280_v21  ;;  %v20305_v42 = vld [vmem:[%s22620_s27 + $0xf30] ss:$8 sps:$4 sm:$0xff]  }
 0x3d2   : > { %v24186_v9 = vpack.c.bf16 %v4557_v51, %v4555_v34  ;;  %v4654_v28 = vsel %vm711_vm7, %v4649_v24, %v4653_v50  ;;  %v4657_v4 = vor.u32 %v4655_v12, %v4641_v14  ;;  %v24194_v13 = vsel %vm1249_vm1, %v5164_v3, %v5165_v60  ;;  %v20284_v3 = vld [vmem:[%s22620_s27 + $0x1030] ss:$8 sps:$4 sm:$0xff]   ;;  %v20310_v51 = vld [vmem:[%s22620_s27 + $0x10f4] ss:$8 sps:$4 sm:$0xff]  }
 0x3d3   : > { %4875 = vmatprep.mubr.bf16.mxu0 %v4654_v28  ;;  %v5456_v52 = vor.u32 %v5455_v1, %v5454_v39  ;;  %v5740_v63 = vrot.slane %v24152_v25, 2  ;;  %v4558_v11 = vsel %vm4498_vm0, %v24093_v45, %v16758_v10  ;;  %v5449_v56 = vor.u32 %v5448_v27, %v5447_v16  ;;  %v20292_v45 = vld [vmem:[%s22620_s27 + $0x1024] ss:$8 sps:$4 sm:$0xff]   ;;  %v20307_v1 = vld [vmem:[%s22620_s27 + $0xf34] ss:$8 sps:$4 sm:$0xff]  }
 0x3d4   : > { %4876 = vmatmul.mubr.bf16.vlgmr.msra.gmra.mxu0 %v4642_v18  ;;  %v4659_v61 = vshll.u32 %v24186_v9, 16  ;;  %v4671_v32 = vshrl.u32 %v24186_v9, 16  ;;  %v5170_v36 = vrot.slane %v24186_v9, 1  ;;  %v24203_v62 = vpack.c.bf16 %v4558_v11, %v4556_v15  ;;  %5639 = vmatpush1.bf16.msra.mxu1 %v20278_v43  ;;  %v20304_v18 = vld [vmem:[%s22620_s27 + $0x1004] ss:$8 sps:$4 sm:$0xff]  }
 0x3d5   : > { %5341 = vmatpush1.bf16.msra.mxu0 %v20281_v33  ;;  %v5457_v2 = vsel %vm1534_vm13, %v5453_v47, %v5456_v52  ;;  %v5742_v44 = vrot.slane %v24186_v9, 2  ;;  %5640 = vmatprep.subr.bf16.mxu1 %v20286_v22  ;;  %v24225_v17 = vsel %vm1534_vm13, %v5446_v6, %v5449_v56  ;;  %v4665_v47 = vor.u32 %v4663_v37, %v4653_v50  ;;  %v20301_v37 = vld [vmem:[%s22620_s27 + $0xf44] ss:$8 sps:$4 sm:$0xff]   ;;  %v20299_v50 = vld [vmem:[%s22620_s27 + $0xf40] ss:$8 sps:$4 sm:$0xff]  }
 0x3d6   : > { %5342 = vmatprep.subr.bf16.mxu0 %v20289_v49  ;;  %v4661_v48 = vrot.slane %v4659_v61, 1  ;;  %v5458_v0 = vrot.slane %v4671_v32, 1  ;;  %v5459_v38 = vrot.slane %v4659_v61, 2  ;;  %v24215_v58 = vsel %vm1249_vm1, %v5165_v60, %v5170_v36  ;;  %5116 = vmatprep.mubr.bf16.mxu1 %v24203_v62  ;;  %v20302_v16 = vld [vmem:[%s22620_s27 + $0x1000] ss:$8 sps:$4 sm:$0xff]  }
 0x3d7   : > { %v4667_v57 = vshll.u32 %v24203_v62, 16  ;;  %v4674_v8 = vshrl.u32 %v24203_v62, 16  ;;  %v5172_v24 = vrot.slane %v24203_v62, 1  ;;  %5117 = vmatmul.mubr.bf16.gmra.mxu1 %v24186_v9  ;;  %v24235_v46 = vsel %vm1831_vm2, %v5739_v31, %v5740_v63  ;;  %v20313_v43 = vld [vmem:[%s22620_s27 + $0xf24] ss:$8 sps:$4 sm:$0xff]  }
 0x3d8   : > { %v4662_v12 = vsel %vm711_vm7, %v4657_v4, %v4661_v48  ;;  %v24230_v60 = vor.u32 %v5459_v38, %v5458_v0  ;;  %5641 = vmatpush1.bf16.msra.mxu1 %v20284_v3  ;;  %5664 = vmatprep.mubr.bf16.mxu1 %v5457_v2  ;;  %v24255_v55 = vsel %vm1831_vm2, %v5736_v41, %v5737_v23  ;;  %v5744_v25 = vrot.slane %v24203_v62, 2  ;;  %v20308_v33 = vld [vmem:[%s22620_s27 + $0x10f0] ss:$8 sps:$4 sm:$0xff]   ;;  %v20311_v39 = vld [vmem:[%s22620_s27 + $0xf20] ss:$8 sps:$4 sm:$0xff]  }
 0x3d9   : > { %5343 = vmatpush1.bf16.msra.mxu0 %v20287_v53  ;;  %v4669_v30 = vrot.slane %v4667_v57, 1  ;;  %v5462_v6 = vrot.slane %v4674_v8, 1  ;;  %v5463_v54 = vrot.slane %v4667_v57, 2  ;;  %v24243_v21 = vsel %vm1249_vm1, %v5168_v35, %v5172_v24  ;;  %5642 = vmatprep.subr.bf16.mxu1 %v20292_v45  ;;  %v20316_v10 = vld [vmem:[%s22620_s27 + $0x10e4] ss:$8 sps:$4 sm:$0xff]  }
 0x3da   : > { %v24248_v31 = vsel %vm1534_vm13, %v5449_v56, %v24230_v60  ;;  %v24263_v14 = vsel %vm1831_vm2, %v5737_v23, %v5742_v44  ;;  %5344 = vmatprep.subr.bf16.mxu0 %v20295_v19  ;;  %v24273_v20 = vsel %vm1831_vm2, %v5740_v63, %v5744_v25  ;;  %v20296_v23 = vld [vmem:[%s22620_s27 + $0x1010] ss:$8 sps:$4 sm:$0xff]   ;;  %v4673_v15 = vor.u32 %v4671_v32, %v4661_v48  ;;  %v20319_v28 = vld [vmem:[%s22620_s27 + $0xf14] ss:$8 sps:$4 sm:$0xff]   ;;  %v20314_v22 = vld [vmem:[%s22620_s27 + $0x10e0] ss:$8 sps:$4 sm:$0xff]  }
 0x3db   : > { %v4670_v34 = vsel %vm711_vm7, %v4665_v47, %v4669_v30  ;;  %v4676_v29 = vor.u32 %v4674_v8, %v4669_v30  ;;  %v24268_v41 = vor.u32 %v5463_v54, %v5462_v6  ;;  %v20317_v49 = vld [vmem:[%s22620_s27 + $0xf10] ss:$8 sps:$4 sm:$0xff]   ;;  %v20322_v4 = vld [vmem:[%s22620_s27 + $0x10d4] ss:$8 sps:$4 sm:$0xff]   ;;  %v20323_v27 = vld [vmem:[%s22620_s27 + $0xf00] ss:$8 sps:$4 sm:$0xff]  }
 0x3dc   : > { %4885 = vmatprep.mubr.bf16.mxu0 %v4670_v34  ;;  %5643 = vmatpush1.bf16.msra.mxu1 %v20290_v7  ;;  %v20328_v63 = vld [vmem:[%s22620_s27 + $0x10c4] ss:$8 sps:$4 sm:$0xff]   ;;  %v20331_v11 = vld [vmem:[%s22620_s27 + $0xff4] ss:$8 sps:$4 sm:$0xff]   ;;  %v20326_v61 = vld [vmem:[%s22620_s27 + $0x10c0] ss:$8 sps:$4 sm:$0xff]  }
 0x3dd   : > { %4886 = vmatmul.mubr.bf16.gmra.mxu0 %v4662_v12  ;;  %v24278_v35 = vsel %vm1534_vm13, %v5456_v52, %v24268_v41  ;;  %5644 = vmatprep.subr.bf16.mxu1 %v20298_v26  ;;  %v20325_v52 = vld [vmem:[%s22620_s27 + $0xf04] ss:$8 sps:$4 sm:$0xff]   ;;  %v20329_v32 = vld [vmem:[%s22620_s27 + $0xff0] ss:$8 sps:$4 sm:$0xff]   ;;  %v20334_v3 = vld [vmem:[%s22620_s27 + $0x10b4] ss:$8 sps:$4 sm:$0xff]  }
 0x3de   : > { %5345 = vmatpush1.bf16.msra.mxu0 %v20293_v40  ;;  %4895 = vmatprep.mubr.bf16.mxu0 %v4676_v29  ;;  %v20337_v53 = vld [vmem:[%s22620_s27 + $0xfe4] ss:$8 sps:$4 sm:$0xff]   ;;  %v20332_v2 = vld [vmem:[%s22620_s27 + $0x10b0] ss:$8 sps:$4 sm:$0xff]   ;;  %v20335_v56 = vld [vmem:[%s22620_s27 + $0xfe0] ss:$8 sps:$4 sm:$0xff]  }
 0x3df   : > { %5346 = vmatprep.subr.bf16.mxu0 %v20301_v37  ;;  %v20340_v45 = vld [vmem:[%s22620_s27 + $0x10a4] ss:$8 sps:$4 sm:$0xff]   ;;  %v20343_v48 = vld [vmem:[%s22620_s27 + $0xfd4] ss:$8 sps:$4 sm:$0xff]   ;;  %v20338_v0 = vld [vmem:[%s22620_s27 + $0x10a0] ss:$8 sps:$4 sm:$0xff]  }
 0x3e0   : > { %5645 = vmatpush1.bf16.msra.mxu1 %v20296_v23  ;;  %v20341_v38 = vld [vmem:[%s22620_s27 + $0xfd0] ss:$8 sps:$4 sm:$0xff]   ;;  %v20346_v57 = vld [vmem:[%s22620_s27 + $0x1094] ss:$8 sps:$4 sm:$0xff]   ;;  %v20349_v19 = vld [vmem:[%s22620_s27 + $0xfc4] ss:$8 sps:$4 sm:$0xff]  }
 0x3e1   : > { %5646 = vmatprep.subr.bf16.mxu1 %v20304_v18  ;;  %v20344_v8 = vld [vmem:[%s22620_s27 + $0x1090] ss:$8 sps:$4 sm:$0xff]   ;;  %v20347_v47 = vld [vmem:[%s22620_s27 + $0xfc0] ss:$8 sps:$4 sm:$0xff]   ;;  %v20352_v12 = vld [vmem:[%s22620_s27 + $0x1084] ss:$8 sps:$4 sm:$0xff]  }
 0x3e2   : > { %5347 = vmatpush1.bf16.msra.mxu0 %v20299_v50  ;;  %v20355_v7 = vld [vmem:[%s22620_s27 + $0xfb4] ss:$8 sps:$4 sm:$0xff]   ;;  %v20350_v30 = vld [vmem:[%s22620_s27 + $0x1080] ss:$8 sps:$4 sm:$0xff]   ;;  %v20353_v6 = vld [vmem:[%s22620_s27 + $0xfb0] ss:$8 sps:$4 sm:$0xff]  }
 0x3e3   : > { %5348 = vmatprep.subr.bf16.mxu0 %v20307_v1  ;;  %v20358_v54 = vld [vmem:[%s22620_s27 + $0xfa4] ss:$8 sps:$4 sm:$0xff]   ;;  %v20356_v40 = vld [vmem:[%s22620_s27 + $0xfa0] ss:$8 sps:$4 sm:$0xff]   ;;  %v20361_v34 = vld [vmem:[%s22620_s27 + $0xf94] ss:$8 sps:$4 sm:$0xff]  }
 0x3e4   : > { %5647 = vmatpush1.bf16.msra.mxu1 %v20302_v16  ;;  %v20359_v29 = vld [vmem:[%s22620_s27 + $0xf90] ss:$8 sps:$4 sm:$0xff]   ;;  %v20364_v26 = vld [vmem:[%s22620_s27 + $0xf84] ss:$8 sps:$4 sm:$0xff]   ;;  %v20362_v37 = vld [vmem:[%s22620_s27 + $0xf80] ss:$8 sps:$4 sm:$0xff]  }
 0x3e5   : > { %4896 = vmatmul.mubr.bf16.gmra.mxu0 %v4673_v15  ;;  %5648 = vmatprep.subr.bf16.mxu1 %v20310_v51  ;;  %v20367_v23 = vld [vmem:[%s22620_s27 + $0x1174] ss:$8 sps:$4 sm:$0xff]   ;;  %v20368_v50 = vld [vmem:[%s22620_s27 + $0x1160] ss:$8 sps:$4 sm:$0xff]   ;;  %v20382_v1 = vld [vmem:[%s22620_s27 + $0x1124] ss:$8 sps:$4 sm:$0xff]  }
 0x3e6   : > { %5349 = vmatpush1.bf16.msra.mxu0 %v20305_v42  ;;  %5372 = vmatprep.mubr.bf16.mxu0 %v24184_v5  ;;  %v20320_v5 = vld [vmem:[%s22620_s27 + $0x10d0] ss:$8 sps:$4 sm:$0xff]   ;;  %v20373_v18 = vld [vmem:[%s22620_s27 + $0x1154] ss:$8 sps:$4 sm:$0xff]   ;;  %v20388_v42 = vld [vmem:[%s22620_s27 + $0x1104] ss:$8 sps:$4 sm:$0xff]  }
 0x3e7   : > { %5350 = vmatprep.subr.bf16.mxu0 %v20313_v43  ;;  %v20383_v16 = vld [vmem:[%s22620_s27 + $0x1110] ss:$8 sps:$4 sm:$0xff]   ;;  %v20386_v15 = vld [vmem:[%s22620_s27 + $0x1100] ss:$8 sps:$4 sm:$0xff]   ;;  %v20421_v62 = vld [vmem:[%s22620_s27 + $0x1254] ss:$8 sps:$4 sm:$0xff]  }
 0x3e8   : > { %5649 = vmatpush2.bf16.msra.mxu1 %v20308_v33  ;;  %v20389_v51 = vld [vmem:[%s22620_s27 + $0x11f0] ss:$8 sps:$4 sm:$0xff]   ;;  %v20392_v43 = vld [vmem:[%s22620_s27 + $0x11e0] ss:$8 sps:$4 sm:$0xff]   ;;  %v20397_v33 = vld [vmem:[%s22620_s27 + $0x11d4] ss:$8 sps:$4 sm:$0xff]  }
 0x3e9   : > { %5650 = vmatprep.subr.bf16.mxu1 %v20316_v10  ;;  %v20400_v10 = vld [vmem:[%s22620_s27 + $0x11c4] ss:$8 sps:$4 sm:$0xff]   ;;  %v20431_v9 = vld [vmem:[%s22620_s27 + $0x1360] ss:$8 sps:$4 sm:$0xff]  }
 0x3ea   : > { %5351 = vmatpush1.bf16.msra.mxu0 %v20311_v39  ;;  %v20395_v39 = vld [vmem:[%s22620_s27 + $0x11d0] ss:$8 sps:$4 sm:$0xff]  }
 0x3eb   : > { %5352 = vmatprep.subr.bf16.mxu0 %v20319_v28  ;;  %v20398_v28 = vld [vmem:[%s22620_s27 + $0x11c0] ss:$8 sps:$4 sm:$0xff]  }
 0x3ec   : > { %5651 = vmatpush2.bf16.msra.mxu1 %v20314_v22  ;;  %v20403_v22 = vld [vmem:[%s22620_s27 + $0x11b4] ss:$8 sps:$4 sm:$0xff]  }
 0x3ed   : > { %5652 = vmatprep.subr.bf16.mxu1 %v20322_v4  ;;  %v20406_v4 = vld [vmem:[%s22620_s27 + $0x11a4] ss:$8 sps:$4 sm:$0xff]  }
 0x3ee   : > { %5353 = vmatpush1.bf16.msra.mxu0 %v20317_v49  ;;  %v20401_v49 = vld [vmem:[%s22620_s27 + $0x11b0] ss:$8 sps:$4 sm:$0xff]  }
 0x3ef   : > { %5354 = vmatprep.subr.bf16.mxu0 %v20325_v52  ;;  %v20404_v52 = vld [vmem:[%s22620_s27 + $0x11a0] ss:$8 sps:$4 sm:$0xff]  }
 0x3f0   : > { %5653 = vmatpush2.bf16.msra.mxu1 %v20320_v5  ;;  %v20409_v5 = vld [vmem:[%s22620_s27 + $0x1194] ss:$8 sps:$4 sm:$0xff]  }
 0x3f1   : > { %5654 = vmatprep.subr.bf16.mxu1 %v20328_v63  ;;  %v20412_v63 = vld [vmem:[%s22620_s27 + $0x1184] ss:$8 sps:$4 sm:$0xff]  }
 0x3f2   : > { %5355 = vmatpush1.bf16.msra.mxu0 %v20323_v27  ;;  %v20407_v27 = vld [vmem:[%s22620_s27 + $0x1190] ss:$8 sps:$4 sm:$0xff]  }
 0x3f3   : > { %5356 = vmatprep.subr.bf16.mxu0 %v20331_v11  ;;  %v20410_v11 = vld [vmem:[%s22620_s27 + $0x1180] ss:$8 sps:$4 sm:$0xff]  }
 0x3f4   : > { %5655 = vmatpush2.bf16.msra.mxu1 %v20326_v61  ;;  %v20413_v61 = vld [vmem:[%s22620_s27 + $0x1270] ss:$8 sps:$4 sm:$0xff]  }
 0x3f5   : > { %5656 = vmatprep.subr.bf16.mxu1 %v20334_v3  ;;  %v20418_v3 = vld [vmem:[%s22620_s27 + $0x1264] ss:$8 sps:$4 sm:$0xff]  }
 0x3f6   : > { %5357 = vmatpush2.bf16.msra.mxu0 %v20329_v32  ;;  %v20415_v32 = vld [vmem:[%s22620_s27 + $0x1274] ss:$8 sps:$4 sm:$0xff]  }
 0x3f7   : > { %5358 = vmatprep.subr.bf16.mxu0 %v20337_v53  ;;  %v20425_v53 = vld [vmem:[%s22620_s27 + $0x1370] ss:$8 sps:$4 sm:$0xff]  }
 0x3f8   : > { %5657 = vmatpush2.bf16.msra.mxu1 %v20332_v2  ;;  %v20424_v2 = vld [vmem:[%s22620_s27 + $0x1244] ss:$8 sps:$4 sm:$0xff]  }
 0x3f9   : > { %5658 = vmatprep.subr.bf16.mxu1 %v20340_v45  ;;  %v20422_v45 = vld [vmem:[%s22620_s27 + $0x1240] ss:$8 sps:$4 sm:$0xff]  }
 0x3fa   : > { %5359 = vmatpush2.bf16.msra.mxu0 %v20335_v56  ;;  %v20437_v56 = vld [vmem:[%s22620_s27 + $0x1350] ss:$8 sps:$4 sm:$0xff]  }
 0x3fb   : > { %5360 = vmatprep.subr.bf16.mxu0 %v20343_v48  ;;  %v20445_v48 = vld [vmem:[%s22620_s27 + $0x1344] ss:$8 sps:$4 sm:$0xff]  }
 0x3fc   : > { %5659 = vmatpush2.bf16.msra.mxu1 %v20338_v0  ;;  %v20430_v0 = vld [vmem:[%s22620_s27 + $0x1234] ss:$8 sps:$4 sm:$0xff]  }
 0x3fd   : > { %5660 = vmatprep.subr.bf16.mxu1 %v20346_v57  ;;  %v20428_v57 = vld [vmem:[%s22620_s27 + $0x1230] ss:$8 sps:$4 sm:$0xff]  }
 0x3fe   : > { %5361 = vmatpush2.bf16.msra.mxu0 %v20341_v38  ;;  %v20443_v38 = vld [vmem:[%s22620_s27 + $0x1340] ss:$8 sps:$4 sm:$0xff]  }
 0x3ff   : > { %5362 = vmatprep.subr.bf16.mxu0 %v20349_v19  ;;  %v20451_v19 = vld [vmem:[%s22620_s27 + $0x1334] ss:$8 sps:$4 sm:$0xff]  }
 0x400   : > { %5661 = vmatpush2.bf16.msra.mxu1 %v20344_v8  ;;  %v20436_v8 = vld [vmem:[%s22620_s27 + $0x1224] ss:$8 sps:$4 sm:$0xff]  }
 0x401   : > { %5662 = vmatprep.subr.bf16.mxu1 %v20352_v12  ;;  %v20434_v12 = vld [vmem:[%s22620_s27 + $0x1220] ss:$8 sps:$4 sm:$0xff]  }
 0x402   : > { %5363 = vmatpush2.bf16.msra.mxu0 %v20347_v47  ;;  %v20449_v47 = vld [vmem:[%s22620_s27 + $0x1330] ss:$8 sps:$4 sm:$0xff]  }
 0x403   : > { %5364 = vmatprep.subr.bf16.mxu0 %v20355_v7  ;;  %v20442_v7 = vld [vmem:[%s22620_s27 + $0x1214] ss:$8 sps:$4 sm:$0xff]  }
 0x404   : > { %5663 = vmatpush2.bf16.msra.mxu1 %v20350_v30  ;;  %v20440_v30 = vld [vmem:[%s22620_s27 + $0x1210] ss:$8 sps:$4 sm:$0xff]  }
 0x406   : > { %5365 = vmatpush2.bf16.msra.mxu0 %v20353_v6  ;;  %v20448_v6 = vld [vmem:[%s22620_s27 + $0x1204] ss:$8 sps:$4 sm:$0xff]  }
 0x407   : > { %5366 = vmatprep.subr.bf16.mxu0 %v20358_v54  ;;  %5665 = vmatmul.mubr.bf16.vlgmr.msra.gmra.mxu1 %v24225_v17  ;;  %v20365_v17 = vld [vmem:[%s22620_s27 + $0x1170] ss:$8 sps:$4 sm:$0xff]   ;;  %v20446_v54 = vld [vmem:[%s22620_s27 + $0x1200] ss:$8 sps:$4 sm:$0xff]  }
 0x408   : > { %5674 = vmatprep.mubr.bf16.mxu1 %v24278_v35  ;;  %v20370_v35 = vld [vmem:[%s22620_s27 + $0x1164] ss:$8 sps:$4 sm:$0xff]  }
 0x40a   : > { %5367 = vmatpush2.bf16.msra.mxu0 %v20356_v40 }
 0x40b   : > { %5368 = vmatprep.subr.bf16.mxu0 %v20361_v34 }
 0x40e   : > { %5369 = vmatpush2.bf16.msra.mxu0 %v20359_v29 }
 0x40f   : > { %5370 = vmatprep.subr.bf16.mxu0 %v20364_v26  ;;  %5675 = vmatmul.mubr.bf16.gmra.mxu1 %v24248_v31  ;;  %v20371_v31 = vld [vmem:[%s22620_s27 + $0x1150] ss:$8 sps:$4 sm:$0xff]  }
 0x410   : > { %5684 = vmatprep.mubr.bf16.mxu1 %v24268_v41  ;;  %v20376_v41 = vld [vmem:[%s22620_s27 + $0x1144] ss:$8 sps:$4 sm:$0xff]  }
 0x412   : > { %5371 = vmatpush2.bf16.msra.mxu0 %v20362_v37 }
 0x413   : > { %5912 = vmatprep.subr.bf16.mxu0 %v20367_v23 }
 0x415   : > { %5373 = vmatmul.mubr.bf16.vlgmr.msra.gmra.mxu0 %v24194_v13  ;;  %v20374_v13 = vld [vmem:[%s22620_s27 + $0x1140] ss:$8 sps:$4 sm:$0xff]  }
 0x416   : > { %5382 = vmatprep.mubr.bf16.mxu0 %v24243_v21  ;;  %5913 = vmatpush1.bf16.msra.mxu0 %v20365_v17  ;;  %v20379_v21 = vld [vmem:[%s22620_s27 + $0x1134] ss:$8 sps:$4 sm:$0xff]  }
 0x417   : > { %5914 = vmatprep.subr.bf16.mxu0 %v20370_v35  ;;  %5685 = vmatmul.mubr.bf16.gmra.mxu1 %v24230_v60  ;;  %v20377_v60 = vld [vmem:[%s22620_s27 + $0x1130] ss:$8 sps:$4 sm:$0xff]  }
 0x41a   : > { %5915 = vmatpush1.bf16.msra.mxu0 %v20368_v50 }
 0x41b   : > { %5916 = vmatprep.subr.bf16.mxu0 %v20373_v18 }
 0x41d   : > { %5383 = vmatmul.mubr.bf16.gmra.mxu0 %v24215_v58  ;;  %v20380_v58 = vld [vmem:[%s22620_s27 + $0x1120] ss:$8 sps:$4 sm:$0xff]  }
 0x41e   : > { %5392 = vmatprep.mubr.bf16.mxu0 %v5172_v24  ;;  %5917 = vmatpush1.bf16.msra.mxu0 %v20371_v31  ;;  %v20385_v24 = vld [vmem:[%s22620_s27 + $0x1114] ss:$8 sps:$4 sm:$0xff]  }
 0x41f   : > { %5918 = vmatprep.subr.bf16.mxu0 %v20376_v41 }
 0x422   : > { %5919 = vmatpush1.bf16.msra.mxu0 %v20374_v13 }
 0x423   : > { %5920 = vmatprep.subr.bf16.mxu0 %v20379_v21 }
 0x425   : > { %5393 = vmatmul.mubr.bf16.gmra.mxu0 %v5170_v36  ;;  %v20391_v36 = vld [vmem:[%s22620_s27 + $0x11f4] ss:$8 sps:$4 sm:$0xff]  }
 0x426   : > { %5921 = vmatpush1.bf16.msra.mxu0 %v20377_v60  ;;  %5944 = vmatprep.mubr.bf16.mxu0 %v24235_v46  ;;  %v20394_v46 = vld [vmem:[%s22620_s27 + $0x11e4] ss:$8 sps:$4 sm:$0xff]  }
 0x427   : > { %5922 = vmatprep.subr.bf16.mxu0 %v20382_v1 }
 0x42a   : > { %5923 = vmatpush1.bf16.msra.mxu0 %v20380_v58 }
 0x42b   : > { %5924 = vmatprep.subr.bf16.mxu0 %v20385_v24 }
 0x42e   : > { %5925 = vmatpush1.bf16.msra.mxu0 %v20383_v16 }
 0x42f   : > { %5926 = vmatprep.subr.bf16.mxu0 %v20388_v42 }
 0x432   : > { %5927 = vmatpush1.bf16.msra.mxu0 %v20386_v15 }
 0x433   : > { %5928 = vmatprep.subr.bf16.mxu0 %v20391_v36 }
 0x436   : > { %5929 = vmatpush2.bf16.msra.mxu0 %v20389_v51 }
 0x437   : > { %5930 = vmatprep.subr.bf16.mxu0 %v20394_v46 }
 0x43a   : > { %5931 = vmatpush2.bf16.msra.mxu0 %v20392_v43 }
 0x43b   : > { %5932 = vmatprep.subr.bf16.mxu0 %v20397_v33 }
 0x43e   : > { %5933 = vmatpush2.bf16.msra.mxu0 %v20395_v39 }
 0x43f   : > { %5934 = vmatprep.subr.bf16.mxu0 %v20400_v10 }
 0x442   : > { %5935 = vmatpush2.bf16.msra.mxu0 %v20398_v28 }
 0x443   : > { %5936 = vmatprep.subr.bf16.mxu0 %v20403_v22 }
 0x446   : > { %5937 = vmatpush2.bf16.msra.mxu0 %v20401_v49 }
 0x447   : > { %5938 = vmatprep.subr.bf16.mxu0 %v20406_v4 }
 0x44a   : > { %5939 = vmatpush2.bf16.msra.mxu0 %v20404_v52  ;;  %v20452_v52 = vld [vmem:[%s22620_s27 + $0x12f0] ss:$8 sps:$4 sm:$0xff]  }
 0x44b   : > { %5940 = vmatprep.subr.bf16.mxu0 %v20409_v5  ;;  %v20454_v5 = vld [vmem:[%s22620_s27 + $0x12f4] ss:$8 sps:$4 sm:$0xff]  }
 0x44e   : > { %5941 = vmatpush2.bf16.msra.mxu0 %v20407_v27  ;;  %v20455_v27 = vld [vmem:[%s22620_s27 + $0x1320] ss:$8 sps:$4 sm:$0xff]  }
 0x44f   : > { %5942 = vmatprep.subr.bf16.mxu0 %v20412_v63  ;;  %v20457_v63 = vld [vmem:[%s22620_s27 + $0x1324] ss:$8 sps:$4 sm:$0xff]  }
 0x452   : > { %5943 = vmatpush2.bf16.msra.mxu0 %v20410_v11  ;;  %v20458_v11 = vld [vmem:[%s22620_s27 + $0x12e0] ss:$8 sps:$4 sm:$0xff]  }
 0x453   : > { %6566 = vmatprep.subr.bf16.mxu0 %v20415_v32  ;;  %v20461_v32 = vld [vmem:[%s22620_s27 + $0x1310] ss:$8 sps:$4 sm:$0xff]  }
 0x455   : > { %5945 = vmatmul.mubr.bf16.vlgmr.msra.gmra.mxu0 %v24255_v55  ;;  %v20416_v55 = vld [vmem:[%s22620_s27 + $0x1260] ss:$8 sps:$4 sm:$0xff]  }
 0x456   : > { %5954 = vmatprep.mubr.bf16.mxu0 %v24273_v20  ;;  %6567 = vmatpush1.bf16.msra.mxu0 %v20413_v61  ;;  %v20427_v20 = vld [vmem:[%s22620_s27 + $0x1374] ss:$8 sps:$4 sm:$0xff]   ;;  %v20460_v61 = vld [vmem:[%s22620_s27 + $0x12e4] ss:$8 sps:$4 sm:$0xff]  }
 0x457   : > { %6568 = vmatprep.subr.bf16.mxu0 %v20418_v3  ;;  %6345 = vmatprep.subr.bf16.mxu1 %v20427_v20  ;;  %v20463_v3 = vld [vmem:[%s22620_s27 + $0x1314] ss:$8 sps:$4 sm:$0xff]   ;;  %v20469_v20 = vld [vmem:[%s22620_s27 + $0x1304] ss:$8 sps:$4 sm:$0xff]  }
 0x458   : > { %6346 = vmatpush1.bf16.msra.mxu1 %v20425_v53  ;;  %v20466_v53 = vld [vmem:[%s22620_s27 + $0x12d4] ss:$8 sps:$4 sm:$0xff]  }
 0x45a   : > { %6569 = vmatpush1.bf16.msra.mxu0 %v20416_v55  ;;  %v20464_v55 = vld [vmem:[%s22620_s27 + $0x12d0] ss:$8 sps:$4 sm:$0xff]  }
 0x45b   : > { %6570 = vmatprep.subr.bf16.mxu0 %v20421_v62  ;;  %v20467_v62 = vld [vmem:[%s22620_s27 + $0x1300] ss:$8 sps:$4 sm:$0xff]  }
 0x45d   : > { %5955 = vmatmul.mubr.bf16.gmra.mxu0 %v24263_v14  ;;  %v20439_v14 = vld [vmem:[%s22620_s27 + $0x1354] ss:$8 sps:$4 sm:$0xff]  }
 0x45e   : > { %5964 = vmatprep.mubr.bf16.mxu0 %v5744_v25  ;;  %v20433_v25 = vld [vmem:[%s22620_s27 + $0x1364] ss:$8 sps:$4 sm:$0xff]  }
 0x45f   : > { %6347 = vmatprep.subr.bf16.mxu1 %v20433_v25  ;;  %v20470_v25 = vld [vmem:[%s22620_s27 + $0x12c0] ss:$8 sps:$4 sm:$0xff]  }
 0x460   : > { %6348 = vmatpush1.bf16.msra.mxu1 %v20431_v9  ;;  %v20472_v9 = vld [vmem:[%s22620_s27 + $0x12c4] ss:$8 sps:$4 sm:$0xff]  }
 0x461   : > { %6349 = vmatprep.subr.bf16.mxu1 %v20439_v14  ;;  %v20475_v14 = vld [vmem:[%s22620_s27 + $0x13f4] ss:$8 sps:$4 sm:$0xff]  }
 0x464   : > { %6350 = vmatpush1.bf16.msra.mxu1 %v20437_v56  ;;  %v20478_v56 = vld [vmem:[%s22620_s27 + $0x12b4] ss:$8 sps:$4 sm:$0xff]  }
 0x465   : > { %5965 = vmatmul.mubr.bf16.gmra.mxu0 %v5742_v44  ;;  %v20419_v44 = vld [vmem:[%s22620_s27 + $0x1250] ss:$8 sps:$4 sm:$0xff]   ;;  %6351 = vmatprep.subr.bf16.mxu1 %v20445_v48  ;;  %v20481_v48 = vld [vmem:[%s22620_s27 + $0x13e4] ss:$8 sps:$4 sm:$0xff]  }
 0x466   : > { %6571 = vmatpush1.bf16.msra.mxu0 %v20419_v44  ;;  %v20473_v44 = vld [vmem:[%s22620_s27 + $0x13f0] ss:$8 sps:$4 sm:$0xff]  }
 0x467   : > { %6572 = vmatprep.subr.bf16.mxu0 %v20424_v2  ;;  %v20476_v2 = vld [vmem:[%s22620_s27 + $0x12b0] ss:$8 sps:$4 sm:$0xff]  }
 0x468   : > { %6352 = vmatpush1.bf16.msra.mxu1 %v20443_v38  ;;  %v20487_v38 = vld [vmem:[%s22620_s27 + $0x13d4] ss:$8 sps:$4 sm:$0xff]  }
 0x469   : > { %6353 = vmatprep.subr.bf16.mxu1 %v20451_v19  ;;  %v20485_v19 = vld [vmem:[%s22620_s27 + $0x13d0] ss:$8 sps:$4 sm:$0xff]  }
 0x46a   : > { %6573 = vmatpush1.bf16.msra.mxu0 %v20422_v45  ;;  %v20479_v45 = vld [vmem:[%s22620_s27 + $0x13e0] ss:$8 sps:$4 sm:$0xff]  }
 0x46b   : > { %6574 = vmatprep.subr.bf16.mxu0 %v20430_v0  ;;  %v20484_v0 = vld [vmem:[%s22620_s27 + $0x12a4] ss:$8 sps:$4 sm:$0xff]  }
 0x46c   : > { %6354 = vmatpush1.bf16.msra.mxu1 %v20449_v47  ;;  %v20493_v47 = vld [vmem:[%s22620_s27 + $0x13c4] ss:$8 sps:$4 sm:$0xff]  }
 0x46d   : > { %6355 = vmatprep.subr.bf16.mxu1 %v20457_v63 }
 0x46e   : > { %6575 = vmatpush1.bf16.msra.mxu0 %v20428_v57  ;;  %v20482_v57 = vld [vmem:[%s22620_s27 + $0x12a0] ss:$8 sps:$4 sm:$0xff]  }
 0x46f   : > { %6576 = vmatprep.subr.bf16.mxu0 %v20436_v8  ;;  %v20490_v8 = vld [vmem:[%s22620_s27 + $0x1294] ss:$8 sps:$4 sm:$0xff]  }
 0x470   : > { %6356 = vmatpush1.bf16.msra.mxu1 %v20455_v27 }
 0x471   : > { %6357 = vmatprep.subr.bf16.mxu1 %v20463_v3 }
 0x472   : > { %6577 = vmatpush1.bf16.msra.mxu0 %v20434_v12 }
 0x473   : > { %6578 = vmatprep.subr.bf16.mxu0 %v20442_v7  ;;  %v20488_v7 = vld [vmem:[%s22620_s27 + $0x1290] ss:$8 sps:$4 sm:$0xff]  }
 0x474   : > { %6358 = vmatpush1.bf16.msra.mxu1 %v20461_v32  ;;  %v20523_v32 = vld [vmem:[%s22620_s27 + $0x1474] ss:$8 sps:$4 sm:$0xff]  }
 0x475   : > { %6359 = vmatprep.subr.bf16.mxu1 %v20469_v20 }
 0x476   : > { %6579 = vmatpush1.bf16.msra.mxu0 %v20440_v30 }
 0x477   : > { %6580 = vmatprep.subr.bf16.mxu0 %v20448_v6  ;;  %v20491_v6 = vld [vmem:[%s22620_s27 + $0x13c0] ss:$8 sps:$4 sm:$0xff]  }
 0x478   : > { %6360 = vmatpush1.bf16.msra.mxu1 %v20467_v62 }
 0x479   : > { %6361 = vmatprep.subr.bf16.mxu1 %v20475_v14 }
 0x47a   : > { %6581 = vmatpush1.bf16.msra.mxu0 %v20446_v54  ;;  %v20496_v54 = vld [vmem:[%s22620_s27 + $0x1284] ss:$8 sps:$4 sm:$0xff]  }
 0x47b   : > { %6582 = vmatprep.subr.bf16.mxu0 %v20454_v5 }
 0x47c   : > { %6362 = vmatpush2.bf16.msra.mxu1 %v20473_v44 }
 0x47d   : > { %6363 = vmatprep.subr.bf16.mxu1 %v20481_v48 }
 0x47e   : > { %6583 = vmatpush2.bf16.msra.mxu0 %v20452_v52 }
 0x47f   : > { %6584 = vmatprep.subr.bf16.mxu0 %v20460_v61  ;;  %v20515_v61 = vld [vmem:[%s22620_s27 + $0x1380] ss:$8 sps:$4 sm:$0xff]  }
 0x480   : > { %6364 = vmatpush2.bf16.msra.mxu1 %v20479_v45 }
 0x481   : > { %6365 = vmatprep.subr.bf16.mxu1 %v20487_v38 }
 0x482   : > { %6585 = vmatpush2.bf16.msra.mxu0 %v20458_v11 }
 0x483   : > { %6586 = vmatprep.subr.bf16.mxu0 %v20466_v53 }
 0x484   : > { %6366 = vmatpush2.bf16.msra.mxu1 %v20485_v19 }
 0x485   : > { %6367 = vmatprep.subr.bf16.mxu1 %v20493_v47  ;;  %v22279_v47 = vld [vmem:[%s22731_s24] sm:$0xff] }
 0x486   : > { %6587 = vmatpush2.bf16.msra.mxu0 %v20464_v55 }
 0x487   : > { %v5098_v40 = vpop.f32.mrf.mxu1  ;;  %6588 = vmatprep.subr.bf16.mxu0 %v20472_v9 }
 0x488   : > { %6368 = vmatpush2.bf16.msra.mxu1 %v20491_v6  ;;  %v22280_v6 = vld [vmem:[%s22731_s24 + $0x8] sm:$0xff] }
 0x489   : > { %v5100_v34 = vpop.f32.mrf.mxu1 }
 0x48a   : > { %6589 = vmatpush2.bf16.msra.mxu0 %v20470_v25 }
 0x48b   : > { %v5102_v29 = vpop.f32.mrf.mxu1  ;;  %6590 = vmatprep.subr.bf16.mxu0 %v20478_v56 }
 0x48d   : > { %v24404_v26 = vpop.f32.mrf.mxu1 }
 0x48e   : > { %6591 = vmatpush2.bf16.msra.mxu0 %v20476_v2 }
 0x48f   : > { %v5108_v37 = vpop.f32.mrf.mxu1  ;;  %6592 = vmatprep.subr.bf16.mxu0 %v20484_v0 }
 0x491   : > { %v5110_v23 = vpop.f32.mrf.mxu1 }
 0x492   : > { %6593 = vmatpush2.bf16.msra.mxu0 %v20482_v57 }
 0x493   : > { %v5112_v17 = vpop.f32.mrf.mxu1  ;;  %6594 = vmatprep.subr.bf16.mxu0 %v20490_v8 }
 0x494   : > { %v4877_v35 = vpop.f32.mrf.mxu0 }
 0x495   : > { %v24406_v50 = vadd.f32 %v5098_v40, %v4877_v35  ;;  %v24408_v18 = vpop.f32.mrf.mxu1  ;;  %v20499_v40 = vld [vmem:[%s22620_s27 + $0x13b4] ss:$8 sps:$4 sm:$0xff]   ;;  %v20505_v35 = vld [vmem:[%s22620_s27 + $0x13a4] ss:$8 sps:$4 sm:$0xff]  }
 0x496   : > { %v4879_v31 = vpop.f32.mrf.mxu0  ;;  %6595 = vmatpush2.bf16.msra.mxu0 %v20488_v7  ;;  %6369 = vmatprep.subr.bf16.mxu1 %v20499_v40 }
 0x497   : > { %v24410_v41 = vadd.f32 %v5100_v34, %v4879_v31  ;;  %v5118_v13 = vpop.f32.mrf.mxu1  ;;  %6596 = vmatprep.subr.bf16.mxu0 %v20496_v54 }
 0x498   : > { %v4881_v21 = vpop.f32.mrf.mxu0 }
 0x499   : > { %v24412_v60 = vadd.f32 %v5102_v29, %v4881_v21  ;;  %v5120_v1 = vpop.f32.mrf.mxu1  ;;  %v20494_v29 = vld [vmem:[%s22620_s27 + $0x1280] ss:$8 sps:$4 sm:$0xff]  }
 0x49a   : > { %v24414_v58 = vpop.f32.mrf.mxu0  ;;  %6597 = vmatpush2.bf16.msra.mxu0 %v20494_v29  ;;  %v20503_v21 = vld [vmem:[%s22620_s27 + $0x13a0] ss:$8 sps:$4 sm:$0xff]  }
 0x49b   : > { %v5122_v24 = vpop.f32.mrf.mxu1 }
 0x49d   : > { %v4887_v16 = vpop.f32.mrf.mxu0  ;;  %v5123_v15 = vpop.f32.mrf.mxu1 }
 0x49e   : > { %v24416_v42 = vadd.f32 %v5108_v37, %v4887_v16 }
 0x49f   : > { %v4889_v36 = vpop.f32.mrf.mxu0 }
 0x4a0   : > { %v24418_v51 = vadd.f32 %v5110_v23, %v4889_v36  ;;  %v20497_v23 = vld [vmem:[%s22620_s27 + $0x13b0] ss:$8 sps:$4 sm:$0xff]  }
 0x4a1   : > { %v4891_v46 = vpop.f32.mrf.mxu0  ;;  %6370 = vmatpush2.bf16.msra.mxu1 %v20497_v23 }
 0x4a2   : > { %v24420_v43 = vadd.f32 %v5112_v17, %v4891_v46  ;;  %v20502_v17 = vld [vmem:[%s22620_s27 + $0x1574] ss:$8 sps:$4 sm:$0xff]   ;;  %6371 = vmatprep.subr.bf16.mxu1 %v20505_v35  ;;  %v20509_v46 = vld [vmem:[%s22620_s27 + $0x1390] ss:$8 sps:$4 sm:$0xff]  }
 0x4a3   : > { %v24422_v33 = vpop.f32.mrf.mxu0  ;;  %7134 = vmatprep.subr.bf16.mxu0 %v20502_v17 }
 0x4a5   : > { %v4897_v39 = vpop.f32.mrf.mxu0  ;;  %6372 = vmatpush2.bf16.msra.mxu1 %v20503_v21 }
 0x4a6   : > { %v24424_v10 = vadd.f32 %v5118_v13, %v4897_v39 }
 0x4a7   : > { %v4899_v28 = vpop.f32.mrf.mxu0 }
 0x4a8   : > { %v24426_v22 = vadd.f32 %v5120_v1, %v4899_v28  ;;  %v20511_v1 = vld [vmem:[%s22620_s27 + $0x1394] ss:$8 sps:$4 sm:$0xff]   ;;  %v20517_v28 = vld [vmem:[%s22620_s27 + $0x1384] ss:$8 sps:$4 sm:$0xff]  }
 0x4a9   : > { %v4901_v49 = vpop.f32.mrf.mxu0  ;;  %6373 = vmatprep.subr.bf16.mxu1 %v20511_v1 }
 0x4aa   : > { %6374 = vmatpush2.bf16.msra.mxu1 %v20509_v46 }
 0x4ab   : > { %v4902_v4 = vpop.f32.mrf.mxu0  ;;  %6375 = vmatprep.subr.bf16.mxu1 %v20517_v28 }
 0x4ae   : > { %6376 = vmatpush2.bf16.msra.mxu1 %v20515_v61 }
 0x4af   : > { %6842 = vmatprep.subr.bf16.mxu1 %v20523_v32 }
 0x4c7   : > { %v5666_v12 = vpop.f32.mrf.mxu1 }
 0x4c9   : > { %v5668_v30 = vpop.f32.mrf.mxu1 }
 0x4cb   : > { %v5670_v34 = vpop.f32.mrf.mxu1 }
 0x4cd   : > { %v24459_v37 = vpop.f32.mrf.mxu1 }
 0x4cf   : > { %v5676_v31 = vpop.f32.mrf.mxu1 }
 0x4d1   : > { %v5678_v13 = vpop.f32.mrf.mxu1 }
 0x4d3   : > { %v5680_v24 = vpop.f32.mrf.mxu1 }
 0x4d5   : > { %v5374_v16 = vpop.f32.mrf.mxu0  ;;  %v24467_v36 = vpop.f32.mrf.mxu1 }
 0x4d6   : > { %v5401_v15 = vadd.f32 %v5374_v16, %v24406_v50 }
 0x4d7   : > { %v5376_v39 = vpop.f32.mrf.mxu0  ;;  %v5686_v4 = vpop.f32.mrf.mxu1 }
 0x4d8   : > { %v5402_v49 = vadd.f32 %v5376_v39, %v24410_v41  ;;  %v5693_v52 = vadd.f32 %v5666_v12, %v5401_v15 }
 0x4d9   : > { %v5378_v5 = vpop.f32.mrf.mxu0  ;;  %v5688_v63 = vpop.f32.mrf.mxu1 }
 0x4da   : > { %v5403_v27 = vadd.f32 %v5378_v5, %v24412_v60  ;;  %v5694_v11 = vadd.f32 %v5668_v30, %v5402_v49 }
 0x4db   : > { %v5380_v50 = vpop.f32.mrf.mxu0  ;;  %v5690_v3 = vpop.f32.mrf.mxu1 }
 0x4dc   : > { %v5695_v53 = vadd.f32 %v5670_v34, %v5403_v27 }
 0x4dd   : > { %v5384_v55 = vpop.f32.mrf.mxu0  ;;  %v5691_v62 = vpop.f32.mrf.mxu1 }
 0x4de   : > { %v5405_v20 = vadd.f32 %v5384_v55, %v24416_v42 }
 0x4df   : > { %v5386_v41 = vpop.f32.mrf.mxu0 }
 0x4e0   : > { %v5406_v25 = vadd.f32 %v5386_v41, %v24418_v51  ;;  %v5697_v60 = vadd.f32 %v5676_v31, %v5405_v20  ;;  %v5985_v51 = vsub.s32 2, %v26534_v59 }
 0x4e1   : > { %v5388_v9 = vpop.f32.mrf.mxu0 }
 0x4e2   : > { %v5407_v44 = vadd.f32 %v5388_v9, %v24420_v43  ;;  %v5698_v14 = vadd.f32 %v5678_v13, %v5406_v25  ;;  %v5986_v12 = vrot.slane %v22279_v47, %v5985_v51  ;;  %v5105_v43 = vadd.f32 %v24404_v26, %v24414_v58 }
 0x4e3   : > { %v5390_v2 = vpop.f32.mrf.mxu0  ;;  %v5990_v54 = vrot.slane %v22280_v6, %v5985_v51  ;;  %v5115_v26 = vadd.f32 %v24408_v18, %v24422_v33 }
 0x4e4   : > { %v5699_v56 = vadd.f32 %v5680_v24, %v5407_v44  ;;  %v5404_v40 = vadd.f32 %v5380_v50, %v5105_v43 }
 0x4e5   : > { %v5394_v45 = vpop.f32.mrf.mxu0  ;;  %v5408_v15 = vadd.f32 %v5390_v2, %v5115_v26 }
 0x4e6   : > { %v5409_v48 = vadd.f32 %v5394_v45, %v24424_v10  ;;  %v5696_v31 = vadd.f32 %v24459_v37, %v5404_v40 }
 0x4e7   : > { %v5396_v0 = vpop.f32.mrf.mxu0 }
 0x4e8   : > { %v5410_v42 = vadd.f32 %v5396_v0, %v24426_v22  ;;  %v5701_v38 = vadd.f32 %v5686_v4, %v5409_v48 }
 0x4e9   : > { %v5398_v57 = vpop.f32.mrf.mxu0 }
 0x4ea   : > { %v5702_v19 = vadd.f32 %v5688_v63, %v5410_v42 }
 0x4eb   : > { %v5399_v8 = vpop.f32.mrf.mxu0 }
 0x515   : > { %v5946_v7 = vpop.f32.mrf.mxu0 }
 0x516   : > { %v5973_v30 = vadd.f32 %v5946_v7, %v5693_v52 }
 0x517   : > { %v5948_v10 = vpop.f32.mrf.mxu0 }
 0x518   : > { %v24485_v34 = vadd.f32 %v5986_v12, %v5973_v30  ;;  %v5974_v22 = vadd.f32 %v5948_v10, %v5694_v11  ;;  %v5700_v11 = vadd.f32 %v24467_v36, %v5408_v15 }
 0x519   : > { %v5950_v29 = vpop.f32.mrf.mxu0 }
 0x51a   : > { %v6011_v23 = vmin.f32 %v24485_v34, 0.0  ;;  %v24488_v17 = vadd.f32 %v5990_v54, %v5974_v22  ;;  %v5975_v35 = vadd.f32 %v5950_v29, %v5695_v53  ;;  %vm6001_vm3 = vcmp.gt.f32.partialorder %v24485_v34, 0.0 }
 0x51b   : > { %v5952_v13 = vpop.f32.mrf.mxu0 }
 0x51c   : > { %v6021_v58 = vmul.f32 1.442695, %v6011_v23  ;;  %v6012_v21 = vmin.f32 %v24488_v17, 0.0  ;;  %v24494_v1 = vadd.f32 %v5986_v12, %v5975_v35  ;;  %v5976_v24 = vadd.f32 %v5952_v13, %v5696_v31 }
 0x51d   : > { %v5956_v16 = vpop.f32.mrf.mxu0  ;;  %vm6002_vm11 = vcmp.gt.f32.partialorder %v24488_v17, 0.0 }
 0x51e   : > { %22193 = vpow2.f32 %v6021_v58  ;;  %v6023_v46 = vmul.f32 1.442695, %v6012_v21  ;;  %v6013_v39 = vmin.f32 %v24494_v1, 0.0  ;;  %v24497_v28 = vadd.f32 %v5990_v54, %v5976_v24  ;;  %v20500_v21 = vld [vmem:[%s22620_s27 + $0x1570] ss:$8 sps:$4 sm:$0xff]  }
 0x51f   : > { %v5977_v49 = vadd.f32 %v5956_v16, %v5697_v60  ;;  %v5958_v37 = vpop.f32.mrf.mxu0  ;;  %vm6003_vm4 = vcmp.gt.f32.partialorder %v24494_v1, 0.0 }
 0x520   : > { %22195 = vpow2.f32 %v6023_v46  ;;  %v6025_v4 = vmul.f32 1.442695, %v6013_v39  ;;  %v5978_v52 = vadd.f32 %v5958_v37, %v5698_v14  ;;  %v6014_v18 = vmin.f32 %v24497_v28, 0.0 }
 0x521   : > { %v24500_v33 = vadd.f32 %v5986_v12, %v5977_v49  ;;  %v5960_v5 = vpop.f32.mrf.mxu0  ;;  %vm6004_vm12 = vcmp.gt.f32.partialorder %v24497_v28, 0.0 }
 0x522   : > { %22197 = vpow2.f32 %v6025_v4  ;;  %v24502_v27 = vadd.f32 %v5990_v54, %v5978_v52  ;;  %v5979_v63 = vadd.f32 %v5960_v5, %v5699_v56  ;;  %v6027_v61 = vmul.f32 1.442695, %v6014_v18  ;;  %v20506_v5 = vld [vmem:[%s22620_s27 + $0x1560] ss:$8 sps:$4 sm:$0xff]  }
 0x523   : > { %v6015_v50 = vmin.f32 %v24500_v33, 0.0  ;;  %v5962_v32 = vpop.f32.mrf.mxu0  ;;  %vm6005_vm14 = vcmp.gt.f32.partialorder %v24500_v33, 0.0 }
 0x524   : > { %v6016_v3 = vmin.f32 %v24502_v27, 0.0  ;;  %v24507_v53 = vadd.f32 %v5986_v12, %v5979_v63  ;;  %v5980_v55 = vadd.f32 %v5962_v32, %v5700_v11  ;;  %22199 = vpow2.f32 %v6027_v61 }
 0x525   : > { %v6029_v20 = vmul.f32 1.442695, %v6015_v50  ;;  %v5966_v62 = vpop.f32.mrf.mxu0  ;;  %vm6006_vm15 = vcmp.gt.f32.partialorder %v24502_v27, 0.0 }
 0x526   : > { %v6031_v41 = vmul.f32 1.442695, %v6016_v3  ;;  %v6017_v25 = vmin.f32 %v24507_v53, 0.0  ;;  %v24510_v60 = vadd.f32 %v5990_v54, %v5980_v55  ;;  %v5981_v9 = vadd.f32 %v5966_v62, %v5701_v38 }
 0x527   : > { %22201 = vpow2.f32 %v6029_v20  ;;  %v5968_v36 = vpop.f32.mrf.mxu0  ;;  %vm6007_vm0 = vcmp.gt.f32.partialorder %v24507_v53, 0.0 }
 0x528   : > { %22203 = vpow2.f32 %v6031_v41  ;;  %v6033_v44 = vmul.f32 1.442695, %v6017_v25  ;;  %v6018_v14 = vmin.f32 %v24510_v60, 0.0  ;;  %v24513_v2 = vadd.f32 %v5986_v12, %v5981_v9 }
 0x529   : > { %v5982_v56 = vadd.f32 %v5968_v36, %v5702_v19  ;;  %v5970_v45 = vpop.f32.mrf.mxu0 }
 0x52a   : > { %22205 = vpow2.f32 %v6033_v44  ;;  %v6035_v48 = vmul.f32 1.442695, %v6018_v14  ;;  %v6019_v42 = vmin.f32 %v24513_v2, 0.0  ;;  %v20512_v14 = vld [vmem:[%s22620_s27 + $0x1550] ss:$8 sps:$4 sm:$0xff]  }
 0x52b   : > { %v22194_v0 = vpop.eup %22193  ;;  %v24516_v57 = vadd.f32 %v5990_v54, %v5982_v56  ;;  %v5971_v8 = vpop.f32.mrf.mxu0 }
 0x52c   : > { %22207 = vpow2.f32 %v6035_v48  ;;  %v6037_v38 = vmul.f32 1.442695, %v6019_v42  ;;  %v17079_v43 = vadd.f32 -1.0, %v22194_v0  ;;  %v20520_v42 = vld [vmem:[%s22620_s27 + $0x1544] ss:$8 sps:$4 sm:$0xff]  }
 0x52d   : > { %v22196_v51 = vpop.eup %22195  ;;  %v6020_v47 = vmin.f32 %v24516_v57, 0.0 }
 0x52e   : > { %22209 = vpow2.f32 %v6037_v38  ;;  %v17080_v30 = vadd.f32 -1.0, %v22196_v51  ;;  %v6051_v54 = vsel %vm6001_vm3, %v24485_v34, %v17079_v43  ;;  %vm6008_vm3 = vcmp.gt.f32.partialorder %v24510_v60, 0.0 }
 0x52f   : > { %v22198_v7 = vpop.eup %22197  ;;  %v6039_v12 = vmul.f32 1.442695, %v6020_v47 }
 0x530   : > { %v17081_v19 = vadd.f32 -1.0, %v22198_v7  ;;  %v6052_v23 = vsel %vm6002_vm11, %v24488_v17, %v17080_v30  ;;  %v20508_v17 = vld [vmem:[%s22620_s27 + $0x1564] ss:$8 sps:$4 sm:$0xff]   ;;  %vm6010_vm11 = vcmp.gt.f32.partialorder %v24516_v57, 0.0 }
 0x531   : > { %22211 = vpow2.f32 %v6039_v12  ;;  %v22200_v6 = vpop.eup %22199 }
 0x532   : > { %v6053_v40 = vsel %vm6003_vm4, %v24494_v1, %v17081_v19  ;;  %v17082_v22 = vadd.f32 -1.0, %v22200_v6  ;;  %vm6009_vm4 = vcmp.gt.f32.partialorder %v24513_v2, 0.0 }
 0x533   : > { %v24524_v10 = vpack.c.bf16 %v6053_v40, %v6051_v54  ;;  %v20518_v54 = vld [vmem:[%s22620_s27 + $0x1540] ss:$8 sps:$4 sm:$0xff]   ;;  %v20521_v40 = vld [vmem:[%s22620_s27 + $0x1470] ss:$8 sps:$4 sm:$0xff]  }
 0x534   : > { %v22202_v29 = vpop.eup %22201  ;;  %v6054_v31 = vsel %vm6004_vm12, %v24497_v28, %v17082_v22 }
 0x535   : > { %v22204_v35 = vpop.eup %22203  ;;  %v17083_v13 = vadd.f32 -1.0, %v22202_v29  ;;  %v6134_v26 = vshrl.u32 %v24524_v10, 16  ;;  %v6136_v34 = vshll.u32 %v24524_v10, 16  ;;  %v24531_v58 = vpack.c.bf16 %v6054_v31, %v6052_v23 }
 0x536   : > { %v17084_v24 = vadd.f32 -1.0, %v22204_v35  ;;  %v6666_v32 = vrot.slane %v24524_v10, 1 }
 0x537   : > { %v22206_v1 = vpop.eup %22205  ;;  %6598 = vmatprep.mubr.bf16.mxu0 %v24531_v58  ;;  %v6146_v15 = vshrl.u32 %v24531_v58, 16  ;;  %v6148_v46 = vshll.u32 %v24531_v58, 16  ;;  %v6138_v39 = vrot.slane %v6136_v34, 1  ;;  %v6055_v49 = vsel %vm6005_vm14, %v24500_v33, %v17083_v13  ;;  %v20514_v33 = vld [vmem:[%s22620_s27 + $0x1554] ss:$8 sps:$4 sm:$0xff]  }
 0x538   : > { %v17085_v16 = vadd.f32 -1.0, %v22206_v1  ;;  %6599 = vmatmul.mubr.bf16.vlgmr.msra.gmra.mxu0 %v24524_v10  ;;  %v24545_v37 = vrot.slane %v6134_v26, 1  ;;  %v24547_v4 = vrot.slane %v6136_v34, 2  ;;  %v6669_v62 = vrot.slane %v24531_v58, 1  ;;  %v20529_v13 = vld [vmem:[%s22620_s27 + $0x1464] ss:$8 sps:$4 sm:$0xff]  }
 0x539   : > { %v22208_v28 = vpop.eup %22207  ;;  %7135 = vmatpush1.bf16.msra.mxu0 %v20500_v21  ;;  %v6150_v63 = vrot.slane %v6148_v46, 1  ;;  %v24551_v11 = vrot.slane %v6146_v15, 1  ;;  %v24557_v50 = vrot.slane %v6148_v46, 2  ;;  %v6139_v20 = vor.u32 %v6138_v39, %v6134_v26 }
 0x53a   : > { %v6057_v52 = vsel %vm6007_vm0, %v24507_v53, %v17085_v16  ;;  %v17086_v18 = vadd.f32 -1.0, %v22208_v28  ;;  %7136 = vmatprep.subr.bf16.mxu0 %v20508_v17  ;;  %v6056_v53 = vsel %vm6006_vm15, %v24502_v27, %v17084_v24  ;;  %v6948_v36 = vor.u32 %v24547_v4, %v24545_v37  ;;  %v20524_v28 = vld [vmem:[%s22620_s27 + $0x1530] ss:$8 sps:$4 sm:$0xff]   ;;  %v20527_v37 = vld [vmem:[%s22620_s27 + $0x1460] ss:$8 sps:$4 sm:$0xff]  }
 0x53b   : > { %v24553_v61 = vpack.c.bf16 %v6057_v52, %v6055_v49  ;;  %v22210_v3 = vpop.eup %22209  ;;  %v6151_v27 = vor.u32 %v6150_v63, %v6146_v15  ;;  %v6955_v56 = vor.u32 %v24557_v50, %v24551_v11  ;;  %v7241_v50 = vrot.slane %v24531_v58, 2 }
 0x53c   : > { %v6058_v55 = vsel %vm6008_vm3, %v24510_v60, %v17086_v18  ;;  %v17087_v25 = vadd.f32 -1.0, %v22210_v3 }
 0x53d   : > { %v24567_v41 = vpack.c.bf16 %v6058_v55, %v6056_v53  ;;  %v6141_v9 = vshll.u32 %v24553_v61, 16  ;;  %7137 = vmatpush1.bf16.msra.mxu0 %v20506_v5  ;;  %v6157_v60 = vshrl.u32 %v24553_v61, 16  ;;  %v6667_v45 = vrot.slane %v24553_v61, 1  ;;  %v20532_v5 = vld [vmem:[%s22620_s27 + $0x1524] ss:$8 sps:$4 sm:$0xff]  }
 0x53e   : > { %v22212_v44 = vpop.eup %22211  ;;  %v6059_v48 = vsel %vm6009_vm4, %v24513_v2, %v17087_v25  ;;  %7138 = vmatprep.subr.bf16.mxu0 %v20514_v33  ;;  %v20535_v53 = vld [vmem:[%s22620_s27 + $0x1454] ss:$8 sps:$4 sm:$0xff]   ;;  %v20530_v25 = vld [vmem:[%s22620_s27 + $0x1520] ss:$8 sps:$4 sm:$0xff]  }
 0x53f   : > { %v17088_v0 = vadd.f32 -1.0, %v22212_v44  ;;  %6608 = vmatprep.mubr.bf16.mxu0 %v24567_v41  ;;  %v6153_v8 = vshll.u32 %v24567_v41, 16  ;;  %v6143_v51 = vrot.slane %v6141_v9, 1  ;;  %v24583_v38 = vpack.c.bf16 %v6059_v48, %v6059_v48  ;;  %v20533_v44 = vld [vmem:[%s22620_s27 + $0x1450] ss:$8 sps:$4 sm:$0xff]  }
 0x540   : > { %v6950_v47 = vrot.slane %v6141_v9, 2  ;;  %v6165_v43 = vshrl.u32 %v24567_v41, 16  ;;  %v6949_v7 = vrot.slane %v6157_v60, 1  ;;  %6609 = vmatmul.mubr.bf16.gmra.mxu0 %v24553_v61  ;;  %v6670_v34 = vrot.slane %v24567_v41, 1 }
 0x541   : > { %v6060_v2 = vsel %vm6010_vm11, %v24516_v57, %v17088_v0  ;;  %v6155_v12 = vrot.slane %v6153_v8, 1  ;;  %v6144_v30 = vsel %vm711_vm7, %v6139_v20, %v6143_v51  ;;  %v6957_v19 = vrot.slane %v6153_v8, 2  ;;  %7139 = vmatpush1.bf16.msra.mxu0 %v20512_v14  ;;  %v20526_v57 = vld [vmem:[%s22620_s27 + $0x1534] ss:$8 sps:$4 sm:$0xff]  }
 0x542   : > { %v24591_v6 = vpack.c.bf16 %v6060_v2, %v6060_v2  ;;  %v6956_v22 = vrot.slane %v6165_v43, 1  ;;  %v6159_v29 = vor.u32 %v6157_v60, %v6143_v51  ;;  %v6161_v23 = vshll.u32 %v24583_v38, 16  ;;  %7140 = vmatprep.subr.bf16.mxu0 %v20520_v42  ;;  %v20538_v60 = vld [vmem:[%s22620_s27 + $0x1514] ss:$8 sps:$4 sm:$0xff]   ;;  %v20541_v42 = vld [vmem:[%s22620_s27 + $0x1444] ss:$8 sps:$4 sm:$0xff]  }
 0x543   : > { %v6156_v35 = vsel %vm711_vm7, %v6151_v27, %v6155_v12  ;;  %v6167_v31 = vor.u32 %v6165_v43, %v6155_v12  ;;  %v6173_v26 = vshrl.u32 %v24583_v38, 16  ;;  %v24607_v16 = vsel %vm1249_vm1, %v6669_v62, %v6670_v34  ;;  %v20539_v43 = vld [vmem:[%s22620_s27 + $0x1440] ss:$8 sps:$4 sm:$0xff]   ;;  %v20547_v2 = vld [vmem:[%s22620_s27 + $0x1434] ss:$8 sps:$4 sm:$0xff]  }
 0x544   : > { %6618 = vmatprep.mubr.bf16.mxu0 %v24591_v6  ;;  %6377 = vmatprep.mubr.bf16.mxu1 %v6156_v35  ;;  %v6169_v21 = vshll.u32 %v24591_v6, 16  ;;  %v6958_v1 = vor.u32 %v6957_v19, %v6956_v22  ;;  %v24603_v24 = vrot.slane %v6161_v23, 1  ;;  %v6176_v17 = vshrl.u32 %v24591_v6, 16  ;;  %v20542_v12 = vld [vmem:[%s22620_s27 + $0x1500] ss:$8 sps:$4 sm:$0xff]  }
 0x545   : > { %6378 = vmatmul.mubr.bf16.vlgmr.msra.gmra.mxu1 %v6144_v30  ;;  %v6951_v15 = vor.u32 %v6950_v47, %v6949_v7  ;;  %v6960_v46 = vrot.slane %v6173_v26, 1  ;;  %v6961_v39 = vrot.slane %v6161_v23, 2  ;;  %7141 = vmatpush1.bf16.msra.mxu0 %v20518_v54  ;;  %v24630_v55 = vsel %vm1249_vm1, %v6666_v32, %v6667_v45  ;;  %v20536_v47 = vld [vmem:[%s22620_s27 + $0x1510] ss:$8 sps:$4 sm:$0xff]   ;;  %v20544_v7 = vld [vmem:[%s22620_s27 + $0x1504] ss:$8 sps:$4 sm:$0xff]  }
 0x546   : > { %6843 = vmatpush1.bf16.msra.mxu1 %v20521_v40  ;;  %v6171_v49 = vrot.slane %v6169_v21, 1  ;;  %v6959_v4 = vsel %vm1534_vm13, %v6955_v56, %v6958_v1  ;;  %v6164_v52 = vsel %vm711_vm7, %v6159_v29, %v24603_v24  ;;  %v6964_v18 = vrot.slane %v6176_v17, 1  ;;  %7142 = vmatprep.subr.bf16.mxu0 %v20526_v57  ;;  %v20545_v30 = vld [vmem:[%s22620_s27 + $0x1430] ss:$8 sps:$4 sm:$0xff]   ;;  %v20550_v54 = vld [vmem:[%s22620_s27 + $0x15f4] ss:$8 sps:$4 sm:$0xff]  }
 0x547   : > { %6844 = vmatprep.subr.bf16.mxu1 %v20529_v13  ;;  %v24618_v63 = vsel %vm1534_vm13, %v6948_v36, %v6951_v15  ;;  %v6965_v11 = vrot.slane %v6169_v21, 2  ;;  %v24620_v33 = vor.u32 %v6961_v39, %v6960_v46  ;;  %v6674_v20 = vrot.slane %v24591_v6, 1  ;;  %v20553_v40 = vld [vmem:[%s22620_s27 + $0x1424] ss:$8 sps:$4 sm:$0xff]   ;;  %v20548_v22 = vld [vmem:[%s22620_s27 + $0x15f0] ss:$8 sps:$4 sm:$0xff]  }
 0x548   : > { %v6172_v3 = vsel %vm711_vm7, %v6167_v31, %v6171_v49  ;;  %v7238_v62 = vrot.slane %v24524_v10, 2  ;;  %6619 = vmatmul.mubr.bf16.gmra.mxu0 %v24583_v38  ;;  %v6672_v36 = vrot.slane %v24583_v38, 1  ;;  %v7242_v32 = vrot.slane %v24567_v41, 2  ;;  %v20551_v29 = vld [vmem:[%s22620_s27 + $0x1420] ss:$8 sps:$4 sm:$0xff]  }
 0x549   : > { %6387 = vmatprep.mubr.bf16.mxu1 %v6172_v3  ;;  %v24636_v58 = vor.u32 %v6965_v11, %v6964_v18  ;;  %v24640_v9 = vsel %vm1534_vm13, %v6951_v15, %v24620_v33  ;;  %7143 = vmatpush1.bf16.msra.mxu0 %v20524_v28  ;;  %v24648_v10 = vsel %vm1249_vm1, %v6670_v34, %v6674_v20  ;;  %v7239_v14 = vrot.slane %v24553_v61, 2  ;;  %v20556_v23 = vld [vmem:[%s22620_s27 + $0x15e4] ss:$8 sps:$4 sm:$0xff]   ;;  %v20559_v35 = vld [vmem:[%s22620_s27 + $0x1414] ss:$8 sps:$4 sm:$0xff]  }
 0x54a   : > { %6845 = vmatpush1.bf16.msra.mxu1 %v20527_v37  ;;  %v7246_v27 = vrot.slane %v24591_v6, 2  ;;  %v7244_v56 = vrot.slane %v24583_v38, 2  ;;  %7166 = vmatprep.mubr.bf16.mxu0 %v6959_v4  ;;  %v24663_v48 = vsel %vm1249_vm1, %v6667_v45, %v6672_v36  ;;  %v24666_v0 = vsel %vm1831_vm2, %v7241_v50, %v7242_v32  ;;  %v20554_v57 = vld [vmem:[%s22620_s27 + $0x15e0] ss:$8 sps:$4 sm:$0xff]   ;;  %v20557_v31 = vld [vmem:[%s22620_s27 + $0x1410] ss:$8 sps:$4 sm:$0xff]  }
 0x54b   : > { %7144 = vmatprep.subr.bf16.mxu0 %v20532_v5  ;;  %v24656_v41 = vsel %vm1534_vm13, %v6958_v1, %v24636_v58  ;;  %6846 = vmatprep.subr.bf16.mxu1 %v20535_v53  ;;  %v24670_v8 = vsel %vm1831_vm2, %v7238_v62, %v7239_v14  ;;  %v6178_v45 = vor.u32 %v6176_v17, %v6171_v49  ;;  %v20562_v13 = vld [vmem:[%s22620_s27 + $0x15d4] ss:$8 sps:$4 sm:$0xff]   ;;  %v20560_v34 = vld [vmem:[%s22620_s27 + $0x15d0] ss:$8 sps:$4 sm:$0xff]   ;;  %v20563_v21 = vld [vmem:[%s22620_s27 + $0x1400] ss:$8 sps:$4 sm:$0xff]  }
 0x54c   : > { %v24675_v51 = vsel %vm1831_vm2, %v7242_v32, %v7246_v27  ;;  %v24680_v61 = vsel %vm1831_vm2, %v7239_v14, %v7244_v56  ;;  %v6175_v19 = vor.u32 %v6173_v26, %v24603_v24  ;;  %v20565_v26 = vld [vmem:[%s22620_s27 + $0x1404] ss:$8 sps:$4 sm:$0xff]   ;;  %v20571_v24 = vld [vmem:[%s22620_s27 + $0x14f4] ss:$8 sps:$4 sm:$0xff]   ;;  %v20566_v17 = vld [vmem:[%s22620_s27 + $0x15c0] ss:$8 sps:$4 sm:$0xff]  }
 0x54d   : > { %6388 = vmatmul.mubr.bf16.gmra.mxu1 %v6164_v52  ;;  %7145 = vmatpush1.bf16.msra.mxu0 %v20530_v25  ;;  %v20568_v1 = vld [vmem:[%s22620_s27 + $0x15c4] ss:$8 sps:$4 sm:$0xff]   ;;  %v20574_v15 = vld [vmem:[%s22620_s27 + $0x15b4] ss:$8 sps:$4 sm:$0xff]   ;;  %v20572_v39 = vld [vmem:[%s22620_s27 + $0x15b0] ss:$8 sps:$4 sm:$0xff]  }
 0x54e   : > { %6847 = vmatpush1.bf16.msra.mxu1 %v20533_v44  ;;  %6397 = vmatprep.mubr.bf16.mxu1 %v6178_v45  ;;  %v20577_v46 = vld [vmem:[%s22620_s27 + $0x14e4] ss:$8 sps:$4 sm:$0xff]   ;;  %v20575_v28 = vld [vmem:[%s22620_s27 + $0x14e0] ss:$8 sps:$4 sm:$0xff]   ;;  %v20583_v37 = vld [vmem:[%s22620_s27 + $0x14d4] ss:$8 sps:$4 sm:$0xff]  }
 0x54f   : > { %7146 = vmatprep.subr.bf16.mxu0 %v20538_v60  ;;  %6848 = vmatprep.subr.bf16.mxu1 %v20541_v42  ;;  %v20580_v49 = vld [vmem:[%s22620_s27 + $0x15a4] ss:$8 sps:$4 sm:$0xff]   ;;  %v20578_v4 = vld [vmem:[%s22620_s27 + $0x15a0] ss:$8 sps:$4 sm:$0xff]   ;;  %v20581_v52 = vld [vmem:[%s22620_s27 + $0x14d0] ss:$8 sps:$4 sm:$0xff]  }
 0x550   : > { %v20586_v18 = vld [vmem:[%s22620_s27 + $0x1594] ss:$8 sps:$4 sm:$0xff]   ;;  %v20589_v5 = vld [vmem:[%s22620_s27 + $0x14c4] ss:$8 sps:$4 sm:$0xff]   ;;  %v20584_v11 = vld [vmem:[%s22620_s27 + $0x1590] ss:$8 sps:$4 sm:$0xff]  }
 0x551   : > { %7147 = vmatpush1.bf16.msra.mxu0 %v20536_v47  ;;  %v20587_v50 = vld [vmem:[%s22620_s27 + $0x14c0] ss:$8 sps:$4 sm:$0xff]   ;;  %v20592_v3 = vld [vmem:[%s22620_s27 + $0x1584] ss:$8 sps:$4 sm:$0xff]   ;;  %v20595_v53 = vld [vmem:[%s22620_s27 + $0x14b4] ss:$8 sps:$4 sm:$0xff]  }
 0x552   : > { %6849 = vmatpush1.bf16.msra.mxu1 %v20539_v43  ;;  %7148 = vmatprep.subr.bf16.mxu0 %v20544_v7  ;;  %v20590_v62 = vld [vmem:[%s22620_s27 + $0x1580] ss:$8 sps:$4 sm:$0xff]   ;;  %v20593_v25 = vld [vmem:[%s22620_s27 + $0x14b0] ss:$8 sps:$4 sm:$0xff]   ;;  %v20598_v32 = vld [vmem:[%s22620_s27 + $0x14a4] ss:$8 sps:$4 sm:$0xff]  }
 0x553   : > { %6850 = vmatprep.subr.bf16.mxu1 %v20547_v2  ;;  %v20596_v44 = vld [vmem:[%s22620_s27 + $0x14a0] ss:$8 sps:$4 sm:$0xff]   ;;  %v20601_v14 = vld [vmem:[%s22620_s27 + $0x1494] ss:$8 sps:$4 sm:$0xff]   ;;  %v20599_v60 = vld [vmem:[%s22620_s27 + $0x1490] ss:$8 sps:$4 sm:$0xff]  }
 0x554   : > { %v20604_v42 = vld [vmem:[%s22620_s27 + $0x1484] ss:$8 sps:$4 sm:$0xff]   ;;  %v20602_v45 = vld [vmem:[%s22620_s27 + $0x1480] ss:$8 sps:$4 sm:$0xff]   ;;  %v20607_v47 = vld [vmem:[%s22620_s27 + $0x1674] ss:$8 sps:$4 sm:$0xff]  }
 0x555   : > { %6398 = vmatmul.mubr.bf16.gmra.mxu1 %v6175_v19  ;;  %7149 = vmatpush1.bf16.msra.mxu0 %v20542_v12  ;;  %v20608_v43 = vld [vmem:[%s22620_s27 + $0x1660] ss:$8 sps:$4 sm:$0xff]   ;;  %v20613_v7 = vld [vmem:[%s22620_s27 + $0x1654] ss:$8 sps:$4 sm:$0xff]   ;;  %v20622_v2 = vld [vmem:[%s22620_s27 + $0x1624] ss:$8 sps:$4 sm:$0xff]  }
 0x556   : > { %6851 = vmatpush1.bf16.msra.mxu1 %v20545_v30  ;;  %6874 = vmatprep.mubr.bf16.mxu1 %v24607_v16  ;;  %v20569_v16 = vld [vmem:[%s22620_s27 + $0x14f0] ss:$8 sps:$4 sm:$0xff]   ;;  %v20628_v30 = vld [vmem:[%s22620_s27 + $0x1604] ss:$8 sps:$4 sm:$0xff]   ;;  %v20626_v19 = vld [vmem:[%s22620_s27 + $0x1600] ss:$8 sps:$4 sm:$0xff]  }
 0x557   : > { %7150 = vmatprep.subr.bf16.mxu0 %v20550_v54  ;;  %6852 = vmatprep.subr.bf16.mxu1 %v20553_v40  ;;  %v20623_v12 = vld [vmem:[%s22620_s27 + $0x1610] ss:$8 sps:$4 sm:$0xff]   ;;  %v20632_v40 = vld [vmem:[%s22620_s27 + $0x16e0] ss:$8 sps:$4 sm:$0xff]   ;;  %v20661_v6 = vld [vmem:[%s22620_s27 + $0x1754] ss:$8 sps:$4 sm:$0xff]  }
 0x558   : > { %v20629_v54 = vld [vmem:[%s22620_s27 + $0x16f0] ss:$8 sps:$4 sm:$0xff]   ;;  %v20671_v38 = vld [vmem:[%s22620_s27 + $0x1860] ss:$8 sps:$4 sm:$0xff]  }
 0x559   : > { %7151 = vmatpush2.bf16.msra.mxu0 %v20548_v22  ;;  %v20637_v22 = vld [vmem:[%s22620_s27 + $0x16d4] ss:$8 sps:$4 sm:$0xff]  }
 0x55a   : > { %6853 = vmatpush1.bf16.msra.mxu1 %v20551_v29  ;;  %7152 = vmatprep.subr.bf16.mxu0 %v20556_v23  ;;  %v20635_v29 = vld [vmem:[%s22620_s27 + $0x16d0] ss:$8 sps:$4 sm:$0xff]   ;;  %v20640_v23 = vld [vmem:[%s22620_s27 + $0x16c4] ss:$8 sps:$4 sm:$0xff]  }
 0x55b   : > { %6854 = vmatprep.subr.bf16.mxu1 %v20559_v35  ;;  %v20638_v35 = vld [vmem:[%s22620_s27 + $0x16c0] ss:$8 sps:$4 sm:$0xff]  }
 0x55d   : > { %7153 = vmatpush2.bf16.msra.mxu0 %v20554_v57  ;;  %v20643_v57 = vld [vmem:[%s22620_s27 + $0x16b4] ss:$8 sps:$4 sm:$0xff]  }
 0x55e   : > { %6855 = vmatpush1.bf16.msra.mxu1 %v20557_v31  ;;  %7154 = vmatprep.subr.bf16.mxu0 %v20562_v13  ;;  %v20641_v31 = vld [vmem:[%s22620_s27 + $0x16b0] ss:$8 sps:$4 sm:$0xff]   ;;  %v20646_v13 = vld [vmem:[%s22620_s27 + $0x16a4] ss:$8 sps:$4 sm:$0xff]  }
 0x55f   : > { %6856 = vmatprep.subr.bf16.mxu1 %v20565_v26  ;;  %v20644_v26 = vld [vmem:[%s22620_s27 + $0x16a0] ss:$8 sps:$4 sm:$0xff]  }
 0x561   : > { %7155 = vmatpush2.bf16.msra.mxu0 %v20560_v34  ;;  %v20649_v34 = vld [vmem:[%s22620_s27 + $0x1694] ss:$8 sps:$4 sm:$0xff]  }
 0x562   : > { %6857 = vmatpush1.bf16.msra.mxu1 %v20563_v21  ;;  %7156 = vmatprep.subr.bf16.mxu0 %v20568_v1  ;;  %v20647_v21 = vld [vmem:[%s22620_s27 + $0x1690] ss:$8 sps:$4 sm:$0xff]   ;;  %v20652_v1 = vld [vmem:[%s22620_s27 + $0x1684] ss:$8 sps:$4 sm:$0xff]  }
 0x563   : > { %6858 = vmatprep.subr.bf16.mxu1 %v20571_v24  ;;  %v20650_v24 = vld [vmem:[%s22620_s27 + $0x1680] ss:$8 sps:$4 sm:$0xff]  }
 0x565   : > { %7157 = vmatpush2.bf16.msra.mxu0 %v20566_v17  ;;  %v20653_v17 = vld [vmem:[%s22620_s27 + $0x1770] ss:$8 sps:$4 sm:$0xff]  }
 0x566   : > { %6859 = vmatpush2.bf16.msra.mxu1 %v20569_v16  ;;  %7158 = vmatprep.subr.bf16.mxu0 %v20574_v15  ;;  %v20655_v16 = vld [vmem:[%s22620_s27 + $0x1774] ss:$8 sps:$4 sm:$0xff]   ;;  %v20658_v15 = vld [vmem:[%s22620_s27 + $0x1764] ss:$8 sps:$4 sm:$0xff]  }
 0x567   : > { %6860 = vmatprep.subr.bf16.mxu1 %v20577_v46  ;;  %v20665_v46 = vld [vmem:[%s22620_s27 + $0x1870] ss:$8 sps:$4 sm:$0xff]  }
 0x569   : > { %7159 = vmatpush2.bf16.msra.mxu0 %v20572_v39  ;;  %v20664_v39 = vld [vmem:[%s22620_s27 + $0x1744] ss:$8 sps:$4 sm:$0xff]  }
 0x56a   : > { %6861 = vmatpush2.bf16.msra.mxu1 %v20575_v28  ;;  %7160 = vmatprep.subr.bf16.mxu0 %v20580_v49  ;;  %v20677_v28 = vld [vmem:[%s22620_s27 + $0x1850] ss:$8 sps:$4 sm:$0xff]   ;;  %v20662_v49 = vld [vmem:[%s22620_s27 + $0x1740] ss:$8 sps:$4 sm:$0xff]  }
 0x56b   : > { %6862 = vmatprep.subr.bf16.mxu1 %v20583_v37  ;;  %v20685_v37 = vld [vmem:[%s22620_s27 + $0x1844] ss:$8 sps:$4 sm:$0xff]  }
 0x56d   : > { %7161 = vmatpush2.bf16.msra.mxu0 %v20578_v4  ;;  %v20670_v4 = vld [vmem:[%s22620_s27 + $0x1734] ss:$8 sps:$4 sm:$0xff]  }
 0x56e   : > { %6863 = vmatpush2.bf16.msra.mxu1 %v20581_v52  ;;  %7162 = vmatprep.subr.bf16.mxu0 %v20586_v18  ;;  %v20683_v52 = vld [vmem:[%s22620_s27 + $0x1840] ss:$8 sps:$4 sm:$0xff]   ;;  %v20668_v18 = vld [vmem:[%s22620_s27 + $0x1730] ss:$8 sps:$4 sm:$0xff]  }
 0x56f   : > { %6864 = vmatprep.subr.bf16.mxu1 %v20589_v5  ;;  %v20691_v5 = vld [vmem:[%s22620_s27 + $0x1834] ss:$8 sps:$4 sm:$0xff]  }
 0x571   : > { %7163 = vmatpush2.bf16.msra.mxu0 %v20584_v11  ;;  %v20676_v11 = vld [vmem:[%s22620_s27 + $0x1724] ss:$8 sps:$4 sm:$0xff]  }
 0x572   : > { %6865 = vmatpush2.bf16.msra.mxu1 %v20587_v50  ;;  %7164 = vmatprep.subr.bf16.mxu0 %v20592_v3  ;;  %v20689_v50 = vld [vmem:[%s22620_s27 + $0x1830] ss:$8 sps:$4 sm:$0xff]   ;;  %v20674_v3 = vld [vmem:[%s22620_s27 + $0x1720] ss:$8 sps:$4 sm:$0xff]  }
 0x573   : > { %6866 = vmatprep.subr.bf16.mxu1 %v20595_v53  ;;  %v20682_v53 = vld [vmem:[%s22620_s27 + $0x1714] ss:$8 sps:$4 sm:$0xff]  }
 0x575   : > { %7165 = vmatpush2.bf16.msra.mxu0 %v20590_v62  ;;  %v20680_v62 = vld [vmem:[%s22620_s27 + $0x1710] ss:$8 sps:$4 sm:$0xff]  }
 0x576   : > { %6867 = vmatpush2.bf16.msra.mxu1 %v20593_v25  ;;  %v20688_v25 = vld [vmem:[%s22620_s27 + $0x1704] ss:$8 sps:$4 sm:$0xff]  }
 0x577   : > { %6868 = vmatprep.subr.bf16.mxu1 %v20598_v32  ;;  %v20686_v32 = vld [vmem:[%s22620_s27 + $0x1700] ss:$8 sps:$4 sm:$0xff]  }
 0x578   : > { %7167 = vmatmul.mubr.bf16.vlgmr.msra.gmra.mxu0 %v24618_v63  ;;  %v20605_v63 = vld [vmem:[%s22620_s27 + $0x1670] ss:$8 sps:$4 sm:$0xff]  }
 0x579   : > { %7176 = vmatprep.mubr.bf16.mxu0 %v24656_v41  ;;  %v20610_v41 = vld [vmem:[%s22620_s27 + $0x1664] ss:$8 sps:$4 sm:$0xff]  }
 0x57a   : > { %6869 = vmatpush2.bf16.msra.mxu1 %v20596_v44 }
 0x57b   : > { %6870 = vmatprep.subr.bf16.mxu1 %v20601_v14 }
 0x57e   : > { %6871 = vmatpush2.bf16.msra.mxu1 %v20599_v60 }
 0x57f   : > { %6872 = vmatprep.subr.bf16.mxu1 %v20604_v42 }
 0x580   : > { %7177 = vmatmul.mubr.bf16.gmra.mxu0 %v24640_v9  ;;  %v20616_v9 = vld [vmem:[%s22620_s27 + $0x1644] ss:$8 sps:$4 sm:$0xff]  }
 0x581   : > { %7186 = vmatprep.mubr.bf16.mxu0 %v24636_v58  ;;  %v20611_v58 = vld [vmem:[%s22620_s27 + $0x1650] ss:$8 sps:$4 sm:$0xff]  }
 0x582   : > { %6873 = vmatpush2.bf16.msra.mxu1 %v20602_v45 }
 0x583   : > { %7414 = vmatprep.subr.bf16.mxu1 %v20607_v47 }
 0x585   : > { %6875 = vmatmul.mubr.bf16.vlgmr.msra.gmra.mxu1 %v24630_v55  ;;  %v20614_v55 = vld [vmem:[%s22620_s27 + $0x1640] ss:$8 sps:$4 sm:$0xff]  }
 0x586   : > { %6884 = vmatprep.mubr.bf16.mxu1 %v24648_v10  ;;  %7415 = vmatpush1.bf16.msra.mxu1 %v20605_v63  ;;  %v20619_v10 = vld [vmem:[%s22620_s27 + $0x1634] ss:$8 sps:$4 sm:$0xff]  }
 0x587   : > { %7416 = vmatprep.subr.bf16.mxu1 %v20610_v41 }
 0x588   : > { %7187 = vmatmul.mubr.bf16.gmra.mxu0 %v24620_v33  ;;  %v20617_v33 = vld [vmem:[%s22620_s27 + $0x1630] ss:$8 sps:$4 sm:$0xff]  }
 0x58a   : > { %7417 = vmatpush1.bf16.msra.mxu1 %v20608_v43 }
 0x58b   : > { %7418 = vmatprep.subr.bf16.mxu1 %v20613_v7 }
 0x58d   : > { %6885 = vmatmul.mubr.bf16.gmra.mxu1 %v24663_v48  ;;  %v20625_v48 = vld [vmem:[%s22620_s27 + $0x1614] ss:$8 sps:$4 sm:$0xff]  }
 0x58e   : > { %6894 = vmatprep.mubr.bf16.mxu1 %v6674_v20  ;;  %7419 = vmatpush1.bf16.msra.mxu1 %v20611_v58  ;;  %v20620_v20 = vld [vmem:[%s22620_s27 + $0x1620] ss:$8 sps:$4 sm:$0xff]  }
 0x58f   : > { %7420 = vmatprep.subr.bf16.mxu1 %v20616_v9 }
 0x592   : > { %7421 = vmatpush1.bf16.msra.mxu1 %v20614_v55 }
 0x593   : > { %7422 = vmatprep.subr.bf16.mxu1 %v20619_v10 }
 0x595   : > { %6895 = vmatmul.mubr.bf16.gmra.mxu1 %v6672_v36  ;;  %v20631_v36 = vld [vmem:[%s22620_s27 + $0x16f4] ss:$8 sps:$4 sm:$0xff]  }
 0x596   : > { %7423 = vmatpush1.bf16.msra.mxu1 %v20617_v33  ;;  %7446 = vmatprep.mubr.bf16.mxu1 %v24666_v0  ;;  %v20634_v0 = vld [vmem:[%s22620_s27 + $0x16e4] ss:$8 sps:$4 sm:$0xff]  }
 0x597   : > { %7424 = vmatprep.subr.bf16.mxu1 %v20622_v2 }
 0x59a   : > { %7425 = vmatpush1.bf16.msra.mxu1 %v20620_v20 }
 0x59b   : > { %7426 = vmatprep.subr.bf16.mxu1 %v20625_v48 }
 0x59e   : > { %7427 = vmatpush1.bf16.msra.mxu1 %v20623_v12 }
 0x59f   : > { %7428 = vmatprep.subr.bf16.mxu1 %v20628_v30 }
 0x5a2   : > { %7429 = vmatpush1.bf16.msra.mxu1 %v20626_v19 }
 0x5a3   : > { %7430 = vmatprep.subr.bf16.mxu1 %v20631_v36 }
 0x5a6   : > { %7431 = vmatpush2.bf16.msra.mxu1 %v20629_v54 }
 0x5a7   : > { %7432 = vmatprep.subr.bf16.mxu1 %v20634_v0 }
 0x5aa   : > { %7433 = vmatpush2.bf16.msra.mxu1 %v20632_v40 }
 0x5ab   : > { %7434 = vmatprep.subr.bf16.mxu1 %v20637_v22 }
 0x5ae   : > { %7435 = vmatpush2.bf16.msra.mxu1 %v20635_v29 }
 0x5af   : > { %7436 = vmatprep.subr.bf16.mxu1 %v20640_v23 }
 0x5b2   : > { %7437 = vmatpush2.bf16.msra.mxu1 %v20638_v35 }
 0x5b3   : > { %7438 = vmatprep.subr.bf16.mxu1 %v20643_v57 }
 0x5b6   : > { %7439 = vmatpush2.bf16.msra.mxu1 %v20641_v31 }
 0x5b7   : > { %7440 = vmatprep.subr.bf16.mxu1 %v20646_v13 }
 0x5ba   : > { %7441 = vmatpush2.bf16.msra.mxu1 %v20644_v26  ;;  %v20692_v26 = vld [vmem:[%s22620_s27 + $0x17f0] ss:$8 sps:$4 sm:$0xff]  }
 0x5bb   : > { %7442 = vmatprep.subr.bf16.mxu1 %v20649_v34  ;;  %v20694_v34 = vld [vmem:[%s22620_s27 + $0x17f4] ss:$8 sps:$4 sm:$0xff]  }
 0x5be   : > { %7443 = vmatpush2.bf16.msra.mxu1 %v20647_v21  ;;  %v20695_v21 = vld [vmem:[%s22620_s27 + $0x1820] ss:$8 sps:$4 sm:$0xff]  }
 0x5bf   : > { %7444 = vmatprep.subr.bf16.mxu1 %v20652_v1  ;;  %v20697_v1 = vld [vmem:[%s22620_s27 + $0x1824] ss:$8 sps:$4 sm:$0xff]  }
 0x5c2   : > { %7445 = vmatpush2.bf16.msra.mxu1 %v20650_v24  ;;  %v20698_v24 = vld [vmem:[%s22620_s27 + $0x17e0] ss:$8 sps:$4 sm:$0xff]  }
 0x5c3   : > { %8052 = vmatprep.subr.bf16.mxu1 %v20655_v16  ;;  %v20701_v16 = vld [vmem:[%s22620_s27 + $0x1810] ss:$8 sps:$4 sm:$0xff]  }
 0x5c5   : > { %7447 = vmatmul.mubr.bf16.vlgmr.msra.gmra.mxu1 %v24670_v8  ;;  %v20656_v8 = vld [vmem:[%s22620_s27 + $0x1760] ss:$8 sps:$4 sm:$0xff]  }
 0x5c6   : > { %7456 = vmatprep.mubr.bf16.mxu1 %v24675_v51  ;;  %8053 = vmatpush1.bf16.msra.mxu1 %v20653_v17  ;;  %v20667_v51 = vld [vmem:[%s22620_s27 + $0x1874] ss:$8 sps:$4 sm:$0xff]   ;;  %v20700_v17 = vld [vmem:[%s22620_s27 + $0x17e4] ss:$8 sps:$4 sm:$0xff]  }
 0x5c7   : > { %8054 = vmatprep.subr.bf16.mxu1 %v20658_v15  ;;  %7839 = vmatprep.subr.bf16.mxu0 %v20667_v51  ;;  %v20703_v15 = vld [vmem:[%s22620_s27 + $0x1814] ss:$8 sps:$4 sm:$0xff]   ;;  %v20709_v51 = vld [vmem:[%s22620_s27 + $0x1804] ss:$8 sps:$4 sm:$0xff]  }
 0x5c8   : > { %7840 = vmatpush1.bf16.msra.mxu0 %v20665_v46  ;;  %v20706_v46 = vld [vmem:[%s22620_s27 + $0x17d4] ss:$8 sps:$4 sm:$0xff]  }
 0x5ca   : > { %8055 = vmatpush1.bf16.msra.mxu1 %v20656_v8  ;;  %v20704_v8 = vld [vmem:[%s22620_s27 + $0x17d0] ss:$8 sps:$4 sm:$0xff]  }
 0x5cb   : > { %8056 = vmatprep.subr.bf16.mxu1 %v20661_v6  ;;  %v20707_v6 = vld [vmem:[%s22620_s27 + $0x1800] ss:$8 sps:$4 sm:$0xff]  }
 0x5cd   : > { %7457 = vmatmul.mubr.bf16.gmra.mxu1 %v24680_v61  ;;  %v20679_v61 = vld [vmem:[%s22620_s27 + $0x1854] ss:$8 sps:$4 sm:$0xff]  }
 0x5ce   : > { %7466 = vmatprep.mubr.bf16.mxu1 %v7246_v27  ;;  %v20673_v27 = vld [vmem:[%s22620_s27 + $0x1864] ss:$8 sps:$4 sm:$0xff]  }
 0x5cf   : > { %7841 = vmatprep.subr.bf16.mxu0 %v20673_v27  ;;  %v20710_v27 = vld [vmem:[%s22620_s27 + $0x17c0] ss:$8 sps:$4 sm:$0xff]  }
 0x5d0   : > { %7842 = vmatpush1.bf16.msra.mxu0 %v20671_v38  ;;  %v20712_v38 = vld [vmem:[%s22620_s27 + $0x17c4] ss:$8 sps:$4 sm:$0xff]  }
 0x5d1   : > { %7843 = vmatprep.subr.bf16.mxu0 %v20679_v61  ;;  %v20715_v61 = vld [vmem:[%s22620_s27 + $0x18f4] ss:$8 sps:$4 sm:$0xff]  }
 0x5d4   : > { %7844 = vmatpush1.bf16.msra.mxu0 %v20677_v28  ;;  %v20718_v28 = vld [vmem:[%s22620_s27 + $0x17b4] ss:$8 sps:$4 sm:$0xff]  }
 0x5d5   : > { %7467 = vmatmul.mubr.bf16.gmra.mxu1 %v7244_v56  ;;  %v20659_v56 = vld [vmem:[%s22620_s27 + $0x1750] ss:$8 sps:$4 sm:$0xff]   ;;  %7845 = vmatprep.subr.bf16.mxu0 %v20685_v37  ;;  %v20721_v37 = vld [vmem:[%s22620_s27 + $0x18e4] ss:$8 sps:$4 sm:$0xff]  }
 0x5d6   : > { %8057 = vmatpush1.bf16.msra.mxu1 %v20659_v56  ;;  %v20713_v56 = vld [vmem:[%s22620_s27 + $0x18f0] ss:$8 sps:$4 sm:$0xff]  }
 0x5d7   : > { %8058 = vmatprep.subr.bf16.mxu1 %v20664_v39  ;;  %v20716_v39 = vld [vmem:[%s22620_s27 + $0x17b0] ss:$8 sps:$4 sm:$0xff]  }
 0x5d8   : > { %7846 = vmatpush1.bf16.msra.mxu0 %v20683_v52  ;;  %v20727_v52 = vld [vmem:[%s22620_s27 + $0x18d4] ss:$8 sps:$4 sm:$0xff]  }
 0x5d9   : > { %7847 = vmatprep.subr.bf16.mxu0 %v20691_v5  ;;  %v20725_v5 = vld [vmem:[%s22620_s27 + $0x18d0] ss:$8 sps:$4 sm:$0xff]  }
 0x5da   : > { %8059 = vmatpush1.bf16.msra.mxu1 %v20662_v49  ;;  %v20719_v49 = vld [vmem:[%s22620_s27 + $0x18e0] ss:$8 sps:$4 sm:$0xff]  }
 0x5db   : > { %8060 = vmatprep.subr.bf16.mxu1 %v20670_v4  ;;  %v20724_v4 = vld [vmem:[%s22620_s27 + $0x17a4] ss:$8 sps:$4 sm:$0xff]  }
 0x5dc   : > { %7848 = vmatpush1.bf16.msra.mxu0 %v20689_v50  ;;  %v20733_v50 = vld [vmem:[%s22620_s27 + $0x18c4] ss:$8 sps:$4 sm:$0xff]  }
 0x5dd   : > { %7849 = vmatprep.subr.bf16.mxu0 %v20697_v1 }
 0x5de   : > { %8061 = vmatpush1.bf16.msra.mxu1 %v20668_v18  ;;  %v20722_v18 = vld [vmem:[%s22620_s27 + $0x17a0] ss:$8 sps:$4 sm:$0xff]  }
 0x5df   : > { %8062 = vmatprep.subr.bf16.mxu1 %v20676_v11  ;;  %v20730_v11 = vld [vmem:[%s22620_s27 + $0x1794] ss:$8 sps:$4 sm:$0xff]  }
 0x5e0   : > { %7850 = vmatpush1.bf16.msra.mxu0 %v20695_v21 }
 0x5e1   : > { %7851 = vmatprep.subr.bf16.mxu0 %v20703_v15 }
 0x5e2   : > { %8063 = vmatpush1.bf16.msra.mxu1 %v20674_v3 }
 0x5e3   : > { %8064 = vmatprep.subr.bf16.mxu1 %v20682_v53  ;;  %v20728_v53 = vld [vmem:[%s22620_s27 + $0x1790] ss:$8 sps:$4 sm:$0xff]  }
 0x5e4   : > { %7852 = vmatpush1.bf16.msra.mxu0 %v20701_v16  ;;  %v20763_v16 = vld [vmem:[%s22620_s27 + $0x1974] ss:$8 sps:$4 sm:$0xff]  }
 0x5e5   : > { %7853 = vmatprep.subr.bf16.mxu0 %v20709_v51 }
 0x5e6   : > { %8065 = vmatpush1.bf16.msra.mxu1 %v20680_v62  ;;  %v20731_v62 = vld [vmem:[%s22620_s27 + $0x18c0] ss:$8 sps:$4 sm:$0xff]  }
 0x5e7   : > { %8066 = vmatprep.subr.bf16.mxu1 %v20688_v25  ;;  %v20736_v25 = vld [vmem:[%s22620_s27 + $0x1784] ss:$8 sps:$4 sm:$0xff]  }
 0x5e8   : > { %7854 = vmatpush1.bf16.msra.mxu0 %v20707_v6 }
 0x5e9   : > { %7855 = vmatprep.subr.bf16.mxu0 %v20715_v61 }
 0x5ea   : > { %8067 = vmatpush1.bf16.msra.mxu1 %v20686_v32 }
 0x5eb   : > { %8068 = vmatprep.subr.bf16.mxu1 %v20694_v34 }
 0x5ec   : > { %7856 = vmatpush2.bf16.msra.mxu0 %v20713_v56 }
 0x5ed   : > { %7857 = vmatprep.subr.bf16.mxu0 %v20721_v37 }
 0x5ee   : > { %8069 = vmatpush2.bf16.msra.mxu1 %v20692_v26 }
 0x5ef   : > { %8070 = vmatprep.subr.bf16.mxu1 %v20700_v17 }
 0x5f0   : > { %7858 = vmatpush2.bf16.msra.mxu0 %v20719_v49 }
 0x5f1   : > { %7859 = vmatprep.subr.bf16.mxu0 %v20727_v52 }
 0x5f2   : > { %8071 = vmatpush2.bf16.msra.mxu1 %v20698_v24  ;;  %v20755_v24 = vld [vmem:[%s22620_s27 + $0x1880] ss:$8 sps:$4 sm:$0xff]  }
 0x5f3   : > { %8072 = vmatprep.subr.bf16.mxu1 %v20706_v46 }
 0x5f4   : > { %7860 = vmatpush2.bf16.msra.mxu0 %v20725_v5 }
 0x5f5   : > { %7861 = vmatprep.subr.bf16.mxu0 %v20733_v50  ;;  %v22281_v50 = vld [vmem:[%s22731_s24] sm:$0xff] }
 0x5f6   : > { %8073 = vmatpush2.bf16.msra.mxu1 %v20704_v8 }
 0x5f7   : > { %8074 = vmatprep.subr.bf16.mxu1 %v20712_v38 }
 0x5f8   : > { %v6600_v44 = vpop.f32.mrf.mxu0  ;;  %7862 = vmatpush2.bf16.msra.mxu0 %v20731_v62 }
 0x5fa   : > { %v6602_v14 = vpop.f32.mrf.mxu0  ;;  %8075 = vmatpush2.bf16.msra.mxu1 %v20710_v27 }
 0x5fb   : > { %8076 = vmatprep.subr.bf16.mxu1 %v20718_v28 }
 0x5fc   : > { %v6604_v60 = vpop.f32.mrf.mxu0 }
 0x5fe   : > { %v24808_v42 = vpop.f32.mrf.mxu0  ;;  %8077 = vmatpush2.bf16.msra.mxu1 %v20716_v39 }
 0x5ff   : > { %8078 = vmatprep.subr.bf16.mxu1 %v20724_v4 }
 0x600   : > { %v6610_v45 = vpop.f32.mrf.mxu0 }
 0x602   : > { %v6612_v47 = vpop.f32.mrf.mxu0  ;;  %8079 = vmatpush2.bf16.msra.mxu1 %v20722_v18 }
 0x603   : > { %8080 = vmatprep.subr.bf16.mxu1 %v20730_v11 }
 0x604   : > { %v6614_v63 = vpop.f32.mrf.mxu0 }
 0x605   : > { %v6379_v41 = vpop.f32.mrf.mxu1 }
 0x606   : > { %v24810_v43 = vadd.f32 %v6600_v44, %v6379_v41  ;;  %v24812_v7 = vpop.f32.mrf.mxu0  ;;  %v20739_v44 = vld [vmem:[%s22620_s27 + $0x18b4] ss:$8 sps:$4 sm:$0xff]   ;;  %8081 = vmatpush2.bf16.msra.mxu1 %v20728_v53  ;;  %v20745_v41 = vld [vmem:[%s22620_s27 + $0x18a4] ss:$8 sps:$4 sm:$0xff]  }
 0x607   : > { %v6381_v58 = vpop.f32.mrf.mxu1  ;;  %8082 = vmatprep.subr.bf16.mxu1 %v20736_v25  ;;  %7863 = vmatprep.subr.bf16.mxu0 %v20739_v44  ;;  %v22282_v25 = vld [vmem:[%s22731_s24 + $0x8] sm:$0xff] }
 0x608   : > { %v24814_v9 = vadd.f32 %v6602_v14, %v6381_v58  ;;  %v6620_v55 = vpop.f32.mrf.mxu0 }
 0x609   : > { %v6383_v10 = vpop.f32.mrf.mxu1 }
 0x60a   : > { %v24816_v33 = vadd.f32 %v6604_v60, %v6383_v10  ;;  %v6622_v2 = vpop.f32.mrf.mxu0  ;;  %v20734_v60 = vld [vmem:[%s22620_s27 + $0x1780] ss:$8 sps:$4 sm:$0xff]  }
 0x60b   : > { %v24818_v20 = vpop.f32.mrf.mxu1  ;;  %8083 = vmatpush2.bf16.msra.mxu1 %v20734_v60 }
 0x60c   : > { %v6624_v48 = vpop.f32.mrf.mxu0 }
 0x60d   : > { %v6389_v12 = vpop.f32.mrf.mxu1 }
 0x60e   : > { %v24820_v30 = vadd.f32 %v6610_v45, %v6389_v12  ;;  %v6625_v19 = vpop.f32.mrf.mxu0  ;;  %v20737_v45 = vld [vmem:[%s22620_s27 + $0x18b0] ss:$8 sps:$4 sm:$0xff]  }
 0x60f   : > { %v6391_v36 = vpop.f32.mrf.mxu1  ;;  %7864 = vmatpush2.bf16.msra.mxu0 %v20737_v45 }
 0x610   : > { %v24822_v54 = vadd.f32 %v6612_v47, %v6391_v36  ;;  %v20742_v47 = vld [vmem:[%s22620_s27 + $0x1a74] ss:$8 sps:$4 sm:$0xff]   ;;  %7865 = vmatprep.subr.bf16.mxu0 %v20745_v41  ;;  %v20749_v36 = vld [vmem:[%s22620_s27 + $0x1890] ss:$8 sps:$4 sm:$0xff]  }
 0x611   : > { %v6393_v0 = vpop.f32.mrf.mxu1  ;;  %8602 = vmatprep.subr.bf16.mxu1 %v20742_v47 }
 0x612   : > { %v24824_v40 = vadd.f32 %v6614_v63, %v6393_v0 }
 0x613   : > { %v24826_v22 = vpop.f32.mrf.mxu1 }
 0x615   : > { %v6399_v29 = vpop.f32.mrf.mxu1 }
 0x616   : > { %v24828_v23 = vadd.f32 %v6620_v55, %v6399_v29  ;;  %v20743_v55 = vld [vmem:[%s22620_s27 + $0x18a0] ss:$8 sps:$4 sm:$0xff]  }
 0x617   : > { %v6401_v35 = vpop.f32.mrf.mxu1  ;;  %7866 = vmatpush2.bf16.msra.mxu0 %v20743_v55 }
 0x618   : > { %v24830_v57 = vadd.f32 %v6622_v2, %v6401_v35  ;;  %v20751_v2 = vld [vmem:[%s22620_s27 + $0x1894] ss:$8 sps:$4 sm:$0xff]   ;;  %v20757_v35 = vld [vmem:[%s22620_s27 + $0x1884] ss:$8 sps:$4 sm:$0xff]  }
 0x619   : > { %v6403_v31 = vpop.f32.mrf.mxu1  ;;  %7867 = vmatprep.subr.bf16.mxu0 %v20751_v2 }
 0x61b   : > { %v6404_v13 = vpop.f32.mrf.mxu1  ;;  %7868 = vmatpush2.bf16.msra.mxu0 %v20749_v36 }
 0x61c   : > { %7869 = vmatprep.subr.bf16.mxu0 %v20757_v35 }
 0x61f   : > { %7870 = vmatpush2.bf16.msra.mxu0 %v20755_v24 }
 0x620   : > { %8318 = vmatprep.subr.bf16.mxu0 %v20763_v16 }
 0x638   : > { %v7168_v3 = vpop.f32.mrf.mxu0 }
 0x63a   : > { %v7170_v32 = vpop.f32.mrf.mxu0 }
 0x63c   : > { %v7172_v14 = vpop.f32.mrf.mxu0 }
 0x63e   : > { %v24865_v63 = vpop.f32.mrf.mxu0 }
 0x640   : > { %v7178_v58 = vpop.f32.mrf.mxu0 }
 0x642   : > { %v7180_v10 = vpop.f32.mrf.mxu0 }
 0x644   : > { %v7182_v48 = vpop.f32.mrf.mxu0 }
 0x645   : > { %v6876_v12 = vpop.f32.mrf.mxu1 }
 0x646   : > { %v6903_v19 = vadd.f32 %v6876_v12, %v24810_v43  ;;  %v24872_v0 = vpop.f32.mrf.mxu0 }
 0x647   : > { %v6878_v29 = vpop.f32.mrf.mxu1 }
 0x648   : > { %v6904_v31 = vadd.f32 %v6878_v29, %v24814_v9  ;;  %v7195_v13 = vadd.f32 %v7168_v3, %v6903_v19  ;;  %v7188_v26 = vpop.f32.mrf.mxu0 }
 0x649   : > { %v6880_v34 = vpop.f32.mrf.mxu1 }
 0x64a   : > { %v6905_v21 = vadd.f32 %v6880_v34, %v24816_v33  ;;  %v7196_v1 = vadd.f32 %v7170_v32, %v6904_v31  ;;  %v7190_v17 = vpop.f32.mrf.mxu0 }
 0x64b   : > { %v6882_v43 = vpop.f32.mrf.mxu1 }
 0x64c   : > { %v7197_v15 = vadd.f32 %v7172_v14, %v6905_v21  ;;  %v7192_v46 = vpop.f32.mrf.mxu0 }
 0x64d   : > { %v6886_v8 = vpop.f32.mrf.mxu1 }
 0x64e   : > { %v6907_v51 = vadd.f32 %v6886_v8, %v24820_v30  ;;  %v7193_v6 = vpop.f32.mrf.mxu0 }
 0x64f   : > { %v6888_v9 = vpop.f32.mrf.mxu1 }
 0x650   : > { %v6908_v27 = vadd.f32 %v6888_v9, %v24822_v54  ;;  %v7199_v33 = vadd.f32 %v7178_v58, %v6907_v51  ;;  %v7487_v54 = vsub.s32 3, %v26534_v59 }
 0x651   : > { %v6890_v38 = vpop.f32.mrf.mxu1 }
 0x652   : > { %v6909_v56 = vadd.f32 %v6890_v38, %v24824_v40  ;;  %v7200_v61 = vadd.f32 %v7180_v10, %v6908_v27  ;;  %v7488_v3 = vrot.slane %v22281_v50, %v7487_v54  ;;  %v6607_v40 = vadd.f32 %v24808_v42, %v24818_v20 }
 0x653   : > { %v6892_v39 = vpop.f32.mrf.mxu1  ;;  %v7492_v32 = vrot.slane %v22282_v25, %v7487_v54  ;;  %v6617_v42 = vadd.f32 %v24812_v7, %v24826_v22 }
 0x654   : > { %v7201_v28 = vadd.f32 %v7182_v48, %v6909_v56  ;;  %v6906_v44 = vadd.f32 %v6882_v43, %v6607_v40 }
 0x655   : > { %v6896_v49 = vpop.f32.mrf.mxu1  ;;  %v6910_v19 = vadd.f32 %v6892_v39, %v6617_v42 }
 0x656   : > { %v6911_v37 = vadd.f32 %v6896_v49, %v24828_v23  ;;  %v7198_v58 = vadd.f32 %v24865_v63, %v6906_v44 }
 0x657   : > { %v6898_v4 = vpop.f32.mrf.mxu1  ;;  %v7202_v24 = vadd.f32 %v24872_v0, %v6910_v19 }
 0x658   : > { %v6912_v30 = vadd.f32 %v6898_v4, %v24830_v57  ;;  %v7203_v52 = vadd.f32 %v7188_v26, %v6911_v37 }
 0x659   : > { %v6900_v18 = vpop.f32.mrf.mxu1 }
 0x65a   : > { %v7204_v5 = vadd.f32 %v7190_v17, %v6912_v30 }
 0x65b   : > { %v6901_v11 = vpop.f32.mrf.mxu1 }
 0x685   : > { %v7448_v53 = vpop.f32.mrf.mxu1 }
 0x686   : > { %v7475_v62 = vadd.f32 %v7448_v53, %v7195_v13 }
 0x687   : > { %v7450_v23 = vpop.f32.mrf.mxu1 }
 0x688   : > { %v24889_v14 = vadd.f32 %v7488_v3, %v7475_v62  ;;  %v7476_v57 = vadd.f32 %v7450_v23, %v7196_v1 }
 0x689   : > { %v7452_v60 = vpop.f32.mrf.mxu1 }
 0x68a   : > { %v7513_v45 = vmin.f32 %v24889_v14, 0.0  ;;  %v24892_v47 = vadd.f32 %v7492_v32, %v7476_v57  ;;  %v7477_v41 = vadd.f32 %v7452_v60, %v7197_v15  ;;  %vm7503_vm12 = vcmp.gt.f32.partialorder %v24889_v14, 0.0 }
 0x68b   : > { %v7454_v55 = vpop.f32.mrf.mxu1 }
 0x68c   : > { %v7523_v20 = vmul.f32 1.442695, %v7513_v45  ;;  %v7514_v10 = vmin.f32 %v24892_v47, 0.0  ;;  %v24898_v2 = vadd.f32 %v7488_v3, %v7477_v41  ;;  %v7478_v48 = vadd.f32 %v7454_v55, %v7198_v58 }
 0x68d   : > { %v7458_v12 = vpop.f32.mrf.mxu1  ;;  %vm7504_vm15 = vcmp.gt.f32.partialorder %v24892_v47, 0.0 }
 0x68e   : > { %22213 = vpow2.f32 %v7523_v20  ;;  %v7525_v36 = vmul.f32 1.442695, %v7514_v10  ;;  %v7515_v29 = vmin.f32 %v24898_v2, 0.0  ;;  %v24901_v35 = vadd.f32 %v7492_v32, %v7478_v48  ;;  %v20740_v10 = vld [vmem:[%s22620_s27 + $0x1a70] ss:$8 sps:$4 sm:$0xff]  }
 0x68f   : > { %v7479_v31 = vadd.f32 %v7458_v12, %v7199_v33  ;;  %v7460_v63 = vpop.f32.mrf.mxu1  ;;  %vm7505_vm14 = vcmp.gt.f32.partialorder %v24898_v2, 0.0  ;;  %v20748_v48 = vld [vmem:[%s22620_s27 + $0x1a64] ss:$8 sps:$4 sm:$0xff]  }
 0x690   : > { %22215 = vpow2.f32 %v7525_v36  ;;  %v7527_v13 = vmul.f32 1.442695, %v7515_v29  ;;  %v7480_v26 = vadd.f32 %v7460_v63, %v7200_v61  ;;  %v7516_v7 = vmin.f32 %v24901_v35, 0.0 }
 0x691   : > { %v24904_v22 = vadd.f32 %v7488_v3, %v7479_v31  ;;  %v7462_v34 = vpop.f32.mrf.mxu1  ;;  %vm7506_vm0 = vcmp.gt.f32.partialorder %v24901_v35, 0.0 }
 0x692   : > { %22217 = vpow2.f32 %v7527_v13  ;;  %v24906_v21 = vadd.f32 %v7492_v32, %v7480_v26  ;;  %v7481_v1 = vadd.f32 %v7462_v34, %v7201_v28  ;;  %v7529_v17 = vmul.f32 1.442695, %v7516_v7 }
 0x693   : > { %v7517_v43 = vmin.f32 %v24904_v22, 0.0  ;;  %v7464_v16 = vpop.f32.mrf.mxu1  ;;  %vm7507_vm3 = vcmp.gt.f32.partialorder %v24904_v22, 0.0 }
 0x694   : > { %v7518_v15 = vmin.f32 %v24906_v21, 0.0  ;;  %v24911_v46 = vadd.f32 %v7488_v3, %v7481_v1  ;;  %v7482_v8 = vadd.f32 %v7464_v16, %v7202_v24  ;;  %22219 = vpow2.f32 %v7529_v17  ;;  %v20746_v1 = vld [vmem:[%s22620_s27 + $0x1a60] ss:$8 sps:$4 sm:$0xff]   ;;  %v20754_v16 = vld [vmem:[%s22620_s27 + $0x1a54] ss:$8 sps:$4 sm:$0xff]  }
 0x695   : > { %v7531_v51 = vmul.f32 1.442695, %v7517_v43  ;;  %v7468_v6 = vpop.f32.mrf.mxu1  ;;  %vm7508_vm4 = vcmp.gt.f32.partialorder %v24906_v21, 0.0 }
 0x696   : > { %v7533_v9 = vmul.f32 1.442695, %v7518_v15  ;;  %v7519_v27 = vmin.f32 %v24911_v46, 0.0  ;;  %v24914_v33 = vadd.f32 %v7492_v32, %v7482_v8  ;;  %v7483_v38 = vadd.f32 %v7468_v6, %v7203_v52 }
 0x697   : > { %22221 = vpow2.f32 %v7531_v51  ;;  %v7470_v0 = vpop.f32.mrf.mxu1  ;;  %vm7509_vm11 = vcmp.gt.f32.partialorder %v24911_v46, 0.0 }
 0x698   : > { %22223 = vpow2.f32 %v7533_v9  ;;  %v7535_v56 = vmul.f32 1.442695, %v7519_v27  ;;  %v7520_v61 = vmin.f32 %v24914_v33, 0.0  ;;  %v24917_v39 = vadd.f32 %v7488_v3, %v7483_v38 }
 0x699   : > { %v7484_v28 = vadd.f32 %v7470_v0, %v7204_v5  ;;  %v7472_v49 = vpop.f32.mrf.mxu1 }
 0x69a   : > { %22225 = vpow2.f32 %v7535_v56  ;;  %v7537_v37 = vmul.f32 1.442695, %v7520_v61  ;;  %v7521_v30 = vmin.f32 %v24917_v39, 0.0 }
 0x69b   : > { %v22214_v4 = vpop.eup %22213  ;;  %v24920_v18 = vadd.f32 %v7492_v32, %v7484_v28  ;;  %v7473_v11 = vpop.f32.mrf.mxu1  ;;  %v20752_v28 = vld [vmem:[%s22620_s27 + $0x1a50] ss:$8 sps:$4 sm:$0xff]  }
 0x69c   : > { %22227 = vpow2.f32 %v7537_v37  ;;  %v7539_v52 = vmul.f32 1.442695, %v7521_v30  ;;  %v17409_v40 = vadd.f32 -1.0, %v22214_v4 }
 0x69d   : > { %v22216_v54 = vpop.eup %22215  ;;  %v7522_v50 = vmin.f32 %v24920_v18, 0.0 }
 0x69e   : > { %22229 = vpow2.f32 %v7539_v52  ;;  %v17410_v62 = vadd.f32 -1.0, %v22216_v54  ;;  %v7553_v32 = vsel %vm7503_vm12, %v24889_v14, %v17409_v40  ;;  %vm7510_vm12 = vcmp.gt.f32.partialorder %v24914_v33, 0.0  ;;  %v20760_v54 = vld [vmem:[%s22620_s27 + $0x1a44] ss:$8 sps:$4 sm:$0xff]  }
 0x69f   : > { %v22218_v53 = vpop.eup %22217  ;;  %v7541_v3 = vmul.f32 1.442695, %v7522_v50 }
 0x6a0   : > { %v17411_v5 = vadd.f32 -1.0, %v22218_v53  ;;  %v7554_v45 = vsel %vm7504_vm15, %v24892_v47, %v17410_v62  ;;  %vm7512_vm15 = vcmp.gt.f32.partialorder %v24920_v18, 0.0 }
 0x6a1   : > { %22231 = vpow2.f32 %v7541_v3  ;;  %v22220_v25 = vpop.eup %22219 }
 0x6a2   : > { %v7555_v44 = vsel %vm7505_vm14, %v24898_v2, %v17411_v5  ;;  %v17412_v57 = vadd.f32 -1.0, %v22220_v25  ;;  %vm7511_vm14 = vcmp.gt.f32.partialorder %v24917_v39, 0.0 }
 0x6a3   : > { %v24928_v23 = vpack.c.bf16 %v7555_v44, %v7553_v32 }
 0x6a4   : > { %v22222_v60 = vpop.eup %22221  ;;  %v7556_v58 = vsel %vm7506_vm0, %v24901_v35, %v17412_v57  ;;  %v20758_v57 = vld [vmem:[%s22620_s27 + $0x1a40] ss:$8 sps:$4 sm:$0xff]  }
 0x6a5   : > { %v22224_v41 = vpop.eup %22223  ;;  %v17413_v55 = vadd.f32 -1.0, %v22222_v60  ;;  %v7636_v14 = vshrl.u32 %v24928_v23, 16  ;;  %v7638_v42 = vshll.u32 %v24928_v23, 16  ;;  %v24935_v20 = vpack.c.bf16 %v7556_v58, %v7554_v45  ;;  %v20761_v60 = vld [vmem:[%s22620_s27 + $0x1970] ss:$8 sps:$4 sm:$0xff]  }
 0x6a6   : > { %v17414_v2 = vadd.f32 -1.0, %v22224_v41  ;;  %v8144_v26 = vrot.slane %v24928_v23, 1  ;;  %v8696_v56 = vrot.slane %v24928_v23, 2 }
 0x6a7   : > { %v22226_v47 = vpop.eup %22225  ;;  %v7640_v12 = vrot.slane %v7638_v42, 1  ;;  %v24943_v19 = vrot.slane %v7636_v14, 1  ;;  %8084 = vmatprep.mubr.bf16.mxu1 %v24935_v20  ;;  %v7648_v29 = vshrl.u32 %v24935_v20, 16  ;;  %v7650_v35 = vshll.u32 %v24935_v20, 16 }
 0x6a8   : > { %v17415_v36 = vadd.f32 -1.0, %v22226_v47  ;;  %v24948_v31 = vrot.slane %v7638_v42, 2  ;;  %v7557_v13 = vsel %vm7507_vm3, %v24904_v22, %v17413_v55  ;;  %8085 = vmatmul.mubr.bf16.vlgmr.msra.gmra.mxu1 %v24928_v23  ;;  %v7558_v22 = vsel %vm7508_vm4, %v24906_v21, %v17414_v2  ;;  %v20766_v55 = vld [vmem:[%s22620_s27 + $0x1a34] ss:$8 sps:$4 sm:$0xff]   ;;  %v20781_v23 = vld [vmem:[%s22620_s27 + $0x1944] ss:$8 sps:$4 sm:$0xff]  }
 0x6a9   : > { %v22228_v63 = vpop.eup %22227  ;;  %8603 = vmatpush1.bf16.msra.mxu1 %v20740_v10  ;;  %v7652_v24 = vrot.slane %v7650_v35, 1  ;;  %v24961_v17 = vrot.slane %v7648_v29, 1  ;;  %v7641_v15 = vor.u32 %v7640_v12, %v7636_v14  ;;  %v8420_v8 = vrot.slane %v7650_v35, 2 }
 0x6aa   : > { %v7559_v7 = vsel %vm7509_vm11, %v24911_v46, %v17415_v36  ;;  %v17416_v34 = vadd.f32 -1.0, %v22228_v63  ;;  %8604 = vmatprep.subr.bf16.mxu1 %v20748_v48  ;;  %v8147_v6 = vrot.slane %v24935_v20, 1  ;;  %v8414_v9 = vor.u32 %v24948_v31, %v24943_v19  ;;  %v20769_v48 = vld [vmem:[%s22620_s27 + $0x1964] ss:$8 sps:$4 sm:$0xff]  }
 0x6ab   : > { %v24966_v43 = vpack.c.bf16 %v7559_v7, %v7557_v13  ;;  %v22230_v51 = vpop.eup %22229  ;;  %v8699_v27 = vrot.slane %v24935_v20, 2  ;;  %v7653_v49 = vor.u32 %v7652_v24, %v7648_v29  ;;  %v20764_v29 = vld [vmem:[%s22620_s27 + $0x1a30] ss:$8 sps:$4 sm:$0xff]   ;;  %v20767_v24 = vld [vmem:[%s22620_s27 + $0x1960] ss:$8 sps:$4 sm:$0xff]  }
 0x6ac   : > { %v7560_v46 = vsel %vm7510_vm12, %v24914_v33, %v17416_v34  ;;  %v17417_v38 = vadd.f32 -1.0, %v22230_v51  ;;  %v8421_v33 = vor.u32 %v8420_v8, %v24961_v17  ;;  %v20772_v17 = vld [vmem:[%s22620_s27 + $0x1a24] ss:$8 sps:$4 sm:$0xff]  }
 0x6ad   : > { %v24976_v21 = vpack.c.bf16 %v7560_v46, %v7558_v22  ;;  %v7643_v0 = vshll.u32 %v24966_v43, 16  ;;  %8605 = vmatpush1.bf16.msra.mxu1 %v20746_v1  ;;  %v7659_v37 = vshrl.u32 %v24966_v43, 16  ;;  %v8145_v4 = vrot.slane %v24966_v43, 1 }
 0x6ae   : > { %v22232_v61 = vpop.eup %22231  ;;  %v7561_v30 = vsel %vm7511_vm14, %v24917_v39, %v17417_v38  ;;  %8606 = vmatprep.subr.bf16.mxu1 %v20754_v16 }
 0x6af   : > { %v17418_v11 = vadd.f32 -1.0, %v22232_v61  ;;  %8094 = vmatprep.mubr.bf16.mxu1 %v24976_v21  ;;  %v7655_v52 = vshll.u32 %v24976_v21, 16  ;;  %v7645_v50 = vrot.slane %v7643_v0, 1  ;;  %v24990_v40 = vpack.c.bf16 %v7561_v30, %v7561_v30 }
 0x6b0   : > { %v7667_v53 = vshrl.u32 %v24976_v21, 16  ;;  %v8415_v3 = vrot.slane %v7659_v37, 1  ;;  %v8148_v62 = vrot.slane %v24976_v21, 1  ;;  %8095 = vmatmul.mubr.bf16.gmra.mxu1 %v24966_v43  ;;  %v8416_v10 = vrot.slane %v7643_v0, 2 }
 0x6b1   : > { %v7562_v39 = vsel %vm7512_vm15, %v24920_v18, %v17418_v11  ;;  %v7657_v5 = vrot.slane %v7655_v52, 1  ;;  %v7646_v25 = vsel %vm711_vm7, %v7641_v15, %v7645_v50  ;;  %v8423_v32 = vrot.slane %v7655_v52, 2  ;;  %8607 = vmatpush1.bf16.msra.mxu1 %v20752_v28  ;;  %v20775_v15 = vld [vmem:[%s22620_s27 + $0x1954] ss:$8 sps:$4 sm:$0xff]   ;;  %v20779_v52 = vld [vmem:[%s22620_s27 + $0x1940] ss:$8 sps:$4 sm:$0xff]  }
 0x6b2   : > { %v24999_v44 = vpack.c.bf16 %v7562_v39, %v7562_v39  ;;  %v8422_v45 = vrot.slane %v7667_v53, 1  ;;  %v7661_v41 = vor.u32 %v7659_v37, %v7645_v50  ;;  %v7663_v58 = vshll.u32 %v24990_v40, 16  ;;  %8608 = vmatprep.subr.bf16.mxu1 %v20760_v54  ;;  %v20776_v54 = vld [vmem:[%s22620_s27 + $0x1a10] ss:$8 sps:$4 sm:$0xff]   ;;  %v20784_v50 = vld [vmem:[%s22620_s27 + $0x1a04] ss:$8 sps:$4 sm:$0xff]  }
 0x6b3   : > { %v7658_v18 = vsel %vm711_vm7, %v7653_v49, %v7657_v5  ;;  %v7669_v14 = vor.u32 %v7667_v53, %v7657_v5  ;;  %v8149_v42 = vsel %vm1249_vm1, %v8147_v6, %v8148_v62  ;;  %v8417_v35 = vor.u32 %v8416_v10, %v8415_v3  ;;  %v20770_v49 = vld [vmem:[%s22620_s27 + $0x1a20] ss:$8 sps:$4 sm:$0xff]   ;;  %v20785_v3 = vld [vmem:[%s22620_s27 + $0x1930] ss:$8 sps:$4 sm:$0xff]   ;;  %v20793_v39 = vld [vmem:[%s22620_s27 + $0x1924] ss:$8 sps:$4 sm:$0xff]  }
 0x6b4   : > { %7871 = vmatprep.mubr.bf16.mxu0 %v7658_v18  ;;  %v8424_v47 = vor.u32 %v8423_v32, %v8422_v45  ;;  %v7671_v2 = vshll.u32 %v24999_v44, 16  ;;  %v7665_v12 = vrot.slane %v7663_v58, 1  ;;  %v8432_v36 = vshrl.u32 %v24999_v44, 16  ;;  %v20782_v53 = vld [vmem:[%s22620_s27 + $0x1a00] ss:$8 sps:$4 sm:$0xff]  }
 0x6b5   : > { %7872 = vmatmul.mubr.bf16.vlgmr.msra.gmra.mxu0 %v7646_v25  ;;  %v8426_v63 = vshrl.u32 %v24990_v40, 16  ;;  %v8429_v13 = vrot.slane %v7663_v58, 2  ;;  %v25017_v7 = vsel %vm1249_vm1, %v8144_v26, %v8145_v4  ;;  %8609 = vmatpush1.bf16.msra.mxu1 %v20758_v57  ;;  %v25028_v8 = vsel %vm1534_vm13, %v8414_v9, %v8417_v35  ;;  %v20788_v5 = vld [vmem:[%s22620_s27 + $0x1af0] ss:$8 sps:$4 sm:$0xff]   ;;  %v20791_v25 = vld [vmem:[%s22620_s27 + $0x1920] ss:$8 sps:$4 sm:$0xff]  }
 0x6b6   : > { %8319 = vmatpush1.bf16.msra.mxu0 %v20761_v60  ;;  %v8425_v34 = vsel %vm1534_vm13, %v8421_v33, %v8424_v47  ;;  %v7673_v1 = vrot.slane %v7671_v2, 1  ;;  %v7666_v22 = vsel %vm711_vm7, %v7661_v41, %v7665_v12  ;;  %v8434_v16 = vrot.slane %v8432_v36, 1  ;;  %8610 = vmatprep.subr.bf16.mxu1 %v20766_v55  ;;  %v20773_v33 = vld [vmem:[%s22620_s27 + $0x1950] ss:$8 sps:$4 sm:$0xff]   ;;  %v20796_v32 = vld [vmem:[%s22620_s27 + $0x1ae4] ss:$8 sps:$4 sm:$0xff]  }
 0x6b7   : > { %8634 = vmatprep.mubr.bf16.mxu1 %v8425_v34  ;;  %v8435_v26 = vrot.slane %v7671_v2, 2  ;;  %v8428_v51 = vrot.slane %v8426_v63, 1  ;;  %v8152_v46 = vrot.slane %v24999_v44, 1  ;;  %8320 = vmatprep.subr.bf16.mxu0 %v20769_v48  ;;  %v8150_v38 = vrot.slane %v24990_v40, 1  ;;  %v20794_v57 = vld [vmem:[%s22620_s27 + $0x1ae0] ss:$8 sps:$4 sm:$0xff]  }
 0x6b8   : > { %v7674_v6 = vsel %vm711_vm7, %v7669_v14, %v7673_v1  ;;  %v8700_v0 = vrot.slane %v24976_v21, 2  ;;  %v8697_v61 = vrot.slane %v24966_v43, 2  ;;  %v8704_v28 = vrot.slane %v24999_v44, 2  ;;  %v20778_v43 = vld [vmem:[%s22620_s27 + $0x1a14] ss:$8 sps:$4 sm:$0xff]  }
 0x6b9   : > { %7881 = vmatprep.mubr.bf16.mxu0 %v7674_v6  ;;  %v8436_v19 = vor.u32 %v8435_v26, %v8434_v16  ;;  %v8430_v31 = vor.u32 %v8429_v13, %v8428_v51  ;;  %v25036_v9 = vsel %vm1249_vm1, %v8148_v62, %v8152_v46  ;;  %8611 = vmatpush1.bf16.msra.mxu1 %v20764_v29  ;;  %v8702_v11 = vrot.slane %v24990_v40, 2  ;;  %v20787_v40 = vld [vmem:[%s22620_s27 + $0x1934] ss:$8 sps:$4 sm:$0xff]   ;;  %v20797_v60 = vld [vmem:[%s22620_s27 + $0x1910] ss:$8 sps:$4 sm:$0xff]  }
 0x6ba   : > { %8321 = vmatpush1.bf16.msra.mxu0 %v20767_v24  ;;  %v25044_v21 = vsel %vm1249_vm1, %v8145_v4, %v8150_v38  ;;  %v25049_v37 = vsel %vm1831_vm2, %v8699_v27, %v8700_v0  ;;  %v25054_v30 = vsel %vm1831_vm2, %v8696_v56, %v8697_v61  ;;  %8612 = vmatprep.subr.bf16.mxu1 %v20772_v17  ;;  %v20790_v62 = vld [vmem:[%s22620_s27 + $0x1af4] ss:$8 sps:$4 sm:$0xff]   ;;  %v20805_v41 = vld [vmem:[%s22620_s27 + $0x1904] ss:$8 sps:$4 sm:$0xff]   ;;  %v20800_v58 = vld [vmem:[%s22620_s27 + $0x1ad0] ss:$8 sps:$4 sm:$0xff]  }
 0x6bb   : > { %8322 = vmatprep.subr.bf16.mxu0 %v20775_v15  ;;  %v25059_v4 = vsel %vm1534_vm13, %v8424_v47, %v8436_v19  ;;  %v25062_v20 = vsel %vm1534_vm13, %v8417_v35, %v8430_v31  ;;  %v25065_v27 = vsel %vm1831_vm2, %v8700_v0, %v8704_v28  ;;  %v25069_v56 = vsel %vm1831_vm2, %v8697_v61, %v8702_v11  ;;  %v20799_v44 = vld [vmem:[%s22620_s27 + $0x1914] ss:$8 sps:$4 sm:$0xff]   ;;  %v20803_v18 = vld [vmem:[%s22620_s27 + $0x1900] ss:$8 sps:$4 sm:$0xff]   ;;  %v20808_v55 = vld [vmem:[%s22620_s27 + $0x1ac4] ss:$8 sps:$4 sm:$0xff]  }
 0x6bc   : > { %v20802_v45 = vld [vmem:[%s22620_s27 + $0x1ad4] ss:$8 sps:$4 sm:$0xff]   ;;  %v20809_v10 = vld [vmem:[%s22620_s27 + $0x19f0] ss:$8 sps:$4 sm:$0xff]   ;;  %v20817_v2 = vld [vmem:[%s22620_s27 + $0x19e4] ss:$8 sps:$4 sm:$0xff]  }
 0x6bd   : > { %7882 = vmatmul.mubr.bf16.gmra.mxu0 %v7666_v22  ;;  %8613 = vmatpush1.bf16.msra.mxu1 %v20770_v49  ;;  %v20811_v14 = vld [vmem:[%s22620_s27 + $0x19f4] ss:$8 sps:$4 sm:$0xff]   ;;  %v20812_v48 = vld [vmem:[%s22620_s27 + $0x1ab0] ss:$8 sps:$4 sm:$0xff]   ;;  %v20815_v12 = vld [vmem:[%s22620_s27 + $0x19e0] ss:$8 sps:$4 sm:$0xff]  }
 0x6be   : > { %8323 = vmatpush1.bf16.msra.mxu0 %v20773_v33  ;;  %8350 = vmatprep.mubr.bf16.mxu0 %v8149_v42  ;;  %v20806_v42 = vld [vmem:[%s22620_s27 + $0x1ac0] ss:$8 sps:$4 sm:$0xff]   ;;  %v20814_v47 = vld [vmem:[%s22620_s27 + $0x1ab4] ss:$8 sps:$4 sm:$0xff]   ;;  %v20820_v36 = vld [vmem:[%s22620_s27 + $0x1aa4] ss:$8 sps:$4 sm:$0xff]  }
 0x6bf   : > { %8614 = vmatprep.subr.bf16.mxu1 %v20778_v43  ;;  %8324 = vmatprep.subr.bf16.mxu0 %v20781_v23  ;;  %v20823_v29 = vld [vmem:[%s22620_s27 + $0x19d4] ss:$8 sps:$4 sm:$0xff]   ;;  %v20818_v35 = vld [vmem:[%s22620_s27 + $0x1aa0] ss:$8 sps:$4 sm:$0xff]   ;;  %v20821_v63 = vld [vmem:[%s22620_s27 + $0x19d0] ss:$8 sps:$4 sm:$0xff]  }
 0x6c0   : > { %v20826_v13 = vld [vmem:[%s22620_s27 + $0x1a94] ss:$8 sps:$4 sm:$0xff]   ;;  %v20829_v34 = vld [vmem:[%s22620_s27 + $0x19c4] ss:$8 sps:$4 sm:$0xff]   ;;  %v20824_v1 = vld [vmem:[%s22620_s27 + $0x1a90] ss:$8 sps:$4 sm:$0xff]  }
 0x6c1   : > { %8615 = vmatpush1.bf16.msra.mxu1 %v20776_v54  ;;  %v20827_v24 = vld [vmem:[%s22620_s27 + $0x19c0] ss:$8 sps:$4 sm:$0xff]   ;;  %v20832_v17 = vld [vmem:[%s22620_s27 + $0x1a84] ss:$8 sps:$4 sm:$0xff]   ;;  %v20835_v22 = vld [vmem:[%s22620_s27 + $0x19b4] ss:$8 sps:$4 sm:$0xff]  }
 0x6c2   : > { %8325 = vmatpush1.bf16.msra.mxu0 %v20779_v52  ;;  %8616 = vmatprep.subr.bf16.mxu1 %v20784_v50  ;;  %v20830_v16 = vld [vmem:[%s22620_s27 + $0x1a80] ss:$8 sps:$4 sm:$0xff]   ;;  %v20833_v15 = vld [vmem:[%s22620_s27 + $0x19b0] ss:$8 sps:$4 sm:$0xff]   ;;  %v20838_v26 = vld [vmem:[%s22620_s27 + $0x19a4] ss:$8 sps:$4 sm:$0xff]  }
 0x6c3   : > { %8326 = vmatprep.subr.bf16.mxu0 %v20787_v40  ;;  %v20836_v51 = vld [vmem:[%s22620_s27 + $0x19a0] ss:$8 sps:$4 sm:$0xff]   ;;  %v20841_v46 = vld [vmem:[%s22620_s27 + $0x1994] ss:$8 sps:$4 sm:$0xff]   ;;  %v20839_v6 = vld [vmem:[%s22620_s27 + $0x1990] ss:$8 sps:$4 sm:$0xff]  }
 0x6c4   : > { %v20844_v38 = vld [vmem:[%s22620_s27 + $0x1984] ss:$8 sps:$4 sm:$0xff]   ;;  %v20842_v0 = vld [vmem:[%s22620_s27 + $0x1980] ss:$8 sps:$4 sm:$0xff]   ;;  %v20847_v61 = vld [vmem:[%s22620_s27 + $0x1b74] ss:$8 sps:$4 sm:$0xff]  }
 0x6c5   : > { %8617 = vmatpush1.bf16.msra.mxu1 %v20782_v53  ;;  %v20845_v19 = vld [vmem:[%s22620_s27 + $0x1b70] ss:$8 sps:$4 sm:$0xff]   ;;  %v20848_v31 = vld [vmem:[%s22620_s27 + $0x1b60] ss:$8 sps:$4 sm:$0xff]   ;;  %v20853_v28 = vld [vmem:[%s22620_s27 + $0x1b54] ss:$8 sps:$4 sm:$0xff]  }
 0x6c6   : > { %8327 = vmatpush1.bf16.msra.mxu0 %v20785_v3  ;;  %8618 = vmatprep.subr.bf16.mxu1 %v20790_v62  ;;  %v20851_v49 = vld [vmem:[%s22620_s27 + $0x1b50] ss:$8 sps:$4 sm:$0xff]   ;;  %v20856_v33 = vld [vmem:[%s22620_s27 + $0x1b44] ss:$8 sps:$4 sm:$0xff]   ;;  %v20866_v23 = vld [vmem:[%s22620_s27 + $0x1b00] ss:$8 sps:$4 sm:$0xff]  }
 0x6c7   : > { %8328 = vmatprep.subr.bf16.mxu0 %v20793_v39  ;;  %v20857_v11 = vld [vmem:[%s22620_s27 + $0x1b30] ss:$8 sps:$4 sm:$0xff]   ;;  %v20862_v43 = vld [vmem:[%s22620_s27 + $0x1b24] ss:$8 sps:$4 sm:$0xff]   ;;  %v20871_v54 = vld [vmem:[%s22620_s27 + $0x1bf4] ss:$8 sps:$4 sm:$0xff]  }
 0x6c8   : > { %v20869_v52 = vld [vmem:[%s22620_s27 + $0x1bf0] ss:$8 sps:$4 sm:$0xff]   ;;  %v20874_v50 = vld [vmem:[%s22620_s27 + $0x1be4] ss:$8 sps:$4 sm:$0xff]   ;;  %v20872_v40 = vld [vmem:[%s22620_s27 + $0x1be0] ss:$8 sps:$4 sm:$0xff]  }
 0x6c9   : > { %8619 = vmatpush2.bf16.msra.mxu1 %v20788_v5  ;;  %v20877_v53 = vld [vmem:[%s22620_s27 + $0x1bd4] ss:$8 sps:$4 sm:$0xff]   ;;  %v20875_v3 = vld [vmem:[%s22620_s27 + $0x1bd0] ss:$8 sps:$4 sm:$0xff]   ;;  %v20880_v62 = vld [vmem:[%s22620_s27 + $0x1bc4] ss:$8 sps:$4 sm:$0xff]  }
 0x6ca   : > { %8329 = vmatpush1.bf16.msra.mxu0 %v20791_v25  ;;  %8620 = vmatprep.subr.bf16.mxu1 %v20796_v32  ;;  %v20878_v39 = vld [vmem:[%s22620_s27 + $0x1bc0] ss:$8 sps:$4 sm:$0xff]   ;;  %v20883_v5 = vld [vmem:[%s22620_s27 + $0x1bb4] ss:$8 sps:$4 sm:$0xff]   ;;  %v20881_v25 = vld [vmem:[%s22620_s27 + $0x1bb0] ss:$8 sps:$4 sm:$0xff]  }
 0x6cb   : > { %8330 = vmatprep.subr.bf16.mxu0 %v20799_v44  ;;  %v20886_v32 = vld [vmem:[%s22620_s27 + $0x1ba4] ss:$8 sps:$4 sm:$0xff]   ;;  %v20884_v44 = vld [vmem:[%s22620_s27 + $0x1ba0] ss:$8 sps:$4 sm:$0xff]  }
 0x6cd   : > { %8621 = vmatpush2.bf16.msra.mxu1 %v20794_v57  ;;  %v20889_v57 = vld [vmem:[%s22620_s27 + $0x1b94] ss:$8 sps:$4 sm:$0xff]  }
 0x6ce   : > { %8331 = vmatpush1.bf16.msra.mxu0 %v20797_v60  ;;  %8622 = vmatprep.subr.bf16.mxu1 %v20802_v45  ;;  %v20887_v60 = vld [vmem:[%s22620_s27 + $0x1b90] ss:$8 sps:$4 sm:$0xff]   ;;  %v20892_v45 = vld [vmem:[%s22620_s27 + $0x1b84] ss:$8 sps:$4 sm:$0xff]  }
 0x6cf   : > { %8332 = vmatprep.subr.bf16.mxu0 %v20805_v41  ;;  %v20890_v41 = vld [vmem:[%s22620_s27 + $0x1b80] ss:$8 sps:$4 sm:$0xff]  }
 0x6d1   : > { %8623 = vmatpush2.bf16.msra.mxu1 %v20800_v58  ;;  %v20893_v58 = vld [vmem:[%s22620_s27 + $0x1c70] ss:$8 sps:$4 sm:$0xff]  }
 0x6d2   : > { %8333 = vmatpush1.bf16.msra.mxu0 %v20803_v18  ;;  %8624 = vmatprep.subr.bf16.mxu1 %v20808_v55  ;;  %v20895_v18 = vld [vmem:[%s22620_s27 + $0x1c74] ss:$8 sps:$4 sm:$0xff]   ;;  %v20898_v55 = vld [vmem:[%s22620_s27 + $0x1c64] ss:$8 sps:$4 sm:$0xff]  }
 0x6d3   : > { %8334 = vmatprep.subr.bf16.mxu0 %v20811_v14  ;;  %v20905_v14 = vld [vmem:[%s22620_s27 + $0x1d70] ss:$8 sps:$4 sm:$0xff]  }
 0x6d5   : > { %8625 = vmatpush2.bf16.msra.mxu1 %v20806_v42  ;;  %v20896_v42 = vld [vmem:[%s22620_s27 + $0x1c60] ss:$8 sps:$4 sm:$0xff]  }
 0x6d6   : > { %8335 = vmatpush2.bf16.msra.mxu0 %v20809_v10  ;;  %8626 = vmatprep.subr.bf16.mxu1 %v20814_v47  ;;  %v20907_v10 = vld [vmem:[%s22620_s27 + $0x1d74] ss:$8 sps:$4 sm:$0xff]   ;;  %v20913_v47 = vld [vmem:[%s22620_s27 + $0x1d64] ss:$8 sps:$4 sm:$0xff]  }
 0x6d7   : > { %8336 = vmatprep.subr.bf16.mxu0 %v20817_v2  ;;  %v20919_v2 = vld [vmem:[%s22620_s27 + $0x1d54] ss:$8 sps:$4 sm:$0xff]  }
 0x6d9   : > { %8627 = vmatpush2.bf16.msra.mxu1 %v20812_v48  ;;  %v20904_v48 = vld [vmem:[%s22620_s27 + $0x1c44] ss:$8 sps:$4 sm:$0xff]  }
 0x6da   : > { %8337 = vmatpush2.bf16.msra.mxu0 %v20815_v12  ;;  %8628 = vmatprep.subr.bf16.mxu1 %v20820_v36  ;;  %v20917_v12 = vld [vmem:[%s22620_s27 + $0x1d50] ss:$8 sps:$4 sm:$0xff]   ;;  %v20902_v36 = vld [vmem:[%s22620_s27 + $0x1c40] ss:$8 sps:$4 sm:$0xff]  }
 0x6db   : > { %8338 = vmatprep.subr.bf16.mxu0 %v20823_v29  ;;  %v20925_v29 = vld [vmem:[%s22620_s27 + $0x1d44] ss:$8 sps:$4 sm:$0xff]  }
 0x6dd   : > { %8629 = vmatpush2.bf16.msra.mxu1 %v20818_v35  ;;  %v20910_v35 = vld [vmem:[%s22620_s27 + $0x1c34] ss:$8 sps:$4 sm:$0xff]  }
 0x6de   : > { %8339 = vmatpush2.bf16.msra.mxu0 %v20821_v63  ;;  %8630 = vmatprep.subr.bf16.mxu1 %v20826_v13  ;;  %v20923_v63 = vld [vmem:[%s22620_s27 + $0x1d40] ss:$8 sps:$4 sm:$0xff]   ;;  %v20908_v13 = vld [vmem:[%s22620_s27 + $0x1c30] ss:$8 sps:$4 sm:$0xff]  }
 0x6df   : > { %8340 = vmatprep.subr.bf16.mxu0 %v20829_v34  ;;  %v20931_v34 = vld [vmem:[%s22620_s27 + $0x1d34] ss:$8 sps:$4 sm:$0xff]  }
 0x6e1   : > { %8631 = vmatpush2.bf16.msra.mxu1 %v20824_v1  ;;  %v20916_v1 = vld [vmem:[%s22620_s27 + $0x1c24] ss:$8 sps:$4 sm:$0xff]  }
 0x6e2   : > { %8341 = vmatpush2.bf16.msra.mxu0 %v20827_v24  ;;  %8632 = vmatprep.subr.bf16.mxu1 %v20832_v17  ;;  %v20929_v24 = vld [vmem:[%s22620_s27 + $0x1d30] ss:$8 sps:$4 sm:$0xff]   ;;  %v20914_v17 = vld [vmem:[%s22620_s27 + $0x1c20] ss:$8 sps:$4 sm:$0xff]  }
 0x6e3   : > { %8342 = vmatprep.subr.bf16.mxu0 %v20835_v22  ;;  %v20922_v22 = vld [vmem:[%s22620_s27 + $0x1c14] ss:$8 sps:$4 sm:$0xff]  }
 0x6e5   : > { %8633 = vmatpush2.bf16.msra.mxu1 %v20830_v16  ;;  %v20920_v16 = vld [vmem:[%s22620_s27 + $0x1c10] ss:$8 sps:$4 sm:$0xff]  }
 0x6e6   : > { %8343 = vmatpush2.bf16.msra.mxu0 %v20833_v15  ;;  %9259 = vmatprep.subr.bf16.mxu1 %v20907_v10  ;;  %v20928_v15 = vld [vmem:[%s22620_s27 + $0x1c04] ss:$8 sps:$4 sm:$0xff]  }
 0x6e7   : > { %8344 = vmatprep.subr.bf16.mxu0 %v20838_v26  ;;  %v20926_v26 = vld [vmem:[%s22620_s27 + $0x1c00] ss:$8 sps:$4 sm:$0xff]  }
 0x6e8   : > { %8635 = vmatmul.mubr.bf16.vlgmr.msra.gmra.mxu1 %v25028_v8  ;;  %v20850_v8 = vld [vmem:[%s22620_s27 + $0x1b64] ss:$8 sps:$4 sm:$0xff]  }
 0x6e9   : > { %8644 = vmatprep.mubr.bf16.mxu1 %v25059_v4  ;;  %v20860_v4 = vld [vmem:[%s22620_s27 + $0x1b20] ss:$8 sps:$4 sm:$0xff]   ;;  %9260 = vmatpush1.bf16.msra.mxu1 %v20905_v14  ;;  %v21003_v14 = vld [vmem:[%s22620_s27 + $0x1e74] ss:$8 sps:$4 sm:$0xff]  }
 0x6ea   : > { %8345 = vmatpush2.bf16.msra.mxu0 %v20836_v51  ;;  %9261 = vmatprep.subr.bf16.mxu1 %v20913_v47  ;;  %v20932_v51 = vld [vmem:[%s22620_s27 + $0x1cf0] ss:$8 sps:$4 sm:$0xff]  }
 0x6eb   : > { %8346 = vmatprep.subr.bf16.mxu0 %v20841_v46  ;;  %v20934_v46 = vld [vmem:[%s22620_s27 + $0x1cf4] ss:$8 sps:$4 sm:$0xff]  }
 0x6ee   : > { %8347 = vmatpush2.bf16.msra.mxu0 %v20839_v6  ;;  %v20935_v6 = vld [vmem:[%s22620_s27 + $0x1d20] ss:$8 sps:$4 sm:$0xff]  }
 0x6ef   : > { %8348 = vmatprep.subr.bf16.mxu0 %v20844_v38  ;;  %v20937_v38 = vld [vmem:[%s22620_s27 + $0x1d24] ss:$8 sps:$4 sm:$0xff]  }
 0x6f0   : > { %8645 = vmatmul.mubr.bf16.gmra.mxu1 %v25062_v20  ;;  %v20863_v20 = vld [vmem:[%s22620_s27 + $0x1b10] ss:$8 sps:$4 sm:$0xff]  }
 0x6f2   : > { %8349 = vmatpush2.bf16.msra.mxu0 %v20842_v0  ;;  %v20938_v0 = vld [vmem:[%s22620_s27 + $0x1ce0] ss:$8 sps:$4 sm:$0xff]  }
 0x6f3   : > { %8870 = vmatprep.subr.bf16.mxu0 %v20847_v61  ;;  %v20940_v61 = vld [vmem:[%s22620_s27 + $0x1ce4] ss:$8 sps:$4 sm:$0xff]  }
 0x6f5   : > { %8351 = vmatmul.mubr.bf16.vlgmr.msra.gmra.mxu0 %v25017_v7  ;;  %v20854_v7 = vld [vmem:[%s22620_s27 + $0x1b40] ss:$8 sps:$4 sm:$0xff]  }
 0x6f6   : > { %8360 = vmatprep.mubr.bf16.mxu0 %v25036_v9  ;;  %8871 = vmatpush1.bf16.msra.mxu0 %v20845_v19  ;;  %v20859_v9 = vld [vmem:[%s22620_s27 + $0x1b34] ss:$8 sps:$4 sm:$0xff]   ;;  %v20941_v19 = vld [vmem:[%s22620_s27 + $0x1d10] ss:$8 sps:$4 sm:$0xff]  }
 0x6f7   : > { %8872 = vmatprep.subr.bf16.mxu0 %v20850_v8  ;;  %v20943_v8 = vld [vmem:[%s22620_s27 + $0x1d14] ss:$8 sps:$4 sm:$0xff]  }
 0x6fa   : > { %8873 = vmatpush1.bf16.msra.mxu0 %v20848_v31  ;;  %v20946_v31 = vld [vmem:[%s22620_s27 + $0x1cd4] ss:$8 sps:$4 sm:$0xff]  }
 0x6fb   : > { %8874 = vmatprep.subr.bf16.mxu0 %v20853_v28  ;;  %v20944_v28 = vld [vmem:[%s22620_s27 + $0x1cd0] ss:$8 sps:$4 sm:$0xff]  }
 0x6fd   : > { %8361 = vmatmul.mubr.bf16.gmra.mxu0 %v25044_v21  ;;  %v20865_v21 = vld [vmem:[%s22620_s27 + $0x1b14] ss:$8 sps:$4 sm:$0xff]  }
 0x6fe   : > { %8875 = vmatpush1.bf16.msra.mxu0 %v20851_v49  ;;  %8902 = vmatprep.mubr.bf16.mxu0 %v25049_v37  ;;  %v20868_v37 = vld [vmem:[%s22620_s27 + $0x1b04] ss:$8 sps:$4 sm:$0xff]  }
 0x6ff   : > { %8876 = vmatprep.subr.bf16.mxu0 %v20856_v33  ;;  %v20949_v49 = vld [vmem:[%s22620_s27 + $0x1d04] ss:$8 sps:$4 sm:$0xff]   ;;  %v20947_v33 = vld [vmem:[%s22620_s27 + $0x1d00] ss:$8 sps:$4 sm:$0xff]  }
 0x702   : > { %8877 = vmatpush1.bf16.msra.mxu0 %v20854_v7  ;;  %v20950_v7 = vld [vmem:[%s22620_s27 + $0x1cc0] ss:$8 sps:$4 sm:$0xff]  }
 0x703   : > { %8878 = vmatprep.subr.bf16.mxu0 %v20859_v9  ;;  %v20952_v9 = vld [vmem:[%s22620_s27 + $0x1cc4] ss:$8 sps:$4 sm:$0xff]  }
 0x706   : > { %8879 = vmatpush1.bf16.msra.mxu0 %v20857_v11  ;;  %v20953_v11 = vld [vmem:[%s22620_s27 + $0x1df0] ss:$8 sps:$4 sm:$0xff]  }
 0x707   : > { %8880 = vmatprep.subr.bf16.mxu0 %v20862_v43  ;;  %v20955_v43 = vld [vmem:[%s22620_s27 + $0x1df4] ss:$8 sps:$4 sm:$0xff]  }
 0x70a   : > { %8881 = vmatpush1.bf16.msra.mxu0 %v20860_v4  ;;  %v20958_v4 = vld [vmem:[%s22620_s27 + $0x1cb4] ss:$8 sps:$4 sm:$0xff]  }
 0x70b   : > { %8882 = vmatprep.subr.bf16.mxu0 %v20865_v21  ;;  %v20961_v21 = vld [vmem:[%s22620_s27 + $0x1de4] ss:$8 sps:$4 sm:$0xff]  }
 0x70e   : > { %8883 = vmatpush1.bf16.msra.mxu0 %v20863_v20  ;;  %v20956_v20 = vld [vmem:[%s22620_s27 + $0x1cb0] ss:$8 sps:$4 sm:$0xff]  }
 0x70f   : > { %8884 = vmatprep.subr.bf16.mxu0 %v20868_v37  ;;  %v20959_v37 = vld [vmem:[%s22620_s27 + $0x1de0] ss:$8 sps:$4 sm:$0xff]  }
 0x712   : > { %8885 = vmatpush1.bf16.msra.mxu0 %v20866_v23  ;;  %v20964_v23 = vld [vmem:[%s22620_s27 + $0x1ca4] ss:$8 sps:$4 sm:$0xff]  }
 0x713   : > { %8886 = vmatprep.subr.bf16.mxu0 %v20871_v54  ;;  %v20967_v54 = vld [vmem:[%s22620_s27 + $0x1dd4] ss:$8 sps:$4 sm:$0xff]  }
 0x716   : > { %8887 = vmatpush2.bf16.msra.mxu0 %v20869_v52  ;;  %v20962_v52 = vld [vmem:[%s22620_s27 + $0x1ca0] ss:$8 sps:$4 sm:$0xff]  }
 0x717   : > { %8888 = vmatprep.subr.bf16.mxu0 %v20874_v50  ;;  %v20965_v50 = vld [vmem:[%s22620_s27 + $0x1dd0] ss:$8 sps:$4 sm:$0xff]  }
 0x71a   : > { %8889 = vmatpush2.bf16.msra.mxu0 %v20872_v40  ;;  %v20970_v40 = vld [vmem:[%s22620_s27 + $0x1c94] ss:$8 sps:$4 sm:$0xff]  }
 0x71b   : > { %8890 = vmatprep.subr.bf16.mxu0 %v20877_v53  ;;  %v20973_v53 = vld [vmem:[%s22620_s27 + $0x1dc4] ss:$8 sps:$4 sm:$0xff]  }
 0x71e   : > { %8891 = vmatpush2.bf16.msra.mxu0 %v20875_v3  ;;  %v20968_v3 = vld [vmem:[%s22620_s27 + $0x1c90] ss:$8 sps:$4 sm:$0xff]  }
 0x71f   : > { %8892 = vmatprep.subr.bf16.mxu0 %v20880_v62  ;;  %v20971_v62 = vld [vmem:[%s22620_s27 + $0x1dc0] ss:$8 sps:$4 sm:$0xff]  }
 0x722   : > { %8893 = vmatpush2.bf16.msra.mxu0 %v20878_v39  ;;  %v20976_v39 = vld [vmem:[%s22620_s27 + $0x1c84] ss:$8 sps:$4 sm:$0xff]  }
 0x723   : > { %8894 = vmatprep.subr.bf16.mxu0 %v20883_v5  ;;  %v20979_v5 = vld [vmem:[%s22620_s27 + $0x1db4] ss:$8 sps:$4 sm:$0xff]  }
 0x726   : > { %8895 = vmatpush2.bf16.msra.mxu0 %v20881_v25  ;;  %v20974_v25 = vld [vmem:[%s22620_s27 + $0x1c80] ss:$8 sps:$4 sm:$0xff]  }
 0x727   : > { %8896 = vmatprep.subr.bf16.mxu0 %v20886_v32  ;;  %v20977_v32 = vld [vmem:[%s22620_s27 + $0x1db0] ss:$8 sps:$4 sm:$0xff]  }
 0x72a   : > { %8897 = vmatpush2.bf16.msra.mxu0 %v20884_v44  ;;  %v20982_v44 = vld [vmem:[%s22620_s27 + $0x1f74] ss:$8 sps:$4 sm:$0xff]  }
 0x72b   : > { %8898 = vmatprep.subr.bf16.mxu0 %v20889_v57  ;;  %v20985_v57 = vld [vmem:[%s22620_s27 + $0x1da4] ss:$8 sps:$4 sm:$0xff]  }
 0x72e   : > { %8899 = vmatpush2.bf16.msra.mxu0 %v20887_v60  ;;  %v20983_v60 = vld [vmem:[%s22620_s27 + $0x1da0] ss:$8 sps:$4 sm:$0xff]  }
 0x72f   : > { %8900 = vmatprep.subr.bf16.mxu0 %v20892_v45  ;;  %v20991_v45 = vld [vmem:[%s22620_s27 + $0x1d94] ss:$8 sps:$4 sm:$0xff]  }
 0x732   : > { %8901 = vmatpush2.bf16.msra.mxu0 %v20890_v41  ;;  %v20989_v41 = vld [vmem:[%s22620_s27 + $0x1d90] ss:$8 sps:$4 sm:$0xff]  }
 0x733   : > { %9472 = vmatprep.subr.bf16.mxu0 %v20895_v18 }
 0x735   : > { %8903 = vmatmul.mubr.bf16.vlgmr.msra.gmra.mxu0 %v25054_v30  ;;  %v20901_v30 = vld [vmem:[%s22620_s27 + $0x1c54] ss:$8 sps:$4 sm:$0xff]  }
 0x736   : > { %8912 = vmatprep.mubr.bf16.mxu0 %v25065_v27  ;;  %9473 = vmatpush1.bf16.msra.mxu0 %v20893_v58  ;;  %v20911_v27 = vld [vmem:[%s22620_s27 + $0x1d60] ss:$8 sps:$4 sm:$0xff]   ;;  %v20997_v58 = vld [vmem:[%s22620_s27 + $0x1d84] ss:$8 sps:$4 sm:$0xff]  }
 0x737   : > { %9474 = vmatprep.subr.bf16.mxu0 %v20898_v55  ;;  %9262 = vmatpush1.bf16.msra.mxu1 %v20911_v27  ;;  %v20995_v55 = vld [vmem:[%s22620_s27 + $0x1d80] ss:$8 sps:$4 sm:$0xff]  }
 0x738   : > { %9263 = vmatprep.subr.bf16.mxu1 %v20919_v2 }
 0x73a   : > { %9475 = vmatpush1.bf16.msra.mxu0 %v20896_v42 }
 0x73b   : > { %9476 = vmatprep.subr.bf16.mxu0 %v20901_v30  ;;  %9264 = vmatpush1.bf16.msra.mxu1 %v20917_v12 }
 0x73c   : > { %9265 = vmatprep.subr.bf16.mxu1 %v20925_v29 }
 0x73d   : > { %8913 = vmatmul.mubr.bf16.gmra.mxu0 %v25069_v56  ;;  %v20899_v56 = vld [vmem:[%s22620_s27 + $0x1c50] ss:$8 sps:$4 sm:$0xff]  }
 0x73e   : > { %9477 = vmatpush1.bf16.msra.mxu0 %v20899_v56 }
 0x73f   : > { %9478 = vmatprep.subr.bf16.mxu0 %v20904_v48  ;;  %9266 = vmatpush1.bf16.msra.mxu1 %v20923_v63 }
 0x740   : > { %9267 = vmatprep.subr.bf16.mxu1 %v20931_v34 }
 0x742   : > { %9479 = vmatpush1.bf16.msra.mxu0 %v20902_v36 }
 0x743   : > { %9480 = vmatprep.subr.bf16.mxu0 %v20910_v35  ;;  %9268 = vmatpush1.bf16.msra.mxu1 %v20929_v24 }
 0x744   : > { %9269 = vmatprep.subr.bf16.mxu1 %v20937_v38 }
 0x746   : > { %9481 = vmatpush1.bf16.msra.mxu0 %v20908_v13 }
 0x747   : > { %9482 = vmatprep.subr.bf16.mxu0 %v20916_v1  ;;  %9270 = vmatpush1.bf16.msra.mxu1 %v20935_v6 }
 0x748   : > { %9271 = vmatprep.subr.bf16.mxu1 %v20943_v8 }
 0x74a   : > { %9483 = vmatpush1.bf16.msra.mxu0 %v20914_v17 }
 0x74b   : > { %9484 = vmatprep.subr.bf16.mxu0 %v20922_v22  ;;  %9272 = vmatpush1.bf16.msra.mxu1 %v20941_v19  ;;  %v8933_v19 = vsub.s32 4, %v26534_v59 }
 0x74c   : > { %9273 = vmatprep.subr.bf16.mxu1 %v20949_v49 }
 0x74e   : > { %9485 = vmatpush1.bf16.msra.mxu0 %v20920_v16 }
 0x74f   : > { %9486 = vmatprep.subr.bf16.mxu0 %v20928_v15  ;;  %9274 = vmatpush1.bf16.msra.mxu1 %v20947_v33 }
 0x750   : > { %9275 = vmatprep.subr.bf16.mxu1 %v20955_v43 }
 0x752   : > { %9487 = vmatpush1.bf16.msra.mxu0 %v20926_v26 }
 0x753   : > { %9488 = vmatprep.subr.bf16.mxu0 %v20934_v46  ;;  %9276 = vmatpush2.bf16.msra.mxu1 %v20953_v11 }
 0x754   : > { %9277 = vmatprep.subr.bf16.mxu1 %v20961_v21 }
 0x756   : > { %9489 = vmatpush2.bf16.msra.mxu0 %v20932_v51 }
 0x757   : > { %9490 = vmatprep.subr.bf16.mxu0 %v20940_v61  ;;  %9278 = vmatpush2.bf16.msra.mxu1 %v20959_v37 }
 0x758   : > { %9279 = vmatprep.subr.bf16.mxu1 %v20967_v54 }
 0x75a   : > { %9491 = vmatpush2.bf16.msra.mxu0 %v20938_v0 }
 0x75b   : > { %9492 = vmatprep.subr.bf16.mxu0 %v20946_v31  ;;  %9280 = vmatpush2.bf16.msra.mxu1 %v20965_v50 }
 0x75c   : > { %9281 = vmatprep.subr.bf16.mxu1 %v20973_v53 }
 0x75e   : > { %9493 = vmatpush2.bf16.msra.mxu0 %v20944_v28 }
 0x75f   : > { %9494 = vmatprep.subr.bf16.mxu0 %v20952_v9  ;;  %9282 = vmatpush2.bf16.msra.mxu1 %v20971_v62  ;;  %v22283_v9 = vld [vmem:[%s22731_s24] sm:$0xff] }
 0x760   : > { %9283 = vmatprep.subr.bf16.mxu1 %v20979_v5  ;;  %v8934_v11 = vrot.slane %v22283_v9, %v8933_v19 }
 0x762   : > { %9495 = vmatpush2.bf16.msra.mxu0 %v20950_v7 }
 0x763   : > { %9496 = vmatprep.subr.bf16.mxu0 %v20958_v4  ;;  %9284 = vmatpush2.bf16.msra.mxu1 %v20977_v32 }
 0x764   : > { %9285 = vmatprep.subr.bf16.mxu1 %v20985_v57 }
 0x766   : > { %9497 = vmatpush2.bf16.msra.mxu0 %v20956_v20 }
 0x767   : > { %9498 = vmatprep.subr.bf16.mxu0 %v20964_v23  ;;  %9286 = vmatpush2.bf16.msra.mxu1 %v20983_v60  ;;  %v22284_v23 = vld [vmem:[%s22731_s24 + $0x8] sm:$0xff] }
 0x768   : > { %9287 = vmatprep.subr.bf16.mxu1 %v20991_v45  ;;  %v8086_v47 = vpop.f32.mrf.mxu1  ;;  %v8938_v54 = vrot.slane %v22284_v23, %v8933_v19 }
 0x76a   : > { %9499 = vmatpush2.bf16.msra.mxu0 %v20962_v52  ;;  %v8088_v56 = vpop.f32.mrf.mxu1 }
 0x76b   : > { %9500 = vmatprep.subr.bf16.mxu0 %v20970_v40  ;;  %9288 = vmatpush2.bf16.msra.mxu1 %v20989_v41 }
 0x76c   : > { %9289 = vmatprep.subr.bf16.mxu1 %v20997_v58  ;;  %v8090_v48 = vpop.f32.mrf.mxu1 }
 0x76e   : > { %9501 = vmatpush2.bf16.msra.mxu0 %v20968_v3  ;;  %v8092_v36 = vpop.f32.mrf.mxu1 }
 0x76f   : > { %9502 = vmatprep.subr.bf16.mxu0 %v20976_v39  ;;  %9290 = vmatpush2.bf16.msra.mxu1 %v20995_v55 }
 0x770   : > { %9732 = vmatprep.subr.bf16.mxu1 %v21003_v14  ;;  %v8096_v35 = vpop.f32.mrf.mxu1 }
 0x772   : > { %9503 = vmatpush2.bf16.msra.mxu0 %v20974_v25  ;;  %v8098_v13 = vpop.f32.mrf.mxu1 }
 0x773   : > { %10004 = vmatprep.subr.bf16.mxu0 %v20982_v44 }
 0x774   : > { %v8100_v1 = vpop.f32.mrf.mxu1 }
 0x775   : > { %v7873_v18 = vpop.f32.mrf.mxu0 }
 0x776   : > { %v8102_v17 = vpop.f32.mrf.mxu1  ;;  %v8087_v6 = vadd.f32 %v8086_v47, %v7873_v18 }
 0x777   : > { %v7875_v42 = vpop.f32.mrf.mxu0 }
 0x778   : > { %v8089_v0 = vadd.f32 %v8088_v56, %v7875_v42 }
 0x779   : > { %v7877_v10 = vpop.f32.mrf.mxu0 }
 0x77a   : > { %v8091_v31 = vadd.f32 %v8090_v48, %v7877_v10 }
 0x77b   : > { %v7879_v30 = vpop.f32.mrf.mxu0 }
 0x77c   : > { %v8093_v43 = vadd.f32 %v8092_v36, %v7879_v30 }
 0x77d   : > { %v7883_v27 = vpop.f32.mrf.mxu0 }
 0x77e   : > { %v8097_v52 = vadd.f32 %v8096_v35, %v7883_v27 }
 0x77f   : > { %v7885_v2 = vpop.f32.mrf.mxu0 }
 0x780   : > { %v8099_v53 = vadd.f32 %v8098_v13, %v7885_v2 }
 0x781   : > { %v7887_v12 = vpop.f32.mrf.mxu0 }
 0x782   : > { %v8101_v5 = vadd.f32 %v8100_v1, %v7887_v12 }
 0x783   : > { %v7889_v29 = vpop.f32.mrf.mxu0 }
 0x784   : > { %v8103_v58 = vadd.f32 %v8102_v17, %v7889_v29 }
 0x7a8   : > { %v8636_v16 = vpop.f32.mrf.mxu1 }
 0x7aa   : > { %v8638_v26 = vpop.f32.mrf.mxu1 }
 0x7ac   : > { %v8640_v46 = vpop.f32.mrf.mxu1 }
 0x7ae   : > { %v8642_v8 = vpop.f32.mrf.mxu1 }
 0x7b0   : > { %v8646_v4 = vpop.f32.mrf.mxu1 }
 0x7b2   : > { %v8648_v25 = vpop.f32.mrf.mxu1 }
 0x7b4   : > { %v8650_v47 = vpop.f32.mrf.mxu1 }
 0x7b5   : > { %v8352_v63 = vpop.f32.mrf.mxu0 }
 0x7b6   : > { %v8371_v61 = vadd.f32 %v8352_v63, %v8087_v6  ;;  %v8652_v17 = vpop.f32.mrf.mxu1 }
 0x7b7   : > { %v8354_v34 = vpop.f32.mrf.mxu0 }
 0x7b8   : > { %v8372_v28 = vadd.f32 %v8354_v34, %v8089_v0  ;;  %v8655_v7 = vadd.f32 %v8636_v16, %v8371_v61 }
 0x7b9   : > { %v8356_v24 = vpop.f32.mrf.mxu0 }
 0x7ba   : > { %v8373_v33 = vadd.f32 %v8356_v24, %v8091_v31  ;;  %v8656_v37 = vadd.f32 %v8638_v26, %v8372_v28 }
 0x7bb   : > { %v8358_v22 = vpop.f32.mrf.mxu0 }
 0x7bc   : > { %v8374_v50 = vadd.f32 %v8358_v22, %v8093_v43  ;;  %v8657_v39 = vadd.f32 %v8640_v46, %v8373_v33 }
 0x7bd   : > { %v8362_v15 = vpop.f32.mrf.mxu0 }
 0x7be   : > { %v8375_v32 = vadd.f32 %v8362_v15, %v8097_v52  ;;  %v8658_v18 = vadd.f32 %v8642_v8, %v8374_v50 }
 0x7bf   : > { %v8364_v51 = vpop.f32.mrf.mxu0 }
 0x7c0   : > { %v8376_v57 = vadd.f32 %v8364_v51, %v8099_v53  ;;  %v8659_v56 = vadd.f32 %v8646_v4, %v8375_v32 }
 0x7c1   : > { %v8366_v38 = vpop.f32.mrf.mxu0 }
 0x7c2   : > { %v8377_v14 = vadd.f32 %v8366_v38, %v8101_v5  ;;  %v8660_v35 = vadd.f32 %v8648_v25, %v8376_v57  ;;  %v20980_v57 = vld [vmem:[%s22620_s27 + $0x1f70] ss:$8 sps:$4 sm:$0xff]  }
 0x7c3   : > { %v8368_v49 = vpop.f32.mrf.mxu0 }
 0x7c4   : > { %v8378_v48 = vadd.f32 %v8368_v49, %v8103_v58  ;;  %v8661_v24 = vadd.f32 %v8650_v47, %v8377_v14 }
 0x7c6   : > { %v8662_v46 = vadd.f32 %v8652_v17, %v8378_v48 }
 0x7f5   : > { %v8904_v21 = vpop.f32.mrf.mxu0 }
 0x7f6   : > { %v8923_v20 = vadd.f32 %v8904_v21, %v8655_v7 }
 0x7f7   : > { %v8906_v40 = vpop.f32.mrf.mxu0 }
 0x7f8   : > { %v25226_v3 = vadd.f32 %v8934_v11, %v8923_v20  ;;  %v8924_v62 = vadd.f32 %v8906_v40, %v8656_v37 }
 0x7f9   : > { %v8908_v44 = vpop.f32.mrf.mxu0 }
 0x7fa   : > { %v8955_v60 = vmin.f32 %v25226_v3, 0.0  ;;  %v25229_v45 = vadd.f32 %v8938_v54, %v8924_v62  ;;  %v8925_v41 = vadd.f32 %v8908_v44, %v8657_v39  ;;  %vm8947_vm3 = vcmp.gt.f32.partialorder %v25226_v3, 0.0 }
 0x7fb   : > { %v8910_v55 = vpop.f32.mrf.mxu0 }
 0x7fc   : > { %v8963_v42 = vmul.f32 1.442695, %v8955_v60  ;;  %v8956_v10 = vmin.f32 %v25229_v45, 0.0  ;;  %v8941_v30 = vadd.f32 %v8934_v11, %v8925_v41  ;;  %v8926_v27 = vadd.f32 %v8910_v55, %v8658_v18  ;;  %v20988_v41 = vld [vmem:[%s22620_s27 + $0x1f64] ss:$8 sps:$4 sm:$0xff]  }
 0x7fd   : > { %v8914_v2 = vpop.f32.mrf.mxu0  ;;  %vm8948_vm4 = vcmp.gt.f32.partialorder %v25229_v45, 0.0 }
 0x7fe   : > { %v8965_v12 = vmul.f32 1.442695, %v8956_v10  ;;  %v8957_v36 = vmin.f32 %v8941_v30, 0.0  ;;  %v8942_v63 = vadd.f32 %v8938_v54, %v8926_v27  ;;  %v8927_v13 = vadd.f32 %v8914_v2, %v8659_v56  ;;  %v20994_v56 = vld [vmem:[%s22620_s27 + $0x1f54] ss:$8 sps:$4 sm:$0xff]  }
 0x7ff   : > { %v8916_v34 = vpop.f32.mrf.mxu0  ;;  %22233 = vpow2.f32 %v8963_v42  ;;  %vm8949_vm0 = vcmp.gt.f32.partialorder %v8941_v30, 0.0 }
 0x800   : > { %v8967_v29 = vmul.f32 1.442695, %v8957_v36  ;;  %v8928_v1 = vadd.f32 %v8916_v34, %v8660_v35  ;;  %22235 = vpow2.f32 %v8965_v12  ;;  %v8958_v22 = vmin.f32 %v8942_v63, 0.0  ;;  %v20992_v34 = vld [vmem:[%s22620_s27 + $0x1f50] ss:$8 sps:$4 sm:$0xff]  }
 0x801   : > { %v8943_v16 = vadd.f32 %v8934_v11, %v8927_v13  ;;  %v8918_v15 = vpop.f32.mrf.mxu0  ;;  %vm8950_vm11 = vcmp.gt.f32.partialorder %v8942_v63, 0.0 }
 0x802   : > { %22237 = vpow2.f32 %v8967_v29  ;;  %v25232_v26 = vadd.f32 %v8938_v54, %v8928_v1  ;;  %v8929_v51 = vadd.f32 %v8918_v15, %v8661_v24  ;;  %v8969_v6 = vmul.f32 1.442695, %v8958_v22  ;;  %v21000_v22 = vld [vmem:[%s22620_s27 + $0x1f44] ss:$8 sps:$4 sm:$0xff]  }
 0x803   : > { %v8959_v38 = vmin.f32 %v8943_v16, 0.0  ;;  %v8920_v0 = vpop.f32.mrf.mxu0  ;;  %vm8951_vm12 = vcmp.gt.f32.partialorder %v8943_v16, 0.0 }
 0x804   : > { %v8960_v61 = vmin.f32 %v25232_v26, 0.0  ;;  %v8945_v19 = vadd.f32 %v8934_v11, %v8929_v51  ;;  %v8930_v8 = vadd.f32 %v8920_v0, %v8662_v46  ;;  %22239 = vpow2.f32 %v8969_v6 }
 0x805   : > { %v8971_v31 = vmul.f32 1.442695, %v8959_v38  ;;  %vm8952_vm15 = vcmp.gt.f32.partialorder %v25232_v26, 0.0 }
 0x806   : > { %v8973_v28 = vmul.f32 1.442695, %v8960_v61  ;;  %v8961_v49 = vmin.f32 %v8945_v19, 0.0  ;;  %v8946_v33 = vadd.f32 %v8938_v54, %v8930_v8  ;;  %vm8953_vm14 = vcmp.gt.f32.partialorder %v8945_v19, 0.0 }
 0x807   : > { %22241 = vpow2.f32 %v8971_v31 }
 0x808   : > { %22243 = vpow2.f32 %v8973_v28  ;;  %v8975_v7 = vmul.f32 1.442695, %v8961_v49  ;;  %v8962_v9 = vmin.f32 %v8946_v33, 0.0  ;;  %v20998_v28 = vld [vmem:[%s22620_s27 + $0x1f40] ss:$8 sps:$4 sm:$0xff]  }
 0x809   : > { %v21001_v49 = vld [vmem:[%s22620_s27 + $0x1e70] ss:$8 sps:$4 sm:$0xff]  }
 0x80a   : > { %22245 = vpow2.f32 %v8975_v7  ;;  %v8977_v43 = vmul.f32 1.442695, %v8962_v9 }
 0x80c   : > { %22247 = vpow2.f32 %v8977_v43  ;;  %v22234_v4 = vpop.eup %22233 }
 0x80d   : > { %v22236_v21 = vpop.eup %22235  ;;  %v17739_v37 = vadd.f32 -1.0, %v22234_v4 }
 0x80e   : > { %v17740_v52 = vadd.f32 -1.0, %v22236_v21 }
 0x80f   : > { %v22238_v20 = vpop.eup %22237  ;;  %v8987_v53 = vsel %vm8947_vm3, %v25226_v3, %v17739_v37 }
 0x810   : > { %v17741_v23 = vadd.f32 -1.0, %v22238_v20  ;;  %v8988_v39 = vsel %vm8948_vm4, %v25229_v45, %v17740_v52  ;;  %v21009_v52 = vld [vmem:[%s22620_s27 + $0x1e64] ss:$8 sps:$4 sm:$0xff]  }
 0x811   : > { %v22240_v11 = vpop.eup %22239 }
 0x812   : > { %v8989_v50 = vsel %vm8949_vm0, %v8941_v30, %v17741_v23  ;;  %v17742_v54 = vadd.f32 -1.0, %v22240_v11  ;;  %v20986_v30 = vld [vmem:[%s22620_s27 + $0x1f60] ss:$8 sps:$4 sm:$0xff]   ;;  %vm8954_vm0 = vcmp.gt.f32.partialorder %v8946_v33, 0.0  ;;  %v21006_v23 = vld [vmem:[%s22620_s27 + $0x1f34] ss:$8 sps:$4 sm:$0xff]  }
 0x813   : > { %v25239_v5 = vpack.c.bf16 %v8989_v50, %v8987_v53  ;;  %v21004_v50 = vld [vmem:[%s22620_s27 + $0x1f30] ss:$8 sps:$4 sm:$0xff]   ;;  %v21015_v53 = vld [vmem:[%s22620_s27 + $0x1e54] ss:$8 sps:$4 sm:$0xff]  }
 0x814   : > { %v22242_v40 = vpop.eup %22241  ;;  %v8990_v25 = vsel %vm8950_vm11, %v8942_v63, %v17742_v54  ;;  %v21007_v54 = vld [vmem:[%s22620_s27 + $0x1e60] ss:$8 sps:$4 sm:$0xff]  }
 0x815   : > { %v22244_v62 = vpop.eup %22243  ;;  %v25241_v32 = vpack.c.bf16 %v8990_v25, %v8988_v39  ;;  %v17743_v44 = vadd.f32 -1.0, %v22242_v40  ;;  %v9068_v55 = vshll.u32 %v25239_v5, 16  ;;  %v9066_v12 = vshrl.u32 %v25239_v5, 16  ;;  %v21012_v40 = vld [vmem:[%s22620_s27 + $0x1f24] ss:$8 sps:$4 sm:$0xff]  }
 0x816   : > { %v17744_v58 = vadd.f32 -1.0, %v22244_v62  ;;  %v9562_v13 = vrot.slane %v25239_v5, 1  ;;  %v10098_v0 = vrot.slane %v25239_v5, 2  ;;  %v21010_v39 = vld [vmem:[%s22620_s27 + $0x1f20] ss:$8 sps:$4 sm:$0xff]  }
 0x817   : > { %v22246_v60 = vpop.eup %22245  ;;  %9504 = vmatprep.mubr.bf16.mxu0 %v25241_v32  ;;  %v9080_v45 = vshll.u32 %v25241_v32, 16  ;;  %v8991_v14 = vsel %vm8951_vm12, %v8943_v16, %v17743_v44  ;;  %v9078_v47 = vshrl.u32 %v25241_v32, 16  ;;  %v9070_v29 = vrot.slane %v9068_v55, 1  ;;  %v21013_v25 = vld [vmem:[%s22620_s27 + $0x1e50] ss:$8 sps:$4 sm:$0xff]  }
 0x818   : > { %v17745_v18 = vadd.f32 -1.0, %v22246_v60  ;;  %9505 = vmatmul.mubr.bf16.vlgmr.msra.gmra.mxu0 %v25239_v5  ;;  %v8992_v2 = vsel %vm8952_vm15, %v25232_v26, %v17744_v58  ;;  %v10101_v26 = vrot.slane %v25241_v32, 2  ;;  %v21018_v60 = vld [vmem:[%s22620_s27 + $0x1f14] ss:$8 sps:$4 sm:$0xff]   ;;  %v21021_v58 = vld [vmem:[%s22620_s27 + $0x1e44] ss:$8 sps:$4 sm:$0xff]  }
 0x819   : > { %v22248_v3 = vpop.eup %22247  ;;  %10005 = vmatpush1.bf16.msra.mxu0 %v20980_v57  ;;  %v9082_v35 = vrot.slane %v9080_v45, 1  ;;  %v9833_v1 = vrot.slane %v9078_v47, 1  ;;  %v9834_v24 = vrot.slane %v9080_v45, 2  ;;  %v21019_v45 = vld [vmem:[%s22620_s27 + $0x1e40] ss:$8 sps:$4 sm:$0xff]  }
 0x81a   : > { %v8993_v42 = vsel %vm8953_vm14, %v8945_v19, %v17745_v18  ;;  %v17746_v10 = vadd.f32 -1.0, %v22248_v3  ;;  %10006 = vmatprep.subr.bf16.mxu0 %v20988_v41  ;;  %v9565_v41 = vrot.slane %v25241_v32, 1  ;;  %v21016_v3 = vld [vmem:[%s22620_s27 + $0x1f10] ss:$8 sps:$4 sm:$0xff]   ;;  %v21022_v32 = vld [vmem:[%s22620_s27 + $0x1f00] ss:$8 sps:$4 sm:$0xff]  }
 0x81b   : > { %v25252_v27 = vpack.c.bf16 %v8993_v42, %v8991_v14  ;;  %v9083_v61 = vor.u32 %v9082_v35, %v9078_v47  ;;  %v9835_v7 = vor.u32 %v9834_v24, %v9833_v1  ;;  %v21024_v14 = vld [vmem:[%s22620_s27 + $0x1f04] ss:$8 sps:$4 sm:$0xff]   ;;  %v21027_v42 = vld [vmem:[%s22620_s27 + $0x1e34] ss:$8 sps:$4 sm:$0xff]   ;;  %v21040_v24 = vld [vmem:[%s22620_s27 + $0x1fd0] ss:$8 sps:$4 sm:$0xff]  }
 0x81c   : > { %v8994_v48 = vsel %vm8954_vm0, %v8946_v33, %v17746_v10  ;;  %v9071_v33 = vor.u32 %v9070_v29, %v9066_v12  ;;  %v21025_v10 = vld [vmem:[%s22620_s27 + $0x1e30] ss:$8 sps:$4 sm:$0xff]   ;;  %v21033_v47 = vld [vmem:[%s22620_s27 + $0x1e24] ss:$8 sps:$4 sm:$0xff]   ;;  %v21039_v35 = vld [vmem:[%s22620_s27 + $0x1e14] ss:$8 sps:$4 sm:$0xff]  }
 0x81d   : > { %v25257_v36 = vpack.c.bf16 %v8994_v48, %v8992_v2  ;;  %v9073_v63 = vshll.u32 %v25252_v27, 16  ;;  %10007 = vmatpush1.bf16.msra.mxu0 %v20986_v30  ;;  %v9563_v17 = vrot.slane %v25252_v27, 1  ;;  %v10099_v51 = vrot.slane %v25252_v27, 2  ;;  %v21030_v30 = vld [vmem:[%s22620_s27 + $0x1ff4] ss:$8 sps:$4 sm:$0xff]  }
 0x81e   : > { %10008 = vmatprep.subr.bf16.mxu0 %v20994_v56  ;;  %v9089_v62 = vshrl.u32 %v25252_v27, 16  ;;  %v21028_v56 = vld [vmem:[%s22620_s27 + $0x1ff0] ss:$8 sps:$4 sm:$0xff]   ;;  %v21031_v2 = vld [vmem:[%s22620_s27 + $0x1e20] ss:$8 sps:$4 sm:$0xff]  }
 0x81f   : > { %9514 = vmatprep.mubr.bf16.mxu0 %v25257_v36  ;;  %v9085_v16 = vshll.u32 %v25257_v36, 16  ;;  %v9092_v15 = vshrl.u32 %v25257_v36, 16  ;;  %v9075_v46 = vrot.slane %v9073_v63, 1  ;;  %v25276_v6 = vsel %vm1249_vm1, %v9562_v13, %v9563_v17  ;;  %v21036_v48 = vld [vmem:[%s22620_s27 + $0x1fe4] ss:$8 sps:$4 sm:$0xff]  }
 0x820   : > { %v10102_v38 = vrot.slane %v25257_v36, 2  ;;  %9515 = vmatmul.mubr.bf16.gmra.mxu0 %v25252_v27  ;;  %v25296_v20 = vsel %vm1831_vm2, %v10098_v0, %v10099_v51  ;;  %v9566_v44 = vrot.slane %v25257_v36, 1  ;;  %v21034_v13 = vld [vmem:[%s22620_s27 + $0x1fe0] ss:$8 sps:$4 sm:$0xff]   ;;  %v21042_v29 = vld [vmem:[%s22620_s27 + $0x1fd4] ss:$8 sps:$4 sm:$0xff]  }
 0x821   : > { %v9087_v19 = vrot.slane %v9085_v16, 1  ;;  %v9836_v8 = vrot.slane %v9092_v15, 1  ;;  %v9837_v31 = vrot.slane %v9085_v16, 2  ;;  %10009 = vmatpush1.bf16.msra.mxu0 %v20992_v34  ;;  %v9076_v37 = vsel %vm711_vm7, %v9071_v33, %v9075_v46  ;;  %v21037_v34 = vld [vmem:[%s22620_s27 + $0x1e10] ss:$8 sps:$4 sm:$0xff]  }
 0x822   : > { %v25288_v9 = vsel %vm1831_vm2, %v10101_v26, %v10102_v38  ;;  %10010 = vmatprep.subr.bf16.mxu0 %v21000_v22  ;;  %v9091_v57 = vor.u32 %v9089_v62, %v9075_v46  ;;  %v9567_v18 = vsel %vm1249_vm1, %v9565_v41, %v9566_v44  ;;  %v21045_v1 = vld [vmem:[%s22620_s27 + $0x1e04] ss:$8 sps:$4 sm:$0xff]   ;;  %v21043_v22 = vld [vmem:[%s22620_s27 + $0x1e00] ss:$8 sps:$4 sm:$0xff]   ;;  %v21049_v46 = vld [vmem:[%s22620_s27 + $0x1ef0] ss:$8 sps:$4 sm:$0xff]  }
 0x823   : > { %v9088_v43 = vsel %vm711_vm7, %v9083_v61, %v9087_v19  ;;  %v9094_v4 = vor.u32 %v9092_v15, %v9087_v19  ;;  %v25291_v21 = vor.u32 %v9837_v31, %v9836_v8  ;;  %v21048_v16 = vld [vmem:[%s22620_s27 + $0x1fc4] ss:$8 sps:$4 sm:$0xff]   ;;  %v21051_v15 = vld [vmem:[%s22620_s27 + $0x1ef4] ss:$8 sps:$4 sm:$0xff]   ;;  %v21046_v26 = vld [vmem:[%s22620_s27 + $0x1fc0] ss:$8 sps:$4 sm:$0xff]  }
 0x824   : > { %9291 = vmatprep.mubr.bf16.mxu1 %v9088_v43  ;;  %v21054_v0 = vld [vmem:[%s22620_s27 + $0x1fb4] ss:$8 sps:$4 sm:$0xff]   ;;  %v21057_v61 = vld [vmem:[%s22620_s27 + $0x1ee4] ss:$8 sps:$4 sm:$0xff]   ;;  %v21052_v19 = vld [vmem:[%s22620_s27 + $0x1fb0] ss:$8 sps:$4 sm:$0xff]  }
 0x825   : > { %9292 = vmatmul.mubr.bf16.vlgmr.msra.gmra.mxu1 %v9076_v37  ;;  %v9839_v11 = vsel %vm1534_vm13, %v9835_v7, %v25291_v21  ;;  %10011 = vmatpush1.bf16.msra.mxu0 %v20998_v28  ;;  %v21055_v8 = vld [vmem:[%s22620_s27 + $0x1ee0] ss:$8 sps:$4 sm:$0xff]   ;;  %v21060_v31 = vld [vmem:[%s22620_s27 + $0x1fa4] ss:$8 sps:$4 sm:$0xff]   ;;  %v21063_v28 = vld [vmem:[%s22620_s27 + $0x1ed4] ss:$8 sps:$4 sm:$0xff]  }
 0x826   : > { %9733 = vmatpush1.bf16.msra.mxu1 %v21001_v49  ;;  %9301 = vmatprep.mubr.bf16.mxu1 %v9094_v4  ;;  %v21058_v49 = vld [vmem:[%s22620_s27 + $0x1fa0] ss:$8 sps:$4 sm:$0xff]   ;;  %v21061_v33 = vld [vmem:[%s22620_s27 + $0x1ed0] ss:$8 sps:$4 sm:$0xff]   ;;  %v21066_v7 = vld [vmem:[%s22620_s27 + $0x1f94] ss:$8 sps:$4 sm:$0xff]  }
 0x827   : > { %10036 = vmatprep.mubr.bf16.mxu0 %v9839_v11  ;;  %10012 = vmatprep.subr.bf16.mxu0 %v21006_v23  ;;  %v21069_v43 = vld [vmem:[%s22620_s27 + $0x1ec4] ss:$8 sps:$4 sm:$0xff]   ;;  %v21064_v4 = vld [vmem:[%s22620_s27 + $0x1f90] ss:$8 sps:$4 sm:$0xff]   ;;  %v21067_v37 = vld [vmem:[%s22620_s27 + $0x1ec0] ss:$8 sps:$4 sm:$0xff]  }
 0x828   : > { %9734 = vmatprep.subr.bf16.mxu1 %v21009_v52  ;;  %v21072_v23 = vld [vmem:[%s22620_s27 + $0x1f84] ss:$8 sps:$4 sm:$0xff]   ;;  %v21075_v52 = vld [vmem:[%s22620_s27 + $0x1eb4] ss:$8 sps:$4 sm:$0xff]   ;;  %v9829_v11 = vrot.slane %v9089_v62, 1 }
 0x829   : > { %10013 = vmatpush1.bf16.msra.mxu0 %v21004_v50  ;;  %v9830_v50 = vrot.slane %v9073_v63, 2  ;;  %v21079_v5 = vld [vmem:[%s22620_s27 + $0x1e90] ss:$8 sps:$4 sm:$0xff]   ;;  %v21082_v41 = vld [vmem:[%s22620_s27 + $0x1e80] ss:$8 sps:$4 sm:$0xff]  }
 0x82a   : > { %9735 = vmatpush1.bf16.msra.mxu1 %v21007_v54  ;;  %10014 = vmatprep.subr.bf16.mxu0 %v21012_v40  ;;  %v21070_v54 = vld [vmem:[%s22620_s27 + $0x1f80] ss:$8 sps:$4 sm:$0xff]   ;;  %v21073_v40 = vld [vmem:[%s22620_s27 + $0x1eb0] ss:$8 sps:$4 sm:$0xff]   ;;  %v21141_v36 = vld [vmem:[%s22620_s27 + $0x2154] ss:$8 sps:$4 sm:$0xff]  }
 0x82b   : > { %9736 = vmatprep.subr.bf16.mxu1 %v21015_v53  ;;  %v9826_v53 = vrot.slane %v9066_v12, 1  ;;  %v9831_v62 = vor.u32 %v9830_v50, %v9829_v11  ;;  %v21151_v27 = vld [vmem:[%s22620_s27 + $0x2260] ss:$8 sps:$4 sm:$0xff]   ;;  %v21148_v50 = vld [vmem:[%s22620_s27 + $0x2130] ss:$8 sps:$4 sm:$0xff]  }
 0x82c   : > { %v21163_v11 = vld [vmem:[%s22620_s27 + $0x2240] ss:$8 sps:$4 sm:$0xff]  }
 0x82d   : > { %9302 = vmatmul.mubr.bf16.gmra.mxu1 %v9091_v57  ;;  %10015 = vmatpush1.bf16.msra.mxu0 %v21010_v39  ;;  %v9827_v39 = vrot.slane %v9068_v55, 2  ;;  %v21076_v57 = vld [vmem:[%s22620_s27 + $0x1ea0] ss:$8 sps:$4 sm:$0xff]   ;;  %v21084_v55 = vld [vmem:[%s22620_s27 + $0x1e84] ss:$8 sps:$4 sm:$0xff]  }
 0x82e   : > { %9737 = vmatpush1.bf16.msra.mxu1 %v21013_v25  ;;  %9764 = vmatprep.mubr.bf16.mxu1 %v9567_v18  ;;  %v21078_v25 = vld [vmem:[%s22620_s27 + $0x1ea4] ss:$8 sps:$4 sm:$0xff]   ;;  %v21085_v18 = vld [vmem:[%s22620_s27 + $0x2070] ss:$8 sps:$4 sm:$0xff]  }
 0x82f   : > { %10016 = vmatprep.subr.bf16.mxu0 %v21018_v60  ;;  %9738 = vmatprep.subr.bf16.mxu1 %v21021_v58  ;;  %v9828_v63 = vor.u32 %v9827_v39, %v9826_v53  ;;  %v21081_v60 = vld [vmem:[%s22620_s27 + $0x1e94] ss:$8 sps:$4 sm:$0xff]   ;;  %v21169_v53 = vld [vmem:[%s22620_s27 + $0x2230] ss:$8 sps:$4 sm:$0xff]   ;;  %v21154_v39 = vld [vmem:[%s22620_s27 + $0x2120] ss:$8 sps:$4 sm:$0xff]  }
 0x830   : > { %v21087_v58 = vld [vmem:[%s22620_s27 + $0x2074] ss:$8 sps:$4 sm:$0xff]  }
 0x831   : > { %10017 = vmatpush1.bf16.msra.mxu0 %v21016_v3  ;;  %v9832_v12 = vsel %vm1534_vm13, %v9828_v63, %v9831_v62  ;;  %v21090_v3 = vld [vmem:[%s22620_s27 + $0x2064] ss:$8 sps:$4 sm:$0xff]  }
 0x832   : > { %9739 = vmatpush1.bf16.msra.mxu1 %v21019_v45  ;;  %10018 = vmatprep.subr.bf16.mxu0 %v21024_v14  ;;  %v21093_v45 = vld [vmem:[%s22620_s27 + $0x2054] ss:$8 sps:$4 sm:$0xff]   ;;  %v21091_v14 = vld [vmem:[%s22620_s27 + $0x2050] ss:$8 sps:$4 sm:$0xff]   ;;  %v21168_v63 = vld [vmem:[%s22620_s27 + $0x2104] ss:$8 sps:$4 sm:$0xff]  }
 0x833   : > { %9740 = vmatprep.subr.bf16.mxu1 %v21027_v42  ;;  %v21096_v42 = vld [vmem:[%s22620_s27 + $0x2044] ss:$8 sps:$4 sm:$0xff]  }
 0x835   : > { %10019 = vmatpush1.bf16.msra.mxu0 %v21022_v32  ;;  %v21097_v32 = vld [vmem:[%s22620_s27 + $0x2030] ss:$8 sps:$4 sm:$0xff]  }
 0x836   : > { %9741 = vmatpush1.bf16.msra.mxu1 %v21025_v10  ;;  %10020 = vmatprep.subr.bf16.mxu0 %v21030_v30  ;;  %v21102_v10 = vld [vmem:[%s22620_s27 + $0x2024] ss:$8 sps:$4 sm:$0xff]   ;;  %v21100_v30 = vld [vmem:[%s22620_s27 + $0x2020] ss:$8 sps:$4 sm:$0xff]  }
 0x837   : > { %9742 = vmatprep.subr.bf16.mxu1 %v21033_v47  ;;  %v21103_v47 = vld [vmem:[%s22620_s27 + $0x2010] ss:$8 sps:$4 sm:$0xff]  }
 0x839   : > { %10021 = vmatpush2.bf16.msra.mxu0 %v21028_v56  ;;  %v21106_v56 = vld [vmem:[%s22620_s27 + $0x2000] ss:$8 sps:$4 sm:$0xff]  }
 0x83a   : > { %9743 = vmatpush1.bf16.msra.mxu1 %v21031_v2  ;;  %10022 = vmatprep.subr.bf16.mxu0 %v21036_v48  ;;  %v21111_v2 = vld [vmem:[%s22620_s27 + $0x20f4] ss:$8 sps:$4 sm:$0xff]   ;;  %v21109_v48 = vld [vmem:[%s22620_s27 + $0x20f0] ss:$8 sps:$4 sm:$0xff]  }
 0x83b   : > { %9744 = vmatprep.subr.bf16.mxu1 %v21039_v35  ;;  %v21114_v35 = vld [vmem:[%s22620_s27 + $0x20e4] ss:$8 sps:$4 sm:$0xff]  }
 0x83d   : > { %10023 = vmatpush2.bf16.msra.mxu0 %v21034_v13  ;;  %v21112_v13 = vld [vmem:[%s22620_s27 + $0x20e0] ss:$8 sps:$4 sm:$0xff]  }
 0x83e   : > { %9745 = vmatpush1.bf16.msra.mxu1 %v21037_v34  ;;  %10024 = vmatprep.subr.bf16.mxu0 %v21042_v29  ;;  %v21117_v34 = vld [vmem:[%s22620_s27 + $0x20d4] ss:$8 sps:$4 sm:$0xff]   ;;  %v21115_v29 = vld [vmem:[%s22620_s27 + $0x20d0] ss:$8 sps:$4 sm:$0xff]  }
 0x83f   : > { %9746 = vmatprep.subr.bf16.mxu1 %v21045_v1  ;;  %v21120_v1 = vld [vmem:[%s22620_s27 + $0x20c4] ss:$8 sps:$4 sm:$0xff]  }
 0x841   : > { %10025 = vmatpush2.bf16.msra.mxu0 %v21040_v24  ;;  %v21118_v24 = vld [vmem:[%s22620_s27 + $0x20c0] ss:$8 sps:$4 sm:$0xff]  }
 0x842   : > { %9747 = vmatpush1.bf16.msra.mxu1 %v21043_v22  ;;  %10026 = vmatprep.subr.bf16.mxu0 %v21048_v16  ;;  %v21123_v22 = vld [vmem:[%s22620_s27 + $0x20b4] ss:$8 sps:$4 sm:$0xff]   ;;  %v21121_v16 = vld [vmem:[%s22620_s27 + $0x20b0] ss:$8 sps:$4 sm:$0xff]  }
 0x843   : > { %9748 = vmatprep.subr.bf16.mxu1 %v21051_v15  ;;  %v21126_v15 = vld [vmem:[%s22620_s27 + $0x20a4] ss:$8 sps:$4 sm:$0xff]  }
 0x845   : > { %10027 = vmatpush2.bf16.msra.mxu0 %v21046_v26  ;;  %v21124_v26 = vld [vmem:[%s22620_s27 + $0x20a0] ss:$8 sps:$4 sm:$0xff]  }
 0x846   : > { %9749 = vmatpush2.bf16.msra.mxu1 %v21049_v46  ;;  %10028 = vmatprep.subr.bf16.mxu0 %v21054_v0  ;;  %v21129_v46 = vld [vmem:[%s22620_s27 + $0x2094] ss:$8 sps:$4 sm:$0xff]   ;;  %v21127_v0 = vld [vmem:[%s22620_s27 + $0x2090] ss:$8 sps:$4 sm:$0xff]  }
 0x847   : > { %9750 = vmatprep.subr.bf16.mxu1 %v21057_v61  ;;  %v21132_v61 = vld [vmem:[%s22620_s27 + $0x2084] ss:$8 sps:$4 sm:$0xff]  }
 0x849   : > { %10029 = vmatpush2.bf16.msra.mxu0 %v21052_v19  ;;  %v21130_v19 = vld [vmem:[%s22620_s27 + $0x2080] ss:$8 sps:$4 sm:$0xff]  }
 0x84a   : > { %9751 = vmatpush2.bf16.msra.mxu1 %v21055_v8  ;;  %10030 = vmatprep.subr.bf16.mxu0 %v21060_v31  ;;  %v21133_v8 = vld [vmem:[%s22620_s27 + $0x2170] ss:$8 sps:$4 sm:$0xff]   ;;  %v21135_v31 = vld [vmem:[%s22620_s27 + $0x2174] ss:$8 sps:$4 sm:$0xff]  }
 0x84b   : > { %9752 = vmatprep.subr.bf16.mxu1 %v21063_v28  ;;  %v21138_v28 = vld [vmem:[%s22620_s27 + $0x2164] ss:$8 sps:$4 sm:$0xff]  }
 0x84d   : > { %10031 = vmatpush2.bf16.msra.mxu0 %v21058_v49  ;;  %v21145_v49 = vld [vmem:[%s22620_s27 + $0x2270] ss:$8 sps:$4 sm:$0xff]  }
 0x84e   : > { %9753 = vmatpush2.bf16.msra.mxu1 %v21061_v33  ;;  %10032 = vmatprep.subr.bf16.mxu0 %v21066_v7  ;;  %v21136_v33 = vld [vmem:[%s22620_s27 + $0x2160] ss:$8 sps:$4 sm:$0xff]   ;;  %v21147_v7 = vld [vmem:[%s22620_s27 + $0x2274] ss:$8 sps:$4 sm:$0xff]  }
 0x84f   : > { %9754 = vmatprep.subr.bf16.mxu1 %v21069_v43  ;;  %v21144_v43 = vld [vmem:[%s22620_s27 + $0x2144] ss:$8 sps:$4 sm:$0xff]  }
 0x851   : > { %10033 = vmatpush2.bf16.msra.mxu0 %v21064_v4  ;;  %v21157_v4 = vld [vmem:[%s22620_s27 + $0x2250] ss:$8 sps:$4 sm:$0xff]  }
 0x852   : > { %9755 = vmatpush2.bf16.msra.mxu1 %v21067_v37  ;;  %10034 = vmatprep.subr.bf16.mxu0 %v21072_v23  ;;  %v21142_v37 = vld [vmem:[%s22620_s27 + $0x2140] ss:$8 sps:$4 sm:$0xff]   ;;  %v21165_v23 = vld [vmem:[%s22620_s27 + $0x2244] ss:$8 sps:$4 sm:$0xff]  }
 0x853   : > { %9756 = vmatprep.subr.bf16.mxu1 %v21075_v52  ;;  %v21150_v52 = vld [vmem:[%s22620_s27 + $0x2134] ss:$8 sps:$4 sm:$0xff]  }
 0x855   : > { %10035 = vmatpush2.bf16.msra.mxu0 %v21070_v54  ;;  %v21171_v54 = vld [vmem:[%s22620_s27 + $0x2234] ss:$8 sps:$4 sm:$0xff]  }
 0x856   : > { %9757 = vmatpush2.bf16.msra.mxu1 %v21073_v40  ;;  %10657 = vmatprep.subr.bf16.mxu0 %v21147_v7  ;;  %v21156_v40 = vld [vmem:[%s22620_s27 + $0x2124] ss:$8 sps:$4 sm:$0xff]  }
 0x857   : > { %9758 = vmatprep.subr.bf16.mxu1 %v21078_v25  ;;  %v21162_v25 = vld [vmem:[%s22620_s27 + $0x2114] ss:$8 sps:$4 sm:$0xff]  }
 0x858   : > { %10037 = vmatmul.mubr.bf16.vlgmr.msra.gmra.mxu0 %v9832_v12  ;;  %v21174_v12 = vld [vmem:[%s22620_s27 + $0x21f4] ss:$8 sps:$4 sm:$0xff]  }
 0x859   : > { %10046 = vmatprep.mubr.bf16.mxu0 %v25291_v21  ;;  %v21088_v21 = vld [vmem:[%s22620_s27 + $0x2060] ss:$8 sps:$4 sm:$0xff]   ;;  %10658 = vmatpush1.bf16.msra.mxu0 %v21145_v49  ;;  %v21243_v49 = vld [vmem:[%s22620_s27 + $0x2374] ss:$8 sps:$4 sm:$0xff]  }
 0x85a   : > { %9759 = vmatpush2.bf16.msra.mxu1 %v21076_v57  ;;  %v21166_v57 = vld [vmem:[%s22620_s27 + $0x2100] ss:$8 sps:$4 sm:$0xff]  }
 0x85b   : > { %9760 = vmatprep.subr.bf16.mxu1 %v21081_v60  ;;  %v21172_v60 = vld [vmem:[%s22620_s27 + $0x21f0] ss:$8 sps:$4 sm:$0xff]  }
 0x85e   : > { %9761 = vmatpush2.bf16.msra.mxu1 %v21079_v5  ;;  %v21175_v5 = vld [vmem:[%s22620_s27 + $0x2220] ss:$8 sps:$4 sm:$0xff]  }
 0x85f   : > { %9762 = vmatprep.subr.bf16.mxu1 %v21084_v55  ;;  %v21177_v55 = vld [vmem:[%s22620_s27 + $0x2224] ss:$8 sps:$4 sm:$0xff]  }
 0x860   : > { %10047 = vmatmul.mubr.bf16.gmra.mxu0 %v9831_v62  ;;  %v21160_v62 = vld [vmem:[%s22620_s27 + $0x2110] ss:$8 sps:$4 sm:$0xff]  }
 0x862   : > { %9763 = vmatpush2.bf16.msra.mxu1 %v21082_v41  ;;  %v21178_v41 = vld [vmem:[%s22620_s27 + $0x21e0] ss:$8 sps:$4 sm:$0xff]  }
 0x863   : > { %10268 = vmatprep.subr.bf16.mxu1 %v21087_v58  ;;  %v21180_v58 = vld [vmem:[%s22620_s27 + $0x21e4] ss:$8 sps:$4 sm:$0xff]  }
 0x865   : > { %9765 = vmatmul.mubr.bf16.vlgmr.msra.gmra.mxu1 %v25276_v6  ;;  %v21094_v6 = vld [vmem:[%s22620_s27 + $0x2040] ss:$8 sps:$4 sm:$0xff]  }
 0x866   : > { %9774 = vmatprep.mubr.bf16.mxu1 %v9566_v44  ;;  %10269 = vmatpush1.bf16.msra.mxu1 %v21085_v18  ;;  %v21099_v44 = vld [vmem:[%s22620_s27 + $0x2034] ss:$8 sps:$4 sm:$0xff]   ;;  %v21181_v18 = vld [vmem:[%s22620_s27 + $0x2210] ss:$8 sps:$4 sm:$0xff]  }
 0x867   : > { %10270 = vmatprep.subr.bf16.mxu1 %v21090_v3  ;;  %v21183_v3 = vld [vmem:[%s22620_s27 + $0x2214] ss:$8 sps:$4 sm:$0xff]  }
 0x86a   : > { %10271 = vmatpush1.bf16.msra.mxu1 %v21088_v21  ;;  %v21186_v21 = vld [vmem:[%s22620_s27 + $0x21d4] ss:$8 sps:$4 sm:$0xff]  }
 0x86b   : > { %10272 = vmatprep.subr.bf16.mxu1 %v21093_v45  ;;  %v21184_v45 = vld [vmem:[%s22620_s27 + $0x21d0] ss:$8 sps:$4 sm:$0xff]  }
 0x86d   : > { %9775 = vmatmul.mubr.bf16.gmra.mxu1 %v9563_v17  ;;  %v21105_v17 = vld [vmem:[%s22620_s27 + $0x2014] ss:$8 sps:$4 sm:$0xff]  }
 0x86e   : > { %10273 = vmatpush1.bf16.msra.mxu1 %v21091_v14  ;;  %10300 = vmatprep.mubr.bf16.mxu1 %v25288_v9  ;;  %v21108_v9 = vld [vmem:[%s22620_s27 + $0x2004] ss:$8 sps:$4 sm:$0xff]  }
 0x86f   : > { %10274 = vmatprep.subr.bf16.mxu1 %v21096_v42  ;;  %v21189_v14 = vld [vmem:[%s22620_s27 + $0x2204] ss:$8 sps:$4 sm:$0xff]   ;;  %v21187_v42 = vld [vmem:[%s22620_s27 + $0x2200] ss:$8 sps:$4 sm:$0xff]  }
 0x872   : > { %10275 = vmatpush1.bf16.msra.mxu1 %v21094_v6  ;;  %v21190_v6 = vld [vmem:[%s22620_s27 + $0x21c0] ss:$8 sps:$4 sm:$0xff]  }
 0x873   : > { %10276 = vmatprep.subr.bf16.mxu1 %v21099_v44  ;;  %v21192_v44 = vld [vmem:[%s22620_s27 + $0x21c4] ss:$8 sps:$4 sm:$0xff]  }
 0x876   : > { %10277 = vmatpush1.bf16.msra.mxu1 %v21097_v32  ;;  %v21193_v32 = vld [vmem:[%s22620_s27 + $0x22f0] ss:$8 sps:$4 sm:$0xff]  }
 0x877   : > { %10278 = vmatprep.subr.bf16.mxu1 %v21102_v10  ;;  %v21195_v10 = vld [vmem:[%s22620_s27 + $0x22f4] ss:$8 sps:$4 sm:$0xff]  }
 0x87a   : > { %10279 = vmatpush1.bf16.msra.mxu1 %v21100_v30  ;;  %v21198_v30 = vld [vmem:[%s22620_s27 + $0x21b4] ss:$8 sps:$4 sm:$0xff]  }
 0x87b   : > { %10280 = vmatprep.subr.bf16.mxu1 %v21105_v17  ;;  %v21201_v17 = vld [vmem:[%s22620_s27 + $0x22e4] ss:$8 sps:$4 sm:$0xff]  }
 0x87e   : > { %10281 = vmatpush1.bf16.msra.mxu1 %v21103_v47  ;;  %v21196_v47 = vld [vmem:[%s22620_s27 + $0x21b0] ss:$8 sps:$4 sm:$0xff]  }
 0x87f   : > { %10282 = vmatprep.subr.bf16.mxu1 %v21108_v9  ;;  %v21199_v9 = vld [vmem:[%s22620_s27 + $0x22e0] ss:$8 sps:$4 sm:$0xff]  }
 0x882   : > { %10283 = vmatpush1.bf16.msra.mxu1 %v21106_v56  ;;  %v21204_v56 = vld [vmem:[%s22620_s27 + $0x21a4] ss:$8 sps:$4 sm:$0xff]  }
 0x883   : > { %10284 = vmatprep.subr.bf16.mxu1 %v21111_v2  ;;  %v21207_v2 = vld [vmem:[%s22620_s27 + $0x22d4] ss:$8 sps:$4 sm:$0xff]  }
 0x886   : > { %10285 = vmatpush2.bf16.msra.mxu1 %v21109_v48  ;;  %v21202_v48 = vld [vmem:[%s22620_s27 + $0x21a0] ss:$8 sps:$4 sm:$0xff]  }
 0x887   : > { %10286 = vmatprep.subr.bf16.mxu1 %v21114_v35  ;;  %v21205_v35 = vld [vmem:[%s22620_s27 + $0x22d0] ss:$8 sps:$4 sm:$0xff]  }
 0x88a   : > { %10287 = vmatpush2.bf16.msra.mxu1 %v21112_v13  ;;  %v21210_v13 = vld [vmem:[%s22620_s27 + $0x2194] ss:$8 sps:$4 sm:$0xff]  }
 0x88b   : > { %10288 = vmatprep.subr.bf16.mxu1 %v21117_v34  ;;  %v21213_v34 = vld [vmem:[%s22620_s27 + $0x22c4] ss:$8 sps:$4 sm:$0xff]  }
 0x88e   : > { %10289 = vmatpush2.bf16.msra.mxu1 %v21115_v29  ;;  %v21208_v29 = vld [vmem:[%s22620_s27 + $0x2190] ss:$8 sps:$4 sm:$0xff]  }
 0x88f   : > { %10290 = vmatprep.subr.bf16.mxu1 %v21120_v1  ;;  %v21211_v1 = vld [vmem:[%s22620_s27 + $0x22c0] ss:$8 sps:$4 sm:$0xff]  }
 0x892   : > { %10291 = vmatpush2.bf16.msra.mxu1 %v21118_v24  ;;  %v21216_v24 = vld [vmem:[%s22620_s27 + $0x2184] ss:$8 sps:$4 sm:$0xff]  }
 0x893   : > { %10292 = vmatprep.subr.bf16.mxu1 %v21123_v22  ;;  %v21219_v22 = vld [vmem:[%s22620_s27 + $0x22b4] ss:$8 sps:$4 sm:$0xff]  }
 0x896   : > { %10293 = vmatpush2.bf16.msra.mxu1 %v21121_v16  ;;  %v21214_v16 = vld [vmem:[%s22620_s27 + $0x2180] ss:$8 sps:$4 sm:$0xff]  }
 0x897   : > { %10294 = vmatprep.subr.bf16.mxu1 %v21126_v15  ;;  %v21217_v15 = vld [vmem:[%s22620_s27 + $0x22b0] ss:$8 sps:$4 sm:$0xff]  }
 0x89a   : > { %10295 = vmatpush2.bf16.msra.mxu1 %v21124_v26  ;;  %v21222_v26 = vld [vmem:[%s22620_s27 + $0x2474] ss:$8 sps:$4 sm:$0xff]  }
 0x89b   : > { %10296 = vmatprep.subr.bf16.mxu1 %v21129_v46  ;;  %v21225_v46 = vld [vmem:[%s22620_s27 + $0x22a4] ss:$8 sps:$4 sm:$0xff]  }
 0x89e   : > { %10297 = vmatpush2.bf16.msra.mxu1 %v21127_v0  ;;  %v21223_v0 = vld [vmem:[%s22620_s27 + $0x22a0] ss:$8 sps:$4 sm:$0xff]  }
 0x89f   : > { %10298 = vmatprep.subr.bf16.mxu1 %v21132_v61  ;;  %v21231_v61 = vld [vmem:[%s22620_s27 + $0x2294] ss:$8 sps:$4 sm:$0xff]  }
 0x8a2   : > { %10299 = vmatpush2.bf16.msra.mxu1 %v21130_v19  ;;  %v21229_v19 = vld [vmem:[%s22620_s27 + $0x2290] ss:$8 sps:$4 sm:$0xff]  }
 0x8a3   : > { %10868 = vmatprep.subr.bf16.mxu1 %v21135_v31 }
 0x8a5   : > { %10301 = vmatmul.mubr.bf16.vlgmr.msra.gmra.mxu1 %v25296_v20  ;;  %v21159_v20 = vld [vmem:[%s22620_s27 + $0x2254] ss:$8 sps:$4 sm:$0xff]  }
 0x8a6   : > { %10310 = vmatprep.mubr.bf16.mxu1 %v10102_v38  ;;  %10869 = vmatpush1.bf16.msra.mxu1 %v21133_v8  ;;  %v21153_v38 = vld [vmem:[%s22620_s27 + $0x2264] ss:$8 sps:$4 sm:$0xff]  }
 0x8a7   : > { %10870 = vmatprep.subr.bf16.mxu1 %v21138_v28  ;;  %10659 = vmatprep.subr.bf16.mxu0 %v21153_v38  ;;  %v21237_v8 = vld [vmem:[%s22620_s27 + $0x2284] ss:$8 sps:$4 sm:$0xff]   ;;  %v21235_v28 = vld [vmem:[%s22620_s27 + $0x2280] ss:$8 sps:$4 sm:$0xff]  }
 0x8a8   : > { %10660 = vmatpush1.bf16.msra.mxu0 %v21151_v27 }
 0x8a9   : > { %10661 = vmatprep.subr.bf16.mxu0 %v21159_v20 }
 0x8aa   : > { %10871 = vmatpush1.bf16.msra.mxu1 %v21136_v33 }
 0x8ab   : > { %10872 = vmatprep.subr.bf16.mxu1 %v21141_v36 }
 0x8ac   : > { %10662 = vmatpush1.bf16.msra.mxu0 %v21157_v4 }
 0x8ad   : > { %10311 = vmatmul.mubr.bf16.gmra.mxu1 %v10099_v51  ;;  %v21139_v51 = vld [vmem:[%s22620_s27 + $0x2150] ss:$8 sps:$4 sm:$0xff]   ;;  %10663 = vmatprep.subr.bf16.mxu0 %v21165_v23 }
 0x8ae   : > { %10873 = vmatpush1.bf16.msra.mxu1 %v21139_v51 }
 0x8af   : > { %10874 = vmatprep.subr.bf16.mxu1 %v21144_v43 }
 0x8b0   : > { %10664 = vmatpush1.bf16.msra.mxu0 %v21163_v11 }
 0x8b1   : > { %10665 = vmatprep.subr.bf16.mxu0 %v21171_v54 }
 0x8b2   : > { %10875 = vmatpush1.bf16.msra.mxu1 %v21142_v37 }
 0x8b3   : > { %10876 = vmatprep.subr.bf16.mxu1 %v21150_v52 }
 0x8b4   : > { %10666 = vmatpush1.bf16.msra.mxu0 %v21169_v53 }
 0x8b5   : > { %10667 = vmatprep.subr.bf16.mxu0 %v21177_v55 }
 0x8b6   : > { %10877 = vmatpush1.bf16.msra.mxu1 %v21148_v50 }
 0x8b7   : > { %10878 = vmatprep.subr.bf16.mxu1 %v21156_v40 }
 0x8b8   : > { %10668 = vmatpush1.bf16.msra.mxu0 %v21175_v5 }
 0x8b9   : > { %10669 = vmatprep.subr.bf16.mxu0 %v21183_v3 }
 0x8ba   : > { %10879 = vmatpush1.bf16.msra.mxu1 %v21154_v39 }
 0x8bb   : > { %10880 = vmatprep.subr.bf16.mxu1 %v21162_v25 }
 0x8bc   : > { %10670 = vmatpush1.bf16.msra.mxu0 %v21181_v18  ;;  %v10331_v18 = vsub.s32 5, %v26534_v59 }
 0x8bd   : > { %10671 = vmatprep.subr.bf16.mxu0 %v21189_v14 }
 0x8be   : > { %10881 = vmatpush1.bf16.msra.mxu1 %v21160_v62 }
 0x8bf   : > { %10882 = vmatprep.subr.bf16.mxu1 %v21168_v63 }
 0x8c0   : > { %10672 = vmatpush1.bf16.msra.mxu0 %v21187_v42 }
 0x8c1   : > { %10673 = vmatprep.subr.bf16.mxu0 %v21195_v10 }
 0x8c2   : > { %10883 = vmatpush1.bf16.msra.mxu1 %v21166_v57 }
 0x8c3   : > { %10884 = vmatprep.subr.bf16.mxu1 %v21174_v12 }
 0x8c4   : > { %10674 = vmatpush2.bf16.msra.mxu0 %v21193_v32 }
 0x8c5   : > { %10675 = vmatprep.subr.bf16.mxu0 %v21201_v17 }
 0x8c6   : > { %10885 = vmatpush2.bf16.msra.mxu1 %v21172_v60 }
 0x8c7   : > { %10886 = vmatprep.subr.bf16.mxu1 %v21180_v58 }
 0x8c8   : > { %10676 = vmatpush2.bf16.msra.mxu0 %v21199_v9 }
 0x8c9   : > { %10677 = vmatprep.subr.bf16.mxu0 %v21207_v2 }
 0x8ca   : > { %10887 = vmatpush2.bf16.msra.mxu1 %v21178_v41 }
 0x8cb   : > { %10888 = vmatprep.subr.bf16.mxu1 %v21186_v21 }
 0x8cc   : > { %10678 = vmatpush2.bf16.msra.mxu0 %v21205_v35 }
 0x8cd   : > { %10679 = vmatprep.subr.bf16.mxu0 %v21213_v34 }
 0x8ce   : > { %10889 = vmatpush2.bf16.msra.mxu1 %v21184_v45 }
 0x8cf   : > { %10890 = vmatprep.subr.bf16.mxu1 %v21192_v44  ;;  %v22285_v44 = vld [vmem:[%s22731_s24] sm:$0xff] }
 0x8d0   : > { %10680 = vmatpush2.bf16.msra.mxu0 %v21211_v1  ;;  %v10332_v32 = vrot.slane %v22285_v44, %v10331_v18 }
 0x8d1   : > { %10681 = vmatprep.subr.bf16.mxu0 %v21219_v22 }
 0x8d2   : > { %10891 = vmatpush2.bf16.msra.mxu1 %v21190_v6 }
 0x8d3   : > { %10892 = vmatprep.subr.bf16.mxu1 %v21198_v30 }
 0x8d4   : > { %10682 = vmatpush2.bf16.msra.mxu0 %v21217_v15 }
 0x8d5   : > { %10683 = vmatprep.subr.bf16.mxu0 %v21225_v46 }
 0x8d6   : > { %10893 = vmatpush2.bf16.msra.mxu1 %v21196_v47 }
 0x8d7   : > { %10894 = vmatprep.subr.bf16.mxu1 %v21204_v56  ;;  %v22286_v56 = vld [vmem:[%s22731_s24 + $0x8] sm:$0xff] }
 0x8d8   : > { %10684 = vmatpush2.bf16.msra.mxu0 %v21223_v0  ;;  %v9506_v38 = vpop.f32.mrf.mxu0  ;;  %v10336_v2 = vrot.slane %v22286_v56, %v10331_v18 }
 0x8d9   : > { %10685 = vmatprep.subr.bf16.mxu0 %v21231_v61 }
 0x8da   : > { %10895 = vmatpush2.bf16.msra.mxu1 %v21202_v48  ;;  %v9508_v51 = vpop.f32.mrf.mxu0 }
 0x8db   : > { %10896 = vmatprep.subr.bf16.mxu1 %v21210_v13 }
 0x8dc   : > { %10686 = vmatpush2.bf16.msra.mxu0 %v21229_v19  ;;  %v9510_v43 = vpop.f32.mrf.mxu0 }
 0x8dd   : > { %10687 = vmatprep.subr.bf16.mxu0 %v21237_v8 }
 0x8de   : > { %10897 = vmatpush2.bf16.msra.mxu1 %v21208_v29  ;;  %v9512_v37 = vpop.f32.mrf.mxu0 }
 0x8df   : > { %10898 = vmatprep.subr.bf16.mxu1 %v21216_v24 }
 0x8e0   : > { %10688 = vmatpush2.bf16.msra.mxu0 %v21235_v28  ;;  %v9516_v52 = vpop.f32.mrf.mxu0 }
 0x8e1   : > { %11126 = vmatprep.subr.bf16.mxu0 %v21243_v49 }
 0x8e2   : > { %10899 = vmatpush2.bf16.msra.mxu1 %v21214_v16  ;;  %v9518_v50 = vpop.f32.mrf.mxu0 }
 0x8e3   : > { %11394 = vmatprep.subr.bf16.mxu1 %v21222_v26 }
 0x8e4   : > { %v9520_v40 = vpop.f32.mrf.mxu0 }
 0x8e5   : > { %v9293_v31 = vpop.f32.mrf.mxu1 }
 0x8e6   : > { %v9522_v39 = vpop.f32.mrf.mxu0  ;;  %v9507_v5 = vadd.f32 %v9506_v38, %v9293_v31 }
 0x8e7   : > { %v9295_v33 = vpop.f32.mrf.mxu1 }
 0x8e8   : > { %v9509_v41 = vadd.f32 %v9508_v51, %v9295_v33 }
 0x8e9   : > { %v9297_v7 = vpop.f32.mrf.mxu1 }
 0x8ea   : > { %v9511_v21 = vadd.f32 %v9510_v43, %v9297_v7 }
 0x8eb   : > { %v9299_v36 = vpop.f32.mrf.mxu1 }
 0x8ec   : > { %v9513_v10 = vadd.f32 %v9512_v37, %v9299_v36 }
 0x8ed   : > { %v9303_v27 = vpop.f32.mrf.mxu1 }
 0x8ee   : > { %v9517_v48 = vadd.f32 %v9516_v52, %v9303_v27 }
 0x8ef   : > { %v9305_v20 = vpop.f32.mrf.mxu1 }
 0x8f0   : > { %v9519_v34 = vadd.f32 %v9518_v50, %v9305_v20 }
 0x8f1   : > { %v9307_v4 = vpop.f32.mrf.mxu1 }
 0x8f2   : > { %v9521_v22 = vadd.f32 %v9520_v40, %v9307_v4 }
 0x8f3   : > { %v9309_v23 = vpop.f32.mrf.mxu1 }
 0x8f4   : > { %v9523_v8 = vadd.f32 %v9522_v39, %v9309_v23 }
 0x918   : > { %v10038_v62 = vpop.f32.mrf.mxu0 }
 0x91a   : > { %v10040_v57 = vpop.f32.mrf.mxu0 }
 0x91c   : > { %v10042_v12 = vpop.f32.mrf.mxu0 }
 0x91e   : > { %v10044_v3 = vpop.f32.mrf.mxu0 }
 0x920   : > { %v10048_v30 = vpop.f32.mrf.mxu0 }
 0x922   : > { %v10050_v16 = vpop.f32.mrf.mxu0 }
 0x924   : > { %v10052_v38 = vpop.f32.mrf.mxu0 }
 0x925   : > { %v9766_v11 = vpop.f32.mrf.mxu1 }
 0x926   : > { %v9785_v58 = vadd.f32 %v9766_v11, %v9507_v5  ;;  %v10054_v39 = vpop.f32.mrf.mxu0 }
 0x927   : > { %v9768_v54 = vpop.f32.mrf.mxu1 }
 0x928   : > { %v9786_v45 = vadd.f32 %v9768_v54, %v9509_v41  ;;  %v10057_v6 = vadd.f32 %v10038_v62, %v9785_v58 }
 0x929   : > { %v9770_v53 = vpop.f32.mrf.mxu1 }
 0x92a   : > { %v9787_v42 = vadd.f32 %v9770_v53, %v9511_v21  ;;  %v10058_v9 = vadd.f32 %v10040_v57, %v9786_v45 }
 0x92b   : > { %v9772_v25 = vpop.f32.mrf.mxu1 }
 0x92c   : > { %v9788_v35 = vadd.f32 %v9772_v25, %v9513_v10  ;;  %v10059_v24 = vadd.f32 %v10042_v12, %v9787_v42 }
 0x92d   : > { %v9776_v63 = vpop.f32.mrf.mxu1 }
 0x92e   : > { %v9789_v15 = vadd.f32 %v9776_v63, %v9517_v48  ;;  %v10060_v31 = vadd.f32 %v10044_v3, %v9788_v35 }
 0x92f   : > { %v9778_v60 = vpop.f32.mrf.mxu1 }
 0x930   : > { %v9790_v46 = vadd.f32 %v9778_v60, %v9519_v34  ;;  %v10061_v51 = vadd.f32 %v10048_v30, %v9789_v15 }
 0x931   : > { %v9780_v55 = vpop.f32.mrf.mxu1 }
 0x932   : > { %v9791_v49 = vadd.f32 %v9780_v55, %v9521_v22  ;;  %v10062_v52 = vadd.f32 %v10050_v16, %v9790_v46  ;;  %v21220_v46 = vld [vmem:[%s22620_s27 + $0x2470] ss:$8 sps:$4 sm:$0xff]  }
 0x933   : > { %v9782_v14 = vpop.f32.mrf.mxu1 }
 0x934   : > { %v9792_v43 = vadd.f32 %v9782_v14, %v9523_v8  ;;  %v10063_v53 = vadd.f32 %v10052_v38, %v9791_v49 }
 0x936   : > { %v10064_v12 = vadd.f32 %v10054_v39, %v9792_v43 }
 0x965   : > { %v10302_v17 = vpop.f32.mrf.mxu1 }
 0x966   : > { %v10321_v47 = vadd.f32 %v10302_v17, %v10057_v6 }
 0x967   : > { %v10304_v13 = vpop.f32.mrf.mxu1 }
 0x968   : > { %v25485_v29 = vadd.f32 %v10332_v32, %v10321_v47  ;;  %v10322_v1 = vadd.f32 %v10304_v13, %v10058_v9 }
 0x969   : > { %v10306_v26 = vpop.f32.mrf.mxu1 }
 0x96a   : > { %v10353_v0 = vmin.f32 %v25485_v29, 0.0  ;;  %v25488_v61 = vadd.f32 %v10336_v2, %v10322_v1  ;;  %v10323_v19 = vadd.f32 %v10306_v26, %v10059_v24  ;;  %vm10345_vm4 = vcmp.gt.f32.partialorder %v25485_v29, 0.0 }
 0x96b   : > { %v10308_v28 = vpop.f32.mrf.mxu1 }
 0x96c   : > { %v10361_v33 = vmul.f32 1.442695, %v10353_v0  ;;  %v10354_v7 = vmin.f32 %v25488_v61, 0.0  ;;  %v10339_v36 = vadd.f32 %v10332_v32, %v10323_v19  ;;  %v10324_v27 = vadd.f32 %v10308_v28, %v10060_v31  ;;  %v21228_v19 = vld [vmem:[%s22620_s27 + $0x2464] ss:$8 sps:$4 sm:$0xff]  }
 0x96d   : > { %v10312_v20 = vpop.f32.mrf.mxu1  ;;  %vm10346_vm11 = vcmp.gt.f32.partialorder %v25488_v61, 0.0 }
 0x96e   : > { %v10363_v4 = vmul.f32 1.442695, %v10354_v7  ;;  %v10355_v37 = vmin.f32 %v10339_v36, 0.0  ;;  %v10340_v11 = vadd.f32 %v10336_v2, %v10324_v27  ;;  %v10325_v50 = vadd.f32 %v10312_v20, %v10061_v51  ;;  %v21234_v51 = vld [vmem:[%s22620_s27 + $0x2454] ss:$8 sps:$4 sm:$0xff]  }
 0x96f   : > { %v10314_v54 = vpop.f32.mrf.mxu1  ;;  %22249 = vpow2.f32 %v10361_v33  ;;  %vm10347_vm3 = vcmp.gt.f32.partialorder %v10339_v36, 0.0 }
 0x970   : > { %v10365_v23 = vmul.f32 1.442695, %v10355_v37  ;;  %v10326_v40 = vadd.f32 %v10314_v54, %v10062_v52  ;;  %22251 = vpow2.f32 %v10363_v4  ;;  %v10356_v25 = vmin.f32 %v10340_v11, 0.0  ;;  %v21232_v54 = vld [vmem:[%s22620_s27 + $0x2450] ss:$8 sps:$4 sm:$0xff]  }
 0x971   : > { %v10341_v62 = vadd.f32 %v10332_v32, %v10325_v50  ;;  %v10316_v63 = vpop.f32.mrf.mxu1  ;;  %vm10348_vm12 = vcmp.gt.f32.partialorder %v10340_v11, 0.0 }
 0x972   : > { %22253 = vpow2.f32 %v10365_v23  ;;  %v25491_v57 = vadd.f32 %v10336_v2, %v10326_v40  ;;  %v10327_v60 = vadd.f32 %v10316_v63, %v10063_v53  ;;  %v10367_v5 = vmul.f32 1.442695, %v10356_v25  ;;  %v21240_v25 = vld [vmem:[%s22620_s27 + $0x2444] ss:$8 sps:$4 sm:$0xff]  }
 0x973   : > { %v10357_v55 = vmin.f32 %v10341_v62, 0.0  ;;  %v10318_v41 = vpop.f32.mrf.mxu1  ;;  %vm10349_vm14 = vcmp.gt.f32.partialorder %v10341_v62, 0.0 }
 0x974   : > { %v10358_v58 = vmin.f32 %v25491_v57, 0.0  ;;  %v10343_v18 = vadd.f32 %v10332_v32, %v10327_v60  ;;  %v10328_v3 = vadd.f32 %v10318_v41, %v10064_v12  ;;  %22255 = vpow2.f32 %v10367_v5 }
 0x975   : > { %v10369_v21 = vmul.f32 1.442695, %v10357_v55  ;;  %vm10350_vm0 = vcmp.gt.f32.partialorder %v25491_v57, 0.0 }
 0x976   : > { %v10371_v45 = vmul.f32 1.442695, %v10358_v58  ;;  %v10359_v14 = vmin.f32 %v10343_v18, 0.0  ;;  %v10344_v42 = vadd.f32 %v10336_v2, %v10328_v3  ;;  %vm10351_vm15 = vcmp.gt.f32.partialorder %v10343_v18, 0.0 }
 0x977   : > { %22257 = vpow2.f32 %v10369_v21 }
 0x978   : > { %22259 = vpow2.f32 %v10371_v45  ;;  %v10373_v6 = vmul.f32 1.442695, %v10359_v14  ;;  %v10360_v44 = vmin.f32 %v10344_v42, 0.0  ;;  %v21238_v45 = vld [vmem:[%s22620_s27 + $0x2440] ss:$8 sps:$4 sm:$0xff]  }
 0x979   : > { %v21241_v14 = vld [vmem:[%s22620_s27 + $0x2370] ss:$8 sps:$4 sm:$0xff]  }
 0x97a   : > { %22261 = vpow2.f32 %v10373_v6  ;;  %v10375_v10 = vmul.f32 1.442695, %v10360_v44 }
 0x97c   : > { %22263 = vpow2.f32 %v10375_v10  ;;  %v22250_v30 = vpop.eup %22249 }
 0x97d   : > { %v22252_v17 = vpop.eup %22251  ;;  %v18067_v9 = vadd.f32 -1.0, %v22250_v30 }
 0x97e   : > { %v18068_v48 = vadd.f32 -1.0, %v22252_v17 }
 0x97f   : > { %v22254_v47 = vpop.eup %22253  ;;  %v10385_v34 = vsel %vm10345_vm4, %v25485_v29, %v18067_v9 }
 0x980   : > { %v18069_v56 = vadd.f32 -1.0, %v22254_v47  ;;  %v10386_v24 = vsel %vm10346_vm11, %v25488_v61, %v18068_v48  ;;  %v21249_v48 = vld [vmem:[%s22620_s27 + $0x2364] ss:$8 sps:$4 sm:$0xff]  }
 0x981   : > { %v22256_v32 = vpop.eup %22255 }
 0x982   : > { %v10387_v35 = vsel %vm10347_vm3, %v10339_v36, %v18069_v56  ;;  %v18070_v2 = vadd.f32 -1.0, %v22256_v32  ;;  %v21226_v36 = vld [vmem:[%s22620_s27 + $0x2460] ss:$8 sps:$4 sm:$0xff]   ;;  %vm10352_vm3 = vcmp.gt.f32.partialorder %v10344_v42, 0.0  ;;  %v21246_v56 = vld [vmem:[%s22620_s27 + $0x2434] ss:$8 sps:$4 sm:$0xff]  }
 0x983   : > { %v25498_v22 = vpack.c.bf16 %v10387_v35, %v10385_v34  ;;  %v21244_v35 = vld [vmem:[%s22620_s27 + $0x2430] ss:$8 sps:$4 sm:$0xff]   ;;  %v21255_v34 = vld [vmem:[%s22620_s27 + $0x2354] ss:$8 sps:$4 sm:$0xff]  }
 0x984   : > { %v22258_v13 = vpop.eup %22257  ;;  %v10388_v16 = vsel %vm10348_vm12, %v10340_v11, %v18070_v2  ;;  %v21247_v2 = vld [vmem:[%s22620_s27 + $0x2360] ss:$8 sps:$4 sm:$0xff]  }
 0x985   : > { %v22260_v1 = vpop.eup %22259  ;;  %v25500_v15 = vpack.c.bf16 %v10388_v16, %v10386_v24  ;;  %v18071_v26 = vadd.f32 -1.0, %v22258_v13  ;;  %v10466_v28 = vshll.u32 %v25498_v22, 16  ;;  %v10464_v4 = vshrl.u32 %v25498_v22, 16  ;;  %v21252_v13 = vld [vmem:[%s22620_s27 + $0x2424] ss:$8 sps:$4 sm:$0xff]  }
 0x986   : > { %v18072_v8 = vadd.f32 -1.0, %v22260_v1  ;;  %v10956_v50 = vrot.slane %v25498_v22, 1  ;;  %v11484_v41 = vrot.slane %v25498_v22, 2  ;;  %v21250_v24 = vld [vmem:[%s22620_s27 + $0x2420] ss:$8 sps:$4 sm:$0xff]  }
 0x987   : > { %v22262_v0 = vpop.eup %22261  ;;  %10900 = vmatprep.mubr.bf16.mxu1 %v25500_v15  ;;  %v10478_v61 = vshll.u32 %v25500_v15, 16  ;;  %v10389_v49 = vsel %vm10349_vm14, %v10341_v62, %v18071_v26  ;;  %v10476_v38 = vshrl.u32 %v25500_v15, 16  ;;  %v10468_v23 = vrot.slane %v10466_v28, 1  ;;  %v21253_v16 = vld [vmem:[%s22620_s27 + $0x2350] ss:$8 sps:$4 sm:$0xff]  }
 0x988   : > { %v18073_v31 = vadd.f32 -1.0, %v22262_v0  ;;  %10901 = vmatmul.mubr.bf16.vlgmr.msra.gmra.mxu1 %v25498_v22  ;;  %v10390_v20 = vsel %vm10350_vm0, %v25491_v57, %v18072_v8  ;;  %v11487_v57 = vrot.slane %v25500_v15, 2  ;;  %v21258_v0 = vld [vmem:[%s22620_s27 + $0x2414] ss:$8 sps:$4 sm:$0xff]   ;;  %v21261_v8 = vld [vmem:[%s22620_s27 + $0x2344] ss:$8 sps:$4 sm:$0xff]  }
 0x989   : > { %v22264_v29 = vpop.eup %22263  ;;  %11395 = vmatpush1.bf16.msra.mxu1 %v21220_v46  ;;  %v10480_v52 = vrot.slane %v10478_v61, 1  ;;  %v11223_v40 = vrot.slane %v10476_v38, 1  ;;  %v11224_v53 = vrot.slane %v10478_v61, 2  ;;  %v21259_v61 = vld [vmem:[%s22620_s27 + $0x2340] ss:$8 sps:$4 sm:$0xff]  }
 0x98a   : > { %v10391_v33 = vsel %vm10351_vm15, %v10343_v18, %v18073_v31  ;;  %v18074_v7 = vadd.f32 -1.0, %v22264_v29  ;;  %11396 = vmatprep.subr.bf16.mxu1 %v21228_v19  ;;  %v10959_v19 = vrot.slane %v25500_v15, 1  ;;  %v21256_v29 = vld [vmem:[%s22620_s27 + $0x2410] ss:$8 sps:$4 sm:$0xff]   ;;  %v21262_v15 = vld [vmem:[%s22620_s27 + $0x2400] ss:$8 sps:$4 sm:$0xff]  }
 0x98b   : > { %v25511_v27 = vpack.c.bf16 %v10391_v33, %v10389_v49  ;;  %v10481_v58 = vor.u32 %v10480_v52, %v10476_v38  ;;  %v11225_v6 = vor.u32 %v11224_v53, %v11223_v40  ;;  %v21264_v49 = vld [vmem:[%s22620_s27 + $0x2404] ss:$8 sps:$4 sm:$0xff]   ;;  %v21267_v33 = vld [vmem:[%s22620_s27 + $0x2334] ss:$8 sps:$4 sm:$0xff]   ;;  %v21280_v53 = vld [vmem:[%s22620_s27 + $0x24d0] ss:$8 sps:$4 sm:$0xff]  }
 0x98c   : > { %v10392_v43 = vsel %vm10352_vm3, %v10344_v42, %v18074_v7  ;;  %v10469_v42 = vor.u32 %v10468_v23, %v10464_v4  ;;  %v21265_v7 = vld [vmem:[%s22620_s27 + $0x2330] ss:$8 sps:$4 sm:$0xff]   ;;  %v21273_v38 = vld [vmem:[%s22620_s27 + $0x2324] ss:$8 sps:$4 sm:$0xff]   ;;  %v21279_v52 = vld [vmem:[%s22620_s27 + $0x2314] ss:$8 sps:$4 sm:$0xff]  }
 0x98d   : > { %v25516_v37 = vpack.c.bf16 %v10392_v43, %v10390_v20  ;;  %v10471_v11 = vshll.u32 %v25511_v27, 16  ;;  %11397 = vmatpush1.bf16.msra.mxu1 %v21226_v36  ;;  %v10957_v39 = vrot.slane %v25511_v27, 1  ;;  %v11485_v60 = vrot.slane %v25511_v27, 2  ;;  %v21270_v36 = vld [vmem:[%s22620_s27 + $0x24f4] ss:$8 sps:$4 sm:$0xff]  }
 0x98e   : > { %11398 = vmatprep.subr.bf16.mxu1 %v21234_v51  ;;  %v10487_v1 = vshrl.u32 %v25511_v27, 16  ;;  %v21268_v51 = vld [vmem:[%s22620_s27 + $0x24f0] ss:$8 sps:$4 sm:$0xff]   ;;  %v21271_v20 = vld [vmem:[%s22620_s27 + $0x2320] ss:$8 sps:$4 sm:$0xff]  }
 0x98f   : > { %10910 = vmatprep.mubr.bf16.mxu1 %v25516_v37  ;;  %v10483_v62 = vshll.u32 %v25516_v37, 16  ;;  %v10490_v63 = vshrl.u32 %v25516_v37, 16  ;;  %v10473_v12 = vrot.slane %v10471_v11, 1  ;;  %v25535_v5 = vsel %vm1249_vm1, %v10956_v50, %v10957_v39  ;;  %v21276_v43 = vld [vmem:[%s22620_s27 + $0x24e4] ss:$8 sps:$4 sm:$0xff]  }
 0x990   : > { %v11488_v55 = vrot.slane %v25516_v37, 2  ;;  %10911 = vmatmul.mubr.bf16.gmra.mxu1 %v25511_v27  ;;  %v25555_v47 = vsel %vm1831_vm2, %v11484_v41, %v11485_v60  ;;  %v10960_v26 = vrot.slane %v25516_v37, 1  ;;  %v21274_v50 = vld [vmem:[%s22620_s27 + $0x24e0] ss:$8 sps:$4 sm:$0xff]   ;;  %v21282_v23 = vld [vmem:[%s22620_s27 + $0x24d4] ss:$8 sps:$4 sm:$0xff]  }
 0x991   : > { %v10485_v18 = vrot.slane %v10483_v62, 1  ;;  %v11226_v3 = vrot.slane %v10490_v63, 1  ;;  %v11227_v21 = vrot.slane %v10483_v62, 2  ;;  %11399 = vmatpush1.bf16.msra.mxu1 %v21232_v54  ;;  %v10474_v9 = vsel %vm711_vm7, %v10469_v42, %v10473_v12  ;;  %v21277_v54 = vld [vmem:[%s22620_s27 + $0x2310] ss:$8 sps:$4 sm:$0xff]  }
 0x992   : > { %v25547_v44 = vsel %vm1831_vm2, %v11487_v57, %v11488_v55  ;;  %11400 = vmatprep.subr.bf16.mxu1 %v21240_v25  ;;  %v10489_v46 = vor.u32 %v10487_v1, %v10473_v12  ;;  %v10961_v31 = vsel %vm1249_vm1, %v10959_v19, %v10960_v26  ;;  %v21285_v40 = vld [vmem:[%s22620_s27 + $0x2304] ss:$8 sps:$4 sm:$0xff]   ;;  %v21283_v25 = vld [vmem:[%s22620_s27 + $0x2300] ss:$8 sps:$4 sm:$0xff]   ;;  %v21289_v12 = vld [vmem:[%s22620_s27 + $0x23f0] ss:$8 sps:$4 sm:$0xff]  }
 0x993   : > { %v10486_v10 = vsel %vm711_vm7, %v10481_v58, %v10485_v18  ;;  %v10492_v30 = vor.u32 %v10490_v63, %v10485_v18  ;;  %v25550_v17 = vor.u32 %v11227_v21, %v11226_v3  ;;  %v21288_v62 = vld [vmem:[%s22620_s27 + $0x24c4] ss:$8 sps:$4 sm:$0xff]   ;;  %v21291_v63 = vld [vmem:[%s22620_s27 + $0x23f4] ss:$8 sps:$4 sm:$0xff]   ;;  %v21286_v57 = vld [vmem:[%s22620_s27 + $0x24c0] ss:$8 sps:$4 sm:$0xff]  }
 0x994   : > { %10689 = vmatprep.mubr.bf16.mxu0 %v10486_v10  ;;  %v21294_v41 = vld [vmem:[%s22620_s27 + $0x24b4] ss:$8 sps:$4 sm:$0xff]   ;;  %v21297_v58 = vld [vmem:[%s22620_s27 + $0x23e4] ss:$8 sps:$4 sm:$0xff]   ;;  %v21292_v18 = vld [vmem:[%s22620_s27 + $0x24b0] ss:$8 sps:$4 sm:$0xff]  }
 0x995   : > { %10690 = vmatmul.mubr.bf16.vlgmr.msra.gmra.mxu0 %v10474_v9  ;;  %v11229_v32 = vsel %vm1534_vm13, %v11225_v6, %v25550_v17  ;;  %11401 = vmatpush1.bf16.msra.mxu1 %v21238_v45  ;;  %v21295_v3 = vld [vmem:[%s22620_s27 + $0x23e0] ss:$8 sps:$4 sm:$0xff]   ;;  %v21300_v21 = vld [vmem:[%s22620_s27 + $0x24a4] ss:$8 sps:$4 sm:$0xff]   ;;  %v21303_v45 = vld [vmem:[%s22620_s27 + $0x23d4] ss:$8 sps:$4 sm:$0xff]  }
 0x996   : > { %11127 = vmatpush1.bf16.msra.mxu0 %v21241_v14  ;;  %10699 = vmatprep.mubr.bf16.mxu0 %v10492_v30  ;;  %v21298_v14 = vld [vmem:[%s22620_s27 + $0x24a0] ss:$8 sps:$4 sm:$0xff]   ;;  %v21301_v42 = vld [vmem:[%s22620_s27 + $0x23d0] ss:$8 sps:$4 sm:$0xff]   ;;  %v21306_v6 = vld [vmem:[%s22620_s27 + $0x2494] ss:$8 sps:$4 sm:$0xff]  }
 0x997   : > { %11426 = vmatprep.mubr.bf16.mxu1 %v11229_v32  ;;  %11402 = vmatprep.subr.bf16.mxu1 %v21246_v56  ;;  %v21309_v10 = vld [vmem:[%s22620_s27 + $0x23c4] ss:$8 sps:$4 sm:$0xff]   ;;  %v21304_v30 = vld [vmem:[%s22620_s27 + $0x2490] ss:$8 sps:$4 sm:$0xff]   ;;  %v21307_v9 = vld [vmem:[%s22620_s27 + $0x23c0] ss:$8 sps:$4 sm:$0xff]  }
 0x998   : > { %11128 = vmatprep.subr.bf16.mxu0 %v21249_v48  ;;  %v21312_v56 = vld [vmem:[%s22620_s27 + $0x2484] ss:$8 sps:$4 sm:$0xff]   ;;  %v21315_v48 = vld [vmem:[%s22620_s27 + $0x23b4] ss:$8 sps:$4 sm:$0xff]   ;;  %v11219_v32 = vrot.slane %v10487_v1, 1 }
 0x999   : > { %11403 = vmatpush1.bf16.msra.mxu1 %v21244_v35  ;;  %v11220_v35 = vrot.slane %v10471_v11, 2  ;;  %v21319_v22 = vld [vmem:[%s22620_s27 + $0x2390] ss:$8 sps:$4 sm:$0xff]   ;;  %v21322_v19 = vld [vmem:[%s22620_s27 + $0x2380] ss:$8 sps:$4 sm:$0xff]  }
 0x99a   : > { %11129 = vmatpush1.bf16.msra.mxu0 %v21247_v2  ;;  %11404 = vmatprep.subr.bf16.mxu1 %v21252_v13  ;;  %v21310_v2 = vld [vmem:[%s22620_s27 + $0x2480] ss:$8 sps:$4 sm:$0xff]   ;;  %v21313_v13 = vld [vmem:[%s22620_s27 + $0x23b0] ss:$8 sps:$4 sm:$0xff]   ;;  %v21387_v37 = vld [vmem:[%s22620_s27 + $0x2764] ss:$8 sps:$4 sm:$0xff]  }
 0x99b   : > { %11130 = vmatprep.subr.bf16.mxu0 %v21255_v34  ;;  %v11216_v34 = vrot.slane %v10464_v4, 1  ;;  %v11221_v1 = vor.u32 %v11220_v35, %v11219_v32  ;;  %v21384_v27 = vld [vmem:[%s22620_s27 + $0x2654] ss:$8 sps:$4 sm:$0xff]   ;;  %v21397_v32 = vld [vmem:[%s22620_s27 + $0x2740] ss:$8 sps:$4 sm:$0xff]  }
 0x99c   : > { %v21405_v35 = vld [vmem:[%s22620_s27 + $0x2734] ss:$8 sps:$4 sm:$0xff]  }
 0x99d   : > { %10700 = vmatmul.mubr.bf16.gmra.mxu0 %v10489_v46  ;;  %11405 = vmatpush1.bf16.msra.mxu1 %v21250_v24  ;;  %v11217_v24 = vrot.slane %v10466_v28, 2  ;;  %v21316_v46 = vld [vmem:[%s22620_s27 + $0x23a0] ss:$8 sps:$4 sm:$0xff]   ;;  %v21324_v28 = vld [vmem:[%s22620_s27 + $0x2384] ss:$8 sps:$4 sm:$0xff]  }
 0x99e   : > { %11131 = vmatpush1.bf16.msra.mxu0 %v21253_v16  ;;  %11158 = vmatprep.mubr.bf16.mxu0 %v10961_v31  ;;  %v21318_v16 = vld [vmem:[%s22620_s27 + $0x23a4] ss:$8 sps:$4 sm:$0xff]   ;;  %v21325_v31 = vld [vmem:[%s22620_s27 + $0x2570] ss:$8 sps:$4 sm:$0xff]  }
 0x99f   : > { %11406 = vmatprep.subr.bf16.mxu1 %v21258_v0  ;;  %11132 = vmatprep.subr.bf16.mxu0 %v21261_v8  ;;  %v11218_v11 = vor.u32 %v11217_v24, %v11216_v34  ;;  %v21321_v0 = vld [vmem:[%s22620_s27 + $0x2394] ss:$8 sps:$4 sm:$0xff]   ;;  %v21403_v34 = vld [vmem:[%s22620_s27 + $0x2730] ss:$8 sps:$4 sm:$0xff]   ;;  %v21411_v24 = vld [vmem:[%s22620_s27 + $0x2724] ss:$8 sps:$4 sm:$0xff]  }
 0x9a0   : > { %v21327_v8 = vld [vmem:[%s22620_s27 + $0x2574] ss:$8 sps:$4 sm:$0xff]  }
 0x9a1   : > { %11407 = vmatpush1.bf16.msra.mxu1 %v21256_v29  ;;  %v11222_v4 = vsel %vm1534_vm13, %v11218_v11, %v11221_v1  ;;  %v21330_v29 = vld [vmem:[%s22620_s27 + $0x2564] ss:$8 sps:$4 sm:$0xff]   ;;  %v21409_v11 = vld [vmem:[%s22620_s27 + $0x2720] ss:$8 sps:$4 sm:$0xff]  }
 0x9a2   : > { %11133 = vmatpush1.bf16.msra.mxu0 %v21259_v61  ;;  %11408 = vmatprep.subr.bf16.mxu1 %v21264_v49  ;;  %v21333_v61 = vld [vmem:[%s22620_s27 + $0x2554] ss:$8 sps:$4 sm:$0xff]   ;;  %v21331_v49 = vld [vmem:[%s22620_s27 + $0x2550] ss:$8 sps:$4 sm:$0xff]  }
 0x9a3   : > { %11134 = vmatprep.subr.bf16.mxu0 %v21267_v33  ;;  %v21336_v33 = vld [vmem:[%s22620_s27 + $0x2544] ss:$8 sps:$4 sm:$0xff]  }
 0x9a5   : > { %11409 = vmatpush1.bf16.msra.mxu1 %v21262_v15  ;;  %v21337_v15 = vld [vmem:[%s22620_s27 + $0x2530] ss:$8 sps:$4 sm:$0xff]  }
 0x9a6   : > { %11135 = vmatpush1.bf16.msra.mxu0 %v21265_v7  ;;  %11410 = vmatprep.subr.bf16.mxu1 %v21270_v36  ;;  %v21342_v7 = vld [vmem:[%s22620_s27 + $0x2524] ss:$8 sps:$4 sm:$0xff]   ;;  %v21340_v36 = vld [vmem:[%s22620_s27 + $0x2520] ss:$8 sps:$4 sm:$0xff]  }
 0x9a7   : > { %11136 = vmatprep.subr.bf16.mxu0 %v21273_v38  ;;  %v21343_v38 = vld [vmem:[%s22620_s27 + $0x2510] ss:$8 sps:$4 sm:$0xff]  }
 0x9a9   : > { %11411 = vmatpush2.bf16.msra.mxu1 %v21268_v51  ;;  %v21346_v51 = vld [vmem:[%s22620_s27 + $0x2500] ss:$8 sps:$4 sm:$0xff]  }
 0x9aa   : > { %11137 = vmatpush1.bf16.msra.mxu0 %v21271_v20  ;;  %11412 = vmatprep.subr.bf16.mxu1 %v21276_v43  ;;  %v21351_v20 = vld [vmem:[%s22620_s27 + $0x25f4] ss:$8 sps:$4 sm:$0xff]   ;;  %v21349_v43 = vld [vmem:[%s22620_s27 + $0x25f0] ss:$8 sps:$4 sm:$0xff]  }
 0x9ab   : > { %11138 = vmatprep.subr.bf16.mxu0 %v21279_v52  ;;  %v21354_v52 = vld [vmem:[%s22620_s27 + $0x25e4] ss:$8 sps:$4 sm:$0xff]  }
 0x9ad   : > { %11413 = vmatpush2.bf16.msra.mxu1 %v21274_v50  ;;  %v21352_v50 = vld [vmem:[%s22620_s27 + $0x25e0] ss:$8 sps:$4 sm:$0xff]  }
 0x9ae   : > { %11139 = vmatpush1.bf16.msra.mxu0 %v21277_v54  ;;  %11414 = vmatprep.subr.bf16.mxu1 %v21282_v23  ;;  %v21357_v54 = vld [vmem:[%s22620_s27 + $0x25d4] ss:$8 sps:$4 sm:$0xff]   ;;  %v21355_v23 = vld [vmem:[%s22620_s27 + $0x25d0] ss:$8 sps:$4 sm:$0xff]  }
 0x9af   : > { %11140 = vmatprep.subr.bf16.mxu0 %v21285_v40  ;;  %v21360_v40 = vld [vmem:[%s22620_s27 + $0x25c4] ss:$8 sps:$4 sm:$0xff]  }
 0x9b1   : > { %11415 = vmatpush2.bf16.msra.mxu1 %v21280_v53  ;;  %v21358_v53 = vld [vmem:[%s22620_s27 + $0x25c0] ss:$8 sps:$4 sm:$0xff]  }
 0x9b2   : > { %11141 = vmatpush1.bf16.msra.mxu0 %v21283_v25  ;;  %11416 = vmatprep.subr.bf16.mxu1 %v21288_v62  ;;  %v21363_v25 = vld [vmem:[%s22620_s27 + $0x25b4] ss:$8 sps:$4 sm:$0xff]   ;;  %v21361_v62 = vld [vmem:[%s22620_s27 + $0x25b0] ss:$8 sps:$4 sm:$0xff]  }
 0x9b3   : > { %11142 = vmatprep.subr.bf16.mxu0 %v21291_v63  ;;  %v21366_v63 = vld [vmem:[%s22620_s27 + $0x25a4] ss:$8 sps:$4 sm:$0xff]  }
 0x9b5   : > { %11417 = vmatpush2.bf16.msra.mxu1 %v21286_v57  ;;  %v21364_v57 = vld [vmem:[%s22620_s27 + $0x25a0] ss:$8 sps:$4 sm:$0xff]  }
 0x9b6   : > { %11143 = vmatpush2.bf16.msra.mxu0 %v21289_v12  ;;  %11418 = vmatprep.subr.bf16.mxu1 %v21294_v41  ;;  %v21369_v12 = vld [vmem:[%s22620_s27 + $0x2594] ss:$8 sps:$4 sm:$0xff]   ;;  %v21367_v41 = vld [vmem:[%s22620_s27 + $0x2590] ss:$8 sps:$4 sm:$0xff]  }
 0x9b7   : > { %11144 = vmatprep.subr.bf16.mxu0 %v21297_v58  ;;  %v21372_v58 = vld [vmem:[%s22620_s27 + $0x2584] ss:$8 sps:$4 sm:$0xff]  }
 0x9b9   : > { %11419 = vmatpush2.bf16.msra.mxu1 %v21292_v18  ;;  %v21370_v18 = vld [vmem:[%s22620_s27 + $0x2580] ss:$8 sps:$4 sm:$0xff]  }
 0x9ba   : > { %11145 = vmatpush2.bf16.msra.mxu0 %v21295_v3  ;;  %11420 = vmatprep.subr.bf16.mxu1 %v21300_v21  ;;  %v21373_v3 = vld [vmem:[%s22620_s27 + $0x2670] ss:$8 sps:$4 sm:$0xff]   ;;  %v21375_v21 = vld [vmem:[%s22620_s27 + $0x2674] ss:$8 sps:$4 sm:$0xff]  }
 0x9bb   : > { %11146 = vmatprep.subr.bf16.mxu0 %v21303_v45  ;;  %v21378_v45 = vld [vmem:[%s22620_s27 + $0x2664] ss:$8 sps:$4 sm:$0xff]  }
 0x9bd   : > { %11421 = vmatpush2.bf16.msra.mxu1 %v21298_v14  ;;  %v21379_v14 = vld [vmem:[%s22620_s27 + $0x2770] ss:$8 sps:$4 sm:$0xff]  }
 0x9be   : > { %11147 = vmatpush2.bf16.msra.mxu0 %v21301_v42  ;;  %11422 = vmatprep.subr.bf16.mxu1 %v21306_v6  ;;  %v21381_v42 = vld [vmem:[%s22620_s27 + $0x2774] ss:$8 sps:$4 sm:$0xff]   ;;  %v21376_v6 = vld [vmem:[%s22620_s27 + $0x2660] ss:$8 sps:$4 sm:$0xff]  }
 0x9bf   : > { %11148 = vmatprep.subr.bf16.mxu0 %v21309_v10  ;;  %v21390_v10 = vld [vmem:[%s22620_s27 + $0x2644] ss:$8 sps:$4 sm:$0xff]  }
 0x9c1   : > { %11423 = vmatpush2.bf16.msra.mxu1 %v21304_v30  ;;  %v21391_v30 = vld [vmem:[%s22620_s27 + $0x2750] ss:$8 sps:$4 sm:$0xff]  }
 0x9c2   : > { %11149 = vmatpush2.bf16.msra.mxu0 %v21307_v9  ;;  %11424 = vmatprep.subr.bf16.mxu1 %v21312_v56  ;;  %v21399_v9 = vld [vmem:[%s22620_s27 + $0x2744] ss:$8 sps:$4 sm:$0xff]   ;;  %v21388_v56 = vld [vmem:[%s22620_s27 + $0x2640] ss:$8 sps:$4 sm:$0xff]  }
 0x9c3   : > { %11150 = vmatprep.subr.bf16.mxu0 %v21315_v48  ;;  %v21396_v48 = vld [vmem:[%s22620_s27 + $0x2634] ss:$8 sps:$4 sm:$0xff]  }
 0x9c5   : > { %11425 = vmatpush2.bf16.msra.mxu1 %v21310_v2  ;;  %v21394_v2 = vld [vmem:[%s22620_s27 + $0x2630] ss:$8 sps:$4 sm:$0xff]  }
 0x9c6   : > { %11151 = vmatpush2.bf16.msra.mxu0 %v21313_v13  ;;  %12007 = vmatprep.subr.bf16.mxu1 %v21381_v42  ;;  %v21402_v13 = vld [vmem:[%s22620_s27 + $0x2624] ss:$8 sps:$4 sm:$0xff]   ;;  %v21444_v42 = vld [vmem:[%s22620_s27 + $0x26b4] ss:$8 sps:$4 sm:$0xff]  }
 0x9c7   : > { %11152 = vmatprep.subr.bf16.mxu0 %v21318_v16  ;;  %v21400_v16 = vld [vmem:[%s22620_s27 + $0x2620] ss:$8 sps:$4 sm:$0xff]  }
 0x9c8   : > { %11427 = vmatmul.mubr.bf16.vlgmr.msra.gmra.mxu1 %v11222_v4  ;;  %v21412_v4 = vld [vmem:[%s22620_s27 + $0x2600] ss:$8 sps:$4 sm:$0xff]  }
 0x9c9   : > { %11436 = vmatprep.mubr.bf16.mxu1 %v25550_v17  ;;  %v21328_v17 = vld [vmem:[%s22620_s27 + $0x2560] ss:$8 sps:$4 sm:$0xff]   ;;  %12008 = vmatpush1.bf16.msra.mxu1 %v21379_v14 }
 0x9ca   : > { %11153 = vmatpush2.bf16.msra.mxu0 %v21316_v46  ;;  %12009 = vmatprep.subr.bf16.mxu1 %v21387_v37  ;;  %v21406_v46 = vld [vmem:[%s22620_s27 + $0x2610] ss:$8 sps:$4 sm:$0xff]   ;;  %v21436_v14 = vld [vmem:[%s22620_s27 + $0x26c0] ss:$8 sps:$4 sm:$0xff]   ;;  %v21447_v37 = vld [vmem:[%s22620_s27 + $0x27c4] ss:$8 sps:$4 sm:$0xff]  }
 0x9cb   : > { %11154 = vmatprep.subr.bf16.mxu0 %v21321_v0  ;;  %v21414_v0 = vld [vmem:[%s22620_s27 + $0x2604] ss:$8 sps:$4 sm:$0xff]  }
 0x9ce   : > { %11155 = vmatpush2.bf16.msra.mxu0 %v21319_v22 }
 0x9cf   : > { %11156 = vmatprep.subr.bf16.mxu0 %v21324_v28 }
 0x9d0   : > { %11437 = vmatmul.mubr.bf16.gmra.mxu1 %v11221_v1  ;;  %v21408_v1 = vld [vmem:[%s22620_s27 + $0x2614] ss:$8 sps:$4 sm:$0xff]  }
 0x9d2   : > { %11157 = vmatpush2.bf16.msra.mxu0 %v21322_v19 }
 0x9d3   : > { %11654 = vmatprep.subr.bf16.mxu0 %v21327_v8 }
 0x9d5   : > { %11159 = vmatmul.mubr.bf16.vlgmr.msra.gmra.mxu0 %v25535_v5  ;;  %v21334_v5 = vld [vmem:[%s22620_s27 + $0x2540] ss:$8 sps:$4 sm:$0xff]  }
 0x9d6   : > { %11168 = vmatprep.mubr.bf16.mxu0 %v10960_v26  ;;  %11655 = vmatpush1.bf16.msra.mxu0 %v21325_v31  ;;  %v21339_v26 = vld [vmem:[%s22620_s27 + $0x2534] ss:$8 sps:$4 sm:$0xff]  }
 0x9d7   : > { %11656 = vmatprep.subr.bf16.mxu0 %v21330_v29 }
 0x9da   : > { %11657 = vmatpush1.bf16.msra.mxu0 %v21328_v17 }
 0x9db   : > { %11658 = vmatprep.subr.bf16.mxu0 %v21333_v61 }
 0x9dd   : > { %11169 = vmatmul.mubr.bf16.gmra.mxu0 %v10957_v39  ;;  %v21345_v39 = vld [vmem:[%s22620_s27 + $0x2514] ss:$8 sps:$4 sm:$0xff]  }
 0x9de   : > { %11659 = vmatpush1.bf16.msra.mxu0 %v21331_v49  ;;  %11686 = vmatprep.mubr.bf16.mxu0 %v25547_v44  ;;  %v21348_v44 = vld [vmem:[%s22620_s27 + $0x2504] ss:$8 sps:$4 sm:$0xff]  }
 0x9df   : > { %11660 = vmatprep.subr.bf16.mxu0 %v21336_v33 }
 0x9e2   : > { %11661 = vmatpush1.bf16.msra.mxu0 %v21334_v5 }
 0x9e3   : > { %11662 = vmatprep.subr.bf16.mxu0 %v21339_v26 }
 0x9e6   : > { %11663 = vmatpush1.bf16.msra.mxu0 %v21337_v15 }
 0x9e7   : > { %11664 = vmatprep.subr.bf16.mxu0 %v21342_v7 }
 0x9ea   : > { %11665 = vmatpush1.bf16.msra.mxu0 %v21340_v36 }
 0x9eb   : > { %11666 = vmatprep.subr.bf16.mxu0 %v21345_v39 }
 0x9ee   : > { %11667 = vmatpush1.bf16.msra.mxu0 %v21343_v38 }
 0x9ef   : > { %11668 = vmatprep.subr.bf16.mxu0 %v21348_v44 }
 0x9f2   : > { %11669 = vmatpush1.bf16.msra.mxu0 %v21346_v51 }
 0x9f3   : > { %11670 = vmatprep.subr.bf16.mxu0 %v21351_v20 }
 0x9f6   : > { %11671 = vmatpush2.bf16.msra.mxu0 %v21349_v43 }
 0x9f7   : > { %11672 = vmatprep.subr.bf16.mxu0 %v21354_v52 }
 0x9fa   : > { %11673 = vmatpush2.bf16.msra.mxu0 %v21352_v50  ;;  %v21415_v50 = vld [vmem:[%s22620_s27 + $0x2710] ss:$8 sps:$4 sm:$0xff]  }
 0x9fb   : > { %11674 = vmatprep.subr.bf16.mxu0 %v21357_v54  ;;  %v21417_v54 = vld [vmem:[%s22620_s27 + $0x2714] ss:$8 sps:$4 sm:$0xff]  }
 0x9fe   : > { %11675 = vmatpush2.bf16.msra.mxu0 %v21355_v23  ;;  %v21418_v23 = vld [vmem:[%s22620_s27 + $0x26f0] ss:$8 sps:$4 sm:$0xff]  }
 0x9ff   : > { %11676 = vmatprep.subr.bf16.mxu0 %v21360_v40  ;;  %v21420_v40 = vld [vmem:[%s22620_s27 + $0x26f4] ss:$8 sps:$4 sm:$0xff]  }
 0xa02   : > { %11677 = vmatpush2.bf16.msra.mxu0 %v21358_v53  ;;  %v21421_v53 = vld [vmem:[%s22620_s27 + $0x2700] ss:$8 sps:$4 sm:$0xff]  }
 0xa03   : > { %11678 = vmatprep.subr.bf16.mxu0 %v21363_v25  ;;  %v21423_v25 = vld [vmem:[%s22620_s27 + $0x2704] ss:$8 sps:$4 sm:$0xff]  }
 0xa06   : > { %11679 = vmatpush2.bf16.msra.mxu0 %v21361_v62  ;;  %v21424_v62 = vld [vmem:[%s22620_s27 + $0x26e0] ss:$8 sps:$4 sm:$0xff]  }
 0xa07   : > { %11680 = vmatprep.subr.bf16.mxu0 %v21366_v63  ;;  %v21426_v63 = vld [vmem:[%s22620_s27 + $0x26e4] ss:$8 sps:$4 sm:$0xff]  }
 0xa0a   : > { %11681 = vmatpush2.bf16.msra.mxu0 %v21364_v57  ;;  %v21427_v57 = vld [vmem:[%s22620_s27 + $0x27f0] ss:$8 sps:$4 sm:$0xff]  }
 0xa0b   : > { %11682 = vmatprep.subr.bf16.mxu0 %v21369_v12  ;;  %v21429_v12 = vld [vmem:[%s22620_s27 + $0x27f4] ss:$8 sps:$4 sm:$0xff]  }
 0xa0e   : > { %11683 = vmatpush2.bf16.msra.mxu0 %v21367_v41  ;;  %v21430_v41 = vld [vmem:[%s22620_s27 + $0x26d0] ss:$8 sps:$4 sm:$0xff]  }
 0xa0f   : > { %11684 = vmatprep.subr.bf16.mxu0 %v21372_v58  ;;  %v21432_v58 = vld [vmem:[%s22620_s27 + $0x26d4] ss:$8 sps:$4 sm:$0xff]  }
 0xa12   : > { %11685 = vmatpush2.bf16.msra.mxu0 %v21370_v18  ;;  %v21435_v18 = vld [vmem:[%s22620_s27 + $0x27e4] ss:$8 sps:$4 sm:$0xff]  }
 0xa13   : > { %12208 = vmatprep.subr.bf16.mxu0 %v21375_v21  ;;  %v21433_v21 = vld [vmem:[%s22620_s27 + $0x27e0] ss:$8 sps:$4 sm:$0xff]  }
 0xa15   : > { %11687 = vmatmul.mubr.bf16.vlgmr.msra.gmra.mxu0 %v25555_v47  ;;  %v21382_v47 = vld [vmem:[%s22620_s27 + $0x2650] ss:$8 sps:$4 sm:$0xff]  }
 0xa16   : > { %11696 = vmatprep.mubr.bf16.mxu0 %v11488_v55  ;;  %12209 = vmatpush1.bf16.msra.mxu0 %v21373_v3  ;;  %v21393_v55 = vld [vmem:[%s22620_s27 + $0x2754] ss:$8 sps:$4 sm:$0xff]   ;;  %v21438_v3 = vld [vmem:[%s22620_s27 + $0x26c4] ss:$8 sps:$4 sm:$0xff]  }
 0xa17   : > { %12210 = vmatprep.subr.bf16.mxu0 %v21378_v45  ;;  %v21441_v45 = vld [vmem:[%s22620_s27 + $0x27d4] ss:$8 sps:$4 sm:$0xff]  }
 0xa1a   : > { %12211 = vmatpush1.bf16.msra.mxu0 %v21376_v6  ;;  %v21439_v6 = vld [vmem:[%s22620_s27 + $0x27d0] ss:$8 sps:$4 sm:$0xff]  }
 0xa1b   : > { %12212 = vmatprep.subr.bf16.mxu0 %v21384_v27  ;;  %v21442_v27 = vld [vmem:[%s22620_s27 + $0x26b0] ss:$8 sps:$4 sm:$0xff]  }
 0xa1d   : > { %11697 = vmatmul.mubr.bf16.gmra.mxu0 %v11485_v60  ;;  %v21385_v60 = vld [vmem:[%s22620_s27 + $0x2760] ss:$8 sps:$4 sm:$0xff]  }
 0xa1e   : > { %12010 = vmatpush1.bf16.msra.mxu1 %v21385_v60  ;;  %12213 = vmatpush1.bf16.msra.mxu0 %v21382_v47  ;;  %v21450_v60 = vld [vmem:[%s22620_s27 + $0x26a4] ss:$8 sps:$4 sm:$0xff]   ;;  %v21453_v47 = vld [vmem:[%s22620_s27 + $0x27b4] ss:$8 sps:$4 sm:$0xff]  }
 0xa1f   : > { %12011 = vmatprep.subr.bf16.mxu1 %v21393_v55  ;;  %12214 = vmatprep.subr.bf16.mxu0 %v21390_v10  ;;  %v21445_v55 = vld [vmem:[%s22620_s27 + $0x27c0] ss:$8 sps:$4 sm:$0xff]  }
 0xa20   : > { %v21448_v10 = vld [vmem:[%s22620_s27 + $0x26a0] ss:$8 sps:$4 sm:$0xff]  }
 0xa22   : > { %12012 = vmatpush1.bf16.msra.mxu1 %v21391_v30  ;;  %12215 = vmatpush1.bf16.msra.mxu0 %v21388_v56  ;;  %v21456_v30 = vld [vmem:[%s22620_s27 + $0x2694] ss:$8 sps:$4 sm:$0xff]   ;;  %v21459_v56 = vld [vmem:[%s22620_s27 + $0x27a4] ss:$8 sps:$4 sm:$0xff]  }
 0xa23   : > { %12013 = vmatprep.subr.bf16.mxu1 %v21399_v9  ;;  %12216 = vmatprep.subr.bf16.mxu0 %v21396_v48  ;;  %v21451_v9 = vld [vmem:[%s22620_s27 + $0x27b0] ss:$8 sps:$4 sm:$0xff]  }
 0xa26   : > { %12014 = vmatpush1.bf16.msra.mxu1 %v21397_v32  ;;  %12217 = vmatpush1.bf16.msra.mxu0 %v21394_v2  ;;  %v21454_v32 = vld [vmem:[%s22620_s27 + $0x2690] ss:$8 sps:$4 sm:$0xff]  }
 0xa27   : > { %12015 = vmatprep.subr.bf16.mxu1 %v21405_v35  ;;  %12218 = vmatprep.subr.bf16.mxu0 %v21402_v13  ;;  %v21462_v35 = vld [vmem:[%s22620_s27 + $0x2684] ss:$8 sps:$4 sm:$0xff]   ;;  %v21457_v13 = vld [vmem:[%s22620_s27 + $0x27a0] ss:$8 sps:$4 sm:$0xff]  }
 0xa2a   : > { %12016 = vmatpush1.bf16.msra.mxu1 %v21403_v34  ;;  %12219 = vmatpush1.bf16.msra.mxu0 %v21400_v16  ;;  %v21465_v34 = vld [vmem:[%s22620_s27 + $0x2794] ss:$8 sps:$4 sm:$0xff]   ;;  %v21460_v16 = vld [vmem:[%s22620_s27 + $0x2680] ss:$8 sps:$4 sm:$0xff]  }
 0xa2b   : > { %12017 = vmatprep.subr.bf16.mxu1 %v21411_v24  ;;  %12220 = vmatprep.subr.bf16.mxu0 %v21408_v1  ;;  %v21468_v1 = vld [vmem:[%s22620_s27 + $0x2974] ss:$8 sps:$4 sm:$0xff]  }
 0xa2e   : > { %12018 = vmatpush1.bf16.msra.mxu1 %v21409_v11  ;;  %12221 = vmatpush1.bf16.msra.mxu0 %v21406_v46  ;;  %v21463_v46 = vld [vmem:[%s22620_s27 + $0x2790] ss:$8 sps:$4 sm:$0xff]  }
 0xa2f   : > { %12222 = vmatprep.subr.bf16.mxu0 %v21414_v0  ;;  %12019 = vmatprep.subr.bf16.mxu1 %v21417_v54  ;;  %v21471_v0 = vld [vmem:[%s22620_s27 + $0x2784] ss:$8 sps:$4 sm:$0xff]  }
 0xa32   : > { %12223 = vmatpush1.bf16.msra.mxu0 %v21412_v4  ;;  %12020 = vmatpush1.bf16.msra.mxu1 %v21415_v50 }
 0xa33   : > { %12224 = vmatprep.subr.bf16.mxu0 %v21420_v40  ;;  %12021 = vmatprep.subr.bf16.mxu1 %v21423_v25 }
 0xa36   : > { %12225 = vmatpush2.bf16.msra.mxu0 %v21418_v23  ;;  %12022 = vmatpush1.bf16.msra.mxu1 %v21421_v53 }
 0xa37   : > { %12226 = vmatprep.subr.bf16.mxu0 %v21426_v63  ;;  %12023 = vmatprep.subr.bf16.mxu1 %v21429_v12  ;;  %v11713_v63 = vsub.s32 6, %v26534_v59 }
 0xa3a   : > { %12227 = vmatpush2.bf16.msra.mxu0 %v21424_v62  ;;  %12024 = vmatpush2.bf16.msra.mxu1 %v21427_v57 }
 0xa3b   : > { %12228 = vmatprep.subr.bf16.mxu0 %v21432_v58  ;;  %12025 = vmatprep.subr.bf16.mxu1 %v21435_v18 }
 0xa3e   : > { %12229 = vmatpush2.bf16.msra.mxu0 %v21430_v41  ;;  %12026 = vmatpush2.bf16.msra.mxu1 %v21433_v21 }
 0xa3f   : > { %12230 = vmatprep.subr.bf16.mxu0 %v21438_v3  ;;  %12027 = vmatprep.subr.bf16.mxu1 %v21441_v45 }
 0xa42   : > { %12231 = vmatpush2.bf16.msra.mxu0 %v21436_v14  ;;  %12028 = vmatpush2.bf16.msra.mxu1 %v21439_v6 }
 0xa43   : > { %12232 = vmatprep.subr.bf16.mxu0 %v21444_v42  ;;  %12029 = vmatprep.subr.bf16.mxu1 %v21447_v37 }
 0xa46   : > { %12233 = vmatpush2.bf16.msra.mxu0 %v21442_v27  ;;  %12030 = vmatpush2.bf16.msra.mxu1 %v21445_v55 }
 0xa47   : > { %12234 = vmatprep.subr.bf16.mxu0 %v21450_v60  ;;  %12031 = vmatprep.subr.bf16.mxu1 %v21453_v47 }
 0xa48   : > { %v10902_v22 = vpop.f32.mrf.mxu1 }
 0xa4a   : > { %v10904_v28 = vpop.f32.mrf.mxu1  ;;  %12235 = vmatpush2.bf16.msra.mxu0 %v21448_v10  ;;  %12032 = vmatpush2.bf16.msra.mxu1 %v21451_v9 }
 0xa4b   : > { %12236 = vmatprep.subr.bf16.mxu0 %v21456_v30  ;;  %12033 = vmatprep.subr.bf16.mxu1 %v21459_v56 }
 0xa4c   : > { %v10906_v19 = vpop.f32.mrf.mxu1 }
 0xa4e   : > { %v10908_v8 = vpop.f32.mrf.mxu1  ;;  %12237 = vmatpush2.bf16.msra.mxu0 %v21454_v32  ;;  %12034 = vmatpush2.bf16.msra.mxu1 %v21457_v13 }
 0xa4f   : > { %12238 = vmatprep.subr.bf16.mxu0 %v21462_v35  ;;  %12035 = vmatprep.subr.bf16.mxu1 %v21465_v34 }
 0xa50   : > { %v10912_v31 = vpop.f32.mrf.mxu1 }
 0xa52   : > { %v10914_v29 = vpop.f32.mrf.mxu1  ;;  %12239 = vmatpush2.bf16.msra.mxu0 %v21460_v16  ;;  %12036 = vmatpush2.bf16.msra.mxu1 %v21463_v46 }
 0xa53   : > { %12692 = vmatprep.subr.bf16.mxu0 %v21468_v1  ;;  %12037 = vmatprep.subr.bf16.mxu1 %v21471_v0 }
 0xa54   : > { %v10916_v17 = vpop.f32.mrf.mxu1 }
 0xa55   : > { %v10691_v61 = vpop.f32.mrf.mxu0 }
 0xa56   : > { %v25703_v49 = vadd.f32 %v10902_v22, %v10691_v61  ;;  %v10917_v33 = vpop.f32.mrf.mxu1 }
 0xa57   : > { %v10693_v5 = vpop.f32.mrf.mxu0 }
 0xa58   : > { %v25705_v26 = vadd.f32 %v10904_v28, %v10693_v5  ;;  %v21469_v28 = vld [vmem:[%s22620_s27 + $0x2780] ss:$8 sps:$4 sm:$0xff]  }
 0xa59   : > { %v10695_v15 = vpop.f32.mrf.mxu0  ;;  %12038 = vmatpush2.bf16.msra.mxu1 %v21469_v28 }
 0xa5a   : > { %v25707_v7 = vadd.f32 %v10906_v19, %v10695_v15  ;;  %v21477_v19 = vld [vmem:[%s22620_s27 + $0x2874] ss:$8 sps:$4 sm:$0xff]  }
 0xa5b   : > { %v10697_v36 = vpop.f32.mrf.mxu0  ;;  %12448 = vmatprep.subr.bf16.mxu1 %v21477_v19 }
 0xa5c   : > { %v25709_v39 = vadd.f32 %v10908_v8, %v10697_v36 }
 0xa5d   : > { %v10701_v38 = vpop.f32.mrf.mxu0 }
 0xa5e   : > { %v25711_v44 = vadd.f32 %v10912_v31, %v10701_v38 }
 0xa5f   : > { %v10703_v51 = vpop.f32.mrf.mxu0 }
 0xa60   : > { %v25713_v20 = vadd.f32 %v10914_v29, %v10703_v51 }
 0xa61   : > { %v10705_v43 = vpop.f32.mrf.mxu0 }
 0xa63   : > { %v10706_v52 = vpop.f32.mrf.mxu0 }
 0xa88   : > { %v11428_v48 = vpop.f32.mrf.mxu1 }
 0xa8a   : > { %v11430_v2 = vpop.f32.mrf.mxu1 }
 0xa8c   : > { %v11432_v24 = vpop.f32.mrf.mxu1 }
 0xa8e   : > { %v11434_v11 = vpop.f32.mrf.mxu1 }
 0xa90   : > { %v11438_v4 = vpop.f32.mrf.mxu1 }
 0xa92   : > { %v11440_v22 = vpop.f32.mrf.mxu1 }
 0xa94   : > { %v11442_v8 = vpop.f32.mrf.mxu1 }
 0xa95   : > { %v11160_v31 = vpop.f32.mrf.mxu0 }
 0xa96   : > { %v11177_v29 = vadd.f32 %v11160_v31, %v25703_v49  ;;  %v11443_v17 = vpop.f32.mrf.mxu1 }
 0xa97   : > { %v11162_v61 = vpop.f32.mrf.mxu0 }
 0xa98   : > { %v11178_v33 = vadd.f32 %v11162_v61, %v25705_v26  ;;  %v11445_v5 = vadd.f32 %v11428_v48, %v11177_v29 }
 0xa99   : > { %v11164_v15 = vpop.f32.mrf.mxu0 }
 0xa9a   : > { %v11179_v36 = vadd.f32 %v11164_v15, %v25707_v7  ;;  %v11446_v38 = vadd.f32 %v11430_v2, %v11178_v33  ;;  %v22287_v7 = vld [vmem:[%s22731_s24] sm:$0xff] }
 0xa9b   : > { %v11166_v51 = vpop.f32.mrf.mxu0  ;;  %v11714_v57 = vrot.slane %v22287_v7, %v11713_v63 }
 0xa9c   : > { %v11180_v43 = vadd.f32 %v11166_v51, %v25709_v39  ;;  %v11447_v52 = vadd.f32 %v11432_v24, %v11179_v36  ;;  %v22288_v39 = vld [vmem:[%s22731_s24 + $0x8] sm:$0xff] }
 0xa9d   : > { %v11170_v50 = vpop.f32.mrf.mxu0  ;;  %v11718_v58 = vrot.slane %v22288_v39, %v11713_v63  ;;  %v21472_v63 = vld [vmem:[%s22620_s27 + $0x2960] ss:$8 sps:$4 sm:$0xff]  }
 0xa9e   : > { %v11181_v49 = vadd.f32 %v11170_v50, %v25711_v44  ;;  %v11448_v54 = vadd.f32 %v11434_v11, %v11180_v43 }
 0xa9f   : > { %v11172_v23 = vpop.f32.mrf.mxu0 }
 0xaa0   : > { %v11182_v40 = vadd.f32 %v11172_v23, %v25713_v20  ;;  %v11449_v26 = vadd.f32 %v11438_v4, %v11181_v49  ;;  %v21466_v49 = vld [vmem:[%s22620_s27 + $0x2970] ss:$8 sps:$4 sm:$0xff]   ;;  %v21474_v23 = vld [vmem:[%s22620_s27 + $0x2964] ss:$8 sps:$4 sm:$0xff]  }
 0xaa1   : > { %v11174_v53 = vpop.f32.mrf.mxu0 }
 0xaa2   : > { %v11450_v25 = vadd.f32 %v11440_v22, %v11182_v40 }
 0xaa3   : > { %v11175_v62 = vpop.f32.mrf.mxu0 }
 0xad5   : > { %v11688_v12 = vpop.f32.mrf.mxu0 }
 0xad6   : > { %v11705_v41 = vadd.f32 %v11688_v12, %v11445_v5 }
 0xad7   : > { %v11690_v18 = vpop.f32.mrf.mxu0 }
 0xad8   : > { %v11719_v3 = vadd.f32 %v11714_v57, %v11705_v41  ;;  %v11706_v21 = vadd.f32 %v11690_v18, %v11446_v38 }
 0xad9   : > { %v11692_v44 = vpop.f32.mrf.mxu0 }
 0xada   : > { %v11731_v45 = vmin.f32 %v11719_v3, 0.0  ;;  %v11720_v14 = vadd.f32 %v11718_v58, %v11706_v21  ;;  %v11707_v42 = vadd.f32 %v11692_v44, %v11447_v52  ;;  %vm11725_vm7 = vcmp.gt.f32.partialorder %v11719_v3, 0.0  ;;  %v21475_v21 = vld [vmem:[%s22620_s27 + $0x2870] ss:$8 sps:$4 sm:$0xff]  }
 0xadb   : > { %v11694_v20 = vpop.f32.mrf.mxu0 }
 0xadc   : > { %v11737_v6 = vmul.f32 1.442695, %v11731_v45  ;;  %v11732_v37 = vmin.f32 %v11720_v14, 0.0  ;;  %v11721_v27 = vadd.f32 %v11714_v57, %v11707_v42  ;;  %v11708_v60 = vadd.f32 %v11694_v20, %v11448_v54 }
 0xadd   : > { %v11698_v55 = vpop.f32.mrf.mxu0  ;;  %vm11726_vm1 = vcmp.gt.f32.partialorder %v11720_v14, 0.0 }
 0xade   : > { %22265 = vpow2.f32 %v11737_v6  ;;  %v11739_v47 = vmul.f32 1.442695, %v11732_v37  ;;  %v11733_v10 = vmin.f32 %v11721_v27, 0.0  ;;  %v11722_v30 = vadd.f32 %v11718_v58, %v11708_v60  ;;  %v21480_v6 = vld [vmem:[%s22620_s27 + $0x2954] ss:$8 sps:$4 sm:$0xff]  }
 0xadf   : > { %v11709_v9 = vadd.f32 %v11698_v55, %v11449_v26  ;;  %v11700_v56 = vpop.f32.mrf.mxu0  ;;  %vm11727_vm13 = vcmp.gt.f32.partialorder %v11721_v27, 0.0  ;;  %v21483_v37 = vld [vmem:[%s22620_s27 + $0x2864] ss:$8 sps:$4 sm:$0xff]   ;;  %v21478_v60 = vld [vmem:[%s22620_s27 + $0x2950] ss:$8 sps:$4 sm:$0xff]  }
 0xae0   : > { %v11741_v48 = vmul.f32 1.442695, %v11733_v10  ;;  %v11710_v32 = vadd.f32 %v11700_v56, %v11450_v25  ;;  %22267 = vpow2.f32 %v11739_v47  ;;  %v11734_v35 = vmin.f32 %v11722_v30, 0.0  ;;  %v21486_v56 = vld [vmem:[%s22620_s27 + $0x2944] ss:$8 sps:$4 sm:$0xff]  }
 0xae1   : > { %v11723_v2 = vadd.f32 %v11714_v57, %v11709_v9  ;;  %v11702_v13 = vpop.f32.mrf.mxu0  ;;  %vm11728_vm2 = vcmp.gt.f32.partialorder %v11722_v30, 0.0 }
 0xae2   : > { %22269 = vpow2.f32 %v11741_v48  ;;  %v11724_v34 = vadd.f32 %v11718_v58, %v11710_v32  ;;  %v11743_v24 = vmul.f32 1.442695, %v11734_v35  ;;  %v21481_v35 = vld [vmem:[%s22620_s27 + $0x2860] ss:$8 sps:$4 sm:$0xff]  }
 0xae3   : > { %v11735_v16 = vmin.f32 %v11723_v2, 0.0  ;;  %v11703_v1 = vpop.f32.mrf.mxu0  ;;  %vm11729_vm11 = vcmp.gt.f32.partialorder %v11723_v2, 0.0 }
 0xae4   : > { %v11736_v11 = vmin.f32 %v11724_v34, 0.0  ;;  %22271 = vpow2.f32 %v11743_v24  ;;  %vm11730_vm4 = vcmp.gt.f32.partialorder %v11724_v34, 0.0 }
 0xae5   : > { %v11745_v46 = vmul.f32 1.442695, %v11735_v16 }
 0xae6   : > { %v11747_v0 = vmul.f32 1.442695, %v11736_v11 }
 0xae7   : > { %22273 = vpow2.f32 %v11745_v46  ;;  %v21484_v46 = vld [vmem:[%s22620_s27 + $0x2940] ss:$8 sps:$4 sm:$0xff]  }
 0xae8   : > { %22275 = vpow2.f32 %v11747_v0 }
 0xaeb   : > { %v22266_v4 = vpop.eup %22265 }
 0xaec   : > { %v18395_v28 = vadd.f32 -1.0, %v22266_v4 }
 0xaed   : > { %v22268_v22 = vpop.eup %22267 }
 0xaee   : > { %v18396_v31 = vadd.f32 -1.0, %v22268_v22  ;;  %v11755_v17 = vsel %vm11725_vm7, %v11719_v3, %v18395_v28  ;;  %v21492_v22 = vld [vmem:[%s22620_s27 + $0x2934] ss:$8 sps:$4 sm:$0xff]  }
 0xaef   : > { %v22270_v19 = vpop.eup %22269 }
 0xaf0   : > { %v18397_v8 = vadd.f32 -1.0, %v22270_v19  ;;  %v11756_v38 = vsel %vm11726_vm1, %v11720_v14, %v18396_v31 }
 0xaf1   : > { %v22272_v29 = vpop.eup %22271 }
 0xaf2   : > { %v11757_v61 = vsel %vm11727_vm13, %v11721_v27, %v18397_v8  ;;  %v18398_v5 = vadd.f32 -1.0, %v22272_v29  ;;  %v21487_v29 = vld [vmem:[%s22620_s27 + $0x2850] ss:$8 sps:$4 sm:$0xff]  }
 0xaf3   : > { %v25762_v33 = vpack.c.bf16 %v11757_v61, %v11755_v17 }
 0xaf4   : > { %v22274_v15 = vpop.eup %22273  ;;  %v11758_v51 = vsel %vm11728_vm2, %v11722_v30, %v18398_v5 }
 0xaf5   : > { %v22276_v36 = vpop.eup %22275  ;;  %v25765_v43 = vshll.u32 %v25762_v33, 16  ;;  %v25767_v52 = vpack.c.bf16 %v11758_v51, %v11756_v38  ;;  %v18399_v54 = vadd.f32 -1.0, %v22274_v15  ;;  %v25772_v40 = vshrl.u32 %v25762_v33, 16  ;;  %v21495_v15 = vld [vmem:[%s22620_s27 + $0x2844] ss:$8 sps:$4 sm:$0xff]  }
 0xaf6   : > { %v18400_v50 = vadd.f32 -1.0, %v22276_v36 }
 0xaf7   : > { %12240 = vmatprep.mubr.bf16.mxu0 %v25767_v52  ;;  %v25776_v53 = vshrl.u32 %v25767_v52, 16  ;;  %v25779_v25 = vshll.u32 %v25767_v52, 16  ;;  %v11836_v62 = vrot.slane %v25765_v43, 1  ;;  %v11759_v41 = vsel %vm11729_vm11, %v11723_v2, %v18399_v54 }
 0xaf8   : > { %v11760_v26 = vsel %vm11730_vm4, %v11724_v34, %v18400_v50  ;;  %12241 = vmatmul.mubr.bf16.vlgmr.msra.gmra.mxu0 %v25762_v33  ;;  %v13008_v58 = vrot.slane %v25772_v40, 2  ;;  %v13009_v18 = vrot.slane %v25765_v43, 3  ;;  %v12285_v20 = vrot.slane %v25767_v52, 1  ;;  %v21489_v34 = vld [vmem:[%s22620_s27 + $0x2854] ss:$8 sps:$4 sm:$0xff]  }
 0xaf9   : > { %12693 = vmatpush1.bf16.msra.mxu0 %v21466_v49  ;;  %v11843_v7 = vrot.slane %v25779_v25, 1  ;;  %v12527_v57 = vrot.slane %v25776_v53, 1  ;;  %v12528_v12 = vrot.slane %v25779_v25, 2  ;;  %v25787_v39 = vpack.c.bf16 %v11760_v26, %v11760_v26  ;;  %v21490_v49 = vld [vmem:[%s22620_s27 + $0x2930] ss:$8 sps:$4 sm:$0xff]  }
 0xafa   : > { %12694 = vmatprep.subr.bf16.mxu0 %v21474_v23  ;;  %v13495_v45 = vrot.slane %v25776_v53, 3  ;;  %v13496_v14 = vrot.slane %v25779_v25, 4  ;;  %v11837_v42 = vor.u32 %v11836_v62, %v25772_v40  ;;  %v25799_v27 = vor.u32 %v13009_v18, %v13008_v58  ;;  %v21493_v58 = vld [vmem:[%s22620_s27 + $0x2840] ss:$8 sps:$4 sm:$0xff]  }
 0xafb   : > { %v11844_v3 = vor.u32 %v11843_v7, %v25776_v53  ;;  %v12529_v44 = vor.u32 %v12528_v12, %v12527_v57  ;;  %v13492_v47 = vrot.slane %v25772_v40, 3  ;;  %v13493_v10 = vrot.slane %v25765_v43, 4 }
 0xafc   : > { %v25802_v55 = vor.u32 %v13496_v14, %v13495_v45  ;;  %v13994_v30 = vrot.slane %v25776_v53, 4  ;;  %v25807_v9 = vpack.c.bf16 %v11759_v41, %v11759_v41  ;;  %v13995_v48 = vrot.slane %v25779_v25, 5 }
 0xafd   : > { %12695 = vmatpush1.bf16.msra.mxu0 %v21472_v63  ;;  %12039 = vmatprep.mubr.bf16.mxu1 %v11844_v3  ;;  %v25812_v32 = vshrl.u32 %v25787_v39, 16  ;;  %v25815_v2 = vor.u32 %v13493_v10, %v13492_v47  ;;  %v25818_v13 = vshll.u32 %v25787_v39, 16  ;;  %v13741_v1 = vrot.slane %v25767_v52, 4  ;;  %v21498_v63 = vld [vmem:[%s22620_s27 + $0x2924] ss:$8 sps:$4 sm:$0xff]  }
 0xafe   : > { %12724 = vmatprep.mubr.bf16.mxu0 %v12529_v44  ;;  %12040 = vmatmul.mubr.bf16.vlgmr.msra.gmra.mxu1 %v11837_v42  ;;  %v13996_v24 = vor.u32 %v13995_v48, %v13994_v30  ;;  %v13742_v11 = vrot.slane %v25787_v39, 4  ;;  %v13982_v4 = vrot.slane %v25772_v40, 4  ;;  %v13983_v19 = vrot.slane %v25765_v43, 5  ;;  %v21501_v44 = vld [vmem:[%s22620_s27 + $0x2834] ss:$8 sps:$4 sm:$0xff]  }
 0xaff   : > { %12449 = vmatpush1.bf16.msra.mxu1 %v21475_v21  ;;  %12480 = vmatprep.mubr.bf16.mxu1 %v12285_v20  ;;  %v14000_v16 = vrot.slane %v25812_v32, 4  ;;  %v14003_v0 = vrot.slane %v25818_v13, 5  ;;  %v25833_v8 = vshrl.u32 %v25807_v9, 16  ;;  %v25836_v31 = vshll.u32 %v25807_v9, 16 }
 0xb00   : > { %12696 = vmatprep.subr.bf16.mxu0 %v21480_v6  ;;  %12450 = vmatprep.subr.bf16.mxu1 %v21483_v37  ;;  %v25829_v28 = vsel %vm3023_vm5, %v13741_v1, %v13742_v11  ;;  %v14495_v61 = vrot.slane %v25776_v53, 5  ;;  %v14496_v5 = vrot.slane %v25779_v25, 6  ;;  %v13984_v36 = vor.u32 %v13983_v19, %v13982_v4  ;;  %v21496_v6 = vld [vmem:[%s22620_s27 + $0x2920] ss:$8 sps:$4 sm:$0xff]   ;;  %v21504_v37 = vld [vmem:[%s22620_s27 + $0x2914] ss:$8 sps:$4 sm:$0xff]  }
 0xb01   : > { %12697 = vmatpush1.bf16.msra.mxu0 %v21478_v60  ;;  %v14004_v17 = vor.u32 %v14003_v0, %v14000_v16  ;;  %v13988_v38 = vrot.slane %v25833_v8, 4  ;;  %v13991_v51 = vrot.slane %v25836_v31, 5  ;;  %v14498_v50 = vrot.slane %v25812_v32, 5 }
 0xb02   : > { %12698 = vmatprep.subr.bf16.mxu0 %v21486_v56  ;;  %v14497_v23 = vor.u32 %v14496_v5, %v14495_v61  ;;  %v14499_v26 = vrot.slane %v25818_v13, 6  ;;  %v13738_v62 = vrot.slane %v25762_v33, 4  ;;  %v13739_v57 = vrot.slane %v25807_v9, 4 }
 0xb03   : > { %12451 = vmatpush1.bf16.msra.mxu1 %v21481_v35  ;;  %v25847_v54 = vsel %vm3312_vm6, %v13996_v24, %v14004_v17  ;;  %v13992_v7 = vor.u32 %v13991_v51, %v13988_v38  ;;  %v14247_v12 = vrot.slane %v25767_v52, 5  ;;  %v14248_v41 = vrot.slane %v25787_v39, 5 }
 0xb04   : > { %12452 = vmatprep.subr.bf16.mxu1 %v21489_v34  ;;  %v14500_v18 = vor.u32 %v14499_v26, %v14498_v50  ;;  %v14488_v3 = vrot.slane %v25772_v40, 5  ;;  %v14489_v21 = vrot.slane %v25765_v43, 6  ;;  %v25863_v14 = vsel %vm3023_vm5, %v13738_v62, %v13739_v57  ;;  %v21499_v34 = vld [vmem:[%s22620_s27 + $0x2830] ss:$8 sps:$4 sm:$0xff]  }
 0xb05   : > { %12699 = vmatpush1.bf16.msra.mxu0 %v21484_v46  ;;  %v25860_v45 = vsel %vm3312_vm6, %v13984_v36, %v13992_v7  ;;  %v25866_v42 = vsel %vm3617_vm9, %v14247_v12, %v14248_v41  ;;  %v14491_v20 = vrot.slane %v25833_v8, 5  ;;  %v14492_v10 = vrot.slane %v25836_v31, 6  ;;  %v21507_v46 = vld [vmem:[%s22620_s27 + $0x2824] ss:$8 sps:$4 sm:$0xff]  }
 0xb06   : > { %12700 = vmatprep.subr.bf16.mxu0 %v21492_v22  ;;  %v25872_v60 = vsel %vm3906_vm8, %v14497_v23, %v14500_v18  ;;  %v14490_v47 = vor.u32 %v14489_v21, %v14488_v3  ;;  %v14992_v30 = vrot.slane %v25776_v53, 6  ;;  %vm14984_vm5 = vsmask.f32 1280  ;;  %v21510_v36 = vld [vmem:[%s22620_s27 + $0x2904] ss:$8 sps:$4 sm:$0xff]  }
 0xb07   : > { %12453 = vmatpush1.bf16.msra.mxu1 %v21487_v29  ;;  %v14993_v56 = vrot.slane %v25779_v25, 7  ;;  %v14995_v48 = vrot.slane %v25812_v32, 6  ;;  %v14996_v35 = vrot.slane %v25818_v13, 7  ;;  %v14493_v24 = vor.u32 %v14492_v10, %v14491_v20  ;;  %v21502_v29 = vld [vmem:[%s22620_s27 + $0x2910] ss:$8 sps:$4 sm:$0xff]  }
 0xb08   : > { %12454 = vmatprep.subr.bf16.mxu1 %v21495_v15  ;;  %v14244_v16 = vrot.slane %v25762_v33, 5  ;;  %v14245_v1 = vrot.slane %v25807_v9, 5  ;;  %v14743_v11 = vrot.slane %v25767_v52, 6  ;;  %v14744_v22 = vrot.slane %v25787_v39, 6  ;;  %v21516_v21 = vld [vmem:[%s22620_s27 + $0x29f4] ss:$8 sps:$4 sm:$0xff]  }
 0xb09   : > { %12701 = vmatpush1.bf16.msra.mxu0 %v21490_v49  ;;  %v14994_v0 = vor.u32 %v14993_v56, %v14992_v30  ;;  %v14997_v4 = vor.u32 %v14996_v35, %v14995_v48  ;;  %v14985_v19 = vrot.slane %v25772_v40, 6  ;;  %v25888_v17 = vsel %vm3906_vm8, %v14490_v47, %v14493_v24  ;;  %v21505_v49 = vld [vmem:[%s22620_s27 + $0x2820] ss:$8 sps:$4 sm:$0xff]   ;;  %v21519_v30 = vld [vmem:[%s22620_s27 + $0x2804] ss:$8 sps:$4 sm:$0xff]  }
 0xb0a   : > { %12702 = vmatprep.subr.bf16.mxu0 %v21498_v63  ;;  %v25891_v61 = vsel %vm3617_vm9, %v14244_v16, %v14245_v1  ;;  %v14986_v5 = vrot.slane %v25765_v43, 7  ;;  %v14988_v15 = vrot.slane %v25833_v8, 6  ;;  %v25900_v51 = vsel %vm4211_vm10, %v14743_v11, %v14744_v22  ;;  %v21513_v63 = vld [vmem:[%s22620_s27 + $0x2814] ss:$8 sps:$4 sm:$0xff]   ;;  %v21514_v56 = vld [vmem:[%s22620_s27 + $0x29f0] ss:$8 sps:$4 sm:$0xff]  }
 0xb0b   : > { %12455 = vmatpush1.bf16.msra.mxu1 %v21493_v58  ;;  %v25897_v38 = vsel %vm14984_vm5, %v14994_v0, %v14997_v4  ;;  %v14989_v50 = vrot.slane %v25836_v31, 7  ;;  %v15488_v26 = vrot.slane %v25812_v32, 7  ;;  %v14740_v62 = vrot.slane %v25762_v33, 6  ;;  %v21508_v58 = vld [vmem:[%s22620_s27 + $0x2900] ss:$8 sps:$4 sm:$0xff]  }
 0xb0c   : > { %12456 = vmatprep.subr.bf16.mxu1 %v21501_v44  ;;  %v14987_v23 = vor.u32 %v14986_v5, %v14985_v19  ;;  %vm15237_vm6 = vcmask 1040384   ;;  %v14741_v57 = vrot.slane %v25807_v9, 6  ;;  %v15241_v12 = vrot.slane %v25767_v52, 7  ;;  %v21520_v24 = vld [vmem:[%s22620_s27 + $0x29e0] ss:$8 sps:$4 sm:$0xff]  }
 0xb0d   : > { %12703 = vmatpush1.bf16.msra.mxu0 %v21496_v6  ;;  %v14990_v7 = vor.u32 %v14989_v50, %v14988_v15  ;;  %v15242_v41 = vrot.slane %v25787_v39, 7  ;;  %vm15482_vm8 = vsmask.f32 256  ;;  %v15487_v18 = vrot.slane %v25776_v53, 7  ;;  %v21528_v16 = vld [vmem:[%s22620_s27 + $0x29d4] ss:$8 sps:$4 sm:$0xff]  }
 0xb0e   : > { %12704 = vmatprep.subr.bf16.mxu0 %v21504_v37  ;;  %v15489_v32 = vor.u32 %v15488_v26, %v25818_v13  ;;  %v15484_v3 = vrot.slane %v25833_v8, 7  ;;  %v25919_v20 = vsel %vm4211_vm10, %v14740_v62, %v14741_v57  ;;  %v15483_v6 = vrot.slane %v25772_v40, 7  ;;  %v21511_v13 = vld [vmem:[%s22620_s27 + $0x2810] ss:$8 sps:$4 sm:$0xff]   ;;  %v21531_v11 = vld [vmem:[%s22620_s27 + $0x28e4] ss:$8 sps:$4 sm:$0xff]  }
 0xb0f   : > { %12457 = vmatpush1.bf16.msra.mxu1 %v21499_v34  ;;  %v25916_v44 = vsel %vm14984_vm5, %v14987_v23, %v14990_v7  ;;  %v25922_v39 = vsel %vm15237_vm6, %v15241_v12, %v15242_v41  ;;  %v15238_v47 = vrot.slane %v25762_v33, 7  ;;  %v15239_v10 = vrot.slane %v25807_v9, 7  ;;  %v21517_v34 = vld [vmem:[%s22620_s27 + $0x2800] ss:$8 sps:$4 sm:$0xff]   ;;  %v21525_v9 = vld [vmem:[%s22620_s27 + $0x28f4] ss:$8 sps:$4 sm:$0xff]  }
 0xb10   : > { %12458 = vmatprep.subr.bf16.mxu1 %v21507_v46  ;;  %v25927_v8 = vsel %vm15482_vm8, %v15487_v18, %v15489_v32  ;;  %v15485_v37 = vor.u32 %v15484_v3, %v25836_v31  ;;  %v21522_v31 = vld [vmem:[%s22620_s27 + $0x29e4] ss:$8 sps:$4 sm:$0xff]   ;;  %v21523_v1 = vld [vmem:[%s22620_s27 + $0x28f0] ss:$8 sps:$4 sm:$0xff]   ;;  %v21529_v4 = vld [vmem:[%s22620_s27 + $0x28e0] ss:$8 sps:$4 sm:$0xff]  }
 0xb11   : > { %12705 = vmatpush1.bf16.msra.mxu0 %v21502_v29  ;;  %v25938_v35 = vsel %vm15237_vm6, %v15238_v47, %v15239_v10  ;;  %v21526_v46 = vld [vmem:[%s22620_s27 + $0x29d0] ss:$8 sps:$4 sm:$0xff]   ;;  %v21534_v0 = vld [vmem:[%s22620_s27 + $0x29c4] ss:$8 sps:$4 sm:$0xff]   ;;  %v21537_v22 = vld [vmem:[%s22620_s27 + $0x28d4] ss:$8 sps:$4 sm:$0xff]  }
 0xb12   : > { %12706 = vmatprep.subr.bf16.mxu0 %v21510_v36  ;;  %v25935_v48 = vsel %vm15482_vm8, %v15483_v6, %v15485_v37  ;;  %v21532_v19 = vld [vmem:[%s22620_s27 + $0x29c0] ss:$8 sps:$4 sm:$0xff]   ;;  %v21540_v29 = vld [vmem:[%s22620_s27 + $0x29b4] ss:$8 sps:$4 sm:$0xff]   ;;  %v21535_v5 = vld [vmem:[%s22620_s27 + $0x28d0] ss:$8 sps:$4 sm:$0xff]  }
 0xb13   : > { %12459 = vmatpush1.bf16.msra.mxu1 %v21505_v49  ;;  %v21543_v15 = vld [vmem:[%s22620_s27 + $0x28c4] ss:$8 sps:$4 sm:$0xff]   ;;  %v21538_v36 = vld [vmem:[%s22620_s27 + $0x29b0] ss:$8 sps:$4 sm:$0xff]   ;;  %v21541_v49 = vld [vmem:[%s22620_s27 + $0x28c0] ss:$8 sps:$4 sm:$0xff]  }
 0xb14   : > { %12460 = vmatprep.subr.bf16.mxu1 %v21513_v63  ;;  %v21546_v50 = vld [vmem:[%s22620_s27 + $0x29a4] ss:$8 sps:$4 sm:$0xff]   ;;  %v21549_v23 = vld [vmem:[%s22620_s27 + $0x28b4] ss:$8 sps:$4 sm:$0xff]   ;;  %v21544_v26 = vld [vmem:[%s22620_s27 + $0x29a0] ss:$8 sps:$4 sm:$0xff]  }
 0xb15   : > { %12707 = vmatpush1.bf16.msra.mxu0 %v21508_v58  ;;  %v21552_v62 = vld [vmem:[%s22620_s27 + $0x2994] ss:$8 sps:$4 sm:$0xff]   ;;  %v21547_v63 = vld [vmem:[%s22620_s27 + $0x28b0] ss:$8 sps:$4 sm:$0xff]   ;;  %v21555_v7 = vld [vmem:[%s22620_s27 + $0x28a4] ss:$8 sps:$4 sm:$0xff]  }
 0xb16   : > { %12708 = vmatprep.subr.bf16.mxu0 %v21516_v21  ;;  %v21550_v57 = vld [vmem:[%s22620_s27 + $0x2990] ss:$8 sps:$4 sm:$0xff]   ;;  %v21558_v12 = vld [vmem:[%s22620_s27 + $0x2984] ss:$8 sps:$4 sm:$0xff]   ;;  %v21553_v41 = vld [vmem:[%s22620_s27 + $0x28a0] ss:$8 sps:$4 sm:$0xff]  }
 0xb17   : > { %12461 = vmatpush1.bf16.msra.mxu1 %v21511_v13  ;;  %v21561_v58 = vld [vmem:[%s22620_s27 + $0x2894] ss:$8 sps:$4 sm:$0xff]   ;;  %v21556_v18 = vld [vmem:[%s22620_s27 + $0x2980] ss:$8 sps:$4 sm:$0xff]   ;;  %v12524_v32 = vrot.slane %v25772_v40, 1  ;;  %v12525_v3 = vrot.slane %v25765_v43, 2 }
 0xb18   : > { %12462 = vmatprep.subr.bf16.mxu1 %v21519_v30  ;;  %v21564_v21 = vld [vmem:[%s22620_s27 + $0x2b74] ss:$8 sps:$4 sm:$0xff]   ;;  %v21559_v6 = vld [vmem:[%s22620_s27 + $0x2890] ss:$8 sps:$4 sm:$0xff]   ;;  %v13011_v13 = vrot.slane %v25776_v53, 2  ;;  %v13012_v37 = vrot.slane %v25779_v25, 3 }
 0xb19   : > { %12709 = vmatpush2.bf16.msra.mxu0 %v21514_v56  ;;  %v21567_v47 = vld [vmem:[%s22620_s27 + $0x2884] ss:$8 sps:$4 sm:$0xff]   ;;  %v21562_v10 = vld [vmem:[%s22620_s27 + $0x2b70] ss:$8 sps:$4 sm:$0xff]   ;;  %v12526_v30 = vor.u32 %v12525_v3, %v12524_v32  ;;  %v21565_v56 = vld [vmem:[%s22620_s27 + $0x2880] ss:$8 sps:$4 sm:$0xff]  }
 0xb1a   : > { %12710 = vmatprep.subr.bf16.mxu0 %v21522_v31  ;;  %v21570_v40 = vld [vmem:[%s22620_s27 + $0x2b64] ss:$8 sps:$4 sm:$0xff]   ;;  %v13013_v43 = vor.u32 %v13012_v37, %v13011_v13  ;;  %v21573_v53 = vld [vmem:[%s22620_s27 + $0x2a74] ss:$8 sps:$4 sm:$0xff]   ;;  %v21568_v25 = vld [vmem:[%s22620_s27 + $0x2b60] ss:$8 sps:$4 sm:$0xff]  }
 0xb1b   : > { %12463 = vmatpush1.bf16.msra.mxu1 %v21517_v34  ;;  %v21576_v31 = vld [vmem:[%s22620_s27 + $0x2b54] ss:$8 sps:$4 sm:$0xff]   ;;  %v21571_v34 = vld [vmem:[%s22620_s27 + $0x2a70] ss:$8 sps:$4 sm:$0xff]   ;;  %v21615_v32 = vld [vmem:[%s22620_s27 + $0x2a04] ss:$8 sps:$4 sm:$0xff]  }
 0xb1c   : > { %12464 = vmatprep.subr.bf16.mxu1 %v21525_v9  ;;  %v12284_v9 = vrot.slane %v25762_v33, 1  ;;  %v21610_v3 = vld [vmem:[%s22620_s27 + $0x2bf0] ss:$8 sps:$4 sm:$0xff]   ;;  %v21621_v13 = vld [vmem:[%s22620_s27 + $0x2af4] ss:$8 sps:$4 sm:$0xff]  }
 0xb1d   : > { %12711 = vmatpush2.bf16.msra.mxu0 %v21520_v24  ;;  %v21579_v24 = vld [vmem:[%s22620_s27 + $0x2a64] ss:$8 sps:$4 sm:$0xff]   ;;  %v21616_v37 = vld [vmem:[%s22620_s27 + $0x2be0] ss:$8 sps:$4 sm:$0xff]  }
 0xb1e   : > { %12712 = vmatprep.subr.bf16.mxu0 %v21528_v16  ;;  %v12769_v16 = vrot.slane %v25767_v52, 2 }
 0xb1f   : > { %12465 = vmatpush2.bf16.msra.mxu1 %v21523_v1  ;;  %v21574_v1 = vld [vmem:[%s22620_s27 + $0x2b50] ss:$8 sps:$4 sm:$0xff]  }
 0xb20   : > { %12466 = vmatprep.subr.bf16.mxu1 %v21531_v11  ;;  %v21582_v11 = vld [vmem:[%s22620_s27 + $0x2b44] ss:$8 sps:$4 sm:$0xff]  }
 0xb21   : > { %12713 = vmatpush2.bf16.msra.mxu0 %v21526_v46  ;;  %v21577_v46 = vld [vmem:[%s22620_s27 + $0x2a60] ss:$8 sps:$4 sm:$0xff]  }
 0xb22   : > { %12714 = vmatprep.subr.bf16.mxu0 %v21534_v0  ;;  %v21585_v0 = vld [vmem:[%s22620_s27 + $0x2a54] ss:$8 sps:$4 sm:$0xff]  }
 0xb23   : > { %12467 = vmatpush2.bf16.msra.mxu1 %v21529_v4  ;;  %v21580_v4 = vld [vmem:[%s22620_s27 + $0x2b40] ss:$8 sps:$4 sm:$0xff]  }
 0xb24   : > { %12468 = vmatprep.subr.bf16.mxu1 %v21537_v22  ;;  %v21588_v22 = vld [vmem:[%s22620_s27 + $0x2b34] ss:$8 sps:$4 sm:$0xff]  }
 0xb25   : > { %12715 = vmatpush2.bf16.msra.mxu0 %v21532_v19  ;;  %v21583_v19 = vld [vmem:[%s22620_s27 + $0x2a50] ss:$8 sps:$4 sm:$0xff]  }
 0xb26   : > { %12716 = vmatprep.subr.bf16.mxu0 %v21540_v29  ;;  %v21591_v29 = vld [vmem:[%s22620_s27 + $0x2a44] ss:$8 sps:$4 sm:$0xff]  }
 0xb27   : > { %12469 = vmatpush2.bf16.msra.mxu1 %v21535_v5  ;;  %v21586_v5 = vld [vmem:[%s22620_s27 + $0x2b30] ss:$8 sps:$4 sm:$0xff]  }
 0xb28   : > { %12470 = vmatprep.subr.bf16.mxu1 %v21543_v15  ;;  %v21594_v15 = vld [vmem:[%s22620_s27 + $0x2b24] ss:$8 sps:$4 sm:$0xff]  }
 0xb29   : > { %12717 = vmatpush2.bf16.msra.mxu0 %v21538_v36  ;;  %v21589_v36 = vld [vmem:[%s22620_s27 + $0x2a40] ss:$8 sps:$4 sm:$0xff]  }
 0xb2a   : > { %12718 = vmatprep.subr.bf16.mxu0 %v21546_v50  ;;  %v21597_v50 = vld [vmem:[%s22620_s27 + $0x2a34] ss:$8 sps:$4 sm:$0xff]  }
 0xb2b   : > { %12471 = vmatpush2.bf16.msra.mxu1 %v21541_v49  ;;  %v21592_v49 = vld [vmem:[%s22620_s27 + $0x2b20] ss:$8 sps:$4 sm:$0xff]  }
 0xb2c   : > { %12472 = vmatprep.subr.bf16.mxu1 %v21549_v23  ;;  %v21600_v23 = vld [vmem:[%s22620_s27 + $0x2b14] ss:$8 sps:$4 sm:$0xff]  }
 0xb2d   : > { %12719 = vmatpush2.bf16.msra.mxu0 %v21544_v26  ;;  %v21595_v26 = vld [vmem:[%s22620_s27 + $0x2a30] ss:$8 sps:$4 sm:$0xff]  }
 0xb2e   : > { %12720 = vmatprep.subr.bf16.mxu0 %v21552_v62  ;;  %v21603_v62 = vld [vmem:[%s22620_s27 + $0x2a24] ss:$8 sps:$4 sm:$0xff]  }
 0xb2f   : > { %12473 = vmatpush2.bf16.msra.mxu1 %v21547_v63  ;;  %v21598_v63 = vld [vmem:[%s22620_s27 + $0x2b10] ss:$8 sps:$4 sm:$0xff]  }
 0xb30   : > { %12474 = vmatprep.subr.bf16.mxu1 %v21555_v7  ;;  %v21606_v7 = vld [vmem:[%s22620_s27 + $0x2b04] ss:$8 sps:$4 sm:$0xff]  }
 0xb31   : > { %12721 = vmatpush2.bf16.msra.mxu0 %v21550_v57  ;;  %v21601_v57 = vld [vmem:[%s22620_s27 + $0x2a20] ss:$8 sps:$4 sm:$0xff]  }
 0xb32   : > { %12722 = vmatprep.subr.bf16.mxu0 %v21558_v12  ;;  %v21609_v12 = vld [vmem:[%s22620_s27 + $0x2a14] ss:$8 sps:$4 sm:$0xff]  }
 0xb33   : > { %12475 = vmatpush2.bf16.msra.mxu1 %v21553_v41  ;;  %v21604_v41 = vld [vmem:[%s22620_s27 + $0x2b00] ss:$8 sps:$4 sm:$0xff]  }
 0xb34   : > { %12476 = vmatprep.subr.bf16.mxu1 %v21561_v58  ;;  %v21612_v58 = vld [vmem:[%s22620_s27 + $0x2bf4] ss:$8 sps:$4 sm:$0xff]  }
 0xb35   : > { %12723 = vmatpush2.bf16.msra.mxu0 %v21556_v18  ;;  %v21607_v18 = vld [vmem:[%s22620_s27 + $0x2a10] ss:$8 sps:$4 sm:$0xff]  }
 0xb36   : > { %13176 = vmatprep.subr.bf16.mxu0 %v21564_v21  ;;  %v21618_v21 = vld [vmem:[%s22620_s27 + $0x2be4] ss:$8 sps:$4 sm:$0xff]  }
 0xb37   : > { %12477 = vmatpush2.bf16.msra.mxu1 %v21559_v6  ;;  %v21613_v6 = vld [vmem:[%s22620_s27 + $0x2a00] ss:$8 sps:$4 sm:$0xff]  }
 0xb38   : > { %12725 = vmatmul.mubr.bf16.vlgmr.msra.gmra.mxu0 %v12526_v30  ;;  %12478 = vmatprep.subr.bf16.mxu1 %v21567_v47  ;;  %v21624_v47 = vld [vmem:[%s22620_s27 + $0x2bd4] ss:$8 sps:$4 sm:$0xff]   ;;  %v21627_v30 = vld [vmem:[%s22620_s27 + $0x2ae4] ss:$8 sps:$4 sm:$0xff]  }
 0xb39   : > { %13177 = vmatpush1.bf16.msra.mxu0 %v21562_v10  ;;  %13208 = vmatprep.mubr.bf16.mxu0 %v13013_v43  ;;  %v21619_v10 = vld [vmem:[%s22620_s27 + $0x2af0] ss:$8 sps:$4 sm:$0xff]   ;;  %v21630_v43 = vld [vmem:[%s22620_s27 + $0x2bc4] ss:$8 sps:$4 sm:$0xff]  }
 0xb3a   : > { %13178 = vmatprep.subr.bf16.mxu0 %v21570_v40  ;;  %v21622_v40 = vld [vmem:[%s22620_s27 + $0x2bd0] ss:$8 sps:$4 sm:$0xff]  }
 0xb3b   : > { %12479 = vmatpush2.bf16.msra.mxu1 %v21565_v56  ;;  %v21625_v56 = vld [vmem:[%s22620_s27 + $0x2ae0] ss:$8 sps:$4 sm:$0xff]  }
 0xb3c   : > { %12932 = vmatprep.subr.bf16.mxu1 %v21573_v53  ;;  %v21633_v53 = vld [vmem:[%s22620_s27 + $0x2ad4] ss:$8 sps:$4 sm:$0xff]  }
 0xb3d   : > { %13179 = vmatpush1.bf16.msra.mxu0 %v21568_v25  ;;  %v21628_v25 = vld [vmem:[%s22620_s27 + $0x2bc0] ss:$8 sps:$4 sm:$0xff]  }
 0xb3e   : > { %12481 = vmatmul.mubr.bf16.vlgmr.msra.gmra.mxu1 %v12284_v9  ;;  %13180 = vmatprep.subr.bf16.mxu0 %v21576_v31  ;;  %v21636_v31 = vld [vmem:[%s22620_s27 + $0x2bb4] ss:$8 sps:$4 sm:$0xff]   ;;  %v21639_v9 = vld [vmem:[%s22620_s27 + $0x2ac4] ss:$8 sps:$4 sm:$0xff]  }
 0xb3f   : > { %12933 = vmatpush1.bf16.msra.mxu1 %v21571_v34  ;;  %12964 = vmatprep.mubr.bf16.mxu1 %v12769_v16  ;;  %v21631_v34 = vld [vmem:[%s22620_s27 + $0x2ad0] ss:$8 sps:$4 sm:$0xff]   ;;  %v21642_v16 = vld [vmem:[%s22620_s27 + $0x2ba4] ss:$8 sps:$4 sm:$0xff]  }
 0xb40   : > { %12934 = vmatprep.subr.bf16.mxu1 %v21579_v24  ;;  %v21634_v24 = vld [vmem:[%s22620_s27 + $0x2bb0] ss:$8 sps:$4 sm:$0xff]  }
 0xb41   : > { %13181 = vmatpush1.bf16.msra.mxu0 %v21574_v1  ;;  %v21637_v1 = vld [vmem:[%s22620_s27 + $0x2ac0] ss:$8 sps:$4 sm:$0xff]  }
 0xb42   : > { %13182 = vmatprep.subr.bf16.mxu0 %v21582_v11  ;;  %v21645_v11 = vld [vmem:[%s22620_s27 + $0x2ab4] ss:$8 sps:$4 sm:$0xff]  }
 0xb43   : > { %12935 = vmatpush1.bf16.msra.mxu1 %v21577_v46  ;;  %v21640_v46 = vld [vmem:[%s22620_s27 + $0x2ba0] ss:$8 sps:$4 sm:$0xff]  }
 0xb44   : > { %12936 = vmatprep.subr.bf16.mxu1 %v21585_v0  ;;  %v21648_v0 = vld [vmem:[%s22620_s27 + $0x2b94] ss:$8 sps:$4 sm:$0xff]  }
 0xb45   : > { %13183 = vmatpush1.bf16.msra.mxu0 %v21580_v4  ;;  %v21643_v4 = vld [vmem:[%s22620_s27 + $0x2ab0] ss:$8 sps:$4 sm:$0xff]  }
 0xb46   : > { %13184 = vmatprep.subr.bf16.mxu0 %v21588_v22  ;;  %v21651_v22 = vld [vmem:[%s22620_s27 + $0x2aa4] ss:$8 sps:$4 sm:$0xff]  }
 0xb47   : > { %12937 = vmatpush1.bf16.msra.mxu1 %v21583_v19  ;;  %v21646_v19 = vld [vmem:[%s22620_s27 + $0x2b90] ss:$8 sps:$4 sm:$0xff]  }
 0xb48   : > { %12938 = vmatprep.subr.bf16.mxu1 %v21591_v29  ;;  %v21654_v29 = vld [vmem:[%s22620_s27 + $0x2b84] ss:$8 sps:$4 sm:$0xff]  }
 0xb49   : > { %13185 = vmatpush1.bf16.msra.mxu0 %v21586_v5  ;;  %v21649_v5 = vld [vmem:[%s22620_s27 + $0x2aa0] ss:$8 sps:$4 sm:$0xff]  }
 0xb4a   : > { %13186 = vmatprep.subr.bf16.mxu0 %v21594_v15  ;;  %v21657_v15 = vld [vmem:[%s22620_s27 + $0x2a94] ss:$8 sps:$4 sm:$0xff]  }
 0xb4b   : > { %12939 = vmatpush1.bf16.msra.mxu1 %v21589_v36  ;;  %v21652_v36 = vld [vmem:[%s22620_s27 + $0x2b80] ss:$8 sps:$4 sm:$0xff]  }
 0xb4c   : > { %12940 = vmatprep.subr.bf16.mxu1 %v21597_v50  ;;  %v21660_v50 = vld [vmem:[%s22620_s27 + $0x2d74] ss:$8 sps:$4 sm:$0xff]  }
 0xb4d   : > { %13187 = vmatpush1.bf16.msra.mxu0 %v21592_v49  ;;  %v21655_v49 = vld [vmem:[%s22620_s27 + $0x2a90] ss:$8 sps:$4 sm:$0xff]  }
 0xb4e   : > { %13188 = vmatprep.subr.bf16.mxu0 %v21600_v23  ;;  %v21663_v23 = vld [vmem:[%s22620_s27 + $0x2a84] ss:$8 sps:$4 sm:$0xff]  }
 0xb4f   : > { %12941 = vmatpush1.bf16.msra.mxu1 %v21595_v26  ;;  %v21658_v26 = vld [vmem:[%s22620_s27 + $0x2d70] ss:$8 sps:$4 sm:$0xff]  }
 0xb50   : > { %12942 = vmatprep.subr.bf16.mxu1 %v21603_v62  ;;  %v21666_v62 = vld [vmem:[%s22620_s27 + $0x2d64] ss:$8 sps:$4 sm:$0xff]  }
 0xb51   : > { %13189 = vmatpush1.bf16.msra.mxu0 %v21598_v63  ;;  %v21661_v63 = vld [vmem:[%s22620_s27 + $0x2a80] ss:$8 sps:$4 sm:$0xff]  }
 0xb52   : > { %13190 = vmatprep.subr.bf16.mxu0 %v21606_v7  ;;  %v21669_v7 = vld [vmem:[%s22620_s27 + $0x2c74] ss:$8 sps:$4 sm:$0xff]  }
 0xb53   : > { %12943 = vmatpush1.bf16.msra.mxu1 %v21601_v57  ;;  %v21664_v57 = vld [vmem:[%s22620_s27 + $0x2d60] ss:$8 sps:$4 sm:$0xff]  }
 0xb54   : > { %12944 = vmatprep.subr.bf16.mxu1 %v21609_v12  ;;  %v21672_v12 = vld [vmem:[%s22620_s27 + $0x2d54] ss:$8 sps:$4 sm:$0xff]  }
 0xb55   : > { %13191 = vmatpush1.bf16.msra.mxu0 %v21604_v41  ;;  %v21667_v41 = vld [vmem:[%s22620_s27 + $0x2c70] ss:$8 sps:$4 sm:$0xff]  }
 0xb56   : > { %13192 = vmatprep.subr.bf16.mxu0 %v21612_v58  ;;  %v12768_v58 = vrot.slane %v25762_v33, 2 }
 0xb57   : > { %12945 = vmatpush1.bf16.msra.mxu1 %v21607_v18  ;;  %v21675_v18 = vld [vmem:[%s22620_s27 + $0x2c64] ss:$8 sps:$4 sm:$0xff]  }
 0xb58   : > { %12946 = vmatprep.subr.bf16.mxu1 %v21615_v32  ;;  %v21670_v32 = vld [vmem:[%s22620_s27 + $0x2d50] ss:$8 sps:$4 sm:$0xff]  }
 0xb59   : > { %13193 = vmatpush2.bf16.msra.mxu0 %v21610_v3  ;;  %v21673_v3 = vld [vmem:[%s22620_s27 + $0x2c60] ss:$8 sps:$4 sm:$0xff]  }
 0xb5a   : > { %13194 = vmatprep.subr.bf16.mxu0 %v21618_v21  ;;  %v21681_v21 = vld [vmem:[%s22620_s27 + $0x2c54] ss:$8 sps:$4 sm:$0xff]  }
 0xb5b   : > { %12947 = vmatpush1.bf16.msra.mxu1 %v21613_v6  ;;  %v21676_v6 = vld [vmem:[%s22620_s27 + $0x2d40] ss:$8 sps:$4 sm:$0xff]  }
 0xb5c   : > { %12948 = vmatprep.subr.bf16.mxu1 %v21621_v13  ;;  %v21684_v13 = vld [vmem:[%s22620_s27 + $0x2d34] ss:$8 sps:$4 sm:$0xff]  }
 0xb5d   : > { %13195 = vmatpush2.bf16.msra.mxu0 %v21616_v37  ;;  %v21687_v37 = vld [vmem:[%s22620_s27 + $0x2c44] ss:$8 sps:$4 sm:$0xff]  }
 0xb5e   : > { %13196 = vmatprep.subr.bf16.mxu0 %v21624_v47  ;;  %v21682_v47 = vld [vmem:[%s22620_s27 + $0x2d30] ss:$8 sps:$4 sm:$0xff]  }
 0xb5f   : > { %12949 = vmatpush2.bf16.msra.mxu1 %v21619_v10  ;;  %v21690_v10 = vld [vmem:[%s22620_s27 + $0x2d24] ss:$8 sps:$4 sm:$0xff]  }
 0xb60   : > { %12950 = vmatprep.subr.bf16.mxu1 %v21627_v30  ;;  %v21685_v30 = vld [vmem:[%s22620_s27 + $0x2c40] ss:$8 sps:$4 sm:$0xff]  }
 0xb61   : > { %13197 = vmatpush2.bf16.msra.mxu0 %v21622_v40  ;;  %v21693_v40 = vld [vmem:[%s22620_s27 + $0x2c34] ss:$8 sps:$4 sm:$0xff]  }
 0xb62   : > { %13198 = vmatprep.subr.bf16.mxu0 %v21630_v43  ;;  %v21688_v43 = vld [vmem:[%s22620_s27 + $0x2d20] ss:$8 sps:$4 sm:$0xff]  }
 0xb63   : > { %12951 = vmatpush2.bf16.msra.mxu1 %v21625_v56  ;;  %v21696_v56 = vld [vmem:[%s22620_s27 + $0x2d14] ss:$8 sps:$4 sm:$0xff]  }
 0xb64   : > { %12952 = vmatprep.subr.bf16.mxu1 %v21633_v53  ;;  %v21691_v53 = vld [vmem:[%s22620_s27 + $0x2c30] ss:$8 sps:$4 sm:$0xff]  }
 0xb65   : > { %13199 = vmatpush2.bf16.msra.mxu0 %v21628_v25  ;;  %v21699_v25 = vld [vmem:[%s22620_s27 + $0x2c24] ss:$8 sps:$4 sm:$0xff]  }
 0xb66   : > { %13200 = vmatprep.subr.bf16.mxu0 %v21636_v31  ;;  %v21694_v31 = vld [vmem:[%s22620_s27 + $0x2d10] ss:$8 sps:$4 sm:$0xff]  }
 0xb67   : > { %12953 = vmatpush2.bf16.msra.mxu1 %v21631_v34  ;;  %v21702_v34 = vld [vmem:[%s22620_s27 + $0x2d04] ss:$8 sps:$4 sm:$0xff]  }
 0xb68   : > { %12954 = vmatprep.subr.bf16.mxu1 %v21639_v9  ;;  %v21697_v9 = vld [vmem:[%s22620_s27 + $0x2c20] ss:$8 sps:$4 sm:$0xff]  }
 0xb69   : > { %13201 = vmatpush2.bf16.msra.mxu0 %v21634_v24  ;;  %v21705_v24 = vld [vmem:[%s22620_s27 + $0x2c14] ss:$8 sps:$4 sm:$0xff]  }
 0xb6a   : > { %13202 = vmatprep.subr.bf16.mxu0 %v21642_v16  ;;  %v21700_v16 = vld [vmem:[%s22620_s27 + $0x2d00] ss:$8 sps:$4 sm:$0xff]  }
 0xb6b   : > { %12955 = vmatpush2.bf16.msra.mxu1 %v21637_v1  ;;  %v21708_v1 = vld [vmem:[%s22620_s27 + $0x2df4] ss:$8 sps:$4 sm:$0xff]  }
 0xb6c   : > { %12956 = vmatprep.subr.bf16.mxu1 %v21645_v11  ;;  %v21703_v11 = vld [vmem:[%s22620_s27 + $0x2c10] ss:$8 sps:$4 sm:$0xff]  }
 0xb6d   : > { %13203 = vmatpush2.bf16.msra.mxu0 %v21640_v46  ;;  %v21711_v46 = vld [vmem:[%s22620_s27 + $0x2c04] ss:$8 sps:$4 sm:$0xff]  }
 0xb6e   : > { %13204 = vmatprep.subr.bf16.mxu0 %v21648_v0  ;;  %v21706_v0 = vld [vmem:[%s22620_s27 + $0x2df0] ss:$8 sps:$4 sm:$0xff]  }
 0xb6f   : > { %12957 = vmatpush2.bf16.msra.mxu1 %v21643_v4  ;;  %v21714_v4 = vld [vmem:[%s22620_s27 + $0x2de4] ss:$8 sps:$4 sm:$0xff]  }
 0xb70   : > { %12958 = vmatprep.subr.bf16.mxu1 %v21651_v22  ;;  %v21709_v22 = vld [vmem:[%s22620_s27 + $0x2c00] ss:$8 sps:$4 sm:$0xff]  }
 0xb71   : > { %13205 = vmatpush2.bf16.msra.mxu0 %v21646_v19  ;;  %v21717_v19 = vld [vmem:[%s22620_s27 + $0x2cf4] ss:$8 sps:$4 sm:$0xff]  }
 0xb72   : > { %13206 = vmatprep.subr.bf16.mxu0 %v21654_v29  ;;  %v21712_v29 = vld [vmem:[%s22620_s27 + $0x2de0] ss:$8 sps:$4 sm:$0xff]  }
 0xb73   : > { %12959 = vmatpush2.bf16.msra.mxu1 %v21649_v5  ;;  %v21720_v5 = vld [vmem:[%s22620_s27 + $0x2dd4] ss:$8 sps:$4 sm:$0xff]  }
 0xb74   : > { %12960 = vmatprep.subr.bf16.mxu1 %v21657_v15  ;;  %v21715_v15 = vld [vmem:[%s22620_s27 + $0x2cf0] ss:$8 sps:$4 sm:$0xff]  }
 0xb75   : > { %13207 = vmatpush2.bf16.msra.mxu0 %v21652_v36  ;;  %v21723_v36 = vld [vmem:[%s22620_s27 + $0x2ce4] ss:$8 sps:$4 sm:$0xff]  }
 0xb76   : > { %13660 = vmatprep.subr.bf16.mxu0 %v21660_v50  ;;  %v21718_v50 = vld [vmem:[%s22620_s27 + $0x2dd0] ss:$8 sps:$4 sm:$0xff]  }
 0xb77   : > { %12961 = vmatpush2.bf16.msra.mxu1 %v21655_v49  ;;  %v21726_v49 = vld [vmem:[%s22620_s27 + $0x2dc4] ss:$8 sps:$4 sm:$0xff]  }
 0xb78   : > { %13209 = vmatmul.mubr.bf16.vlgmr.msra.gmra.mxu0 %v25799_v27  ;;  %12962 = vmatprep.subr.bf16.mxu1 %v21663_v23  ;;  %v13253_v27 = vrot.slane %v25767_v52, 3  ;;  %v21679_v52 = vld [vmem:[%s22620_s27 + $0x2c50] ss:$8 sps:$4 sm:$0xff]   ;;  %v21721_v23 = vld [vmem:[%s22620_s27 + $0x2ce0] ss:$8 sps:$4 sm:$0xff]  }
 0xb79   : > { %13661 = vmatpush1.bf16.msra.mxu0 %v21658_v26  ;;  %13692 = vmatprep.mubr.bf16.mxu0 %v25802_v55  ;;  %v21678_v55 = vld [vmem:[%s22620_s27 + $0x2d44] ss:$8 sps:$4 sm:$0xff]   ;;  %v21729_v26 = vld [vmem:[%s22620_s27 + $0x2cd4] ss:$8 sps:$4 sm:$0xff]  }
 0xb7a   : > { %13662 = vmatprep.subr.bf16.mxu0 %v21666_v62  ;;  %v21724_v62 = vld [vmem:[%s22620_s27 + $0x2dc0] ss:$8 sps:$4 sm:$0xff]  }
 0xb7b   : > { %12963 = vmatpush2.bf16.msra.mxu1 %v21661_v63  ;;  %v21732_v63 = vld [vmem:[%s22620_s27 + $0x2db4] ss:$8 sps:$4 sm:$0xff]  }
 0xb7c   : > { %13416 = vmatprep.subr.bf16.mxu1 %v21669_v7  ;;  %v21727_v7 = vld [vmem:[%s22620_s27 + $0x2cd0] ss:$8 sps:$4 sm:$0xff]  }
 0xb7d   : > { %13663 = vmatpush1.bf16.msra.mxu0 %v21664_v57  ;;  %v21735_v57 = vld [vmem:[%s22620_s27 + $0x2cc4] ss:$8 sps:$4 sm:$0xff]  }
 0xb7e   : > { %12965 = vmatmul.mubr.bf16.vlgmr.msra.gmra.mxu1 %v12768_v58  ;;  %13664 = vmatprep.subr.bf16.mxu0 %v21672_v12  ;;  %v21730_v12 = vld [vmem:[%s22620_s27 + $0x2db0] ss:$8 sps:$4 sm:$0xff]   ;;  %v21733_v58 = vld [vmem:[%s22620_s27 + $0x2cc0] ss:$8 sps:$4 sm:$0xff]  }
 0xb7f   : > { %13417 = vmatpush1.bf16.msra.mxu1 %v21667_v41  ;;  %13448 = vmatprep.mubr.bf16.mxu1 %v13253_v27  ;;  %v21738_v41 = vld [vmem:[%s22620_s27 + $0x2da4] ss:$8 sps:$4 sm:$0xff]   ;;  %v21736_v27 = vld [vmem:[%s22620_s27 + $0x2da0] ss:$8 sps:$4 sm:$0xff]  }
 0xb80   : > { %13418 = vmatprep.subr.bf16.mxu1 %v21675_v18  ;;  %v21741_v18 = vld [vmem:[%s22620_s27 + $0x2cb4] ss:$8 sps:$4 sm:$0xff]  }
 0xb81   : > { %13665 = vmatpush1.bf16.msra.mxu0 %v21670_v32  ;;  %v21744_v32 = vld [vmem:[%s22620_s27 + $0x2d94] ss:$8 sps:$4 sm:$0xff]  }
 0xb82   : > { %13666 = vmatprep.subr.bf16.mxu0 %v21678_v55  ;;  %v21739_v55 = vld [vmem:[%s22620_s27 + $0x2cb0] ss:$8 sps:$4 sm:$0xff]  }
 0xb83   : > { %13419 = vmatpush1.bf16.msra.mxu1 %v21673_v3  ;;  %v21747_v3 = vld [vmem:[%s22620_s27 + $0x2ca4] ss:$8 sps:$4 sm:$0xff]  }
 0xb84   : > { %13420 = vmatprep.subr.bf16.mxu1 %v21681_v21  ;;  %v21742_v21 = vld [vmem:[%s22620_s27 + $0x2d90] ss:$8 sps:$4 sm:$0xff]  }
 0xb85   : > { %13667 = vmatpush1.bf16.msra.mxu0 %v21676_v6  ;;  %v21750_v6 = vld [vmem:[%s22620_s27 + $0x2d84] ss:$8 sps:$4 sm:$0xff]  }
 0xb86   : > { %13668 = vmatprep.subr.bf16.mxu0 %v21684_v13  ;;  %v21745_v13 = vld [vmem:[%s22620_s27 + $0x2ca0] ss:$8 sps:$4 sm:$0xff]  }
 0xb87   : > { %13421 = vmatpush1.bf16.msra.mxu1 %v21679_v52  ;;  %v21753_v52 = vld [vmem:[%s22620_s27 + $0x2c94] ss:$8 sps:$4 sm:$0xff]  }
 0xb88   : > { %13422 = vmatprep.subr.bf16.mxu1 %v21687_v37  ;;  %v21748_v37 = vld [vmem:[%s22620_s27 + $0x2d80] ss:$8 sps:$4 sm:$0xff]  }
 0xb89   : > { %13669 = vmatpush1.bf16.msra.mxu0 %v21682_v47  ;;  %v21756_v47 = vld [vmem:[%s22620_s27 + $0x2f74] ss:$8 sps:$4 sm:$0xff]  }
 0xb8a   : > { %13670 = vmatprep.subr.bf16.mxu0 %v21690_v10  ;;  %v21751_v10 = vld [vmem:[%s22620_s27 + $0x2c90] ss:$8 sps:$4 sm:$0xff]  }
 0xb8b   : > { %13423 = vmatpush1.bf16.msra.mxu1 %v21685_v30  ;;  %v21759_v30 = vld [vmem:[%s22620_s27 + $0x2c84] ss:$8 sps:$4 sm:$0xff]  }
 0xb8c   : > { %13424 = vmatprep.subr.bf16.mxu1 %v21693_v40  ;;  %v21754_v40 = vld [vmem:[%s22620_s27 + $0x2f70] ss:$8 sps:$4 sm:$0xff]  }
 0xb8d   : > { %13671 = vmatpush1.bf16.msra.mxu0 %v21688_v43  ;;  %v21762_v43 = vld [vmem:[%s22620_s27 + $0x2f64] ss:$8 sps:$4 sm:$0xff]  }
 0xb8e   : > { %13672 = vmatprep.subr.bf16.mxu0 %v21696_v56  ;;  %v21757_v56 = vld [vmem:[%s22620_s27 + $0x2c80] ss:$8 sps:$4 sm:$0xff]  }
 0xb8f   : > { %13425 = vmatpush1.bf16.msra.mxu1 %v21691_v53 }
 0xb90   : > { %13426 = vmatprep.subr.bf16.mxu1 %v21699_v25  ;;  %v21765_v25 = vld [vmem:[%s22620_s27 + $0x2e74] ss:$8 sps:$4 sm:$0xff]  }
 0xb91   : > { %13673 = vmatpush1.bf16.msra.mxu0 %v21694_v31  ;;  %v21760_v31 = vld [vmem:[%s22620_s27 + $0x2f60] ss:$8 sps:$4 sm:$0xff]  }
 0xb92   : > { %13674 = vmatprep.subr.bf16.mxu0 %v21702_v34 }
 0xb93   : > { %13427 = vmatpush1.bf16.msra.mxu1 %v21697_v9  ;;  %v21768_v9 = vld [vmem:[%s22620_s27 + $0x2f54] ss:$8 sps:$4 sm:$0xff]  }
 0xb94   : > { %13428 = vmatprep.subr.bf16.mxu1 %v21705_v24  ;;  %v21763_v24 = vld [vmem:[%s22620_s27 + $0x2e70] ss:$8 sps:$4 sm:$0xff]  }
 0xb95   : > { %13675 = vmatpush1.bf16.msra.mxu0 %v21700_v16 }
 0xb96   : > { %13676 = vmatprep.subr.bf16.mxu0 %v21708_v1  ;;  %v13252_v1 = vrot.slane %v25762_v33, 3  ;;  %v21769_v33 = vld [vmem:[%s22620_s27 + $0x2e60] ss:$8 sps:$4 sm:$0xff]  }
 0xb97   : > { %13429 = vmatpush1.bf16.msra.mxu1 %v21703_v11  ;;  %v21766_v11 = vld [vmem:[%s22620_s27 + $0x2f50] ss:$8 sps:$4 sm:$0xff]  }
 0xb98   : > { %13430 = vmatprep.subr.bf16.mxu1 %v21711_v46 }
 0xb99   : > { %13677 = vmatpush2.bf16.msra.mxu0 %v21706_v0  ;;  %v21774_v0 = vld [vmem:[%s22620_s27 + $0x2f44] ss:$8 sps:$4 sm:$0xff]  }
 0xb9a   : > { %13678 = vmatprep.subr.bf16.mxu0 %v21714_v4 }
 0xb9b   : > { %13431 = vmatpush1.bf16.msra.mxu1 %v21709_v22 }
 0xb9c   : > { %13432 = vmatprep.subr.bf16.mxu1 %v21717_v19  ;;  %v21777_v19 = vld [vmem:[%s22620_s27 + $0x2e54] ss:$8 sps:$4 sm:$0xff]  }
 0xb9d   : > { %13679 = vmatpush2.bf16.msra.mxu0 %v21712_v29 }
 0xb9e   : > { %13680 = vmatprep.subr.bf16.mxu0 %v21720_v5  ;;  %v21772_v5 = vld [vmem:[%s22620_s27 + $0x2f40] ss:$8 sps:$4 sm:$0xff]  }
 0xb9f   : > { %13433 = vmatpush2.bf16.msra.mxu1 %v21715_v15 }
 0xba0   : > { %13434 = vmatprep.subr.bf16.mxu1 %v21723_v36  ;;  %v21780_v36 = vld [vmem:[%s22620_s27 + $0x2f34] ss:$8 sps:$4 sm:$0xff]  }
 0xba1   : > { %13681 = vmatpush2.bf16.msra.mxu0 %v21718_v50  ;;  %v21775_v50 = vld [vmem:[%s22620_s27 + $0x2e50] ss:$8 sps:$4 sm:$0xff]  }
 0xba2   : > { %13682 = vmatprep.subr.bf16.mxu0 %v21726_v49  ;;  %v21783_v49 = vld [vmem:[%s22620_s27 + $0x2e44] ss:$8 sps:$4 sm:$0xff]  }
 0xba3   : > { %13435 = vmatpush2.bf16.msra.mxu1 %v21721_v23  ;;  %v21778_v23 = vld [vmem:[%s22620_s27 + $0x2f30] ss:$8 sps:$4 sm:$0xff]  }
 0xba4   : > { %13436 = vmatprep.subr.bf16.mxu1 %v21729_v26  ;;  %v21786_v26 = vld [vmem:[%s22620_s27 + $0x2f24] ss:$8 sps:$4 sm:$0xff]  }
 0xba5   : > { %13683 = vmatpush2.bf16.msra.mxu0 %v21724_v62  ;;  %v21781_v62 = vld [vmem:[%s22620_s27 + $0x2e40] ss:$8 sps:$4 sm:$0xff]  }
 0xba6   : > { %13684 = vmatprep.subr.bf16.mxu0 %v21732_v63  ;;  %v21789_v63 = vld [vmem:[%s22620_s27 + $0x2e34] ss:$8 sps:$4 sm:$0xff]  }
 0xba7   : > { %13437 = vmatpush2.bf16.msra.mxu1 %v21727_v7  ;;  %v21784_v7 = vld [vmem:[%s22620_s27 + $0x2f20] ss:$8 sps:$4 sm:$0xff]  }
 0xba8   : > { %13438 = vmatprep.subr.bf16.mxu1 %v21735_v57  ;;  %v21792_v57 = vld [vmem:[%s22620_s27 + $0x2f14] ss:$8 sps:$4 sm:$0xff]  }
 0xba9   : > { %13685 = vmatpush2.bf16.msra.mxu0 %v21730_v12  ;;  %v21787_v12 = vld [vmem:[%s22620_s27 + $0x2e30] ss:$8 sps:$4 sm:$0xff]  }
 0xbaa   : > { %13686 = vmatprep.subr.bf16.mxu0 %v21738_v41  ;;  %v21795_v41 = vld [vmem:[%s22620_s27 + $0x2e24] ss:$8 sps:$4 sm:$0xff]  }
 0xbab   : > { %13439 = vmatpush2.bf16.msra.mxu1 %v21733_v58  ;;  %v21790_v58 = vld [vmem:[%s22620_s27 + $0x2f10] ss:$8 sps:$4 sm:$0xff]  }
 0xbac   : > { %13440 = vmatprep.subr.bf16.mxu1 %v21741_v18  ;;  %v21798_v18 = vld [vmem:[%s22620_s27 + $0x2f04] ss:$8 sps:$4 sm:$0xff]  }
 0xbad   : > { %13687 = vmatpush2.bf16.msra.mxu0 %v21736_v27  ;;  %v21793_v27 = vld [vmem:[%s22620_s27 + $0x2e20] ss:$8 sps:$4 sm:$0xff]  }
 0xbae   : > { %13688 = vmatprep.subr.bf16.mxu0 %v21744_v32  ;;  %v21801_v32 = vld [vmem:[%s22620_s27 + $0x2e14] ss:$8 sps:$4 sm:$0xff]  }
 0xbaf   : > { %13441 = vmatpush2.bf16.msra.mxu1 %v21739_v55  ;;  %v21796_v55 = vld [vmem:[%s22620_s27 + $0x2f00] ss:$8 sps:$4 sm:$0xff]  }
 0xbb0   : > { %13442 = vmatprep.subr.bf16.mxu1 %v21747_v3  ;;  %v21804_v3 = vld [vmem:[%s22620_s27 + $0x2ff4] ss:$8 sps:$4 sm:$0xff]  }
 0xbb1   : > { %13689 = vmatpush2.bf16.msra.mxu0 %v21742_v21  ;;  %v21799_v21 = vld [vmem:[%s22620_s27 + $0x2e10] ss:$8 sps:$4 sm:$0xff]  }
 0xbb2   : > { %13690 = vmatprep.subr.bf16.mxu0 %v21750_v6  ;;  %v21807_v6 = vld [vmem:[%s22620_s27 + $0x2e04] ss:$8 sps:$4 sm:$0xff]  }
 0xbb3   : > { %13443 = vmatpush2.bf16.msra.mxu1 %v21745_v13  ;;  %v21802_v13 = vld [vmem:[%s22620_s27 + $0x2ff0] ss:$8 sps:$4 sm:$0xff]  }
 0xbb4   : > { %13444 = vmatprep.subr.bf16.mxu1 %v21753_v52  ;;  %v21810_v52 = vld [vmem:[%s22620_s27 + $0x2fe4] ss:$8 sps:$4 sm:$0xff]  }
 0xbb5   : > { %13691 = vmatpush2.bf16.msra.mxu0 %v21748_v37  ;;  %v21805_v37 = vld [vmem:[%s22620_s27 + $0x2e00] ss:$8 sps:$4 sm:$0xff]  }
 0xbb6   : > { %14168 = vmatprep.subr.bf16.mxu0 %v21756_v47  ;;  %v21813_v47 = vld [vmem:[%s22620_s27 + $0x2ef4] ss:$8 sps:$4 sm:$0xff]  }
 0xbb7   : > { %13445 = vmatpush2.bf16.msra.mxu1 %v21751_v10  ;;  %v21808_v10 = vld [vmem:[%s22620_s27 + $0x2fe0] ss:$8 sps:$4 sm:$0xff]  }
 0xbb8   : > { %13693 = vmatmul.mubr.bf16.vlgmr.msra.gmra.mxu0 %v25815_v2  ;;  %v12242_v53 = vpop.f32.mrf.mxu0  ;;  %13446 = vmatprep.subr.bf16.mxu1 %v21759_v30  ;;  %v21771_v2 = vld [vmem:[%s22620_s27 + $0x2e64] ss:$8 sps:$4 sm:$0xff]   ;;  %v21816_v30 = vld [vmem:[%s22620_s27 + $0x2fd4] ss:$8 sps:$4 sm:$0xff]  }
 0xbb9   : > { %14169 = vmatpush1.bf16.msra.mxu0 %v21754_v40  ;;  %14200 = vmatprep.mubr.bf16.mxu0 %v25847_v54  ;;  %v21811_v40 = vld [vmem:[%s22620_s27 + $0x2ef0] ss:$8 sps:$4 sm:$0xff]  }
 0xbba   : > { %v12244_v34 = vpop.f32.mrf.mxu0  ;;  %14170 = vmatprep.subr.bf16.mxu0 %v21762_v43  ;;  %v21819_v43 = vld [vmem:[%s22620_s27 + $0x2ee4] ss:$8 sps:$4 sm:$0xff]  }
 0xbbb   : > { %13447 = vmatpush2.bf16.msra.mxu1 %v21757_v56  ;;  %v21814_v56 = vld [vmem:[%s22620_s27 + $0x2fd0] ss:$8 sps:$4 sm:$0xff]  }
 0xbbc   : > { %v12246_v16 = vpop.f32.mrf.mxu0  ;;  %13906 = vmatprep.subr.bf16.mxu1 %v21765_v25  ;;  %v21817_v25 = vld [vmem:[%s22620_s27 + $0x2ee0] ss:$8 sps:$4 sm:$0xff]  }
 0xbbd   : > { %14171 = vmatpush1.bf16.msra.mxu0 %v21760_v31  ;;  %v21825_v31 = vld [vmem:[%s22620_s27 + $0x2ed4] ss:$8 sps:$4 sm:$0xff]   ;;  %v21831_v16 = vld [vmem:[%s22620_s27 + $0x2ec4] ss:$8 sps:$4 sm:$0xff]  }
 0xbbe   : > { %13449 = vmatmul.mubr.bf16.vlgmr.msra.gmra.mxu1 %v13252_v1  ;;  %v12041_v46 = vpop.f32.mrf.mxu1  ;;  %v12247_v54 = vpop.f32.mrf.mxu0  ;;  %14172 = vmatprep.subr.bf16.mxu0 %v21768_v9  ;;  %v21828_v9 = vld [vmem:[%s22620_s27 + $0x2fb4] ss:$8 sps:$4 sm:$0xff]   ;;  %v21826_v1 = vld [vmem:[%s22620_s27 + $0x2fb0] ss:$8 sps:$4 sm:$0xff]  }
 0xbbf   : > { %v26122_v4 = vadd.f32 %v12242_v53, %v12041_v46  ;;  %13907 = vmatpush1.bf16.msra.mxu1 %v21763_v24  ;;  %13938 = vmatprep.mubr.bf16.mxu1 %v25829_v28  ;;  %v21822_v53 = vld [vmem:[%s22620_s27 + $0x2fc4] ss:$8 sps:$4 sm:$0xff]   ;;  %v21823_v24 = vld [vmem:[%s22620_s27 + $0x2ed0] ss:$8 sps:$4 sm:$0xff]   ;;  %v21837_v46 = vld [vmem:[%s22620_s27 + $0x2eb4] ss:$8 sps:$4 sm:$0xff]  }
 0xbc0   : > { %v12043_v22 = vpop.f32.mrf.mxu1  ;;  %13908 = vmatprep.subr.bf16.mxu1 %v21771_v2  ;;  %v21834_v2 = vld [vmem:[%s22620_s27 + $0x2fa4] ss:$8 sps:$4 sm:$0xff]   ;;  %v21832_v54 = vld [vmem:[%s22620_s27 + $0x2fa0] ss:$8 sps:$4 sm:$0xff]  }
 0xbc1   : > { %v26127_v29 = vadd.f32 %v12244_v34, %v12043_v22  ;;  %14173 = vmatpush1.bf16.msra.mxu0 %v21766_v11  ;;  %v21820_v34 = vld [vmem:[%s22620_s27 + $0x2fc0] ss:$8 sps:$4 sm:$0xff]   ;;  %v21843_v22 = vld [vmem:[%s22620_s27 + $0x2ea4] ss:$8 sps:$4 sm:$0xff]  }
 0xbc2   : > { %v12045_v15 = vpop.f32.mrf.mxu1  ;;  %14174 = vmatprep.subr.bf16.mxu0 %v21774_v0  ;;  %v21829_v11 = vld [vmem:[%s22620_s27 + $0x2ec0] ss:$8 sps:$4 sm:$0xff]   ;;  %v21840_v0 = vld [vmem:[%s22620_s27 + $0x2f94] ss:$8 sps:$4 sm:$0xff]  }
 0xbc3   : > { %13909 = vmatpush1.bf16.msra.mxu1 %v21769_v33  ;;  %v21835_v33 = vld [vmem:[%s22620_s27 + $0x2eb0] ss:$8 sps:$4 sm:$0xff]   ;;  %v21841_v15 = vld [vmem:[%s22620_s27 + $0x2ea0] ss:$8 sps:$4 sm:$0xff]  }
 0xbc4   : > { %v12046_v28 = vpop.f32.mrf.mxu1  ;;  %13910 = vmatprep.subr.bf16.mxu1 %v21777_v19  ;;  %v21838_v19 = vld [vmem:[%s22620_s27 + $0x2f90] ss:$8 sps:$4 sm:$0xff]  }
 0xbc5   : > { %14175 = vmatpush1.bf16.msra.mxu0 %v21772_v5  ;;  %v21846_v5 = vld [vmem:[%s22620_s27 + $0x2f84] ss:$8 sps:$4 sm:$0xff]   ;;  %v21852_v28 = vld [vmem:[%s22620_s27 + $0x3174] ss:$8 sps:$4 sm:$0xff]  }
 0xbc6   : > { %14176 = vmatprep.subr.bf16.mxu0 %v21780_v36  ;;  %v21849_v36 = vld [vmem:[%s22620_s27 + $0x2e94] ss:$8 sps:$4 sm:$0xff]  }
 0xbc7   : > { %13911 = vmatpush1.bf16.msra.mxu1 %v21775_v50  ;;  %v21844_v50 = vld [vmem:[%s22620_s27 + $0x2f80] ss:$8 sps:$4 sm:$0xff]  }
 0xbc8   : > { %13912 = vmatprep.subr.bf16.mxu1 %v21783_v49  ;;  %v21847_v49 = vld [vmem:[%s22620_s27 + $0x2e90] ss:$8 sps:$4 sm:$0xff]  }
 0xbc9   : > { %14177 = vmatpush1.bf16.msra.mxu0 %v21778_v23  ;;  %v21855_v23 = vld [vmem:[%s22620_s27 + $0x2e84] ss:$8 sps:$4 sm:$0xff]  }
 0xbca   : > { %14178 = vmatprep.subr.bf16.mxu0 %v21786_v26  ;;  %v21850_v26 = vld [vmem:[%s22620_s27 + $0x3170] ss:$8 sps:$4 sm:$0xff]  }
 0xbcb   : > { %13913 = vmatpush1.bf16.msra.mxu1 %v21781_v62  ;;  %v21858_v62 = vld [vmem:[%s22620_s27 + $0x3164] ss:$8 sps:$4 sm:$0xff]  }
 0xbcc   : > { %13914 = vmatprep.subr.bf16.mxu1 %v21789_v63  ;;  %v21853_v63 = vld [vmem:[%s22620_s27 + $0x2e80] ss:$8 sps:$4 sm:$0xff]  }
 0xbcd   : > { %14179 = vmatpush1.bf16.msra.mxu0 %v21784_v7 }
 0xbce   : > { %14180 = vmatprep.subr.bf16.mxu0 %v21792_v57  ;;  %v21861_v57 = vld [vmem:[%s22620_s27 + $0x3074] ss:$8 sps:$4 sm:$0xff]  }
 0xbcf   : > { %13915 = vmatpush1.bf16.msra.mxu1 %v21787_v12  ;;  %v21856_v12 = vld [vmem:[%s22620_s27 + $0x3160] ss:$8 sps:$4 sm:$0xff]  }
 0xbd0   : > { %13916 = vmatprep.subr.bf16.mxu1 %v21795_v41 }
 0xbd1   : > { %14181 = vmatpush1.bf16.msra.mxu0 %v21790_v58  ;;  %v21864_v58 = vld [vmem:[%s22620_s27 + $0x3154] ss:$8 sps:$4 sm:$0xff]  }
 0xbd2   : > { %14182 = vmatprep.subr.bf16.mxu0 %v21798_v18  ;;  %v21859_v18 = vld [vmem:[%s22620_s27 + $0x3070] ss:$8 sps:$4 sm:$0xff]  }
 0xbd3   : > { %13917 = vmatpush1.bf16.msra.mxu1 %v21793_v27 }
 0xbd4   : > { %13918 = vmatprep.subr.bf16.mxu1 %v21801_v32  ;;  %v21867_v32 = vld [vmem:[%s22620_s27 + $0x3064] ss:$8 sps:$4 sm:$0xff]  }
 0xbd5   : > { %14183 = vmatpush1.bf16.msra.mxu0 %v21796_v55 }
 0xbd6   : > { %14184 = vmatprep.subr.bf16.mxu0 %v21804_v3 }
 0xbd7   : > { %13919 = vmatpush1.bf16.msra.mxu1 %v21799_v21 }
 0xbd8   : > { %13920 = vmatprep.subr.bf16.mxu1 %v21807_v6  ;;  %v21865_v6 = vld [vmem:[%s22620_s27 + $0x3060] ss:$8 sps:$4 sm:$0xff]  }
 0xbd9   : > { %14185 = vmatpush2.bf16.msra.mxu0 %v21802_v13 }
 0xbda   : > { %14186 = vmatprep.subr.bf16.mxu0 %v21810_v52  ;;  %v21873_v52 = vld [vmem:[%s22620_s27 + $0x3054] ss:$8 sps:$4 sm:$0xff]  }
 0xbdb   : > { %13921 = vmatpush1.bf16.msra.mxu1 %v21805_v37 }
 0xbdc   : > { %13922 = vmatprep.subr.bf16.mxu1 %v21813_v47 }
 0xbdd   : > { %14187 = vmatpush2.bf16.msra.mxu0 %v21808_v10 }
 0xbde   : > { %14188 = vmatprep.subr.bf16.mxu0 %v21816_v30 }
 0xbdf   : > { %13923 = vmatpush2.bf16.msra.mxu1 %v21811_v40 }
 0xbe0   : > { %13924 = vmatprep.subr.bf16.mxu1 %v21819_v43  ;;  %v21874_v43 = vld [vmem:[%s22620_s27 + $0x3130] ss:$8 sps:$4 sm:$0xff]  }
 0xbe1   : > { %14189 = vmatpush2.bf16.msra.mxu0 %v21814_v56  ;;  %v21882_v56 = vld [vmem:[%s22620_s27 + $0x3124] ss:$8 sps:$4 sm:$0xff]  }
 0xbe2   : > { %14190 = vmatprep.subr.bf16.mxu0 %v21822_v53  ;;  %v21877_v53 = vld [vmem:[%s22620_s27 + $0x3040] ss:$8 sps:$4 sm:$0xff]  }
 0xbe3   : > { %13925 = vmatpush2.bf16.msra.mxu1 %v21817_v25  ;;  %v21885_v25 = vld [vmem:[%s22620_s27 + $0x3034] ss:$8 sps:$4 sm:$0xff]  }
 0xbe4   : > { %13926 = vmatprep.subr.bf16.mxu1 %v21825_v31  ;;  %v21880_v31 = vld [vmem:[%s22620_s27 + $0x3120] ss:$8 sps:$4 sm:$0xff]  }
 0xbe5   : > { %14191 = vmatpush2.bf16.msra.mxu0 %v21820_v34  ;;  %v21888_v34 = vld [vmem:[%s22620_s27 + $0x3114] ss:$8 sps:$4 sm:$0xff]  }
 0xbe6   : > { %14192 = vmatprep.subr.bf16.mxu0 %v21828_v9  ;;  %v21883_v9 = vld [vmem:[%s22620_s27 + $0x3030] ss:$8 sps:$4 sm:$0xff]  }
 0xbe7   : > { %13927 = vmatpush2.bf16.msra.mxu1 %v21823_v24  ;;  %v21891_v24 = vld [vmem:[%s22620_s27 + $0x3024] ss:$8 sps:$4 sm:$0xff]  }
 0xbe8   : > { %13928 = vmatprep.subr.bf16.mxu1 %v21831_v16  ;;  %v21886_v16 = vld [vmem:[%s22620_s27 + $0x3110] ss:$8 sps:$4 sm:$0xff]  }
 0xbe9   : > { %14193 = vmatpush2.bf16.msra.mxu0 %v21826_v1  ;;  %v21894_v1 = vld [vmem:[%s22620_s27 + $0x3104] ss:$8 sps:$4 sm:$0xff]  }
 0xbea   : > { %14194 = vmatprep.subr.bf16.mxu0 %v21834_v2  ;;  %v21889_v2 = vld [vmem:[%s22620_s27 + $0x3020] ss:$8 sps:$4 sm:$0xff]  }
 0xbeb   : > { %13929 = vmatpush2.bf16.msra.mxu1 %v21829_v11  ;;  %v21897_v11 = vld [vmem:[%s22620_s27 + $0x3014] ss:$8 sps:$4 sm:$0xff]  }
 0xbec   : > { %13930 = vmatprep.subr.bf16.mxu1 %v21837_v46  ;;  %v21892_v46 = vld [vmem:[%s22620_s27 + $0x3100] ss:$8 sps:$4 sm:$0xff]  }
 0xbed   : > { %14195 = vmatpush2.bf16.msra.mxu0 %v21832_v54  ;;  %v21900_v54 = vld [vmem:[%s22620_s27 + $0x31f4] ss:$8 sps:$4 sm:$0xff]  }
 0xbee   : > { %14196 = vmatprep.subr.bf16.mxu0 %v21840_v0  ;;  %v21895_v0 = vld [vmem:[%s22620_s27 + $0x3010] ss:$8 sps:$4 sm:$0xff]  }
 0xbef   : > { %13931 = vmatpush2.bf16.msra.mxu1 %v21835_v33  ;;  %v21903_v33 = vld [vmem:[%s22620_s27 + $0x3004] ss:$8 sps:$4 sm:$0xff]  }
 0xbf0   : > { %13932 = vmatprep.subr.bf16.mxu1 %v21843_v22  ;;  %v21898_v22 = vld [vmem:[%s22620_s27 + $0x31f0] ss:$8 sps:$4 sm:$0xff]  }
 0xbf1   : > { %14197 = vmatpush2.bf16.msra.mxu0 %v21838_v19  ;;  %v21906_v19 = vld [vmem:[%s22620_s27 + $0x31e4] ss:$8 sps:$4 sm:$0xff]  }
 0xbf2   : > { %14198 = vmatprep.subr.bf16.mxu0 %v21846_v5  ;;  %v21901_v5 = vld [vmem:[%s22620_s27 + $0x3000] ss:$8 sps:$4 sm:$0xff]  }
 0xbf3   : > { %13933 = vmatpush2.bf16.msra.mxu1 %v21841_v15  ;;  %v21909_v15 = vld [vmem:[%s22620_s27 + $0x30f4] ss:$8 sps:$4 sm:$0xff]  }
 0xbf4   : > { %13934 = vmatprep.subr.bf16.mxu1 %v21849_v36  ;;  %v21904_v36 = vld [vmem:[%s22620_s27 + $0x31e0] ss:$8 sps:$4 sm:$0xff]  }
 0xbf5   : > { %14199 = vmatpush2.bf16.msra.mxu0 %v21844_v50  ;;  %v21912_v50 = vld [vmem:[%s22620_s27 + $0x31d4] ss:$8 sps:$4 sm:$0xff]  }
 0xbf6   : > { %14664 = vmatprep.subr.bf16.mxu0 %v21852_v28  ;;  %v21907_v28 = vld [vmem:[%s22620_s27 + $0x30f0] ss:$8 sps:$4 sm:$0xff]  }
 0xbf7   : > { %13935 = vmatpush2.bf16.msra.mxu1 %v21847_v49  ;;  %v21915_v49 = vld [vmem:[%s22620_s27 + $0x30e4] ss:$8 sps:$4 sm:$0xff]  }
 0xbf8   : > { %v12726_v7 = vpop.f32.mrf.mxu0  ;;  %14201 = vmatmul.mubr.bf16.vlgmr.msra.gmra.mxu0 %v25860_v45  ;;  %13936 = vmatprep.subr.bf16.mxu1 %v21855_v23  ;;  %v21862_v45 = vld [vmem:[%s22620_s27 + $0x3150] ss:$8 sps:$4 sm:$0xff]  }
 0xbf9   : > { %14665 = vmatpush1.bf16.msra.mxu0 %v21850_v26  ;;  %14696 = vmatprep.mubr.bf16.mxu0 %v25872_v60  ;;  %v21870_v60 = vld [vmem:[%s22620_s27 + $0x3144] ss:$8 sps:$4 sm:$0xff]   ;;  %v21910_v23 = vld [vmem:[%s22620_s27 + $0x31d0] ss:$8 sps:$4 sm:$0xff]  }
 0xbfa   : > { %v12728_v41 = vpop.f32.mrf.mxu0  ;;  %14666 = vmatprep.subr.bf16.mxu0 %v21858_v62  ;;  %v21918_v26 = vld [vmem:[%s22620_s27 + $0x31c4] ss:$8 sps:$4 sm:$0xff]   ;;  %v21913_v62 = vld [vmem:[%s22620_s27 + $0x30e0] ss:$8 sps:$4 sm:$0xff]  }
 0xbfb   : > { %13937 = vmatpush2.bf16.msra.mxu1 %v21853_v63  ;;  %v21921_v63 = vld [vmem:[%s22620_s27 + $0x30d4] ss:$8 sps:$4 sm:$0xff]  }
 0xbfc   : > { %v12730_v27 = vpop.f32.mrf.mxu0  ;;  %14412 = vmatprep.subr.bf16.mxu1 %v21861_v57  ;;  %v21924_v57 = vld [vmem:[%s22620_s27 + $0x31b4] ss:$8 sps:$4 sm:$0xff]  }
 0xbfd   : > { %14667 = vmatpush1.bf16.msra.mxu0 %v21856_v12  ;;  %v21919_v12 = vld [vmem:[%s22620_s27 + $0x30d0] ss:$8 sps:$4 sm:$0xff]   ;;  %v21925_v27 = vld [vmem:[%s22620_s27 + $0x30c0] ss:$8 sps:$4 sm:$0xff]  }
 0xbfe   : > { %v12482_v55 = vpop.f32.mrf.mxu1  ;;  %v12731_v3 = vpop.f32.mrf.mxu0  ;;  %13939 = vmatmul.mubr.bf16.vlgmr.msra.gmra.mxu1 %v25863_v14  ;;  %14668 = vmatprep.subr.bf16.mxu0 %v21864_v58  ;;  %v21868_v14 = vld [vmem:[%s22620_s27 + $0x3140] ss:$8 sps:$4 sm:$0xff]   ;;  %v21922_v58 = vld [vmem:[%s22620_s27 + $0x31b0] ss:$8 sps:$4 sm:$0xff]  }
 0xbff   : > { %v12489_v21 = vadd.f32 %v12482_v55, %v26122_v4  ;;  %14413 = vmatpush1.bf16.msra.mxu1 %v21859_v18  ;;  %14444 = vmatprep.mubr.bf16.mxu1 %v25866_v42  ;;  %v21876_v4 = vld [vmem:[%s22620_s27 + $0x3134] ss:$8 sps:$4 sm:$0xff]   ;;  %v21871_v42 = vld [vmem:[%s22620_s27 + $0x3050] ss:$8 sps:$4 sm:$0xff]   ;;  %v21930_v18 = vld [vmem:[%s22620_s27 + $0x31a4] ss:$8 sps:$4 sm:$0xff]  }
 0xc00   : > { %v12484_v13 = vpop.f32.mrf.mxu1  ;;  %14414 = vmatprep.subr.bf16.mxu1 %v21867_v32  ;;  %v21933_v32 = vld [vmem:[%s22620_s27 + $0x30b4] ss:$8 sps:$4 sm:$0xff]   ;;  %v21931_v3 = vld [vmem:[%s22620_s27 + $0x30b0] ss:$8 sps:$4 sm:$0xff]  }
 0xc01   : > { %v12490_v37 = vadd.f32 %v12484_v13, %v26127_v29  ;;  %14669 = vmatpush1.bf16.msra.mxu0 %v21862_v45  ;;  %v26200_v47 = vadd.f32 %v12726_v7, %v12489_v21  ;;  %v21879_v29 = vld [vmem:[%s22620_s27 + $0x3044] ss:$8 sps:$4 sm:$0xff]   ;;  %v21916_v7 = vld [vmem:[%s22620_s27 + $0x31c0] ss:$8 sps:$4 sm:$0xff]   ;;  %v21936_v55 = vld [vmem:[%s22620_s27 + $0x3194] ss:$8 sps:$4 sm:$0xff]  }
 0xc02   : > { %v12486_v10 = vpop.f32.mrf.mxu1  ;;  %14670 = vmatprep.subr.bf16.mxu0 %v21870_v60  ;;  %v21928_v45 = vld [vmem:[%s22620_s27 + $0x31a0] ss:$8 sps:$4 sm:$0xff]   ;;  %v21939_v60 = vld [vmem:[%s22620_s27 + $0x30a4] ss:$8 sps:$4 sm:$0xff]   ;;  %v21934_v21 = vld [vmem:[%s22620_s27 + $0x3190] ss:$8 sps:$4 sm:$0xff]  }
 0xc03   : > { %14415 = vmatpush1.bf16.msra.mxu1 %v21865_v6  ;;  %v26204_v30 = vadd.f32 %v12728_v41, %v12490_v37  ;;  %v21927_v41 = vld [vmem:[%s22620_s27 + $0x30c4] ss:$8 sps:$4 sm:$0xff]   ;;  %v21937_v13 = vld [vmem:[%s22620_s27 + $0x30a0] ss:$8 sps:$4 sm:$0xff]   ;;  %v21943_v10 = vld [vmem:[%s22620_s27 + $0x3090] ss:$8 sps:$4 sm:$0xff]  }
 0xc04   : > { %v12487_v40 = vpop.f32.mrf.mxu1  ;;  %14416 = vmatprep.subr.bf16.mxu1 %v21873_v52  ;;  %v21942_v6 = vld [vmem:[%s22620_s27 + $0x3184] ss:$8 sps:$4 sm:$0xff]   ;;  %v21945_v52 = vld [vmem:[%s22620_s27 + $0x3094] ss:$8 sps:$4 sm:$0xff]   ;;  %v21940_v37 = vld [vmem:[%s22620_s27 + $0x3180] ss:$8 sps:$4 sm:$0xff]  }
 0xc05   : > { %14671 = vmatpush1.bf16.msra.mxu0 %v21868_v14  ;;  %v21948_v14 = vld [vmem:[%s22620_s27 + $0x3374] ss:$8 sps:$4 sm:$0xff]   ;;  %v21954_v40 = vld [vmem:[%s22620_s27 + $0x3364] ss:$8 sps:$4 sm:$0xff]  }
 0xc06   : > { %14672 = vmatprep.subr.bf16.mxu0 %v21876_v4  ;;  %v21951_v4 = vld [vmem:[%s22620_s27 + $0x3084] ss:$8 sps:$4 sm:$0xff]  }
 0xc07   : > { %14417 = vmatpush1.bf16.msra.mxu1 %v21871_v42  ;;  %v21946_v42 = vld [vmem:[%s22620_s27 + $0x3370] ss:$8 sps:$4 sm:$0xff]  }
 0xc08   : > { %14418 = vmatprep.subr.bf16.mxu1 %v21879_v29  ;;  %v21949_v29 = vld [vmem:[%s22620_s27 + $0x3080] ss:$8 sps:$4 sm:$0xff]  }
 0xc09   : > { %14673 = vmatpush1.bf16.msra.mxu0 %v21874_v43 }
 0xc0a   : > { %14674 = vmatprep.subr.bf16.mxu0 %v21882_v56  ;;  %v21957_v56 = vld [vmem:[%s22620_s27 + $0x3274] ss:$8 sps:$4 sm:$0xff]  }
 0xc0b   : > { %14419 = vmatpush1.bf16.msra.mxu1 %v21877_v53  ;;  %v21952_v53 = vld [vmem:[%s22620_s27 + $0x3360] ss:$8 sps:$4 sm:$0xff]  }
 0xc0c   : > { %14420 = vmatprep.subr.bf16.mxu1 %v21885_v25 }
 0xc0d   : > { %14675 = vmatpush1.bf16.msra.mxu0 %v21880_v31  ;;  %v21960_v31 = vld [vmem:[%s22620_s27 + $0x3354] ss:$8 sps:$4 sm:$0xff]  }
 0xc0e   : > { %14676 = vmatprep.subr.bf16.mxu0 %v21888_v34  ;;  %v21955_v34 = vld [vmem:[%s22620_s27 + $0x3270] ss:$8 sps:$4 sm:$0xff]  }
 0xc0f   : > { %14421 = vmatpush1.bf16.msra.mxu1 %v21883_v9 }
 0xc10   : > { %14422 = vmatprep.subr.bf16.mxu1 %v21891_v24  ;;  %v21963_v24 = vld [vmem:[%s22620_s27 + $0x3264] ss:$8 sps:$4 sm:$0xff]  }
 0xc11   : > { %14677 = vmatpush1.bf16.msra.mxu0 %v21886_v16 }
 0xc12   : > { %14678 = vmatprep.subr.bf16.mxu0 %v21894_v1 }
 0xc13   : > { %14423 = vmatpush1.bf16.msra.mxu1 %v21889_v2 }
 0xc14   : > { %14424 = vmatprep.subr.bf16.mxu1 %v21897_v11  ;;  %v21961_v11 = vld [vmem:[%s22620_s27 + $0x3260] ss:$8 sps:$4 sm:$0xff]  }
 0xc15   : > { %14679 = vmatpush1.bf16.msra.mxu0 %v21892_v46 }
 0xc16   : > { %14680 = vmatprep.subr.bf16.mxu0 %v21900_v54  ;;  %v21969_v54 = vld [vmem:[%s22620_s27 + $0x3254] ss:$8 sps:$4 sm:$0xff]  }
 0xc17   : > { %14425 = vmatpush1.bf16.msra.mxu1 %v21895_v0 }
 0xc18   : > { %14426 = vmatprep.subr.bf16.mxu1 %v21903_v33 }
 0xc19   : > { %14681 = vmatpush2.bf16.msra.mxu0 %v21898_v22 }
 0xc1a   : > { %14682 = vmatprep.subr.bf16.mxu0 %v21906_v19 }
 0xc1b   : > { %14427 = vmatpush1.bf16.msra.mxu1 %v21901_v5 }
 0xc1c   : > { %14428 = vmatprep.subr.bf16.mxu1 %v21909_v15  ;;  %v21970_v15 = vld [vmem:[%s22620_s27 + $0x3330] ss:$8 sps:$4 sm:$0xff]  }
 0xc1d   : > { %14683 = vmatpush2.bf16.msra.mxu0 %v21904_v36  ;;  %v21978_v36 = vld [vmem:[%s22620_s27 + $0x3324] ss:$8 sps:$4 sm:$0xff]  }
 0xc1e   : > { %14684 = vmatprep.subr.bf16.mxu0 %v21912_v50  ;;  %v21973_v50 = vld [vmem:[%s22620_s27 + $0x3240] ss:$8 sps:$4 sm:$0xff]  }
 0xc1f   : > { %14429 = vmatpush2.bf16.msra.mxu1 %v21907_v28  ;;  %v21981_v28 = vld [vmem:[%s22620_s27 + $0x3234] ss:$8 sps:$4 sm:$0xff]  }
 0xc20   : > { %14430 = vmatprep.subr.bf16.mxu1 %v21915_v49  ;;  %v21976_v49 = vld [vmem:[%s22620_s27 + $0x3320] ss:$8 sps:$4 sm:$0xff]  }
 0xc21   : > { %14685 = vmatpush2.bf16.msra.mxu0 %v21910_v23  ;;  %v21984_v23 = vld [vmem:[%s22620_s27 + $0x3314] ss:$8 sps:$4 sm:$0xff]  }
 0xc22   : > { %14686 = vmatprep.subr.bf16.mxu0 %v21918_v26  ;;  %v21979_v26 = vld [vmem:[%s22620_s27 + $0x3230] ss:$8 sps:$4 sm:$0xff]  }
 0xc23   : > { %14431 = vmatpush2.bf16.msra.mxu1 %v21913_v62  ;;  %v21987_v62 = vld [vmem:[%s22620_s27 + $0x3224] ss:$8 sps:$4 sm:$0xff]  }
 0xc24   : > { %14432 = vmatprep.subr.bf16.mxu1 %v21921_v63  ;;  %v21982_v63 = vld [vmem:[%s22620_s27 + $0x3310] ss:$8 sps:$4 sm:$0xff]  }
 0xc25   : > { %14687 = vmatpush2.bf16.msra.mxu0 %v21916_v7  ;;  %v21990_v7 = vld [vmem:[%s22620_s27 + $0x3304] ss:$8 sps:$4 sm:$0xff]  }
 0xc26   : > { %14688 = vmatprep.subr.bf16.mxu0 %v21924_v57  ;;  %v21985_v57 = vld [vmem:[%s22620_s27 + $0x3220] ss:$8 sps:$4 sm:$0xff]  }
 0xc27   : > { %14433 = vmatpush2.bf16.msra.mxu1 %v21919_v12  ;;  %v21993_v12 = vld [vmem:[%s22620_s27 + $0x3214] ss:$8 sps:$4 sm:$0xff]  }
 0xc28   : > { %14434 = vmatprep.subr.bf16.mxu1 %v21927_v41  ;;  %v21988_v41 = vld [vmem:[%s22620_s27 + $0x3300] ss:$8 sps:$4 sm:$0xff]  }
 0xc29   : > { %14689 = vmatpush2.bf16.msra.mxu0 %v21922_v58  ;;  %v21996_v58 = vld [vmem:[%s22620_s27 + $0x33f4] ss:$8 sps:$4 sm:$0xff]  }
 0xc2a   : > { %14690 = vmatprep.subr.bf16.mxu0 %v21930_v18  ;;  %v21991_v18 = vld [vmem:[%s22620_s27 + $0x3210] ss:$8 sps:$4 sm:$0xff]  }
 0xc2b   : > { %14435 = vmatpush2.bf16.msra.mxu1 %v21925_v27  ;;  %v21999_v27 = vld [vmem:[%s22620_s27 + $0x3204] ss:$8 sps:$4 sm:$0xff]  }
 0xc2c   : > { %14436 = vmatprep.subr.bf16.mxu1 %v21933_v32  ;;  %v21994_v32 = vld [vmem:[%s22620_s27 + $0x33f0] ss:$8 sps:$4 sm:$0xff]  }
 0xc2d   : > { %14691 = vmatpush2.bf16.msra.mxu0 %v21928_v45  ;;  %v22002_v45 = vld [vmem:[%s22620_s27 + $0x33e4] ss:$8 sps:$4 sm:$0xff]  }
 0xc2e   : > { %14692 = vmatprep.subr.bf16.mxu0 %v21936_v55  ;;  %v21997_v55 = vld [vmem:[%s22620_s27 + $0x3200] ss:$8 sps:$4 sm:$0xff]  }
 0xc2f   : > { %14437 = vmatpush2.bf16.msra.mxu1 %v21931_v3  ;;  %v22005_v3 = vld [vmem:[%s22620_s27 + $0x32f4] ss:$8 sps:$4 sm:$0xff]  }
 0xc30   : > { %14438 = vmatprep.subr.bf16.mxu1 %v21939_v60  ;;  %v22000_v60 = vld [vmem:[%s22620_s27 + $0x33e0] ss:$8 sps:$4 sm:$0xff]  }
 0xc31   : > { %14693 = vmatpush2.bf16.msra.mxu0 %v21934_v21  ;;  %v22008_v21 = vld [vmem:[%s22620_s27 + $0x33d4] ss:$8 sps:$4 sm:$0xff]  }
 0xc32   : > { %14694 = vmatprep.subr.bf16.mxu0 %v21942_v6  ;;  %v22003_v6 = vld [vmem:[%s22620_s27 + $0x32f0] ss:$8 sps:$4 sm:$0xff]  }
 0xc33   : > { %14439 = vmatpush2.bf16.msra.mxu1 %v21937_v13  ;;  %v22011_v13 = vld [vmem:[%s22620_s27 + $0x32e4] ss:$8 sps:$4 sm:$0xff]  }
 0xc34   : > { %14440 = vmatprep.subr.bf16.mxu1 %v21945_v52  ;;  %v22006_v52 = vld [vmem:[%s22620_s27 + $0x33d0] ss:$8 sps:$4 sm:$0xff]  }
 0xc35   : > { %14695 = vmatpush2.bf16.msra.mxu0 %v21940_v37  ;;  %v22014_v37 = vld [vmem:[%s22620_s27 + $0x33c4] ss:$8 sps:$4 sm:$0xff]  }
 0xc36   : > { %15161 = vmatprep.subr.bf16.mxu0 %v21948_v14  ;;  %v22009_v14 = vld [vmem:[%s22620_s27 + $0x32e0] ss:$8 sps:$4 sm:$0xff]  }
 0xc37   : > { %14441 = vmatpush2.bf16.msra.mxu1 %v21943_v10  ;;  %v22017_v10 = vld [vmem:[%s22620_s27 + $0x32d4] ss:$8 sps:$4 sm:$0xff]  }
 0xc38   : > { %v13210_v43 = vpop.f32.mrf.mxu0  ;;  %14697 = vmatmul.mubr.bf16.vlgmr.msra.gmra.mxu0 %v25888_v17  ;;  %14442 = vmatprep.subr.bf16.mxu1 %v21951_v4  ;;  %v21958_v17 = vld [vmem:[%s22620_s27 + $0x3350] ss:$8 sps:$4 sm:$0xff]   ;;  %v22012_v4 = vld [vmem:[%s22620_s27 + $0x33c0] ss:$8 sps:$4 sm:$0xff]  }
 0xc39   : > { %15162 = vmatpush1.bf16.msra.mxu0 %v21946_v42  ;;  %15193 = vmatprep.mubr.bf16.mxu0 %v25897_v38  ;;  %v21966_v38 = vld [vmem:[%s22620_s27 + $0x3344] ss:$8 sps:$4 sm:$0xff]   ;;  %v22020_v42 = vld [vmem:[%s22620_s27 + $0x33b4] ss:$8 sps:$4 sm:$0xff]  }
 0xc3a   : > { %v13212_v25 = vpop.f32.mrf.mxu0  ;;  %15163 = vmatprep.subr.bf16.mxu0 %v21954_v40  ;;  %v22015_v40 = vld [vmem:[%s22620_s27 + $0x32d0] ss:$8 sps:$4 sm:$0xff]  }
 0xc3b   : > { %14443 = vmatpush2.bf16.msra.mxu1 %v21949_v29  ;;  %v22023_v29 = vld [vmem:[%s22620_s27 + $0x32c4] ss:$8 sps:$4 sm:$0xff]  }
 0xc3c   : > { %v13214_v9 = vpop.f32.mrf.mxu0  ;;  %14908 = vmatprep.subr.bf16.mxu1 %v21957_v56  ;;  %v22026_v56 = vld [vmem:[%s22620_s27 + $0x33a4] ss:$8 sps:$4 sm:$0xff]  }
 0xc3d   : > { %15164 = vmatpush1.bf16.msra.mxu0 %v21952_v53  ;;  %v22021_v53 = vld [vmem:[%s22620_s27 + $0x32c0] ss:$8 sps:$4 sm:$0xff]   ;;  %v22027_v9 = vld [vmem:[%s22620_s27 + $0x32b0] ss:$8 sps:$4 sm:$0xff]  }
 0xc3e   : > { %v12966_v16 = vpop.f32.mrf.mxu1  ;;  %v13215_v1 = vpop.f32.mrf.mxu0  ;;  %14445 = vmatmul.mubr.bf16.vlgmr.msra.gmra.mxu1 %v25891_v61  ;;  %15165 = vmatprep.subr.bf16.mxu0 %v21960_v31  ;;  %v21964_v61 = vld [vmem:[%s22620_s27 + $0x3340] ss:$8 sps:$4 sm:$0xff]  }
 0xc3f   : > { %v12973_v2 = vadd.f32 %v12966_v16, %v26200_v47  ;;  %14909 = vmatpush1.bf16.msra.mxu1 %v21955_v34  ;;  %14940 = vmatprep.mubr.bf16.mxu1 %v25900_v51  ;;  %v21972_v47 = vld [vmem:[%s22620_s27 + $0x3334] ss:$8 sps:$4 sm:$0xff]   ;;  %v21967_v51 = vld [vmem:[%s22620_s27 + $0x3250] ss:$8 sps:$4 sm:$0xff]   ;;  %v22024_v31 = vld [vmem:[%s22620_s27 + $0x33a0] ss:$8 sps:$4 sm:$0xff]  }
 0xc40   : > { %v12968_v46 = vpop.f32.mrf.mxu1  ;;  %14910 = vmatprep.subr.bf16.mxu1 %v21963_v24  ;;  %v22032_v34 = vld [vmem:[%s22620_s27 + $0x3394] ss:$8 sps:$4 sm:$0xff]   ;;  %v22035_v24 = vld [vmem:[%s22620_s27 + $0x32a4] ss:$8 sps:$4 sm:$0xff]   ;;  %v22033_v1 = vld [vmem:[%s22620_s27 + $0x32a0] ss:$8 sps:$4 sm:$0xff]  }
 0xc41   : > { %v12974_v0 = vadd.f32 %v12968_v46, %v26204_v30  ;;  %15166 = vmatpush1.bf16.msra.mxu0 %v21958_v17  ;;  %v26274_v33 = vadd.f32 %v13210_v43, %v12973_v2  ;;  %v21975_v30 = vld [vmem:[%s22620_s27 + $0x3244] ss:$8 sps:$4 sm:$0xff]   ;;  %v22018_v43 = vld [vmem:[%s22620_s27 + $0x33b0] ss:$8 sps:$4 sm:$0xff]   ;;  %v22036_v2 = vld [vmem:[%s22620_s27 + $0x3380] ss:$8 sps:$4 sm:$0xff]  }
 0xc42   : > { %v12970_v22 = vpop.f32.mrf.mxu1  ;;  %15167 = vmatprep.subr.bf16.mxu0 %v21966_v38  ;;  %v22030_v17 = vld [vmem:[%s22620_s27 + $0x3390] ss:$8 sps:$4 sm:$0xff]   ;;  %v22038_v16 = vld [vmem:[%s22620_s27 + $0x3384] ss:$8 sps:$4 sm:$0xff]   ;;  %v22041_v38 = vld [vmem:[%s22620_s27 + $0x3294] ss:$8 sps:$4 sm:$0xff]  }
 0xc43   : > { %14911 = vmatpush1.bf16.msra.mxu1 %v21961_v11  ;;  %v26278_v19 = vadd.f32 %v13212_v25, %v12974_v0  ;;  %v22029_v25 = vld [vmem:[%s22620_s27 + $0x32b4] ss:$8 sps:$4 sm:$0xff]   ;;  %v22039_v46 = vld [vmem:[%s22620_s27 + $0x3290] ss:$8 sps:$4 sm:$0xff]   ;;  %v22045_v22 = vld [vmem:[%s22620_s27 + $0x3280] ss:$8 sps:$4 sm:$0xff]  }
 0xc44   : > { %v12971_v5 = vpop.f32.mrf.mxu1  ;;  %14912 = vmatprep.subr.bf16.mxu1 %v21969_v54  ;;  %v22044_v11 = vld [vmem:[%s22620_s27 + $0x3574] ss:$8 sps:$4 sm:$0xff]   ;;  %v22047_v54 = vld [vmem:[%s22620_s27 + $0x3284] ss:$8 sps:$4 sm:$0xff]   ;;  %v22042_v0 = vld [vmem:[%s22620_s27 + $0x3570] ss:$8 sps:$4 sm:$0xff]  }
 0xc45   : > { %15168 = vmatpush1.bf16.msra.mxu0 %v21964_v61  ;;  %v22050_v61 = vld [vmem:[%s22620_s27 + $0x3564] ss:$8 sps:$4 sm:$0xff]   ;;  %v22048_v5 = vld [vmem:[%s22620_s27 + $0x3560] ss:$8 sps:$4 sm:$0xff]  }
 0xc46   : > { %15169 = vmatprep.subr.bf16.mxu0 %v21972_v47 }
 0xc47   : > { %14913 = vmatpush1.bf16.msra.mxu1 %v21967_v51  ;;  %v22053_v51 = vld [vmem:[%s22620_s27 + $0x3474] ss:$8 sps:$4 sm:$0xff]  }
 0xc48   : > { %14914 = vmatprep.subr.bf16.mxu1 %v21975_v30 }
 0xc49   : > { %15170 = vmatpush1.bf16.msra.mxu0 %v21970_v15  ;;  %v22056_v15 = vld [vmem:[%s22620_s27 + $0x3554] ss:$8 sps:$4 sm:$0xff]  }
 0xc4a   : > { %15171 = vmatprep.subr.bf16.mxu0 %v21978_v36  ;;  %v22051_v36 = vld [vmem:[%s22620_s27 + $0x3470] ss:$8 sps:$4 sm:$0xff]  }
 0xc4b   : > { %14915 = vmatpush1.bf16.msra.mxu1 %v21973_v50 }
 0xc4c   : > { %14916 = vmatprep.subr.bf16.mxu1 %v21981_v28  ;;  %v22059_v28 = vld [vmem:[%s22620_s27 + $0x3464] ss:$8 sps:$4 sm:$0xff]  }
 0xc4d   : > { %15172 = vmatpush1.bf16.msra.mxu0 %v21976_v49 }
 0xc4e   : > { %15173 = vmatprep.subr.bf16.mxu0 %v21984_v23 }
 0xc4f   : > { %14917 = vmatpush1.bf16.msra.mxu1 %v21979_v26 }
 0xc50   : > { %14918 = vmatprep.subr.bf16.mxu1 %v21987_v62  ;;  %v22057_v62 = vld [vmem:[%s22620_s27 + $0x3460] ss:$8 sps:$4 sm:$0xff]  }
 0xc51   : > { %15174 = vmatpush1.bf16.msra.mxu0 %v21982_v63 }
 0xc52   : > { %15175 = vmatprep.subr.bf16.mxu0 %v21990_v7  ;;  %v22065_v7 = vld [vmem:[%s22620_s27 + $0x3454] ss:$8 sps:$4 sm:$0xff]  }
 0xc53   : > { %14919 = vmatpush1.bf16.msra.mxu1 %v21985_v57 }
 0xc54   : > { %14920 = vmatprep.subr.bf16.mxu1 %v21993_v12 }
 0xc55   : > { %15176 = vmatpush1.bf16.msra.mxu0 %v21988_v41 }
 0xc56   : > { %15177 = vmatprep.subr.bf16.mxu0 %v21996_v58 }
 0xc57   : > { %14921 = vmatpush1.bf16.msra.mxu1 %v21991_v18 }
 0xc58   : > { %14922 = vmatprep.subr.bf16.mxu1 %v21999_v27  ;;  %v22066_v27 = vld [vmem:[%s22620_s27 + $0x3530] ss:$8 sps:$4 sm:$0xff]  }
 0xc59   : > { %15178 = vmatpush2.bf16.msra.mxu0 %v21994_v32  ;;  %v22074_v32 = vld [vmem:[%s22620_s27 + $0x3524] ss:$8 sps:$4 sm:$0xff]  }
 0xc5a   : > { %15179 = vmatprep.subr.bf16.mxu0 %v22002_v45  ;;  %v22069_v45 = vld [vmem:[%s22620_s27 + $0x3440] ss:$8 sps:$4 sm:$0xff]  }
 0xc5b   : > { %14923 = vmatpush1.bf16.msra.mxu1 %v21997_v55  ;;  %v22077_v55 = vld [vmem:[%s22620_s27 + $0x3434] ss:$8 sps:$4 sm:$0xff]  }
 0xc5c   : > { %14924 = vmatprep.subr.bf16.mxu1 %v22005_v3  ;;  %v22072_v3 = vld [vmem:[%s22620_s27 + $0x3520] ss:$8 sps:$4 sm:$0xff]  }
 0xc5d   : > { %15180 = vmatpush2.bf16.msra.mxu0 %v22000_v60  ;;  %v22080_v60 = vld [vmem:[%s22620_s27 + $0x3514] ss:$8 sps:$4 sm:$0xff]  }
 0xc5e   : > { %15181 = vmatprep.subr.bf16.mxu0 %v22008_v21  ;;  %v22075_v21 = vld [vmem:[%s22620_s27 + $0x3430] ss:$8 sps:$4 sm:$0xff]  }
 0xc5f   : > { %14925 = vmatpush2.bf16.msra.mxu1 %v22003_v6  ;;  %v22083_v6 = vld [vmem:[%s22620_s27 + $0x3424] ss:$8 sps:$4 sm:$0xff]  }
 0xc60   : > { %14926 = vmatprep.subr.bf16.mxu1 %v22011_v13  ;;  %v22078_v13 = vld [vmem:[%s22620_s27 + $0x3510] ss:$8 sps:$4 sm:$0xff]  }
 0xc61   : > { %15182 = vmatpush2.bf16.msra.mxu0 %v22006_v52  ;;  %v22086_v52 = vld [vmem:[%s22620_s27 + $0x3504] ss:$8 sps:$4 sm:$0xff]  }
 0xc62   : > { %15183 = vmatprep.subr.bf16.mxu0 %v22014_v37  ;;  %v22081_v37 = vld [vmem:[%s22620_s27 + $0x3420] ss:$8 sps:$4 sm:$0xff]  }
 0xc63   : > { %14927 = vmatpush2.bf16.msra.mxu1 %v22009_v14  ;;  %v22089_v14 = vld [vmem:[%s22620_s27 + $0x3414] ss:$8 sps:$4 sm:$0xff]  }
 0xc64   : > { %14928 = vmatprep.subr.bf16.mxu1 %v22017_v10  ;;  %v22084_v10 = vld [vmem:[%s22620_s27 + $0x3500] ss:$8 sps:$4 sm:$0xff]  }
 0xc65   : > { %15184 = vmatpush2.bf16.msra.mxu0 %v22012_v4  ;;  %v22092_v4 = vld [vmem:[%s22620_s27 + $0x35f4] ss:$8 sps:$4 sm:$0xff]  }
 0xc66   : > { %15185 = vmatprep.subr.bf16.mxu0 %v22020_v42  ;;  %v22087_v42 = vld [vmem:[%s22620_s27 + $0x3410] ss:$8 sps:$4 sm:$0xff]  }
 0xc67   : > { %14929 = vmatpush2.bf16.msra.mxu1 %v22015_v40  ;;  %v22095_v40 = vld [vmem:[%s22620_s27 + $0x3404] ss:$8 sps:$4 sm:$0xff]  }
 0xc68   : > { %14930 = vmatprep.subr.bf16.mxu1 %v22023_v29  ;;  %v22090_v29 = vld [vmem:[%s22620_s27 + $0x35f0] ss:$8 sps:$4 sm:$0xff]  }
 0xc69   : > { %15186 = vmatpush2.bf16.msra.mxu0 %v22018_v43  ;;  %v22098_v43 = vld [vmem:[%s22620_s27 + $0x35e4] ss:$8 sps:$4 sm:$0xff]  }
 0xc6a   : > { %15187 = vmatprep.subr.bf16.mxu0 %v22026_v56  ;;  %v22093_v56 = vld [vmem:[%s22620_s27 + $0x3400] ss:$8 sps:$4 sm:$0xff]  }
 0xc6b   : > { %14931 = vmatpush2.bf16.msra.mxu1 %v22021_v53  ;;  %v22101_v53 = vld [vmem:[%s22620_s27 + $0x34f4] ss:$8 sps:$4 sm:$0xff]  }
 0xc6c   : > { %14932 = vmatprep.subr.bf16.mxu1 %v22029_v25  ;;  %v22096_v25 = vld [vmem:[%s22620_s27 + $0x35e0] ss:$8 sps:$4 sm:$0xff]  }
 0xc6d   : > { %15188 = vmatpush2.bf16.msra.mxu0 %v22024_v31  ;;  %v22104_v31 = vld [vmem:[%s22620_s27 + $0x35d4] ss:$8 sps:$4 sm:$0xff]  }
 0xc6e   : > { %15189 = vmatprep.subr.bf16.mxu0 %v22032_v34  ;;  %v22099_v34 = vld [vmem:[%s22620_s27 + $0x34f0] ss:$8 sps:$4 sm:$0xff]  }
 0xc6f   : > { %14933 = vmatpush2.bf16.msra.mxu1 %v22027_v9  ;;  %v22107_v9 = vld [vmem:[%s22620_s27 + $0x34e4] ss:$8 sps:$4 sm:$0xff]  }
 0xc70   : > { %14934 = vmatprep.subr.bf16.mxu1 %v22035_v24  ;;  %v22102_v24 = vld [vmem:[%s22620_s27 + $0x35d0] ss:$8 sps:$4 sm:$0xff]  }
 0xc71   : > { %15190 = vmatpush2.bf16.msra.mxu0 %v22030_v17  ;;  %v22110_v17 = vld [vmem:[%s22620_s27 + $0x35c4] ss:$8 sps:$4 sm:$0xff]  }
 0xc72   : > { %15191 = vmatprep.subr.bf16.mxu0 %v22038_v16  ;;  %v22105_v16 = vld [vmem:[%s22620_s27 + $0x34e0] ss:$8 sps:$4 sm:$0xff]  }
 0xc73   : > { %14935 = vmatpush2.bf16.msra.mxu1 %v22033_v1  ;;  %v22113_v1 = vld [vmem:[%s22620_s27 + $0x34d4] ss:$8 sps:$4 sm:$0xff]  }
 0xc74   : > { %14936 = vmatprep.subr.bf16.mxu1 %v22041_v38  ;;  %v22108_v38 = vld [vmem:[%s22620_s27 + $0x35c0] ss:$8 sps:$4 sm:$0xff]  }
 0xc75   : > { %15192 = vmatpush2.bf16.msra.mxu0 %v22036_v2  ;;  %v22116_v2 = vld [vmem:[%s22620_s27 + $0x35b4] ss:$8 sps:$4 sm:$0xff]  }
 0xc76   : > { %15653 = vmatprep.subr.bf16.mxu0 %v22044_v11  ;;  %v22111_v11 = vld [vmem:[%s22620_s27 + $0x34d0] ss:$8 sps:$4 sm:$0xff]  }
 0xc77   : > { %14937 = vmatpush2.bf16.msra.mxu1 %v22039_v46  ;;  %v22119_v46 = vld [vmem:[%s22620_s27 + $0x34c4] ss:$8 sps:$4 sm:$0xff]  }
 0xc78   : > { %v13694_v47 = vpop.f32.mrf.mxu0  ;;  %15194 = vmatmul.mubr.bf16.vlgmr.msra.gmra.mxu0 %v25916_v44  ;;  %14938 = vmatprep.subr.bf16.mxu1 %v22047_v54  ;;  %v22054_v44 = vld [vmem:[%s22620_s27 + $0x3550] ss:$8 sps:$4 sm:$0xff]  }
 0xc79   : > { %15654 = vmatpush1.bf16.msra.mxu0 %v22042_v0  ;;  %15685 = vmatprep.mubr.bf16.mxu0 %v25927_v8  ;;  %v22062_v8 = vld [vmem:[%s22620_s27 + $0x3544] ss:$8 sps:$4 sm:$0xff]   ;;  %v22114_v54 = vld [vmem:[%s22620_s27 + $0x35b0] ss:$8 sps:$4 sm:$0xff]  }
 0xc7a   : > { %v13696_v30 = vpop.f32.mrf.mxu0  ;;  %15655 = vmatprep.subr.bf16.mxu0 %v22050_v61  ;;  %v22122_v0 = vld [vmem:[%s22620_s27 + $0x35a4] ss:$8 sps:$4 sm:$0xff]   ;;  %v22117_v61 = vld [vmem:[%s22620_s27 + $0x34c0] ss:$8 sps:$4 sm:$0xff]  }
 0xc7b   : > { %14939 = vmatpush2.bf16.msra.mxu1 %v22045_v22  ;;  %v22125_v22 = vld [vmem:[%s22620_s27 + $0x34b4] ss:$8 sps:$4 sm:$0xff]  }
 0xc7c   : > { %v13698_v50 = vpop.f32.mrf.mxu0  ;;  %15406 = vmatprep.subr.bf16.mxu1 %v22053_v51  ;;  %v22128_v51 = vld [vmem:[%s22620_s27 + $0x3594] ss:$8 sps:$4 sm:$0xff]  }
 0xc7d   : > { %15656 = vmatpush1.bf16.msra.mxu0 %v22048_v5  ;;  %v22123_v5 = vld [vmem:[%s22620_s27 + $0x34b0] ss:$8 sps:$4 sm:$0xff]   ;;  %v22129_v50 = vld [vmem:[%s22620_s27 + $0x34a0] ss:$8 sps:$4 sm:$0xff]  }
 0xc7e   : > { %v13450_v49 = vpop.f32.mrf.mxu1  ;;  %v13699_v23 = vpop.f32.mrf.mxu0  ;;  %14941 = vmatmul.mubr.bf16.vlgmr.msra.gmra.mxu1 %v25919_v20  ;;  %15657 = vmatprep.subr.bf16.mxu0 %v22056_v15  ;;  %v22060_v20 = vld [vmem:[%s22620_s27 + $0x3540] ss:$8 sps:$4 sm:$0xff]   ;;  %v22126_v15 = vld [vmem:[%s22620_s27 + $0x3590] ss:$8 sps:$4 sm:$0xff]  }
 0xc7f   : > { %v13457_v26 = vadd.f32 %v13450_v49, %v26274_v33  ;;  %15407 = vmatpush1.bf16.msra.mxu1 %v22051_v36  ;;  %15438 = vmatprep.mubr.bf16.mxu1 %v25922_v39  ;;  %v22068_v33 = vld [vmem:[%s22620_s27 + $0x3534] ss:$8 sps:$4 sm:$0xff]   ;;  %v22063_v39 = vld [vmem:[%s22620_s27 + $0x3450] ss:$8 sps:$4 sm:$0xff]   ;;  %v22134_v36 = vld [vmem:[%s22620_s27 + $0x3584] ss:$8 sps:$4 sm:$0xff]  }
 0xc80   : > { %v13452_v63 = vpop.f32.mrf.mxu1  ;;  %15408 = vmatprep.subr.bf16.mxu1 %v22059_v28  ;;  %v22137_v28 = vld [vmem:[%s22620_s27 + $0x3494] ss:$8 sps:$4 sm:$0xff]   ;;  %v22135_v49 = vld [vmem:[%s22620_s27 + $0x3490] ss:$8 sps:$4 sm:$0xff]   ;;  %v22140_v23 = vld [vmem:[%s22620_s27 + $0x3484] ss:$8 sps:$4 sm:$0xff]  }
 0xc81   : > { %v13458_v57 = vadd.f32 %v13452_v63, %v26278_v19  ;;  %15658 = vmatpush1.bf16.msra.mxu0 %v22054_v44  ;;  %v26348_v12 = vadd.f32 %v13694_v47, %v13457_v26  ;;  %v22071_v19 = vld [vmem:[%s22620_s27 + $0x3444] ss:$8 sps:$4 sm:$0xff]   ;;  %v22120_v47 = vld [vmem:[%s22620_s27 + $0x35a0] ss:$8 sps:$4 sm:$0xff]  }
 0xc82   : > { %v13454_v41 = vpop.f32.mrf.mxu1  ;;  %15659 = vmatprep.subr.bf16.mxu0 %v22062_v8  ;;  %v22132_v44 = vld [vmem:[%s22620_s27 + $0x3580] ss:$8 sps:$4 sm:$0xff]  }
 0xc83   : > { %15409 = vmatpush1.bf16.msra.mxu1 %v22057_v62  ;;  %v26352_v58 = vadd.f32 %v13696_v30, %v13458_v57  ;;  %v22131_v30 = vld [vmem:[%s22620_s27 + $0x34a4] ss:$8 sps:$4 sm:$0xff]   ;;  %v22138_v8 = vld [vmem:[%s22620_s27 + $0x3480] ss:$8 sps:$4 sm:$0xff]  }
 0xc84   : > { %v13455_v18 = vpop.f32.mrf.mxu1  ;;  %15410 = vmatprep.subr.bf16.mxu1 %v22065_v7 }
 0xc85   : > { %15660 = vmatpush1.bf16.msra.mxu0 %v22060_v20 }
 0xc86   : > { %15661 = vmatprep.subr.bf16.mxu0 %v22068_v33 }
 0xc87   : > { %15411 = vmatpush1.bf16.msra.mxu1 %v22063_v39 }
 0xc88   : > { %15412 = vmatprep.subr.bf16.mxu1 %v22071_v19 }
 0xc89   : > { %15662 = vmatpush1.bf16.msra.mxu0 %v22066_v27 }
 0xc8a   : > { %15663 = vmatprep.subr.bf16.mxu0 %v22074_v32 }
 0xc8b   : > { %15413 = vmatpush1.bf16.msra.mxu1 %v22069_v45 }
 0xc8c   : > { %15414 = vmatprep.subr.bf16.mxu1 %v22077_v55 }
 0xc8d   : > { %15664 = vmatpush1.bf16.msra.mxu0 %v22072_v3 }
 0xc8e   : > { %15665 = vmatprep.subr.bf16.mxu0 %v22080_v60 }
 0xc8f   : > { %15415 = vmatpush1.bf16.msra.mxu1 %v22075_v21 }
 0xc90   : > { %15416 = vmatprep.subr.bf16.mxu1 %v22083_v6 }
 0xc91   : > { %15666 = vmatpush1.bf16.msra.mxu0 %v22078_v13 }
 0xc92   : > { %15667 = vmatprep.subr.bf16.mxu0 %v22086_v52 }
 0xc93   : > { %15417 = vmatpush1.bf16.msra.mxu1 %v22081_v37 }
 0xc94   : > { %15418 = vmatprep.subr.bf16.mxu1 %v22089_v14 }
 0xc95   : > { %15668 = vmatpush1.bf16.msra.mxu0 %v22084_v10 }
 0xc96   : > { %15669 = vmatprep.subr.bf16.mxu0 %v22092_v4 }
 0xc97   : > { %15419 = vmatpush1.bf16.msra.mxu1 %v22087_v42 }
 0xc98   : > { %15420 = vmatprep.subr.bf16.mxu1 %v22095_v40 }
 0xc99   : > { %15670 = vmatpush2.bf16.msra.mxu0 %v22090_v29 }
 0xc9a   : > { %15671 = vmatprep.subr.bf16.mxu0 %v22098_v43 }
 0xc9b   : > { %15421 = vmatpush1.bf16.msra.mxu1 %v22093_v56 }
 0xc9c   : > { %15422 = vmatprep.subr.bf16.mxu1 %v22101_v53 }
 0xc9d   : > { %15672 = vmatpush2.bf16.msra.mxu0 %v22096_v25 }
 0xc9e   : > { %15673 = vmatprep.subr.bf16.mxu0 %v22104_v31 }
 0xc9f   : > { %15423 = vmatpush2.bf16.msra.mxu1 %v22099_v34 }
 0xca0   : > { %15424 = vmatprep.subr.bf16.mxu1 %v22107_v9  ;;  %v15698_v9 = vsub.s32 7, %v26534_v59 }
 0xca1   : > { %15674 = vmatpush2.bf16.msra.mxu0 %v22102_v24 }
 0xca2   : > { %15675 = vmatprep.subr.bf16.mxu0 %v22110_v17 }
 0xca3   : > { %15425 = vmatpush2.bf16.msra.mxu1 %v22105_v16 }
 0xca4   : > { %15426 = vmatprep.subr.bf16.mxu1 %v22113_v1 }
 0xca5   : > { %15676 = vmatpush2.bf16.msra.mxu0 %v22108_v38  ;;  %v22289_v38 = vld [vmem:[%s22731_s24] sm:$0xff] }
 0xca6   : > { %15677 = vmatprep.subr.bf16.mxu0 %v22116_v2  ;;  %v15699_v2 = vrot.slane %v22289_v38, %v15698_v9 }
 0xca7   : > { %15427 = vmatpush2.bf16.msra.mxu1 %v22111_v11 }
 0xca8   : > { %15428 = vmatprep.subr.bf16.mxu1 %v22119_v46 }
 0xca9   : > { %15678 = vmatpush2.bf16.msra.mxu0 %v22114_v54 }
 0xcaa   : > { %15679 = vmatprep.subr.bf16.mxu0 %v22122_v0  ;;  %v22290_v0 = vld [vmem:[%s22731_s24 + $0x8] sm:$0xff] }
 0xcab   : > { %15429 = vmatpush2.bf16.msra.mxu1 %v22117_v61  ;;  %v15703_v61 = vrot.slane %v22290_v0, %v15698_v9 }
 0xcac   : > { %15430 = vmatprep.subr.bf16.mxu1 %v22125_v22 }
 0xcad   : > { %15680 = vmatpush2.bf16.msra.mxu0 %v22120_v47 }
 0xcae   : > { %15681 = vmatprep.subr.bf16.mxu0 %v22128_v51 }
 0xcaf   : > { %15431 = vmatpush2.bf16.msra.mxu1 %v22123_v5 }
 0xcb0   : > { %15432 = vmatprep.subr.bf16.mxu1 %v22131_v30 }
 0xcb1   : > { %15682 = vmatpush2.bf16.msra.mxu0 %v22126_v15 }
 0xcb2   : > { %15683 = vmatprep.subr.bf16.mxu0 %v22134_v36 }
 0xcb3   : > { %15433 = vmatpush2.bf16.msra.mxu1 %v22129_v50 }
 0xcb4   : > { %15434 = vmatprep.subr.bf16.mxu1 %v22137_v28 }
 0xcb5   : > { %15684 = vmatpush2.bf16.msra.mxu0 %v22132_v44 }
 0xcb7   : > { %15435 = vmatpush2.bf16.msra.mxu1 %v22135_v49 }
 0xcb8   : > { %v14202_v26 = vpop.f32.mrf.mxu0  ;;  %15686 = vmatmul.mubr.bf16.vlgmr.msra.gmra.mxu0 %v25935_v48  ;;  %15436 = vmatprep.subr.bf16.mxu1 %v22140_v23 }
 0xcba   : > { %v14204_v62 = vpop.f32.mrf.mxu0 }
 0xcbb   : > { %15437 = vmatpush2.bf16.msra.mxu1 %v22138_v8 }
 0xcbc   : > { %v14206_v63 = vpop.f32.mrf.mxu0 }
 0xcbe   : > { %v13940_v7 = vpop.f32.mrf.mxu1  ;;  %v14207_v57 = vpop.f32.mrf.mxu0  ;;  %15439 = vmatmul.mubr.bf16.vlgmr.msra.gmra.mxu1 %v25938_v35 }
 0xcbf   : > { %v13947_v20 = vadd.f32 %v13940_v7, %v26348_v12 }
 0xcc0   : > { %v13942_v41 = vpop.f32.mrf.mxu1 }
 0xcc1   : > { %v13948_v33 = vadd.f32 %v13942_v41, %v26352_v58  ;;  %v14209_v39 = vadd.f32 %v14202_v26, %v13947_v20 }
 0xcc2   : > { %v13944_v18 = vpop.f32.mrf.mxu1 }
 0xcc3   : > { %v14210_v19 = vadd.f32 %v14204_v62, %v13948_v33 }
 0xcc4   : > { %v13945_v27 = vpop.f32.mrf.mxu1 }
 0xcf8   : > { %v14698_v32 = vpop.f32.mrf.mxu0 }
 0xcfa   : > { %v14700_v45 = vpop.f32.mrf.mxu0 }
 0xcfc   : > { %v14702_v48 = vpop.f32.mrf.mxu0 }
 0xcfe   : > { %v14446_v55 = vpop.f32.mrf.mxu1  ;;  %v14703_v3 = vpop.f32.mrf.mxu0 }
 0xcff   : > { %v14453_v60 = vadd.f32 %v14446_v55, %v14209_v39 }
 0xd00   : > { %v14448_v21 = vpop.f32.mrf.mxu1 }
 0xd01   : > { %v14454_v6 = vadd.f32 %v14448_v21, %v14210_v19  ;;  %v14705_v13 = vadd.f32 %v14698_v32, %v14453_v60 }
 0xd02   : > { %v14450_v52 = vpop.f32.mrf.mxu1 }
 0xd03   : > { %v14706_v35 = vadd.f32 %v14700_v45, %v14454_v6 }
 0xd04   : > { %v14451_v37 = vpop.f32.mrf.mxu1 }
 0xd38   : > { %v15195_v12 = vpop.f32.mrf.mxu0 }
 0xd3a   : > { %v15197_v14 = vpop.f32.mrf.mxu0 }
 0xd3c   : > { %v15199_v10 = vpop.f32.mrf.mxu0 }
 0xd3e   : > { %v14942_v58 = vpop.f32.mrf.mxu1  ;;  %v15200_v4 = vpop.f32.mrf.mxu0 }
 0xd3f   : > { %v14949_v42 = vadd.f32 %v14942_v58, %v14705_v13 }
 0xd40   : > { %v14944_v40 = vpop.f32.mrf.mxu1 }
 0xd41   : > { %v14950_v29 = vadd.f32 %v14944_v40, %v14706_v35  ;;  %v15202_v43 = vadd.f32 %v15195_v12, %v14949_v42 }
 0xd42   : > { %v14946_v56 = vpop.f32.mrf.mxu1 }
 0xd43   : > { %v15203_v53 = vadd.f32 %v15197_v14, %v14950_v29 }
 0xd44   : > { %v14947_v25 = vpop.f32.mrf.mxu1 }
 0xd78   : > { %v15687_v31 = vpop.f32.mrf.mxu0 }
 0xd7a   : > { %v15689_v34 = vpop.f32.mrf.mxu0 }
 0xd7c   : > { %v15691_v24 = vpop.f32.mrf.mxu0 }
 0xd7e   : > { %v15440_v17 = vpop.f32.mrf.mxu1  ;;  %v15692_v16 = vpop.f32.mrf.mxu0 }
 0xd7f   : > { %v15447_v1 = vadd.f32 %v15440_v17, %v15202_v43 }
 0xd80   : > { %v15442_v11 = vpop.f32.mrf.mxu1 }
 0xd81   : > { %v15694_v46 = vadd.f32 %v15687_v31, %v15447_v1  ;;  %v15448_v54 = vadd.f32 %v15442_v11, %v15203_v53  ;;  %15709 = sbr.rel (%p19425_p9) target bundleno = 3464 (0xd88), region = 52 }
 0xd82   : > { %v15444_v22 = vpop.f32.mrf.mxu1 }
 0xd83   : > { %v15704_v47 = vadd.f32 %v15699_v2, %v15694_v46  ;;  %v15695_v51 = vadd.f32 %v15689_v34, %v15448_v54 }
 0xd84   : > { %v15445_v5 = vpop.f32.mrf.mxu1 }
 0xd85   : > { %v15705_v30 = vadd.f32 %v15703_v61, %v15695_v51 }
 0xd86   : > { %15710 = vst [vmem:[%s22632_s30] sm:$0xff] %v15704_v47 }
 0xd87   : > { %15711 = vst [vmem:[%s22632_s30 + $0x8] sm:$0xff] %v15705_v30 }
 0xd88 PF: > { %p19426_p12 = scmp.le.s32.totalorder %s22433_s18, 0 }
 0xd8a   : > { %15715 = sbr.rel (%p19426_p12) target bundleno = 3475 (0xd93), region = 56 }
 0xd8f   : > { %v15716_v59 = vld [vmem:[%s22632_s30] sm:$0xff]  ;;  %v15717_v15 = vld [vmem:[%s22632_s30 + $0x8] sm:$0xff] }
 0xd90   : > { %v15718_v36 = vadd.f32 %v15716_v59, %v15704_v47  ;;  %v15719_v50 = vadd.f32 %v15717_v15, %v15705_v30 }
 0xd92   : > { %15720 = vst [vmem:[%s22632_s30] sm:$0xff] %v15718_v36  ;;  %15721 = vst [vmem:[%s22632_s30 + $0x8] sm:$0xff] %v15719_v50 }
 0xd93 PF: > { %p19427_p7 = scmp.ne.s32.totalorder %s22433_s18, 7 }
 0xd95   : > { %15725 = sbr.rel (%p19427_p7) target bundleno = 3505 (0xdb1), region = 60 }
 0xd9a   : > { %v15726_v28 = vld [vmem:[%s22632_s30] sm:$0xff]  ;;  %v15727_v44 = vld [vmem:[%s22632_s30 + $0x8] sm:$0xff] }
 0xd9b   : > { %v15728_v49 = vand.u32 2147483647, %v15726_v28  ;;  %v15729_v23 = vand.u32 2147483647, %v15727_v44 }
 0xd9d   : > { %v15730_v8 = vadd.f32 1.0, %v15728_v49  ;;  %v15731_v26 = vadd.f32 1.0, %v15729_v23 }
 0xd9f   : > { %22291 = vrcp.f32 %v15730_v8 }
 0xda0   : > { %22293 = vrcp.f32 %v15731_v26 }
 0xdac   : > { %v22292_v62 = vpop.eup %22291 }
 0xdad   : > { %v22294_v63 = vpop.eup %22293  ;;  %v15733_v7 = vmul.f32 %v22292_v62, %v15726_v28 }
 0xdae   : > { %v15735_v57 = vmul.f32 %v22294_v63, %v15727_v44 }
 0xdaf   : > { %15736 = vst [vmem:[%s22632_s30] sm:$0xff] %v15733_v7 }
 0xdb0   : > { %15737 = vst [vmem:[%s22632_s30 + $0x8] sm:$0xff] %v15735_v57 }
 0xdb1 PF: > { %s20_s22 = sadd.s32 1, %s22449_s22   ;;  %s26556_s8 = sld [smem:[#allocation9_spill]] }
 0xdb2   : > { %p17_p1 = scmp.ge.s32.totalorder %s20_s22, 18   ;;  %s26557_s13 = sld [smem:[#allocation10_spill]] }
 0xdb3   : > { %s26558_s15 = smov %s22425_s16  ;;  %s26559_s16 = smov %s22429_s17 }
 0xdb4   : > { %s26560_s17 = smov %s22536_s28  ;;  %s26561_s18 = smov %s22441_s20 }
 0xdb5   : > { %s26562_s19 = smov %s22445_s21  ;;  %19 = sbr.rel (!%p17_p1) target bundleno = 10 (0xa), region = 169 }
 0xdb7   : > { %s26563_s20 = smov %s26556_s8 }
 0xdb8   : > { %s26564_s21 = smov %s26557_s13 }
 0xdba   :  { %15767 = vsyncpa [#allocation3], 1 }
 0xdbb   :  { %15769 = vsyncpa [#allocation3 + $0x1], 1 }
 0xdbc   :  { %15770 = vsyncpa [#allocation5], 1 }
 0xdbd   :  { %15772 = vsyncpa [#allocation5 + $0x1], 1 }

</bundles_post_ra>
